<compile_context>
chip_gen: v7x
topology: tpu7x:2x2x1
jax: 0.10.0
libtpu: 0.0.40
codegen_flags: <defaults>
</compile_context>

<pallas_src>
import jax
import jax.numpy as jnp
from jax import lax
from jax.experimental import pallas as pl
from jax.experimental.pallas import tpu as pltpu


def _round_up(x, m):
    return ((x + m - 1) // m) * m


def _vmem_capacity_bytes():
    """Physical VMEM per core; conservative fallback if query unavailable."""
    try:
        info = pltpu.get_tpu_info()
        cap = getattr(info, "vmem_capacity_bytes", None)
        if cap:
            return int(cap)
    except Exception:
        pass
    return 64 << 20          # v7x per-TC VMEM (smallest of the three gens)


def _choose_tiles(N, C, H, W, dtype, budget_bytes):
    """Pick (tc, th, est_bytes): channel/row tiles + estimated VMEM per step.

    Block legality: th must be a multiple of 8 or equal H (it is: candidates
    are multiples of the dtype sublane tile, plus H itself); W / 4W blocks are
    full-extent. cdiv grid handles ragged last blocks.
    Budget counts double-buffered BlockSpec tiles with (sublane,128) padding
    PLUS ~12 W-wide f32 tiles of in-kernel temporaries (upcast quadrants,
    butterfly terms, interleave relayout).
    """
    itemsize = jnp.dtype(dtype).itemsize
    sub = max(8, 32 // itemsize)               # 8 f32, 16 bf16, 32 int8
    lanes_in = _round_up(W, 128)
    lanes_out = _round_up(4 * W, 128)

    def step_bytes(tc, th):
        thp = _round_up(th, sub)
        in_tile = 4 * tc * thp * lanes_in * itemsize
        out_tile = tc * thp * lanes_out * itemsize
        pipeline = 2 * (in_tile + out_tile)            # double buffering
        f32_tmp = 12 * tc * _round_up(th, 8) * lanes_in * 4
        return pipeline + f32_tmp

    # candidates: channel tile = powers of two up to C (plus C);
    # row tile = multiples of the sublane tile up to H (plus H itself).
    tcs = sorted({min(C, 1 << k) for k in range(C.bit_length())} | {C})
    if H <= sub:
        ths = [H]
    else:
        ths = sorted(set(range(sub, H + 1, sub)) | {H})

    best = None
    for tc in tcs:
        for th in ths:
            if step_bytes(tc, th) > budget_bytes:
                continue
            key = (tc * th, th)                # max tile size, prefer larger th
            if best is None or key > best[0]:
                best = (key, tc, th)
    if best is None:
        tc, th = 1, ths[0]                     # nothing fits: smallest legal
    else:
        tc, th = best[1], best[2]

    # v7x has 2 TensorCores: make sure the parallel grid has >= 2 iterations.
    def n_steps(tc_, th_):
        return N * (-(-C // tc_)) * (-(-H // th_))

    if n_steps(tc, th) < 2:
        if C >= 2:
            tc = (C + 1) // 2
        elif H > sub:
            th = max(sub, ((H - 1) // sub) * sub)

    return tc, th, step_bytes(tc, th)


def _make_inv_haar_kernel(W):
    two_w = 2 * W
    aligned = (two_w % 128 == 0)   # can the odd-row half-store start lane-aligned?

    def kernel(x_ref, o_ref):
        # x_ref: (1, 4, tc, th, W)  quadrants [ll, lh, hl, hh]
        # o_ref: (1, tc, th, 4W)    row i holds output rows (2i, 2i+1), each
        #                           dx-interleaved to width 2W.
        f32 = jnp.float32
        half = jnp.asarray(0.5, f32)
        ll = x_ref[0, 0].astype(f32) * half          # (tc, th, W)
        lh = x_ref[0, 1].astype(f32) * half
        hl = x_ref[0, 2].astype(f32) * half
        hh = x_ref[0, 3].astype(f32) * half

        # Butterfly (Hadamard) factorization: 8 adds instead of 12.
        a = ll + lh
        b = ll - lh
        c = hl + hh
        d = hl - hh
        o00 = a + c    # (dy=0, dx=0)
        o01 = a - c    # (dy=0, dx=1)
        o10 = b + d    # (dy=1, dx=0)
        o11 = b - d    # (dy=1, dx=1)

        tc_, th_, _ = o00.shape
        if aligned:
            # Two full-lane-aligned, unmasked stores (2W is a multiple of 128):
            # avoids the extra 2W||2W lane concat entirely.
            even = jnp.stack([o00, o01], axis=-1).reshape(tc_, th_, two_w)
            odd = jnp.stack([o10, o11], axis=-1).reshape(tc_, th_, two_w)
            o_ref[0, :, :, pl.ds(0, two_w)] = even.astype(o_ref.dtype)
            o_ref[0, :, :, pl.ds(two_w, two_w)] = odd.astype(o_ref.dtype)
        else:
            # Small / odd W: build the full 4W row and do ONE full-width store
            # so no masked / misaligned vst is emitted at lane offset 2W.
            # interleave(concat(a,c), concat(b,d)) == concat(ilv(a,b), ilv(c,d))
            evens = jnp.concatenate([o00, o10], axis=-1)     # (tc, th, 2W)
            odds = jnp.concatenate([o01, o11], axis=-1)      # (tc, th, 2W)
            full = jnp.stack([evens, odds], axis=-1).reshape(tc_, th_, 4 * W)
            o_ref[0] = full.astype(o_ref.dtype)

    return kernel


def inverse_haar_transform(x):
    """x: (N, 4C, H, W) -> (N, C, 2H, 2W), NCHW (SWAGAN InverseHaarTransform)."""
    N, C4, H, W = x.shape
    assert C4 % 4 == 0
    C = C4 // 4
    itemsize = jnp.dtype(x.dtype).itemsize

    cap = _vmem_capacity_bytes()
    # per-step working-set budget; leaves room for Mosaic internal scratch
    budget = min(max(cap // 3, 8 << 20), 48 << 20)
    tc, th, est_bytes = _choose_tiles(N, C, H, W, x.dtype, budget)

    vmem_limit = int(min(cap - (4 << 20),
                         max(budget + (16 << 20), est_bytes + (8 << 20))))

    x5 = x.reshape(N, 4, C, H, W)   # free contiguous view of input.chunk(4, 1)

    grid = (N, pl.cdiv(C, tc), pl.cdiv(H, th))

    # purely bandwidth-bound: 1 HBM read + 1 HBM write of N*C*4*H*W elements
    bytes_accessed = 8 * N * C * H * W * itemsize
    flops = 8 * N * C * H * W

    out = pl.pallas_call(
        _make_inv_haar_kernel(W),
        out_shape=jax.ShapeDtypeStruct((N, C, H, 4 * W), x.dtype),
        grid=grid,
        in_specs=[pl.BlockSpec((1, 4, tc, th, W),
                               lambda n, c, h: (n, 0, c, h, 0))],
        out_specs=pl.BlockSpec((1, tc, th, 4 * W),
                               lambda n, c, h: (n, c, h, 0)),
        compiler_params=pltpu.CompilerParams(
            dimension_semantics=("parallel", "parallel", "parallel"),
            vmem_limit_bytes=vmem_limit),
        cost_estimate=pl.CostEstimate(
            flops=flops, transcendentals=0, bytes_accessed=bytes_accessed),
    )(x5)

    # (N, C, H, 4W) -> (N, C, 2H, 2W) is a free contiguous reshape:
    # flat index i*4W + dy*2W + 2j + dx == (2i+dy)*2W + (2j+dx).
    return out.reshape(N, C, 2 * H, 2 * W)


# ---------------- pure-JAX reference (upfirdn2d semantics) ------------------

def _get_haar_kernels(dtype=jnp.float32):
    s = 1.0 / 2.0 ** 0.5
    l = jnp.array([[s, s]], dtype=dtype)          # (1, 2)
    h = jnp.array([[-s, s]], dtype=dtype)         # (1, 2)
    ll = l.T @ l
    lh = h.T @ l
    hl = l.T @ h
    hh = h.T @ h
    # buffers registered in the module: ll, -lh, -hl, hh
    return ll, -lh, -hl, hh


def _upfirdn2d_up2_ref(x, kernel):
    # x: (N, C, H, W), kernel: (2, 2); up=2, pad=(1,0,1,0), down=1.
    N, C, H, W = x.shape
    w = jnp.flip(kernel, (0, 1)).reshape(1, 1, 2, 2).astype(x.dtype)
    x2 = x.reshape(N * C, 1, H, W)
    out = lax.conv_general_dilated(
        x2, w, window_strides=(1, 1),
        padding=((1, 1), (1, 1)),          # equals up-append-zero + pad(1,0)
        lhs_dilation=(2, 2),
        dimension_numbers=("NCHW", "OIHW", "NCHW"))
    return out.reshape(N, C, 2 * H, 2 * W)


def inverse_haar_reference(x):
    N, C4, H, W = x.shape
    C = C4 // 4
    k_ll, k_lh, k_hl, k_hh = _get_haar_kernels(x.dtype)
    ll, lh, hl, hh = jnp.split(x, 4, axis=1)
    return (_upfirdn2d_up2_ref(ll, k_ll) + _upfirdn2d_up2_ref(lh, k_lh)
            + _upfirdn2d_up2_ref(hl, k_hl) + _upfirdn2d_up2_ref(hh, k_hh))


if __name__ == "__main__":
    key = jax.random.PRNGKey(0)
    N, C, H, W = 2, 4, 16, 16
    x = jax.random.normal(key, (N, 4 * C, H, W), dtype=jnp.float32)

    out = inverse_haar_transform(x)
    out = jax.block_until_ready(out)

    ref = jax.block_until_ready(inverse_haar_reference(x))
    assert out.shape == (N, C, 2 * H, 2 * W), out.shape
    assert jnp.allclose(out, ref, atol=1e-5, rtol=1e-5), float(
        jnp.max(jnp.abs(out - ref)))

    print("KERNEL_OK")
</pallas_src>

<mosaic_0001>
module attributes {stable_mosaic.version = 11 : i64} {
  func.func @kernel(%arg0: i32, %arg1: i32, %arg2: i32, %arg3: memref<1x4x4x16x16xf32, #tpu.memory_space<vmem>>, %arg4: memref<1x4x16x64xf32, #tpu.memory_space<vmem>>) attributes {dimension_semantics = [#tpu.dimension_semantics<parallel>, #tpu.dimension_semantics<parallel>, #tpu.dimension_semantics<parallel>], iteration_bounds = array<i64: 2, 1, 1>, scalar_prefetch = 0 : i64, scratch_operands = 0 : i64, tpu.core_type = #tpu.core_type<tc>, window_params = [{transform_indices = @transform_0, window_bounds = array<i64: 1, 4, 4, 16, 16>}, {transform_indices = @transform_1, window_bounds = array<i64: 1, 4, 16, 64>}]} {
    %c0 = arith.constant 0 : index
    %c0_0 = arith.constant 0 : index
    %c0_1 = arith.constant 0 : index
    %c0_2 = arith.constant 0 : index
    %c0_3 = arith.constant 0 : index
    %0 = vector.load %arg3[%c0, %c0_0, %c0_1, %c0_2, %c0_3] : memref<1x4x4x16x16xf32, #tpu.memory_space<vmem>>, vector<1x1x4x16x16xf32>
    %1 = vector.shape_cast %0 : vector<1x1x4x16x16xf32> to vector<4x16x16xf32>
    %cst = arith.constant 5.000000e-01 : f32
    %2 = vector.broadcast %cst : f32 to vector<4x16x16xf32>
    %3 = arith.mulf %1, %2 : vector<4x16x16xf32>
    %c0_4 = arith.constant 0 : index
    %c1 = arith.constant 1 : index
    %c0_5 = arith.constant 0 : index
    %c0_6 = arith.constant 0 : index
    %c0_7 = arith.constant 0 : index
    %4 = vector.load %arg3[%c0_4, %c1, %c0_5, %c0_6, %c0_7] : memref<1x4x4x16x16xf32, #tpu.memory_space<vmem>>, vector<1x1x4x16x16xf32>
    %5 = vector.shape_cast %4 : vector<1x1x4x16x16xf32> to vector<4x16x16xf32>
    %cst_8 = arith.constant 5.000000e-01 : f32
    %6 = vector.broadcast %cst_8 : f32 to vector<4x16x16xf32>
    %7 = arith.mulf %5, %6 : vector<4x16x16xf32>
    %c0_9 = arith.constant 0 : index
    %c2 = arith.constant 2 : index
    %c0_10 = arith.constant 0 : index
    %c0_11 = arith.constant 0 : index
    %c0_12 = arith.constant 0 : index
    %8 = vector.load %arg3[%c0_9, %c2, %c0_10, %c0_11, %c0_12] : memref<1x4x4x16x16xf32, #tpu.memory_space<vmem>>, vector<1x1x4x16x16xf32>
    %9 = vector.shape_cast %8 : vector<1x1x4x16x16xf32> to vector<4x16x16xf32>
    %cst_13 = arith.constant 5.000000e-01 : f32
    %10 = vector.broadcast %cst_13 : f32 to vector<4x16x16xf32>
    %11 = arith.mulf %9, %10 : vector<4x16x16xf32>
    %c0_14 = arith.constant 0 : index
    %c3 = arith.constant 3 : index
    %c0_15 = arith.constant 0 : index
    %c0_16 = arith.constant 0 : index
    %c0_17 = arith.constant 0 : index
    %12 = vector.load %arg3[%c0_14, %c3, %c0_15, %c0_16, %c0_17] : memref<1x4x4x16x16xf32, #tpu.memory_space<vmem>>, vector<1x1x4x16x16xf32>
    %13 = vector.shape_cast %12 : vector<1x1x4x16x16xf32> to vector<4x16x16xf32>
    %cst_18 = arith.constant 5.000000e-01 : f32
    %14 = vector.broadcast %cst_18 : f32 to vector<4x16x16xf32>
    %15 = arith.mulf %13, %14 : vector<4x16x16xf32>
    %16 = arith.addf %3, %7 : vector<4x16x16xf32>
    %17 = arith.subf %3, %7 : vector<4x16x16xf32>
    %18 = arith.addf %11, %15 : vector<4x16x16xf32>
    %19 = arith.subf %11, %15 : vector<4x16x16xf32>
    %20 = arith.addf %16, %18 : vector<4x16x16xf32>
    %21 = arith.subf %16, %18 : vector<4x16x16xf32>
    %22 = arith.addf %17, %19 : vector<4x16x16xf32>
    %23 = arith.subf %17, %19 : vector<4x16x16xf32>
    %24 = tpu.concatenate %20, %22 in 2 : vector<4x16x16xf32>, vector<4x16x16xf32> -> vector<4x16x32xf32>
    %25 = tpu.concatenate %21, %23 in 2 : vector<4x16x16xf32>, vector<4x16x16xf32> -> vector<4x16x32xf32>
    %26 = vector.shape_cast %24 : vector<4x16x32xf32> to vector<4x16x32x1xf32>
    %27 = vector.shape_cast %25 : vector<4x16x32xf32> to vector<4x16x32x1xf32>
    %28 = tpu.concatenate %26, %27 in 3 : vector<4x16x32x1xf32>, vector<4x16x32x1xf32> -> vector<4x16x32x2xf32>
    %29 = vector.shape_cast %28 : vector<4x16x32x2xf32> to vector<4x16x64xf32>
    %c0_19 = arith.constant 0 : index
    %c0_20 = arith.constant 0 : index
    %c0_21 = arith.constant 0 : index
    %c0_22 = arith.constant 0 : index
    %30 = vector.load %arg4[%c0_19, %c0_20, %c0_21, %c0_22] : memref<1x4x16x64xf32, #tpu.memory_space<vmem>>, vector<1x4x16x64xf32>
    %31 = vector.shape_cast %30 : vector<1x4x16x64xf32> to vector<4x16x64xf32>
    %32 = vector.shape_cast %29 : vector<4x16x64xf32> to vector<1x4x16x64xf32>
    tpu.vector_store %arg4[%c0_19, %c0_20, %c0_21, %c0_22], %32 {strides = array<i32>} : memref<1x4x16x64xf32, #tpu.memory_space<vmem>>, vector<1x4x16x64xf32>,
    return
  }
  func.func @transform_0(%arg0: i32, %arg1: i32, %arg2: i32) -> (i32, i32, i32, i32, i32) {
    %c0_i32 = arith.constant 0 : i32
    %c0_i32_0 = arith.constant 0 : i32
    %c0_i32_1 = arith.constant 0 : i32
    return %arg0, %c0_i32, %arg1, %arg2, %c0_i32_0 : i32, i32, i32, i32, i32
  }
  func.func @transform_1(%arg0: i32, %arg1: i32, %arg2: i32) -> (i32, i32, i32, i32) {
    %c0_i32 = arith.constant 0 : i32
    %c0_i32_0 = arith.constant 0 : i32
    return %arg0, %arg1, %arg2, %c0_i32 : i32, i32, i32, i32
  }
}

</mosaic_0001>

<bundles_post_ra>
// kernel: tpu_custom_call.1
= control target key start
LH: loop header
LB: loop body
LE: loop exit
PB: predicated region body
PF: predicated region fallthrough
CT: control target
= control target key end

     0   :  { %6 = vsyncpa [#allocation3], 0  ;;  %s15485_s0 = inlined_call_operand.hbm [shape: f32[2,4,4,16,16], index: 0, kind: input, shape index: {}]   ;;  %s15486_s1 = inlined_call_operand.hbm [shape: f32[2,4,16,64], index: 1, kind: output, shape index: {}]  }
   0x1   :  { %8 = vsyncpa [#allocation3 + $0x1], 0 }
   0x2   :  { %9 = vsyncpa [#allocation4], 0 }
   0x3   :  { %11 = vsyncpa [#allocation4 + $0x1], 0  ;;  %s9117_s6 = smov 0   ;;  %s9119_s7 = smov 0  }
   0x4   :  { %s9121_s8 = smov 0   ;;  %s9123_s9 = smov 0  }
   0x5   :  { %s9125_s10 = smov 0   ;;  %s9127_s11 = smov 0  }
   0x6 LB: > { %s8816_s12 = sadd.s32 4294967295, %s9067_s11   ;;  %s8817_s13 = sadd.s32 4294967294, %s9067_s11   ;;  %s9067_s11 = sphi %s9127_s11, %s17_s11   ;;  %s9063_s10 = sphi %s9125_s10, %s17469_s10   ;;  %s9059_s9 = sphi %s9123_s9, %s17468_s9   ;;  %s9055_s8 = sphi %s9121_s8, %s17467_s8   ;;  %s9051_s7 = sphi %s9119_s7, %s17466_s7   ;;  %s9047_s6 = sphi %s9117_s6, %s17465_s6  }
   0x7   : > { %s36_s14 = sadd.s32 1, %s9063_s10  ;;  %s47_s15 = sadd.s32 1, %s9055_s8 }
   0x8   : > { %p38_p0 = scmp.ge.s32.totalorder %s36_s14, 2  ;;  %p54_p1 = scmp.ne.s32.totalorder %s9055_s8, %s9051_s7 }
   0x9   : > { %p55_p2 = scmp.eq.s32.totalorder %s9067_s11, 0  ;;  %p60_p3 = scmp.ne.s32.totalorder %s9051_s7, %s9047_s6 }
   0xa   : > { %s17471_s14 = smov (%p38_p0, %s36_s14), 0  ;;  %p61_p5 = scmp.eq.s32.totalorder %s8816_s12, 0 }
   0xb   : > { %p9158_p4 = por %p55_p2, %p54_p1  ;;  %s40_s17 = ssub.s32 %s9063_s10, %s17471_s14 }
   0xc   : > { %p88_p6 = scmp.eq.s32.totalorder %s8816_s12, 1  ;;  %p45_p7 = scmp.eq.s32.totalorder %s40_s17, 0 }
   0xd   : > { %p9164_p8 = por %p61_p5, %p60_p3  ;;  %p94_p10 = scmp.eq.s32.totalorder %s8817_s13, 1 }
   0xe   : > { %p9168_p9 = por %p88_p6, %p54_p1  ;;  %p8869_p13 = scmp.lt.s32.totalorder %s9067_s11, 2 }
   0xf   : > { %s9173_s20 = scalar_select %p45_p7, %s9055_s8, %s47_s15  }
  0x10   : > { %s15929_s19 = scalar_select %p9168_p9, 1, 0 }
  0x11   : > { %p9175_p11 = por %p94_p10, %p60_p3  ;;  %s114_s22 = sand.u32 1, %s9055_s8  }
  0x12   : > { %s8820_s23 = sshll.u32 %s114_s22, 8  ;;  %s8855_s24 = sshll.u32 %s9063_s10, 12 }
  0x13   : > { %s15930_s21 = scalar_select %p9175_p11, 1, 0 }
  0x14   : > { %s9186_s27 = scalar_lea.hbm %s15485_s0, %s8855_s24  ;;  %s118_s28 = scalar_lea.vmem [#allocation2], %s8820_s23 }
  0x15   : > { %s130_s29 = sshll.u32 %s118_s28, 4  ;;  %p9192_p0 = pnand %p8869_p13, %p9158_p4  ;;  %s9188_s29 = int_to_ptr.vmem [resolvable:$true] %s130_s29 }
  0x16   : > { %s9197_s2 = scalar_lea.sflag [#allocation3], %s114_s22  ;;  %s8955_s3 = scalar_lea.hbm %s9186_s27, 4096 }
  0x17   : > { %p8956_p2 = scmp.ne.s32.totalorder %s9186_s27, %s8955_s3  ;;  %p8957_p3 = pneg %p9192_p0 }
  0x18   : > { %s8960_s12 = scalar_lea.hbm %s15485_s0, 8192  ;;  %p8961_p4 = scmp.lt.u32.totalorder %s9186_s27, %s15485_s0 }
  0x19   : > { %p8958_p5 = pnand %p8957_p3, %p8956_p2  ;;  %p8962_p7 = scmp.lt.u32.totalorder %s8960_s12, %s8955_s3 }
  0x1a   : > { %p8964_p13 = scmp.lt.u32.totalorder %s8955_s3, %s9186_s27 }
  0x1b   : > { %p8959_p6 = pneg %p8958_p5  ;;  %p8963_p10 = por %p8962_p7, %p8961_p4 }
  0x1d   : > { %p8965_p12 = por %p8964_p13, %p8963_p10 }
  0x1f   : > { %p8966_p1 = pnand %p8965_p12, %p8959_p6 }
  0x21   : > { %8969 = shalt.err (!%p8966_p1)
}
  0x22   : > { %s8970_s16 = scalar_lea.vmem %s9188_s29, 4096  ;;  %s9069_s17 = smov [#allocation2]  }
  0x23   : > { %p8971_p2 = scmp.ne.s32.totalorder %s9188_s29, %s8970_s16  ;;  %s8975_s22 = sshll.u32 %s9069_s17, 4  ;;  %s8976_s22 = int_to_ptr.vmem [resolvable:$false] %s8975_s22 }
  0x24   : > { %s8977_s23 = scalar_lea.vmem %s8976_s22, 8192  ;;  %p8978_p9 = scmp.lt.s32.totalorder %s9188_s29, %s8976_s22 }
  0x25   : > { %p8973_p5 = pnand %p8971_p2, %p8957_p3  ;;  %p8979_p4 = scmp.lt.s32.totalorder %s8977_s23, %s8970_s16 }
  0x27   : > { %p8974_p11 = pneg %p8973_p5  ;;  %p8980_p7 = por %p8979_p4, %p8978_p9 }
  0x29   : > { %p8981_p10 = pnand %p8980_p7, %p8974_p11 }
  0x2b   : > { %8984 = shalt.err (!%p8981_p10)
}
  0x2c   : > { %s9070_s24 = smov 128   ;;  %s9071_s25 = smov 8  }
  0x2d   : > { %8864 = dma.hbm_to_vmem [thread:$0]  (!%p9192_p0), %s9186_s27, 4096, %s9188_s29, %s9197_s2, %s9070_s24, %s9070_s24, %s9071_s25  }
  0x2e   : > { %p138_p12 = scmp.lt.s32.totalorder %s9067_s11, 3  ;;  %p15932_p1 = scmp.ge.s32.totalorder %s9067_s11, 1 }
  0x30   : > { %p139_p3 = pnand %p15932_p1, %p138_p12 }
  0x32   : > { %142 = sbr.rel (%p139_p3) target bundleno = 1946 (0x79a), region = 24 }
  0x39   : > { %s9229_s26 = sand.u32 1, %s9051_s7  }
  0x3a   : > { %s8824_s28 = sshll.u32 %s9229_s26, 8  ;;  %s145_s3 = scalar_lea.sflag [#allocation3], %s9229_s26 }
  0x3b   : > { %s9233_s4 = scalar_lea.vmem [#allocation2], %s8824_s28 }
  0x3c   : > { %9038 = dma.done.wait (%p9164_p8), %s145_s3, 4096  }
  0x3d   : > { %9040 = vsyncadd (%p9164_p8), %s145_s3, 4294963200  ;;  %v171_v0 = vld [vmem:[%s9233_s4] sm:$0xff]  ;;  %v172_v7 = vld [vmem:[%s9233_s4 + $0x8] sm:$0xff]  ;;  %s9072_s18 = smov 16   ;;  %vm15920_vm0 = vcmask 130048   ;;  %vm2815_vm1 = vcmask 7168  }
  0x3e   : > { %v8826_v1 = vld [vmem:[%s9233_s4 + $0x40] sm:$0xff]  ;;  %v179_v3 = vmul.f32 0.5, %v171_v0  ;;  %v8827_v8 = vld [vmem:[%s9233_s4 + $0x48] sm:$0xff]  ;;  %v9245_v10 = vmul.f32 0.5, %v172_v7  ;;  %v173_v14 = vld [vmem:[%s9233_s4 + $0x10] sm:$0xff]  ;;  %s9075_s27 = smov 2  }
  0x3f   : > { %v8834_v2 = vld [vmem:[%s9233_s4 + $0x80] sm:$0xff]  ;;  %v196_v4 = vmul.f32 0.5, %v8826_v1  ;;  %v9247_v11 = vmul.f32 0.5, %v8827_v8  ;;  %v8835_v12 = vld [vmem:[%s9233_s4 + $0x88] sm:$0xff]  ;;  %v8828_v19 = vld [vmem:[%s9233_s4 + $0x50] sm:$0xff]  ;;  %v181_v25 = vmul.f32 0.5, %v173_v14 }
  0x40   : > { %v213_v5 = vmul.f32 0.5, %v8834_v2  ;;  %v8842_v6 = vld [vmem:[%s9233_s4 + $0xc0] sm:$0xff]  ;;  %v8843_v13 = vld [vmem:[%s9233_s4 + $0xc8] sm:$0xff]  ;;  %v9256_v17 = vmul.f32 0.5, %v8835_v12  ;;  %v8836_v20 = vld [vmem:[%s9233_s4 + $0x90] sm:$0xff]  ;;  %v198_v30 = vmul.f32 0.5, %v8828_v19 }
  0x41   : > { %v230_v9 = vmul.f32 0.5, %v8842_v6  ;;  %v9252_v15 = vsub.f32 %v179_v3, %v196_v4  ;;  %v9254_v16 = vadd.f32 %v196_v4, %v179_v3  ;;  %v9258_v18 = vmul.f32 0.5, %v8843_v13  ;;  %v8844_v21 = vld [vmem:[%s9233_s4 + $0xd0] sm:$0xff]  ;;  %v174_v26 = vld [vmem:[%s9233_s4 + $0x18] sm:$0xff]  ;;  %v176_v34 = vld [vmem:[%s9233_s4 + $0x28] sm:$0xff]  ;;  %s9076_s29 = smov 4  }
  0x42   : > { %v9269_v24 = vsub.f32 %v9245_v10, %v9247_v11  ;;  %v8829_v27 = vld [vmem:[%s9233_s4 + $0x58] sm:$0xff]  ;;  %v215_v31 = vmul.f32 0.5, %v8836_v20  ;;  %v232_v32 = vmul.f32 0.5, %v8844_v21  ;;  %v9282_v36 = vmul.f32 0.5, %v174_v26  ;;  %v8831_v39 = vld [vmem:[%s9233_s4 + $0x68] sm:$0xff]  ;;  %v175_v46 = vld [vmem:[%s9233_s4 + $0x20] sm:$0xff] }
  0x43   : > { %v9263_v22 = vadd.f32 %v230_v9, %v213_v5  ;;  %v9265_v23 = vsub.f32 %v213_v5, %v230_v9  ;;  %v8837_v28 = vld [vmem:[%s9233_s4 + $0x98] sm:$0xff]  ;;  %v9276_v29 = vsub.f32 %v9256_v17, %v9258_v18  ;;  %v9284_v37 = vmul.f32 0.5, %v8829_v27  ;;  %v8839_v40 = vld [vmem:[%s9233_s4 + $0xa8] sm:$0xff]  ;;  %v8830_v47 = vld [vmem:[%s9233_s4 + $0x60] sm:$0xff]  ;;  %s9077_s30 = smov 6   ;;  %s9078_s2 = smov 8  }
  0x44   : > { %v8845_v33 = vld [vmem:[%s9233_s4 + $0xd8] sm:$0xff]  ;;  %v9286_v38 = vmul.f32 0.5, %v8837_v28  ;;  %v8847_v41 = vld [vmem:[%s9233_s4 + $0xe8] sm:$0xff]  ;;  %v9293_v43 = vsub.f32 %v181_v25, %v198_v30  ;;  %v9295_v44 = vadd.f32 %v232_v32, %v215_v31  ;;  %v264_v45 = vsub.f32 %v215_v31, %v232_v32  ;;  %v8838_v48 = vld [vmem:[%s9233_s4 + $0xa0] sm:$0xff]  ;;  %s9079_s5 = smov 10   ;;  %s9080_s12 = smov 12  }
  0x45   : > { %v286_v35 = vadd.f32 %v9265_v23, %v9252_v15  ;;  %v287_v42 = vadd.f32 %v9276_v29, %v9269_v24  ;;  %v9301_v49 = vadd.f32 %v198_v30, %v181_v25  ;;  %v9303_v50 = vmul.f32 0.5, %v8845_v33  ;;  %v8846_v53 = vld [vmem:[%s9233_s4 + $0xe0] sm:$0xff]  ;;  %v178_v54 = vld [vmem:[%s9233_s4 + $0x38] sm:$0xff]  ;;  %v177_v2 = vld [vmem:[%s9233_s4 + $0x30] sm:$0xff]  ;;  %s9081_s13 = smov 14   ;;  %s9082_s15 = smov 18  }
  0x46   : > { %v249_v51 = vsub.f32 %v9282_v36, %v9284_v37  ;;  %v9307_v52 = vmul.f32 0.5, %v176_v34  ;;  %v288_v55 = vadd.f32 %v264_v45, %v9293_v43  ;;  %v9312_v56 = vmul.f32 0.5, %v8831_v39  ;;  %v8833_v59 = vld [vmem:[%s9233_s4 + $0x78] sm:$0xff]  ;;  %v8832_v7 = vld [vmem:[%s9233_s4 + $0x70] sm:$0xff]  ;;  %s9083_s16 = smov 20   ;;  %s9084_s17 = smov 22  }
  0x47   : > { %310 = vrot.lane.b32.xlu0 %v286_v35, %s9072_s18  ;;  %v9314_v57 = vmul.f32 0.5, %v8839_v40  ;;  %v9316_v58 = vmul.f32 0.5, %v8847_v41  ;;  %v8841_v60 = vld [vmem:[%s9233_s4 + $0xb8] sm:$0xff]  ;;  %v265_v61 = vsub.f32 %v9286_v38, %v9303_v50  ;;  %v9322_v62 = vmul.f32 0.5, %v175_v46  ;;  %v8840_v8 = vld [vmem:[%s9233_s4 + $0xb0] sm:$0xff]  ;;  %s9085_s22 = smov 24  }
  0x48   : > { %v9324_v63 = vmul.f32 0.5, %v8830_v47  ;;  %v9326_v0 = vmul.f32 0.5, %v8838_v48  ;;  %v8849_v1 = vld [vmem:[%s9233_s4 + $0xf8] sm:$0xff]  ;;  %314 = vrot.lane.b32.xlu1 %v288_v55, %s9072_s18  ;;  %v251_v3 = vsub.f32 %v9307_v52, %v9312_v56  ;;  %v234_v5 = vmul.f32 0.5, %v8846_v53  ;;  %v8848_v9 = vld [vmem:[%s9233_s4 + $0xf0] sm:$0xff]  ;;  %s9086_s23 = smov 26  }
  0x49   : > { %v267_v4 = vsub.f32 %v9314_v57, %v9316_v58  ;;  %v186_v6 = vmul.f32 0.5, %v178_v54  ;;  %v289_v12 = vadd.f32 %v265_v61, %v249_v51  ;;  %v203_v14 = vmul.f32 0.5, %v8833_v59  ;;  %s9087_s24 = smov 28   ;;  %s9088_s25 = smov 30  }
  0x4a   : > { %v250_v13 = vsub.f32 %v9322_v62, %v9324_v63  ;;  %v220_v19 = vmul.f32 0.5, %v8841_v60  ;;  %v266_v20 = vsub.f32 %v9326_v0, %v234_v5  ;;  %v237_v21 = vmul.f32 0.5, %v8849_v1  ;;  %s9089_s28 = smov 32   ;;  %s9090_s3 = smov 34  }
  0x4b   : > { %312 = vrot.lane.b32.xlu0 %v287_v42, %s9072_s18  ;;  %v185_v25 = vmul.f32 0.5, %v177_v2  ;;  %v202_v26 = vmul.f32 0.5, %v8832_v7  ;;  %v219_v27 = vmul.f32 0.5, %v8840_v8  ;;  %v236_v28 = vmul.f32 0.5, %v8848_v9  ;;  %s9091_s4 = smov 36   ;;  %p17462_p9 = scmp.ne.s32.totalorder %s15929_s19, 0 }
  0x4c   : > { %316 = vrot.lane.b32.xlu1 %v289_v12, %s9072_s18  ;;  %v291_v30 = vadd.f32 %v267_v4, %v251_v3  ;;  %v290_v31 = vadd.f32 %v266_v20, %v250_v13  ;;  %v253_v32 = vsub.f32 %v186_v6, %v203_v14  ;;  %v269_v33 = vsub.f32 %v220_v19, %v237_v21 }
  0x4d   : > { %v252_v34 = vsub.f32 %v185_v25, %v202_v26  ;;  %v268_v35 = vsub.f32 %v219_v27, %v236_v28  ;;  %v294_v41 = vsub.f32 %v9252_v15, %v9265_v23  ;;  %v295_v42 = vsub.f32 %v9269_v24, %v9276_v29 }
  0x4e   : > { %v293_v40 = vadd.f32 %v269_v33, %v253_v32  ;;  %v296_v46 = vsub.f32 %v9293_v43, %v264_v45  ;;  %v297_v47 = vsub.f32 %v249_v51, %v265_v61  ;;  %v298_v48 = vsub.f32 %v250_v13, %v266_v20 }
  0x4f   : > { %318 = vrot.lane.b32.xlu0 %v290_v31, %s9072_s18  ;;  %v292_v39 = vadd.f32 %v268_v35, %v252_v34  ;;  %v299_v53 = vsub.f32 %v251_v3, %v267_v4  ;;  %v300_v15 = vsub.f32 %v252_v34, %v268_v35  ;;  %v301_v23 = vsub.f32 %v253_v32, %v269_v33 }
  0x50   : > { %320 = vrot.lane.b32.xlu1 %v291_v30, %s9072_s18  ;;  %v9362_v24 = vadd.f32 %v9247_v11, %v9245_v10  ;;  %v9366_v29 = vadd.f32 %v9258_v18, %v9256_v17  ;;  %v9374_v45 = vadd.f32 %v9295_v44, %v9301_v49  ;;  %v9380_v54 = vadd.f32 %v9284_v37, %v9282_v36 }
  0x51   : > { %v9384_v10 = vadd.f32 %v9303_v50, %v9286_v38  ;;  %v9392_v18 = vadd.f32 %v9312_v56, %v9307_v52  ;;  %v9396_v55 = vadd.f32 %v9316_v58, %v9314_v57  ;;  %v9400_v36 = vadd.f32 %v9324_v63, %v9322_v62 }
  0x52   : > { %v9370_v43 = vadd.f32 %v9366_v29, %v9362_v24  ;;  %v9403_v37 = vadd.f32 %v234_v5, %v9326_v0  ;;  %v9409_v59 = vadd.f32 %v203_v14, %v186_v6  ;;  %v9411_v52 = vadd.f32 %v237_v21, %v220_v19 }
  0x53   : > { %322 = vrot.lane.b32.xlu0 %v292_v39, %s9072_s18  ;;  %15933 = vst [vmem:[#allocation8_spill] sm:$0xff] %v9384_v10  ;;  %v9413_v56 = vadd.f32 %v202_v26, %v185_v25  ;;  %v9415_v57 = vadd.f32 %v236_v28, %v219_v27  ;;  %v383_v61 = vlaneseq  ;;  %v270_v63 = vadd.f32 %v9263_v22, %v9254_v16 }
  0x54   : > { %324 = vrot.lane.b32.xlu1 %v293_v40, %s9072_s18  ;;  %vm8416_vm2 = vcmask 15360   ;;  %vm8425_vm3 = vcmask 31744   ;;  %vm8434_vm4 = vcmask 48128   ;;  %vm8443_vm5 = vcmask 64512  }
  0x55   : > { %v9421_v62 = vshrl.u32 %v383_v61, 7  ;;  %vm15919_vm6 = vcmask 80896   ;;  %vm15918_vm7 = vcmask 97280   ;;  %vm15917_vm8 = vcmask 113664  }
  0x56   : > { %vm8487_vm9 = vcmask 146432   ;;  %vm8496_vm10 = vcmask 162816   ;;  %vm8505_vm11 = vcmask 179200   ;;  %vm8514_vm12 = vcmask 195584  }
  0x57   : > { %351 = vrot.lane.b32.xlu0 %v294_v41, %s9072_s18  ;;  %v9426_v0 = vsub.s32 0, %v9421_v62  ;;  %v9431_v4 = vsub.s32 1, %v9421_v62  ;;  %v9435_v6 = vsub.s32 2, %v9421_v62  ;;  %v9439_v8 = vsub.s32 3, %v9421_v62 }
  0x58   : > { %353 = vrot.lane.b32.xlu1 %v295_v42, %s9072_s18  ;;  %v9443_v12 = vsub.s32 4, %v9421_v62  ;;  %v9447_v14 = vsub.s32 5, %v9421_v62  ;;  %v9451_v20 = vsub.s32 6, %v9421_v62  ;;  %v9455_v25 = vsub.s32 7, %v9421_v62 }
  0x59   : > { %vm8523_vm13 = vcmask 211968   ;;  %vm8532_vm14 = vcmask 228352   ;;  %vm8541_vm15 = vcmask 244736  }
  0x5b   : > { %355 = vrot.lane.b32.xlu0 %v296_v46, %s9072_s18 }
  0x5c   : > { %357 = vrot.lane.b32.xlu1 %v297_v47, %s9072_s18 }
  0x5f   : > { %359 = vrot.lane.b32.xlu0 %v298_v48, %s9072_s18 }
  0x60   : > { %361 = vrot.lane.b32.xlu1 %v299_v53, %s9072_s18 }
  0x63   : > { %363 = vrot.lane.b32.xlu0 %v300_v15, %s9072_s18 }
  0x64   : > { %365 = vrot.lane.b32.xlu1 %v301_v23, %s9072_s18 }
  0xb9   : > { %v311_v1 = vpop.permute.xlu0 %310 }
  0xba   : > { %v335_v2 = vsel %vm15920_vm0, %v270_v63, %v311_v1  ;;  %v315_v31 = vpop.permute.xlu1 %314 }
  0xbb   : > { %v386_v3 = vrot.slane %v335_v2, %v9426_v0  ;;  %v405_v5 = vrot.slane %v335_v2, %v9431_v4  ;;  %v424_v7 = vrot.slane %v335_v2, %v9435_v6  ;;  %v443_v9 = vrot.slane %v335_v2, %v9439_v8 }
  0xbc   : > { %v462_v13 = vrot.slane %v335_v2, %v9443_v12  ;;  %v481_v19 = vrot.slane %v335_v2, %v9447_v14  ;;  %v500_v21 = vrot.slane %v335_v2, %v9451_v20  ;;  %v519_v26 = vrot.slane %v335_v2, %v9455_v25 }
  0xbd   : > { %392 = vbcast.lane.b32.xlu1 %v386_v3, 264  ;;  %388 = vbcast.lane.b32.xlu0 %v386_v3, 256  ;;  %v313_v27 = vpop.permute.xlu0 %312 }
  0xbe   : > { %v336_v28 = vsel %vm15920_vm0, %v9370_v43, %v313_v27  ;;  %v9462_v33 = vpop.permute.xlu1 %316 }
  0xbf   : > { %v538_v30 = vrot.slane %v336_v28, %v9426_v0  ;;  %v557_v32 = vrot.slane %v336_v28, %v9431_v4  ;;  %v576_v34 = vrot.slane %v336_v28, %v9435_v6  ;;  %v595_v42 = vrot.slane %v336_v28, %v9439_v8 }
  0xc0   : > { %v614_v48 = vrot.slane %v336_v28, %v9443_v12  ;;  %v633_v23 = vrot.slane %v336_v28, %v9447_v14  ;;  %v652_v2 = vrot.slane %v336_v28, %v9451_v20 }
  0xc1   : > { %400 = vbcast.lane.b32.xlu1 %v386_v3, 280  ;;  %396 = vbcast.lane.b32.xlu0 %v386_v3, 272  ;;  %v9467_v39 = vpop.permute.xlu0 %318 }
  0xc2   : > { %v9465_v35 = vpop.permute.xlu1 %320 }
  0xc5   : > { %411 = vbcast.lane.b32.xlu1 %v405_v5, 264  ;;  %407 = vbcast.lane.b32.xlu0 %v405_v5, 256  ;;  %v9471_v41 = vpop.permute.xlu0 %322 }
  0xc6   : > { %v9469_v40 = vpop.permute.xlu1 %324 }
  0xc9   : > { %419 = vbcast.lane.b32.xlu1 %v405_v5, 280  ;;  %415 = vbcast.lane.b32.xlu0 %v405_v5, 272  ;;  %v9476_v47 = vpop.permute.xlu0 %351 }
  0xca   : > { %v9474_v46 = vpop.permute.xlu1 %353 }
  0xcd   : > { %430 = vbcast.lane.b32.xlu1 %v424_v7, 264  ;;  %426 = vbcast.lane.b32.xlu0 %v424_v7, 256  ;;  %v9481_v15 = vpop.permute.xlu0 %355 }
  0xce   : > { %v9479_v53 = vpop.permute.xlu1 %357 }
  0xcf   : > { %15934 = vst [vmem:[#allocation9_spill] sm:$0xff] %v9479_v53 }
  0xd1   : > { %438 = vbcast.lane.b32.xlu1 %v424_v7, 280  ;;  %434 = vbcast.lane.b32.xlu0 %v424_v7, 272  ;;  %v9486_v61 = vpop.permute.xlu0 %359 }
  0xd2   : > { %v9484_v43 = vpop.permute.xlu1 %361  ;;  %15936 = vst [vmem:[#allocation11_spill] sm:$0xff] %v9486_v61 }
  0xd3   : > { %15935 = vst [vmem:[#allocation10_spill] sm:$0xff] %v9484_v43 }
  0xd5   : > { %449 = vbcast.lane.b32.xlu1 %v443_v9, 264  ;;  %445 = vbcast.lane.b32.xlu0 %v443_v9, 256  ;;  %v9490_v1 = vpop.permute.xlu0 %363 }
  0xd6   : > { %v9488_v63 = vpop.permute.xlu1 %365  ;;  %15938 = vst [vmem:[#allocation13_spill] sm:$0xff] %v9490_v1 }
  0xd7   : > { %15937 = vst [vmem:[#allocation12_spill] sm:$0xff] %v9488_v63 }
  0xd9   : > { %457 = vbcast.lane.b32.xlu1 %v443_v9, 280  ;;  %453 = vbcast.lane.b32.xlu0 %v443_v9, 272 }
  0xdd   : > { %468 = vbcast.lane.b32.xlu1 %v462_v13, 264  ;;  %464 = vbcast.lane.b32.xlu0 %v462_v13, 256 }
  0xe1   : > { %476 = vbcast.lane.b32.xlu1 %v462_v13, 280  ;;  %472 = vbcast.lane.b32.xlu0 %v462_v13, 272  ;;  %v671_v13 = vrot.slane %v336_v28, %v9455_v25 }
  0xe5   : > { %487 = vbcast.lane.b32.xlu1 %v481_v19, 264  ;;  %483 = vbcast.lane.b32.xlu0 %v481_v19, 256 }
  0xe9   : > { %495 = vbcast.lane.b32.xlu1 %v481_v19, 280  ;;  %491 = vbcast.lane.b32.xlu0 %v481_v19, 272  ;;  %v9504_v19 = vsel %vm15920_vm0, %v9374_v45, %v315_v31 }
  0xea   : > { %v690_v27 = vrot.slane %v9504_v19, %v9426_v0 }
  0xed   : > { %506 = vbcast.lane.b32.xlu1 %v500_v21, 264  ;;  %502 = vbcast.lane.b32.xlu0 %v500_v21, 256 }
  0xf1   : > { %514 = vbcast.lane.b32.xlu1 %v500_v21, 280  ;;  %510 = vbcast.lane.b32.xlu0 %v500_v21, 272 }
  0xf5   : > { %525 = vbcast.lane.b32.xlu1 %v519_v26, 264  ;;  %521 = vbcast.lane.b32.xlu0 %v519_v26, 256 }
  0xf9   : > { %533 = vbcast.lane.b32.xlu1 %v519_v26, 280  ;;  %529 = vbcast.lane.b32.xlu0 %v519_v26, 272 }
  0xfd   : > { %544 = vbcast.lane.b32.xlu1 %v538_v30, 264  ;;  %540 = vbcast.lane.b32.xlu0 %v538_v30, 256 }
 0x101   : > { %552 = vbcast.lane.b32.xlu1 %v538_v30, 280  ;;  %548 = vbcast.lane.b32.xlu0 %v538_v30, 272 }
 0x105   : > { %563 = vbcast.lane.b32.xlu1 %v557_v32, 264  ;;  %559 = vbcast.lane.b32.xlu0 %v557_v32, 256 }
 0x109   : > { %571 = vbcast.lane.b32.xlu1 %v557_v32, 280  ;;  %567 = vbcast.lane.b32.xlu0 %v557_v32, 272 }
 0x10d   : > { %582 = vbcast.lane.b32.xlu1 %v576_v34, 264  ;;  %578 = vbcast.lane.b32.xlu0 %v576_v34, 256 }
 0x111   : > { %590 = vbcast.lane.b32.xlu1 %v576_v34, 280  ;;  %586 = vbcast.lane.b32.xlu0 %v576_v34, 272 }
 0x115   : > { %601 = vbcast.lane.b32.xlu1 %v595_v42, 264  ;;  %597 = vbcast.lane.b32.xlu0 %v595_v42, 256 }
 0x119   : > { %609 = vbcast.lane.b32.xlu1 %v595_v42, 280  ;;  %605 = vbcast.lane.b32.xlu0 %v595_v42, 272  ;;  %v709_v42 = vrot.slane %v9504_v19, %v9431_v4 }
 0x11d   : > { %620 = vbcast.lane.b32.xlu1 %v614_v48, 264  ;;  %616 = vbcast.lane.b32.xlu0 %v614_v48, 256 }
 0x121   : > { %628 = vbcast.lane.b32.xlu1 %v614_v48, 280  ;;  %624 = vbcast.lane.b32.xlu0 %v614_v48, 272 }
 0x125   : > { %639 = vbcast.lane.b32.xlu1 %v633_v23, 264  ;;  %635 = vbcast.lane.b32.xlu0 %v633_v23, 256 }
 0x129   : > { %647 = vbcast.lane.b32.xlu1 %v633_v23, 280  ;;  %643 = vbcast.lane.b32.xlu0 %v633_v23, 272 }
 0x12d   : > { %658 = vbcast.lane.b32.xlu1 %v652_v2, 264  ;;  %654 = vbcast.lane.b32.xlu0 %v652_v2, 256 }
 0x12f   : > { %v9493_v3 = vpop.permute.xlu1 %392  ;;  %v9495_v5 = vpop.permute.xlu0 %388 }
 0x131   : > { %666 = vbcast.lane.b32.xlu1 %v652_v2, 280  ;;  %662 = vbcast.lane.b32.xlu0 %v652_v2, 272 }
 0x133   : > { %v9497_v7 = vpop.permute.xlu1 %400  ;;  %v9499_v9 = vpop.permute.xlu0 %396 }
 0x135   : > { %677 = vbcast.lane.b32.xlu1 %v671_v13, 264  ;;  %673 = vbcast.lane.b32.xlu0 %v671_v13, 256 }
 0x137   : > { %v9506_v21 = vpop.permute.xlu1 %411  ;;  %v9508_v26 = vpop.permute.xlu0 %407 }
 0x139   : > { %685 = vbcast.lane.b32.xlu1 %v671_v13, 280  ;;  %681 = vbcast.lane.b32.xlu0 %v671_v13, 272 }
 0x13b   : > { %v9512_v30 = vpop.permute.xlu1 %419  ;;  %v9514_v32 = vpop.permute.xlu0 %415 }
 0x13d   : > { %696 = vbcast.lane.b32.xlu1 %v690_v27, 264  ;;  %692 = vbcast.lane.b32.xlu0 %v690_v27, 256 }
 0x13f   : > { %v9516_v28 = vpop.permute.xlu1 %430  ;;  %v9518_v34 = vpop.permute.xlu0 %426 }
 0x141   : > { %704 = vbcast.lane.b32.xlu1 %v690_v27, 280  ;;  %700 = vbcast.lane.b32.xlu0 %v690_v27, 272  ;;  %v728_v27 = vrot.slane %v9504_v19, %v9435_v6 }
 0x143   : > { %v9520_v45 = vpop.permute.xlu1 %438  ;;  %v9522_v31 = vpop.permute.xlu0 %434 }
 0x145   : > { %715 = vbcast.lane.b32.xlu1 %v709_v42, 264  ;;  %711 = vbcast.lane.b32.xlu0 %v709_v42, 256 }
 0x147   : > { %v9526_v48 = vpop.permute.xlu1 %449  ;;  %v9528_v23 = vpop.permute.xlu0 %445 }
 0x149   : > { %723 = vbcast.lane.b32.xlu1 %v709_v42, 280  ;;  %719 = vbcast.lane.b32.xlu0 %v709_v42, 272  ;;  %v747_v42 = vrot.slane %v9504_v19, %v9439_v8 }
 0x14b   : > { %v9530_v2 = vpop.permute.xlu1 %457  ;;  %v9532_v13 = vpop.permute.xlu0 %453 }
 0x14d   : > { %734 = vbcast.lane.b32.xlu1 %v728_v27, 264  ;;  %730 = vbcast.lane.b32.xlu0 %v728_v27, 256 }
 0x14f   : > { %v9536_v58 = vpop.permute.xlu1 %468  ;;  %v9538_v60 = vpop.permute.xlu0 %464 }
 0x151   : > { %742 = vbcast.lane.b32.xlu1 %v728_v27, 280  ;;  %738 = vbcast.lane.b32.xlu0 %v728_v27, 272  ;;  %v766_v27 = vrot.slane %v9504_v19, %v9443_v12 }
 0x153   : > { %v9540_v38 = vpop.permute.xlu1 %476  ;;  %v9542_v50 = vpop.permute.xlu0 %472 }
 0x155   : > { %753 = vbcast.lane.b32.xlu1 %v747_v42, 264  ;;  %749 = vbcast.lane.b32.xlu0 %v747_v42, 256 }
 0x157   : > { %v9546_v11 = vpop.permute.xlu1 %487  ;;  %v9548_v17 = vpop.permute.xlu0 %483 }
 0x158   : > { %15939 = vst [vmem:[#allocation14_spill] sm:$0xff] %v9546_v11  ;;  %15940 = vst [vmem:[#allocation15_spill] sm:$0xff] %v9548_v17 }
 0x159   : > { %761 = vbcast.lane.b32.xlu1 %v747_v42, 280  ;;  %757 = vbcast.lane.b32.xlu0 %v747_v42, 272  ;;  %v785_v42 = vrot.slane %v9504_v19, %v9447_v14 }
 0x15b   : > { %v9550_v51 = vpop.permute.xlu1 %495  ;;  %v9552_v63 = vpop.permute.xlu0 %491 }
 0x15c   : > { %15941 = vst [vmem:[#allocation16_spill] sm:$0xff] %v9550_v51  ;;  %15942 = vst [vmem:[#allocation17_spill] sm:$0xff] %v9552_v63 }
 0x15d   : > { %772 = vbcast.lane.b32.xlu1 %v766_v27, 264  ;;  %768 = vbcast.lane.b32.xlu0 %v766_v27, 256 }
 0x15f   : > { %v9556_v1 = vpop.permute.xlu1 %506  ;;  %v9558_v43 = vpop.permute.xlu0 %502 }
 0x161   : > { %780 = vbcast.lane.b32.xlu1 %v766_v27, 280  ;;  %776 = vbcast.lane.b32.xlu0 %v766_v27, 272  ;;  %v804_v27 = vrot.slane %v9504_v19, %v9451_v20 }
 0x163   : > { %v9560_v61 = vpop.permute.xlu1 %514  ;;  %v9562_v53 = vpop.permute.xlu0 %510 }
 0x164   : > { %15943 = vst [vmem:[#allocation18_spill] sm:$0xff] %v9560_v61  ;;  %15944 = vst [vmem:[#allocation19_spill] sm:$0xff] %v9562_v53 }
 0x165   : > { %791 = vbcast.lane.b32.xlu1 %v785_v42, 264  ;;  %787 = vbcast.lane.b32.xlu0 %v785_v42, 256 }
 0x167   : > { %v9566_v63 = vpop.permute.xlu1 %525  ;;  %v9568_v51 = vpop.permute.xlu0 %521 }
 0x168   : > { %15945 = vst [vmem:[#allocation20_spill] sm:$0xff] %v9566_v63  ;;  %15946 = vst [vmem:[#allocation21_spill] sm:$0xff] %v9568_v51  ;;  %v273_v51 = vadd.f32 %v9384_v10, %v9380_v54 }
 0x169   : > { %799 = vbcast.lane.b32.xlu1 %v785_v42, 280  ;;  %795 = vbcast.lane.b32.xlu0 %v785_v42, 272 }
 0x16b   : > { %v9570_v17 = vpop.permute.xlu1 %533  ;;  %v9572_v11 = vpop.permute.xlu0 %529 }
 0x16c   : > { %15947 = vst [vmem:[#allocation22_spill] sm:$0xff] %v9570_v17  ;;  %15948 = vst [vmem:[#allocation23_spill] sm:$0xff] %v9572_v11  ;;  %v823_v11 = vrot.slane %v9504_v19, %v9455_v25  ;;  %v9590_v17 = vsel %vm15920_vm0, %v273_v51, %v9462_v33 }
 0x16d   : > { %810 = vbcast.lane.b32.xlu1 %v804_v27, 264  ;;  %806 = vbcast.lane.b32.xlu0 %v804_v27, 256 }
 0x16f   : > { %v9576_v53 = vpop.permute.xlu1 %544  ;;  %v9578_v61 = vpop.permute.xlu0 %540 }
 0x170   : > { %15949 = vst [vmem:[#allocation24_spill] sm:$0xff] %v9576_v53  ;;  %15950 = vst [vmem:[#allocation25_spill] sm:$0xff] %v9578_v61 }
 0x171   : > { %818 = vbcast.lane.b32.xlu1 %v804_v27, 280  ;;  %814 = vbcast.lane.b32.xlu0 %v804_v27, 272  ;;  %v842_v27 = vrot.slane %v9590_v17, %v9426_v0 }
 0x173   : > { %v9582_v63 = vpop.permute.xlu1 %552  ;;  %v9584_v42 = vpop.permute.xlu0 %548 }
 0x174   : > { %15951 = vst [vmem:[#allocation26_spill] sm:$0xff] %v9582_v63  ;;  %15952 = vst [vmem:[#allocation27_spill] sm:$0xff] %v9584_v42 }
 0x175   : > { %829 = vbcast.lane.b32.xlu1 %v823_v11, 264  ;;  %825 = vbcast.lane.b32.xlu0 %v823_v11, 256 }
 0x177   : > { %v9592_v53 = vpop.permute.xlu1 %563  ;;  %v9594_v61 = vpop.permute.xlu0 %559 }
 0x178   : > { %15953 = vst [vmem:[#allocation28_spill] sm:$0xff] %v9592_v53  ;;  %15954 = vst [vmem:[#allocation29_spill] sm:$0xff] %v9594_v61 }
 0x179   : > { %837 = vbcast.lane.b32.xlu1 %v823_v11, 280  ;;  %833 = vbcast.lane.b32.xlu0 %v823_v11, 272  ;;  %v861_v11 = vrot.slane %v9590_v17, %v9431_v4 }
 0x17b   : > { %v9598_v63 = vpop.permute.xlu1 %571  ;;  %v9600_v42 = vpop.permute.xlu0 %567 }
 0x17c   : > { %15955 = vst [vmem:[#allocation30_spill] sm:$0xff] %v9598_v63  ;;  %15956 = vst [vmem:[#allocation31_spill] sm:$0xff] %v9600_v42 }
 0x17d   : > { %848 = vbcast.lane.b32.xlu1 %v842_v27, 264  ;;  %844 = vbcast.lane.b32.xlu0 %v842_v27, 256 }
 0x17f   : > { %v9602_v19 = vpop.permute.xlu1 %582  ;;  %v9604_v10 = vpop.permute.xlu0 %578 }
 0x180   : > { %15957 = vst [vmem:[#allocation32_spill] sm:$0xff] %v9604_v10 }
 0x181   : > { %856 = vbcast.lane.b32.xlu1 %v842_v27, 280  ;;  %852 = vbcast.lane.b32.xlu0 %v842_v27, 272  ;;  %v880_v27 = vrot.slane %v9590_v17, %v9435_v6 }
 0x183   : > { %v9606_v51 = vpop.permute.xlu1 %590  ;;  %v9608_v33 = vpop.permute.xlu0 %586 }
 0x184   : > { %15958 = vst [vmem:[#allocation33_spill] sm:$0xff] %v9606_v51  ;;  %15959 = vst [vmem:[#allocation34_spill] sm:$0xff] %v9608_v33 }
 0x185   : > { %867 = vbcast.lane.b32.xlu1 %v861_v11, 264  ;;  %863 = vbcast.lane.b32.xlu0 %v861_v11, 256 }
 0x187   : > { %v9612_v63 = vpop.permute.xlu1 %601  ;;  %v9614_v42 = vpop.permute.xlu0 %597 }
 0x188   : > { %15960 = vst [vmem:[#allocation35_spill] sm:$0xff] %v9612_v63  ;;  %15961 = vst [vmem:[#allocation36_spill] sm:$0xff] %v9614_v42 }
 0x189   : > { %875 = vbcast.lane.b32.xlu1 %v861_v11, 280  ;;  %871 = vbcast.lane.b32.xlu0 %v861_v11, 272  ;;  %v899_v11 = vrot.slane %v9590_v17, %v9439_v8 }
 0x18b   : > { %v9616_v61 = vpop.permute.xlu1 %609  ;;  %v9618_v53 = vpop.permute.xlu0 %605 }
 0x18c   : > { %15962 = vst [vmem:[#allocation37_spill] sm:$0xff] %v9616_v61  ;;  %15963 = vst [vmem:[#allocation38_spill] sm:$0xff] %v9618_v53 }
 0x18d   : > { %886 = vbcast.lane.b32.xlu1 %v880_v27, 264  ;;  %882 = vbcast.lane.b32.xlu0 %v880_v27, 256 }
 0x18f   : > { %v9622_v33 = vpop.permute.xlu1 %620  ;;  %v9624_v51 = vpop.permute.xlu0 %616 }
 0x190   : > { %15964 = vst [vmem:[#allocation39_spill] sm:$0xff] %v9622_v33  ;;  %15965 = vst [vmem:[#allocation40_spill] sm:$0xff] %v9624_v51 }
 0x191   : > { %894 = vbcast.lane.b32.xlu1 %v880_v27, 280  ;;  %890 = vbcast.lane.b32.xlu0 %v880_v27, 272  ;;  %v918_v27 = vrot.slane %v9590_v17, %v9443_v12 }
 0x193   : > { %v9626_v63 = vpop.permute.xlu1 %628  ;;  %v9628_v42 = vpop.permute.xlu0 %624 }
 0x194   : > { %15966 = vst [vmem:[#allocation41_spill] sm:$0xff] %v9626_v63  ;;  %15967 = vst [vmem:[#allocation42_spill] sm:$0xff] %v9628_v42 }
 0x195   : > { %905 = vbcast.lane.b32.xlu1 %v899_v11, 264  ;;  %901 = vbcast.lane.b32.xlu0 %v899_v11, 256 }
 0x197   : > { %v9632_v53 = vpop.permute.xlu1 %639  ;;  %v9634_v61 = vpop.permute.xlu0 %635 }
 0x198   : > { %15968 = vst [vmem:[#allocation43_spill] sm:$0xff] %v9632_v53  ;;  %15969 = vst [vmem:[#allocation44_spill] sm:$0xff] %v9634_v61 }
 0x199   : > { %913 = vbcast.lane.b32.xlu1 %v899_v11, 280  ;;  %909 = vbcast.lane.b32.xlu0 %v899_v11, 272  ;;  %v937_v11 = vrot.slane %v9590_v17, %v9447_v14 }
 0x19b   : > { %v9636_v33 = vpop.permute.xlu1 %647  ;;  %v9638_v51 = vpop.permute.xlu0 %643 }
 0x19c   : > { %15970 = vst [vmem:[#allocation45_spill] sm:$0xff] %v9636_v33  ;;  %15971 = vst [vmem:[#allocation46_spill] sm:$0xff] %v9638_v51 }
 0x19d   : > { %924 = vbcast.lane.b32.xlu1 %v918_v27, 264  ;;  %920 = vbcast.lane.b32.xlu0 %v918_v27, 256 }
 0x19f   : > { %v9642_v42 = vpop.permute.xlu1 %658  ;;  %v9644_v63 = vpop.permute.xlu0 %654 }
 0x1a0   : > { %15972 = vst [vmem:[#allocation47_spill] sm:$0xff] %v9642_v42  ;;  %15973 = vst [vmem:[#allocation48_spill] sm:$0xff] %v9644_v63 }
 0x1a1   : > { %932 = vbcast.lane.b32.xlu1 %v918_v27, 280  ;;  %928 = vbcast.lane.b32.xlu0 %v918_v27, 272  ;;  %v956_v27 = vrot.slane %v9590_v17, %v9451_v20 }
 0x1a3   : > { %v9646_v53 = vpop.permute.xlu1 %666  ;;  %v9648_v61 = vpop.permute.xlu0 %662 }
 0x1a4   : > { %15974 = vst [vmem:[#allocation49_spill] sm:$0xff] %v9646_v53  ;;  %15975 = vst [vmem:[#allocation50_spill] sm:$0xff] %v9648_v61 }
 0x1a5   : > { %943 = vbcast.lane.b32.xlu1 %v937_v11, 264  ;;  %939 = vbcast.lane.b32.xlu0 %v937_v11, 256 }
 0x1a7   : > { %v9652_v51 = vpop.permute.xlu1 %677  ;;  %v9654_v33 = vpop.permute.xlu0 %673 }
 0x1a8   : > { %15976 = vst [vmem:[#allocation51_spill] sm:$0xff] %v9652_v51  ;;  %15977 = vst [vmem:[#allocation52_spill] sm:$0xff] %v9654_v33 }
 0x1a9   : > { %951 = vbcast.lane.b32.xlu1 %v937_v11, 280  ;;  %947 = vbcast.lane.b32.xlu0 %v937_v11, 272  ;;  %v975_v11 = vrot.slane %v9590_v17, %v9455_v25 }
 0x1ab   : > { %v9656_v42 = vpop.permute.xlu1 %685  ;;  %v9658_v63 = vpop.permute.xlu0 %681 }
 0x1ac   : > { %15978 = vst [vmem:[#allocation53_spill] sm:$0xff] %v9656_v42  ;;  %15979 = vst [vmem:[#allocation54_spill] sm:$0xff] %v9658_v63  ;;  %v274_v63 = vadd.f32 %v9403_v37, %v9400_v36 }
 0x1ad   : > { %962 = vbcast.lane.b32.xlu1 %v956_v27, 264  ;;  %958 = vbcast.lane.b32.xlu0 %v956_v27, 256 }
 0x1af   : > { %v9662_v61 = vpop.permute.xlu1 %696  ;;  %v9664_v53 = vpop.permute.xlu0 %692 }
 0x1b0   : > { %15980 = vst [vmem:[#allocation55_spill] sm:$0xff] %v9664_v53  ;;  %v9680_v53 = vsel %vm15920_vm0, %v274_v63, %v9467_v39 }
 0x1b1   : > { %970 = vbcast.lane.b32.xlu1 %v956_v27, 280  ;;  %966 = vbcast.lane.b32.xlu0 %v956_v27, 272  ;;  %v994_v17 = vrot.slane %v9680_v53, %v9426_v0  ;;  %v1013_v63 = vrot.slane %v9680_v53, %v9431_v4 }
 0x1b3   : > { %v9666_v51 = vpop.permute.xlu1 %704  ;;  %v9668_v33 = vpop.permute.xlu0 %700 }
 0x1b4   : > { %15981 = vst [vmem:[#allocation56_spill] sm:$0xff] %v9666_v51  ;;  %15982 = vst [vmem:[#allocation57_spill] sm:$0xff] %v9668_v33 }
 0x1b5   : > { %981 = vbcast.lane.b32.xlu1 %v975_v11, 264  ;;  %977 = vbcast.lane.b32.xlu0 %v975_v11, 256 }
 0x1b7   : > { %v9674_v42 = vpop.permute.xlu1 %715  ;;  %v9676_v10 = vpop.permute.xlu0 %711 }
 0x1b8   : > { %15983 = vst [vmem:[#allocation58_spill] sm:$0xff] %v9674_v42  ;;  %15984 = vst [vmem:[#allocation59_spill] sm:$0xff] %v9676_v10 }
 0x1b9   : > { %989 = vbcast.lane.b32.xlu1 %v975_v11, 280  ;;  %985 = vbcast.lane.b32.xlu0 %v975_v11, 272 }
 0x1bb   : > { %v9682_v27 = vpop.permute.xlu1 %723  ;;  %v9684_v33 = vpop.permute.xlu0 %719 }
 0x1bc   : > { %15985 = vst [vmem:[#allocation60_spill] sm:$0xff] %v9682_v27  ;;  %15986 = vst [vmem:[#allocation61_spill] sm:$0xff] %v9684_v33 }
 0x1bd   : > { %1000 = vbcast.lane.b32.xlu1 %v994_v17, 264  ;;  %996 = vbcast.lane.b32.xlu0 %v994_v17, 256 }
 0x1bf   : > { %v9688_v51 = vpop.permute.xlu1 %734  ;;  %v9690_v42 = vpop.permute.xlu0 %730 }
 0x1c0   : > { %15987 = vst [vmem:[#allocation62_spill] sm:$0xff] %v9688_v51  ;;  %15988 = vst [vmem:[#allocation63_spill] sm:$0xff] %v9690_v42 }
 0x1c1   : > { %1008 = vbcast.lane.b32.xlu1 %v994_v17, 280  ;;  %1004 = vbcast.lane.b32.xlu0 %v994_v17, 272  ;;  %v1032_v17 = vrot.slane %v9680_v53, %v9435_v6 }
 0x1c3   : > { %v9692_v10 = vpop.permute.xlu1 %742  ;;  %v9694_v39 = vpop.permute.xlu0 %738 }
 0x1c4   : > { %15989 = vst [vmem:[#allocation64_spill] sm:$0xff] %v9692_v10  ;;  %15990 = vst [vmem:[#allocation65_spill] sm:$0xff] %v9694_v39 }
 0x1c5   : > { %1019 = vbcast.lane.b32.xlu1 %v1013_v63, 264  ;;  %1015 = vbcast.lane.b32.xlu0 %v1013_v63, 256 }
 0x1c7   : > { %v9698_v11 = vpop.permute.xlu1 %753  ;;  %v9700_v33 = vpop.permute.xlu0 %749 }
 0x1c8   : > { %15991 = vst [vmem:[#allocation66_spill] sm:$0xff] %v9698_v11  ;;  %15992 = vst [vmem:[#allocation67_spill] sm:$0xff] %v9700_v33 }
 0x1c9   : > { %1027 = vbcast.lane.b32.xlu1 %v1013_v63, 280  ;;  %1023 = vbcast.lane.b32.xlu0 %v1013_v63, 272  ;;  %v1051_v63 = vrot.slane %v9680_v53, %v9439_v8 }
 0x1cb   : > { %v9702_v27 = vpop.permute.xlu1 %761  ;;  %v9704_v42 = vpop.permute.xlu0 %757 }
 0x1cc   : > { %15993 = vst [vmem:[#allocation68_spill] sm:$0xff] %v9702_v27  ;;  %15994 = vst [vmem:[#allocation69_spill] sm:$0xff] %v9704_v42 }
 0x1cd   : > { %1038 = vbcast.lane.b32.xlu1 %v1032_v17, 264  ;;  %1034 = vbcast.lane.b32.xlu0 %v1032_v17, 256 }
 0x1cf   : > { %v9708_v39 = vpop.permute.xlu1 %772  ;;  %v9710_v10 = vpop.permute.xlu0 %768 }
 0x1d0   : > { %15995 = vst [vmem:[#allocation70_spill] sm:$0xff] %v9708_v39  ;;  %15996 = vst [vmem:[#allocation71_spill] sm:$0xff] %v9710_v10 }
 0x1d1   : > { %1046 = vbcast.lane.b32.xlu1 %v1032_v17, 280  ;;  %1042 = vbcast.lane.b32.xlu0 %v1032_v17, 272  ;;  %v1070_v17 = vrot.slane %v9680_v53, %v9443_v12 }
 0x1d3   : > { %v9712_v11 = vpop.permute.xlu1 %780  ;;  %v9714_v33 = vpop.permute.xlu0 %776 }
 0x1d4   : > { %15997 = vst [vmem:[#allocation72_spill] sm:$0xff] %v9712_v11  ;;  %15998 = vst [vmem:[#allocation73_spill] sm:$0xff] %v9714_v33 }
 0x1d5   : > { %1057 = vbcast.lane.b32.xlu1 %v1051_v63, 264  ;;  %1053 = vbcast.lane.b32.xlu0 %v1051_v63, 256 }
 0x1d7   : > { %v9718_v42 = vpop.permute.xlu1 %791  ;;  %v9720_v27 = vpop.permute.xlu0 %787 }
 0x1d8   : > { %15999 = vst [vmem:[#allocation74_spill] sm:$0xff] %v9718_v42  ;;  %16000 = vst [vmem:[#allocation75_spill] sm:$0xff] %v9720_v27 }
 0x1d9   : > { %1065 = vbcast.lane.b32.xlu1 %v1051_v63, 280  ;;  %1061 = vbcast.lane.b32.xlu0 %v1051_v63, 272  ;;  %v1089_v63 = vrot.slane %v9680_v53, %v9447_v14 }
 0x1db   : > { %v9722_v39 = vpop.permute.xlu1 %799  ;;  %v9724_v10 = vpop.permute.xlu0 %795 }
 0x1dc   : > { %16001 = vst [vmem:[#allocation76_spill] sm:$0xff] %v9722_v39  ;;  %16002 = vst [vmem:[#allocation77_spill] sm:$0xff] %v9724_v10 }
 0x1dd   : > { %1076 = vbcast.lane.b32.xlu1 %v1070_v17, 264  ;;  %1072 = vbcast.lane.b32.xlu0 %v1070_v17, 256 }
 0x1df   : > { %v9728_v33 = vpop.permute.xlu1 %810  ;;  %v9730_v11 = vpop.permute.xlu0 %806 }
 0x1e0   : > { %16003 = vst [vmem:[#allocation78_spill] sm:$0xff] %v9728_v33  ;;  %16004 = vst [vmem:[#allocation79_spill] sm:$0xff] %v9730_v11 }
 0x1e1   : > { %1084 = vbcast.lane.b32.xlu1 %v1070_v17, 280  ;;  %1080 = vbcast.lane.b32.xlu0 %v1070_v17, 272  ;;  %v1108_v17 = vrot.slane %v9680_v53, %v9451_v20 }
 0x1e3   : > { %v9732_v42 = vpop.permute.xlu1 %818  ;;  %v9734_v27 = vpop.permute.xlu0 %814 }
 0x1e4   : > { %16005 = vst [vmem:[#allocation80_spill] sm:$0xff] %v9732_v42  ;;  %16006 = vst [vmem:[#allocation81_spill] sm:$0xff] %v9734_v27 }
 0x1e5   : > { %1095 = vbcast.lane.b32.xlu1 %v1089_v63, 264  ;;  %1091 = vbcast.lane.b32.xlu0 %v1089_v63, 256 }
 0x1e7   : > { %v9738_v10 = vpop.permute.xlu1 %829  ;;  %v9740_v39 = vpop.permute.xlu0 %825 }
 0x1e8   : > { %16007 = vst [vmem:[#allocation82_spill] sm:$0xff] %v9738_v10  ;;  %16008 = vst [vmem:[#allocation83_spill] sm:$0xff] %v9740_v39 }
 0x1e9   : > { %1103 = vbcast.lane.b32.xlu1 %v1089_v63, 280  ;;  %1099 = vbcast.lane.b32.xlu0 %v1089_v63, 272  ;;  %v1127_v63 = vrot.slane %v9680_v53, %v9455_v25 }
 0x1eb   : > { %v9742_v33 = vpop.permute.xlu1 %837  ;;  %v9744_v11 = vpop.permute.xlu0 %833 }
 0x1ec   : > { %16009 = vst [vmem:[#allocation84_spill] sm:$0xff] %v9742_v33  ;;  %16010 = vst [vmem:[#allocation85_spill] sm:$0xff] %v9744_v11  ;;  %v275_v11 = vadd.f32 %v9396_v55, %v9392_v18 }
 0x1ed   : > { %1114 = vbcast.lane.b32.xlu1 %v1108_v17, 264  ;;  %1110 = vbcast.lane.b32.xlu0 %v1108_v17, 256 }
 0x1ef   : > { %v9748_v27 = vpop.permute.xlu1 %848  ;;  %v9750_v42 = vpop.permute.xlu0 %844 }
 0x1f0   : > { %16011 = vst [vmem:[#allocation86_spill] sm:$0xff] %v9750_v42  ;;  %v9766_v42 = vsel %vm15920_vm0, %v275_v11, %v9465_v35 }
 0x1f1   : > { %1122 = vbcast.lane.b32.xlu1 %v1108_v17, 280  ;;  %1118 = vbcast.lane.b32.xlu0 %v1108_v17, 272  ;;  %v1146_v53 = vrot.slane %v9766_v42, %v9426_v0  ;;  %v1165_v11 = vrot.slane %v9766_v42, %v9431_v4 }
 0x1f3   : > { %v9752_v10 = vpop.permute.xlu1 %856  ;;  %v9754_v39 = vpop.permute.xlu0 %852 }
 0x1f4   : > { %16012 = vst [vmem:[#allocation87_spill] sm:$0xff] %v9752_v10  ;;  %16013 = vst [vmem:[#allocation88_spill] sm:$0xff] %v9754_v39 }
 0x1f5   : > { %1133 = vbcast.lane.b32.xlu1 %v1127_v63, 264  ;;  %1129 = vbcast.lane.b32.xlu0 %v1127_v63, 256 }
 0x1f7   : > { %v9760_v33 = vpop.permute.xlu1 %867  ;;  %v9762_v51 = vpop.permute.xlu0 %863 }
 0x1f8   : > { %16014 = vst [vmem:[#allocation89_spill] sm:$0xff] %v9760_v33  ;;  %16015 = vst [vmem:[#allocation90_spill] sm:$0xff] %v9762_v51 }
 0x1f9   : > { %1141 = vbcast.lane.b32.xlu1 %v1127_v63, 280  ;;  %1137 = vbcast.lane.b32.xlu0 %v1127_v63, 272 }
 0x1fb   : > { %v9768_v17 = vpop.permute.xlu1 %875  ;;  %v9770_v39 = vpop.permute.xlu0 %871 }
 0x1fc   : > { %16016 = vst [vmem:[#allocation91_spill] sm:$0xff] %v9768_v17  ;;  %16017 = vst [vmem:[#allocation92_spill] sm:$0xff] %v9770_v39 }
 0x1fd   : > { %1152 = vbcast.lane.b32.xlu1 %v1146_v53, 264  ;;  %1148 = vbcast.lane.b32.xlu0 %v1146_v53, 256 }
 0x1ff   : > { %v9774_v10 = vpop.permute.xlu1 %886  ;;  %v9776_v33 = vpop.permute.xlu0 %882 }
 0x200   : > { %16018 = vst [vmem:[#allocation93_spill] sm:$0xff] %v9774_v10  ;;  %16019 = vst [vmem:[#allocation94_spill] sm:$0xff] %v9776_v33 }
 0x201   : > { %1160 = vbcast.lane.b32.xlu1 %v1146_v53, 280  ;;  %1156 = vbcast.lane.b32.xlu0 %v1146_v53, 272  ;;  %v1184_v53 = vrot.slane %v9766_v42, %v9435_v6 }
 0x203   : > { %v9778_v51 = vpop.permute.xlu1 %894  ;;  %v9780_v35 = vpop.permute.xlu0 %890 }
 0x204   : > { %16020 = vst [vmem:[#allocation95_spill] sm:$0xff] %v9778_v51  ;;  %16021 = vst [vmem:[#allocation96_spill] sm:$0xff] %v9780_v35 }
 0x205   : > { %1171 = vbcast.lane.b32.xlu1 %v1165_v11, 264  ;;  %1167 = vbcast.lane.b32.xlu0 %v1165_v11, 256 }
 0x207   : > { %v9784_v63 = vpop.permute.xlu1 %905  ;;  %v9786_v39 = vpop.permute.xlu0 %901 }
 0x208   : > { %16022 = vst [vmem:[#allocation97_spill] sm:$0xff] %v9784_v63  ;;  %16023 = vst [vmem:[#allocation98_spill] sm:$0xff] %v9786_v39 }
 0x209   : > { %1179 = vbcast.lane.b32.xlu1 %v1165_v11, 280  ;;  %1175 = vbcast.lane.b32.xlu0 %v1165_v11, 272  ;;  %v1203_v11 = vrot.slane %v9766_v42, %v9439_v8 }
 0x20b   : > { %v9788_v17 = vpop.permute.xlu1 %913  ;;  %v9790_v33 = vpop.permute.xlu0 %909 }
 0x20c   : > { %16024 = vst [vmem:[#allocation99_spill] sm:$0xff] %v9788_v17  ;;  %16025 = vst [vmem:[#allocation100_spill] sm:$0xff] %v9790_v33 }
 0x20d   : > { %1190 = vbcast.lane.b32.xlu1 %v1184_v53, 264  ;;  %1186 = vbcast.lane.b32.xlu0 %v1184_v53, 256 }
 0x20f   : > { %v9794_v35 = vpop.permute.xlu1 %924  ;;  %v9796_v51 = vpop.permute.xlu0 %920 }
 0x210   : > { %16026 = vst [vmem:[#allocation101_spill] sm:$0xff] %v9794_v35  ;;  %16027 = vst [vmem:[#allocation102_spill] sm:$0xff] %v9796_v51 }
 0x211   : > { %1198 = vbcast.lane.b32.xlu1 %v1184_v53, 280  ;;  %1194 = vbcast.lane.b32.xlu0 %v1184_v53, 272  ;;  %v1222_v53 = vrot.slane %v9766_v42, %v9443_v12 }
 0x213   : > { %v9798_v63 = vpop.permute.xlu1 %932  ;;  %v9800_v39 = vpop.permute.xlu0 %928 }
 0x214   : > { %16028 = vst [vmem:[#allocation103_spill] sm:$0xff] %v9798_v63  ;;  %16029 = vst [vmem:[#allocation104_spill] sm:$0xff] %v9800_v39 }
 0x215   : > { %1209 = vbcast.lane.b32.xlu1 %v1203_v11, 264  ;;  %1205 = vbcast.lane.b32.xlu0 %v1203_v11, 256 }
 0x217   : > { %v9804_v33 = vpop.permute.xlu1 %943  ;;  %v9806_v17 = vpop.permute.xlu0 %939 }
 0x218   : > { %16030 = vst [vmem:[#allocation105_spill] sm:$0xff] %v9804_v33  ;;  %16031 = vst [vmem:[#allocation106_spill] sm:$0xff] %v9806_v17 }
 0x219   : > { %1217 = vbcast.lane.b32.xlu1 %v1203_v11, 280  ;;  %1213 = vbcast.lane.b32.xlu0 %v1203_v11, 272  ;;  %v1241_v11 = vrot.slane %v9766_v42, %v9447_v14 }
 0x21b   : > { %v9808_v35 = vpop.permute.xlu1 %951  ;;  %v9810_v51 = vpop.permute.xlu0 %947 }
 0x21c   : > { %16032 = vst [vmem:[#allocation107_spill] sm:$0xff] %v9808_v35  ;;  %16033 = vst [vmem:[#allocation108_spill] sm:$0xff] %v9810_v51 }
 0x21d   : > { %1228 = vbcast.lane.b32.xlu1 %v1222_v53, 264  ;;  %1224 = vbcast.lane.b32.xlu0 %v1222_v53, 256 }
 0x21f   : > { %v9814_v39 = vpop.permute.xlu1 %962  ;;  %v9816_v63 = vpop.permute.xlu0 %958 }
 0x220   : > { %16034 = vst [vmem:[#allocation109_spill] sm:$0xff] %v9814_v39  ;;  %16035 = vst [vmem:[#allocation110_spill] sm:$0xff] %v9816_v63 }
 0x221   : > { %1236 = vbcast.lane.b32.xlu1 %v1222_v53, 280  ;;  %1232 = vbcast.lane.b32.xlu0 %v1222_v53, 272  ;;  %v1260_v53 = vrot.slane %v9766_v42, %v9451_v20 }
 0x223   : > { %v9818_v33 = vpop.permute.xlu1 %970  ;;  %v9820_v17 = vpop.permute.xlu0 %966 }
 0x224   : > { %16036 = vst [vmem:[#allocation111_spill] sm:$0xff] %v9818_v33  ;;  %16037 = vst [vmem:[#allocation112_spill] sm:$0xff] %v9820_v17 }
 0x225   : > { %1247 = vbcast.lane.b32.xlu1 %v1241_v11, 264  ;;  %1243 = vbcast.lane.b32.xlu0 %v1241_v11, 256 }
 0x227   : > { %v9824_v51 = vpop.permute.xlu1 %981  ;;  %v9826_v35 = vpop.permute.xlu0 %977 }
 0x228   : > { %16038 = vst [vmem:[#allocation113_spill] sm:$0xff] %v9824_v51  ;;  %16039 = vst [vmem:[#allocation114_spill] sm:$0xff] %v9826_v35 }
 0x229   : > { %1255 = vbcast.lane.b32.xlu1 %v1241_v11, 280  ;;  %1251 = vbcast.lane.b32.xlu0 %v1241_v11, 272  ;;  %v1279_v11 = vrot.slane %v9766_v42, %v9455_v25 }
 0x22b   : > { %v9828_v39 = vpop.permute.xlu1 %989  ;;  %v9830_v63 = vpop.permute.xlu0 %985 }
 0x22c   : > { %16040 = vst [vmem:[#allocation115_spill] sm:$0xff] %v9828_v39  ;;  %16041 = vst [vmem:[#allocation116_spill] sm:$0xff] %v9830_v63  ;;  %v276_v63 = vadd.f32 %v9415_v57, %v9413_v56 }
 0x22d   : > { %1266 = vbcast.lane.b32.xlu1 %v1260_v53, 264  ;;  %1262 = vbcast.lane.b32.xlu0 %v1260_v53, 256 }
 0x22f   : > { %v9834_v17 = vpop.permute.xlu1 %1000  ;;  %v9836_v33 = vpop.permute.xlu0 %996 }
 0x230   : > { %16042 = vst [vmem:[#allocation117_spill] sm:$0xff] %v9836_v33  ;;  %v9852_v33 = vsel %vm15920_vm0, %v276_v63, %v9471_v41 }
 0x231   : > { %1274 = vbcast.lane.b32.xlu1 %v1260_v53, 280  ;;  %1270 = vbcast.lane.b32.xlu0 %v1260_v53, 272  ;;  %v1298_v42 = vrot.slane %v9852_v33, %v9426_v0  ;;  %v1317_v63 = vrot.slane %v9852_v33, %v9431_v4 }
 0x233   : > { %v9838_v51 = vpop.permute.xlu1 %1008  ;;  %v9840_v35 = vpop.permute.xlu0 %1004 }
 0x234   : > { %16043 = vst [vmem:[#allocation118_spill] sm:$0xff] %v9838_v51  ;;  %16044 = vst [vmem:[#allocation119_spill] sm:$0xff] %v9840_v35 }
 0x235   : > { %1285 = vbcast.lane.b32.xlu1 %v1279_v11, 264  ;;  %1281 = vbcast.lane.b32.xlu0 %v1279_v11, 256 }
 0x237   : > { %v9846_v39 = vpop.permute.xlu1 %1019  ;;  %v9848_v10 = vpop.permute.xlu0 %1015 }
 0x238   : > { %16045 = vst [vmem:[#allocation120_spill] sm:$0xff] %v9846_v39  ;;  %16046 = vst [vmem:[#allocation121_spill] sm:$0xff] %v9848_v10 }
 0x239   : > { %1293 = vbcast.lane.b32.xlu1 %v1279_v11, 280  ;;  %1289 = vbcast.lane.b32.xlu0 %v1279_v11, 272 }
 0x23b   : > { %v9854_v53 = vpop.permute.xlu1 %1027  ;;  %v9856_v35 = vpop.permute.xlu0 %1023 }
 0x23c   : > { %16047 = vst [vmem:[#allocation122_spill] sm:$0xff] %v9854_v53  ;;  %16048 = vst [vmem:[#allocation123_spill] sm:$0xff] %v9856_v35 }
 0x23d   : > { %1304 = vbcast.lane.b32.xlu1 %v1298_v42, 264  ;;  %1300 = vbcast.lane.b32.xlu0 %v1298_v42, 256 }
 0x23f   : > { %v9860_v51 = vpop.permute.xlu1 %1038  ;;  %v9862_v39 = vpop.permute.xlu0 %1034 }
 0x240   : > { %16049 = vst [vmem:[#allocation124_spill] sm:$0xff] %v9860_v51  ;;  %16050 = vst [vmem:[#allocation125_spill] sm:$0xff] %v9862_v39 }
 0x241   : > { %1312 = vbcast.lane.b32.xlu1 %v1298_v42, 280  ;;  %1308 = vbcast.lane.b32.xlu0 %v1298_v42, 272  ;;  %v1336_v42 = vrot.slane %v9852_v33, %v9435_v6 }
 0x243   : > { %v9864_v10 = vpop.permute.xlu1 %1046  ;;  %v9866_v41 = vpop.permute.xlu0 %1042 }
 0x244   : > { %16051 = vst [vmem:[#allocation126_spill] sm:$0xff] %v9864_v10  ;;  %16052 = vst [vmem:[#allocation127_spill] sm:$0xff] %v9866_v41 }
 0x245   : > { %1323 = vbcast.lane.b32.xlu1 %v1317_v63, 264  ;;  %1319 = vbcast.lane.b32.xlu0 %v1317_v63, 256 }
 0x247   : > { %v9870_v11 = vpop.permute.xlu1 %1057  ;;  %v9872_v35 = vpop.permute.xlu0 %1053 }
 0x248   : > { %16053 = vst [vmem:[#allocation128_spill] sm:$0xff] %v9870_v11  ;;  %16054 = vst [vmem:[#allocation129_spill] sm:$0xff] %v9872_v35 }
 0x249   : > { %1331 = vbcast.lane.b32.xlu1 %v1317_v63, 280  ;;  %1327 = vbcast.lane.b32.xlu0 %v1317_v63, 272  ;;  %v1355_v63 = vrot.slane %v9852_v33, %v9439_v8 }
 0x24b   : > { %v9874_v53 = vpop.permute.xlu1 %1065  ;;  %v9876_v39 = vpop.permute.xlu0 %1061 }
 0x24c   : > { %16055 = vst [vmem:[#allocation130_spill] sm:$0xff] %v9874_v53  ;;  %16056 = vst [vmem:[#allocation131_spill] sm:$0xff] %v9876_v39 }
 0x24d   : > { %1342 = vbcast.lane.b32.xlu1 %v1336_v42, 264  ;;  %1338 = vbcast.lane.b32.xlu0 %v1336_v42, 256 }
 0x24f   : > { %v9880_v41 = vpop.permute.xlu1 %1076  ;;  %v9882_v10 = vpop.permute.xlu0 %1072 }
 0x250   : > { %16057 = vst [vmem:[#allocation132_spill] sm:$0xff] %v9880_v41  ;;  %16058 = vst [vmem:[#allocation133_spill] sm:$0xff] %v9882_v10 }
 0x251   : > { %1350 = vbcast.lane.b32.xlu1 %v1336_v42, 280  ;;  %1346 = vbcast.lane.b32.xlu0 %v1336_v42, 272  ;;  %v1374_v42 = vrot.slane %v9852_v33, %v9443_v12 }
 0x253   : > { %v9884_v11 = vpop.permute.xlu1 %1084  ;;  %v9886_v35 = vpop.permute.xlu0 %1080 }
 0x254   : > { %16059 = vst [vmem:[#allocation134_spill] sm:$0xff] %v9884_v11  ;;  %16060 = vst [vmem:[#allocation135_spill] sm:$0xff] %v9886_v35 }
 0x255   : > { %1361 = vbcast.lane.b32.xlu1 %v1355_v63, 264  ;;  %1357 = vbcast.lane.b32.xlu0 %v1355_v63, 256 }
 0x257   : > { %v9890_v39 = vpop.permute.xlu1 %1095  ;;  %v9892_v53 = vpop.permute.xlu0 %1091 }
 0x258   : > { %16061 = vst [vmem:[#allocation136_spill] sm:$0xff] %v9890_v39  ;;  %16062 = vst [vmem:[#allocation137_spill] sm:$0xff] %v9892_v53 }
 0x259   : > { %1369 = vbcast.lane.b32.xlu1 %v1355_v63, 280  ;;  %1365 = vbcast.lane.b32.xlu0 %v1355_v63, 272  ;;  %v1393_v63 = vrot.slane %v9852_v33, %v9447_v14 }
 0x25b   : > { %v9894_v41 = vpop.permute.xlu1 %1103  ;;  %v9896_v10 = vpop.permute.xlu0 %1099 }
 0x25c   : > { %16063 = vst [vmem:[#allocation138_spill] sm:$0xff] %v9894_v41  ;;  %16064 = vst [vmem:[#allocation139_spill] sm:$0xff] %v9896_v10 }
 0x25d   : > { %1380 = vbcast.lane.b32.xlu1 %v1374_v42, 264  ;;  %1376 = vbcast.lane.b32.xlu0 %v1374_v42, 256 }
 0x25f   : > { %v9900_v35 = vpop.permute.xlu1 %1114  ;;  %v9902_v11 = vpop.permute.xlu0 %1110 }
 0x260   : > { %16065 = vst [vmem:[#allocation140_spill] sm:$0xff] %v9900_v35  ;;  %16066 = vst [vmem:[#allocation141_spill] sm:$0xff] %v9902_v11 }
 0x261   : > { %1388 = vbcast.lane.b32.xlu1 %v1374_v42, 280  ;;  %1384 = vbcast.lane.b32.xlu0 %v1374_v42, 272  ;;  %v1412_v42 = vrot.slane %v9852_v33, %v9451_v20 }
 0x263   : > { %v9904_v39 = vpop.permute.xlu1 %1122  ;;  %v9906_v53 = vpop.permute.xlu0 %1118 }
 0x264   : > { %16067 = vst [vmem:[#allocation142_spill] sm:$0xff] %v9904_v39  ;;  %16068 = vst [vmem:[#allocation143_spill] sm:$0xff] %v9906_v53 }
 0x265   : > { %1399 = vbcast.lane.b32.xlu1 %v1393_v63, 264  ;;  %1395 = vbcast.lane.b32.xlu0 %v1393_v63, 256 }
 0x267   : > { %v9910_v10 = vpop.permute.xlu1 %1133  ;;  %v9912_v41 = vpop.permute.xlu0 %1129 }
 0x268   : > { %16069 = vst [vmem:[#allocation144_spill] sm:$0xff] %v9910_v10  ;;  %16070 = vst [vmem:[#allocation145_spill] sm:$0xff] %v9912_v41 }
 0x269   : > { %1407 = vbcast.lane.b32.xlu1 %v1393_v63, 280  ;;  %1403 = vbcast.lane.b32.xlu0 %v1393_v63, 272  ;;  %v1431_v63 = vrot.slane %v9852_v33, %v9455_v25 }
 0x26b   : > { %v9914_v35 = vpop.permute.xlu1 %1141  ;;  %v9916_v11 = vpop.permute.xlu0 %1137 }
 0x26c   : > { %16071 = vst [vmem:[#allocation146_spill] sm:$0xff] %v9914_v35  ;;  %16072 = vst [vmem:[#allocation147_spill] sm:$0xff] %v9916_v11  ;;  %v277_v11 = vadd.f32 %v9411_v52, %v9409_v59 }
 0x26d   : > { %1418 = vbcast.lane.b32.xlu1 %v1412_v42, 264  ;;  %1414 = vbcast.lane.b32.xlu0 %v1412_v42, 256 }
 0x26f   : > { %v9920_v53 = vpop.permute.xlu1 %1152  ;;  %v9922_v39 = vpop.permute.xlu0 %1148 }
 0x270   : > { %16073 = vst [vmem:[#allocation148_spill] sm:$0xff] %v9922_v39  ;;  %v9938_v39 = vsel %vm15920_vm0, %v277_v11, %v9469_v40 }
 0x271   : > { %1426 = vbcast.lane.b32.xlu1 %v1412_v42, 280  ;;  %1422 = vbcast.lane.b32.xlu0 %v1412_v42, 272  ;;  %v1450_v33 = vrot.slane %v9938_v39, %v9426_v0  ;;  %v1469_v11 = vrot.slane %v9938_v39, %v9431_v4 }
 0x273   : > { %v9924_v10 = vpop.permute.xlu1 %1160  ;;  %v9926_v41 = vpop.permute.xlu0 %1156 }
 0x274   : > { %16074 = vst [vmem:[#allocation149_spill] sm:$0xff] %v9924_v10  ;;  %16075 = vst [vmem:[#allocation150_spill] sm:$0xff] %v9926_v41 }
 0x275   : > { %1437 = vbcast.lane.b32.xlu1 %v1431_v63, 264  ;;  %1433 = vbcast.lane.b32.xlu0 %v1431_v63, 256 }
 0x277   : > { %v9932_v35 = vpop.permute.xlu1 %1171  ;;  %v9934_v51 = vpop.permute.xlu0 %1167 }
 0x278   : > { %16076 = vst [vmem:[#allocation151_spill] sm:$0xff] %v9932_v35  ;;  %16077 = vst [vmem:[#allocation152_spill] sm:$0xff] %v9934_v51 }
 0x279   : > { %1445 = vbcast.lane.b32.xlu1 %v1431_v63, 280  ;;  %1441 = vbcast.lane.b32.xlu0 %v1431_v63, 272 }
 0x27b   : > { %v9940_v42 = vpop.permute.xlu1 %1179  ;;  %v9942_v41 = vpop.permute.xlu0 %1175 }
 0x27c   : > { %16078 = vst [vmem:[#allocation153_spill] sm:$0xff] %v9940_v42  ;;  %16079 = vst [vmem:[#allocation154_spill] sm:$0xff] %v9942_v41 }
 0x27d   : > { %1456 = vbcast.lane.b32.xlu1 %v1450_v33, 264  ;;  %1452 = vbcast.lane.b32.xlu0 %v1450_v33, 256 }
 0x27f   : > { %v9946_v10 = vpop.permute.xlu1 %1190  ;;  %v9948_v35 = vpop.permute.xlu0 %1186 }
 0x280   : > { %16080 = vst [vmem:[#allocation155_spill] sm:$0xff] %v9946_v10  ;;  %16081 = vst [vmem:[#allocation156_spill] sm:$0xff] %v9948_v35 }
 0x281   : > { %1464 = vbcast.lane.b32.xlu1 %v1450_v33, 280  ;;  %1460 = vbcast.lane.b32.xlu0 %v1450_v33, 272  ;;  %v1488_v33 = vrot.slane %v9938_v39, %v9435_v6 }
 0x283   : > { %v9950_v51 = vpop.permute.xlu1 %1198  ;;  %v9952_v40 = vpop.permute.xlu0 %1194 }
 0x284   : > { %16082 = vst [vmem:[#allocation157_spill] sm:$0xff] %v9950_v51  ;;  %16083 = vst [vmem:[#allocation158_spill] sm:$0xff] %v9952_v40 }
 0x285   : > { %1475 = vbcast.lane.b32.xlu1 %v1469_v11, 264  ;;  %1471 = vbcast.lane.b32.xlu0 %v1469_v11, 256 }
 0x287   : > { %v9956_v63 = vpop.permute.xlu1 %1209  ;;  %v9958_v41 = vpop.permute.xlu0 %1205 }
 0x288   : > { %16084 = vst [vmem:[#allocation159_spill] sm:$0xff] %v9956_v63  ;;  %16085 = vst [vmem:[#allocation160_spill] sm:$0xff] %v9958_v41 }
 0x289   : > { %1483 = vbcast.lane.b32.xlu1 %v1469_v11, 280  ;;  %1479 = vbcast.lane.b32.xlu0 %v1469_v11, 272  ;;  %v1507_v11 = vrot.slane %v9938_v39, %v9439_v8 }
 0x28b   : > { %v9960_v42 = vpop.permute.xlu1 %1217  ;;  %v9962_v35 = vpop.permute.xlu0 %1213 }
 0x28c   : > { %16086 = vst [vmem:[#allocation161_spill] sm:$0xff] %v9960_v42  ;;  %16087 = vst [vmem:[#allocation162_spill] sm:$0xff] %v9962_v35 }
 0x28d   : > { %1494 = vbcast.lane.b32.xlu1 %v1488_v33, 264  ;;  %1490 = vbcast.lane.b32.xlu0 %v1488_v33, 256 }
 0x28f   : > { %v9966_v40 = vpop.permute.xlu1 %1228  ;;  %v9968_v51 = vpop.permute.xlu0 %1224 }
 0x290   : > { %16088 = vst [vmem:[#allocation163_spill] sm:$0xff] %v9966_v40  ;;  %16089 = vst [vmem:[#allocation164_spill] sm:$0xff] %v9968_v51 }
 0x291   : > { %1502 = vbcast.lane.b32.xlu1 %v1488_v33, 280  ;;  %1498 = vbcast.lane.b32.xlu0 %v1488_v33, 272  ;;  %v1526_v33 = vrot.slane %v9938_v39, %v9443_v12 }
 0x293   : > { %v9970_v63 = vpop.permute.xlu1 %1236  ;;  %v9972_v41 = vpop.permute.xlu0 %1232 }
 0x294   : > { %16090 = vst [vmem:[#allocation165_spill] sm:$0xff] %v9970_v63  ;;  %16091 = vst [vmem:[#allocation166_spill] sm:$0xff] %v9972_v41 }
 0x295   : > { %1513 = vbcast.lane.b32.xlu1 %v1507_v11, 264  ;;  %1509 = vbcast.lane.b32.xlu0 %v1507_v11, 256 }
 0x297   : > { %v9976_v35 = vpop.permute.xlu1 %1247  ;;  %v9978_v42 = vpop.permute.xlu0 %1243 }
 0x298   : > { %16092 = vst [vmem:[#allocation167_spill] sm:$0xff] %v9976_v35  ;;  %16093 = vst [vmem:[#allocation168_spill] sm:$0xff] %v9978_v42 }
 0x299   : > { %1521 = vbcast.lane.b32.xlu1 %v1507_v11, 280  ;;  %1517 = vbcast.lane.b32.xlu0 %v1507_v11, 272  ;;  %v1545_v11 = vrot.slane %v9938_v39, %v9447_v14 }
 0x29b   : > { %v9980_v40 = vpop.permute.xlu1 %1255  ;;  %v9982_v51 = vpop.permute.xlu0 %1251 }
 0x29c   : > { %16094 = vst [vmem:[#allocation169_spill] sm:$0xff] %v9980_v40  ;;  %16095 = vst [vmem:[#allocation170_spill] sm:$0xff] %v9982_v51 }
 0x29d   : > { %1532 = vbcast.lane.b32.xlu1 %v1526_v33, 264  ;;  %1528 = vbcast.lane.b32.xlu0 %v1526_v33, 256 }
 0x29f   : > { %v9986_v41 = vpop.permute.xlu1 %1266  ;;  %v9988_v63 = vpop.permute.xlu0 %1262 }
 0x2a0   : > { %16096 = vst [vmem:[#allocation171_spill] sm:$0xff] %v9986_v41  ;;  %16097 = vst [vmem:[#allocation172_spill] sm:$0xff] %v9988_v63 }
 0x2a1   : > { %1540 = vbcast.lane.b32.xlu1 %v1526_v33, 280  ;;  %1536 = vbcast.lane.b32.xlu0 %v1526_v33, 272  ;;  %v1564_v33 = vrot.slane %v9938_v39, %v9451_v20 }
 0x2a3   : > { %v9990_v35 = vpop.permute.xlu1 %1274  ;;  %v9992_v42 = vpop.permute.xlu0 %1270 }
 0x2a4   : > { %16098 = vst [vmem:[#allocation173_spill] sm:$0xff] %v9990_v35  ;;  %16099 = vst [vmem:[#allocation174_spill] sm:$0xff] %v9992_v42 }
 0x2a5   : > { %1551 = vbcast.lane.b32.xlu1 %v1545_v11, 264  ;;  %1547 = vbcast.lane.b32.xlu0 %v1545_v11, 256 }
 0x2a7   : > { %v9996_v51 = vpop.permute.xlu1 %1285  ;;  %v9998_v40 = vpop.permute.xlu0 %1281 }
 0x2a8   : > { %16100 = vst [vmem:[#allocation175_spill] sm:$0xff] %v9996_v51  ;;  %16101 = vst [vmem:[#allocation176_spill] sm:$0xff] %v9998_v40 }
 0x2a9   : > { %1559 = vbcast.lane.b32.xlu1 %v1545_v11, 280  ;;  %1555 = vbcast.lane.b32.xlu0 %v1545_v11, 272  ;;  %v1583_v11 = vrot.slane %v9938_v39, %v9455_v25 }
 0x2ab   : > { %v10000_v41 = vpop.permute.xlu1 %1293  ;;  %v10002_v63 = vpop.permute.xlu0 %1289 }
 0x2ac   : > { %16102 = vst [vmem:[#allocation177_spill] sm:$0xff] %v10000_v41  ;;  %16103 = vst [vmem:[#allocation178_spill] sm:$0xff] %v10002_v63  ;;  %v278_v63 = vsub.f32 %v9254_v16, %v9263_v22 }
 0x2ad   : > { %1570 = vbcast.lane.b32.xlu1 %v1564_v33, 264  ;;  %1566 = vbcast.lane.b32.xlu0 %v1564_v33, 256 }
 0x2af   : > { %v10006_v42 = vpop.permute.xlu1 %1304  ;;  %v10008_v35 = vpop.permute.xlu0 %1300 }
 0x2b0   : > { %16104 = vst [vmem:[#allocation179_spill] sm:$0xff] %v10006_v42  ;;  %16105 = vst [vmem:[#allocation180_spill] sm:$0xff] %v10008_v35  ;;  %v10024_v35 = vsel %vm15920_vm0, %v278_v63, %v9476_v47 }
 0x2b1   : > { %1578 = vbcast.lane.b32.xlu1 %v1564_v33, 280  ;;  %1574 = vbcast.lane.b32.xlu0 %v1564_v33, 272  ;;  %v1602_v39 = vrot.slane %v10024_v35, %v9426_v0  ;;  %v1621_v63 = vrot.slane %v10024_v35, %v9431_v4 }
 0x2b3   : > { %v10010_v51 = vpop.permute.xlu1 %1312  ;;  %v10012_v40 = vpop.permute.xlu0 %1308 }
 0x2b4   : > { %16106 = vst [vmem:[#allocation181_spill] sm:$0xff] %v10010_v51  ;;  %16107 = vst [vmem:[#allocation182_spill] sm:$0xff] %v10012_v40 }
 0x2b5   : > { %1589 = vbcast.lane.b32.xlu1 %v1583_v11, 264  ;;  %1585 = vbcast.lane.b32.xlu0 %v1583_v11, 256 }
 0x2b7   : > { %v10018_v41 = vpop.permute.xlu1 %1323  ;;  %v10020_v10 = vpop.permute.xlu0 %1319 }
 0x2b8   : > { %16108 = vst [vmem:[#allocation183_spill] sm:$0xff] %v10018_v41  ;;  %16109 = vst [vmem:[#allocation184_spill] sm:$0xff] %v10020_v10 }
 0x2b9   : > { %1597 = vbcast.lane.b32.xlu1 %v1583_v11, 280  ;;  %1593 = vbcast.lane.b32.xlu0 %v1583_v11, 272 }
 0x2bb   : > { %v10026_v33 = vpop.permute.xlu1 %1331  ;;  %v10028_v40 = vpop.permute.xlu0 %1327 }
 0x2bc   : > { %16110 = vst [vmem:[#allocation185_spill] sm:$0xff] %v10026_v33  ;;  %16111 = vst [vmem:[#allocation186_spill] sm:$0xff] %v10028_v40 }
 0x2bd   : > { %1608 = vbcast.lane.b32.xlu1 %v1602_v39, 264  ;;  %1604 = vbcast.lane.b32.xlu0 %v1602_v39, 256 }
 0x2bf   : > { %v10032_v16 = vpop.permute.xlu1 %1342  ;;  %v10034_v22 = vpop.permute.xlu0 %1338 }
 0x2c0   : > { %16112 = vst [vmem:[#allocation187_spill] sm:$0xff] %v10032_v16  ;;  %16113 = vst [vmem:[#allocation188_spill] sm:$0xff] %v10034_v22 }
 0x2c1   : > { %1616 = vbcast.lane.b32.xlu1 %v1602_v39, 280  ;;  %1612 = vbcast.lane.b32.xlu0 %v1602_v39, 272  ;;  %v1640_v39 = vrot.slane %v10024_v35, %v9435_v6 }
 0x2c3   : > { %v10036_v10 = vpop.permute.xlu1 %1350  ;;  %v10038_v47 = vpop.permute.xlu0 %1346 }
 0x2c4   : > { %16114 = vst [vmem:[#allocation189_spill] sm:$0xff] %v10036_v10  ;;  %16115 = vst [vmem:[#allocation190_spill] sm:$0xff] %v10038_v47 }
 0x2c5   : > { %1627 = vbcast.lane.b32.xlu1 %v1621_v63, 264  ;;  %1623 = vbcast.lane.b32.xlu0 %v1621_v63, 256 }
 0x2c7   : > { %v10042_v11 = vpop.permute.xlu1 %1361  ;;  %v10044_v40 = vpop.permute.xlu0 %1357 }
 0x2c8   : > { %16116 = vst [vmem:[#allocation191_spill] sm:$0xff] %v10042_v11  ;;  %16117 = vst [vmem:[#allocation192_spill] sm:$0xff] %v10044_v40 }
 0x2c9   : > { %1635 = vbcast.lane.b32.xlu1 %v1621_v63, 280  ;;  %1631 = vbcast.lane.b32.xlu0 %v1621_v63, 272  ;;  %v1659_v63 = vrot.slane %v10024_v35, %v9439_v8 }
 0x2cb   : > { %v10046_v33 = vpop.permute.xlu1 %1369  ;;  %v10048_v22 = vpop.permute.xlu0 %1365 }
 0x2cc   : > { %16118 = vst [vmem:[#allocation193_spill] sm:$0xff] %v10046_v33  ;;  %16119 = vst [vmem:[#allocation194_spill] sm:$0xff] %v10048_v22 }
 0x2cd   : > { %1646 = vbcast.lane.b32.xlu1 %v1640_v39, 264  ;;  %1642 = vbcast.lane.b32.xlu0 %v1640_v39, 256 }
 0x2cf   : > { %v10052_v41 = vpop.permute.xlu1 %1380  ;;  %v10054_v47 = vpop.permute.xlu0 %1376 }
 0x2d0   : > { %16120 = vst [vmem:[#allocation195_spill] sm:$0xff] %v10052_v41  ;;  %16121 = vst [vmem:[#allocation196_spill] sm:$0xff] %v10054_v47 }
 0x2d1   : > { %1654 = vbcast.lane.b32.xlu1 %v1640_v39, 280  ;;  %1650 = vbcast.lane.b32.xlu0 %v1640_v39, 272  ;;  %v1678_v39 = vrot.slane %v10024_v35, %v9443_v12 }
 0x2d3   : > { %v10056_v11 = vpop.permute.xlu1 %1388  ;;  %v10058_v40 = vpop.permute.xlu0 %1384 }
 0x2d4   : > { %16122 = vst [vmem:[#allocation197_spill] sm:$0xff] %v10056_v11  ;;  %16123 = vst [vmem:[#allocation198_spill] sm:$0xff] %v10058_v40 }
 0x2d5   : > { %1665 = vbcast.lane.b32.xlu1 %v1659_v63, 264  ;;  %1661 = vbcast.lane.b32.xlu0 %v1659_v63, 256 }
 0x2d7   : > { %v10062_v22 = vpop.permute.xlu1 %1399  ;;  %v10064_v33 = vpop.permute.xlu0 %1395 }
 0x2d8   : > { %16124 = vst [vmem:[#allocation199_spill] sm:$0xff] %v10062_v22  ;;  %16125 = vst [vmem:[#allocation200_spill] sm:$0xff] %v10064_v33 }
 0x2d9   : > { %1673 = vbcast.lane.b32.xlu1 %v1659_v63, 280  ;;  %1669 = vbcast.lane.b32.xlu0 %v1659_v63, 272  ;;  %v1697_v63 = vrot.slane %v10024_v35, %v9447_v14 }
 0x2db   : > { %v10066_v41 = vpop.permute.xlu1 %1407  ;;  %v10068_v47 = vpop.permute.xlu0 %1403 }
 0x2dc   : > { %16126 = vst [vmem:[#allocation201_spill] sm:$0xff] %v10066_v41  ;;  %16127 = vst [vmem:[#allocation202_spill] sm:$0xff] %v10068_v47 }
 0x2dd   : > { %1684 = vbcast.lane.b32.xlu1 %v1678_v39, 264  ;;  %1680 = vbcast.lane.b32.xlu0 %v1678_v39, 256 }
 0x2df   : > { %v10072_v40 = vpop.permute.xlu1 %1418  ;;  %v10074_v11 = vpop.permute.xlu0 %1414 }
 0x2e0   : > { %16128 = vst [vmem:[#allocation203_spill] sm:$0xff] %v10072_v40  ;;  %16129 = vst [vmem:[#allocation204_spill] sm:$0xff] %v10074_v11 }
 0x2e1   : > { %1692 = vbcast.lane.b32.xlu1 %v1678_v39, 280  ;;  %1688 = vbcast.lane.b32.xlu0 %v1678_v39, 272  ;;  %v1716_v39 = vrot.slane %v10024_v35, %v9451_v20 }
 0x2e3   : > { %v10076_v22 = vpop.permute.xlu1 %1426  ;;  %v10078_v33 = vpop.permute.xlu0 %1422 }
 0x2e4   : > { %16130 = vst [vmem:[#allocation205_spill] sm:$0xff] %v10076_v22  ;;  %16131 = vst [vmem:[#allocation206_spill] sm:$0xff] %v10078_v33 }
 0x2e5   : > { %1703 = vbcast.lane.b32.xlu1 %v1697_v63, 264  ;;  %1699 = vbcast.lane.b32.xlu0 %v1697_v63, 256 }
 0x2e7   : > { %v10082_v47 = vpop.permute.xlu1 %1437  ;;  %v10084_v41 = vpop.permute.xlu0 %1433 }
 0x2e8   : > { %16132 = vst [vmem:[#allocation207_spill] sm:$0xff] %v10082_v47  ;;  %16133 = vst [vmem:[#allocation208_spill] sm:$0xff] %v10084_v41 }
 0x2e9   : > { %1711 = vbcast.lane.b32.xlu1 %v1697_v63, 280  ;;  %1707 = vbcast.lane.b32.xlu0 %v1697_v63, 272  ;;  %v1735_v63 = vrot.slane %v10024_v35, %v9455_v25 }
 0x2eb   : > { %v10086_v40 = vpop.permute.xlu1 %1445  ;;  %v10088_v11 = vpop.permute.xlu0 %1441 }
 0x2ec   : > { %16134 = vst [vmem:[#allocation209_spill] sm:$0xff] %v10086_v40  ;;  %16135 = vst [vmem:[#allocation210_spill] sm:$0xff] %v10088_v11 }
 0x2ed   : > { %1722 = vbcast.lane.b32.xlu1 %v1716_v39, 264  ;;  %1718 = vbcast.lane.b32.xlu0 %v1716_v39, 256 }
 0x2ef   : > { %v10092_v33 = vpop.permute.xlu1 %1456  ;;  %v10094_v22 = vpop.permute.xlu0 %1452 }
 0x2f0   : > { %16136 = vst [vmem:[#allocation211_spill] sm:$0xff] %v10092_v33  ;;  %16137 = vst [vmem:[#allocation212_spill] sm:$0xff] %v10094_v22  ;;  %v16142_v33 = vsub.f32 %v9362_v24, %v9366_v29 }
 0x2f1   : > { %1730 = vbcast.lane.b32.xlu1 %v1716_v39, 280  ;;  %1726 = vbcast.lane.b32.xlu0 %v1716_v39, 272 }
 0x2f2   : > { %v10111_v22 = vsel %vm15920_vm0, %v16142_v33, %v9474_v46 }
 0x2f3   : > { %v10096_v47 = vpop.permute.xlu1 %1464  ;;  %v10098_v41 = vpop.permute.xlu0 %1460  ;;  %v1754_v35 = vrot.slane %v10111_v22, %v9426_v0  ;;  %v1773_v46 = vrot.slane %v10111_v22, %v9431_v4 }
 0x2f4   : > { %16138 = vst [vmem:[#allocation213_spill] sm:$0xff] %v10096_v47  ;;  %16139 = vst [vmem:[#allocation214_spill] sm:$0xff] %v10098_v41 }
 0x2f5   : > { %1741 = vbcast.lane.b32.xlu1 %v1735_v63, 264  ;;  %1737 = vbcast.lane.b32.xlu0 %v1735_v63, 256 }
 0x2f7   : > { %v10102_v11 = vpop.permute.xlu1 %1475  ;;  %v10104_v40 = vpop.permute.xlu0 %1471 }
 0x2f8   : > { %16140 = vst [vmem:[#allocation215_spill] sm:$0xff] %v10102_v11  ;;  %16141 = vst [vmem:[#allocation216_spill] sm:$0xff] %v10104_v40 }
 0x2f9   : > { %1749 = vbcast.lane.b32.xlu1 %v1735_v63, 280  ;;  %1745 = vbcast.lane.b32.xlu0 %v1735_v63, 272 }
 0x2fb   : > { %v10113_v39 = vpop.permute.xlu1 %1483  ;;  %v10115_v41 = vpop.permute.xlu0 %1479 }
 0x2fc   : > { %16143 = vst [vmem:[#allocation217_spill] sm:$0xff] %v10113_v39  ;;  %16144 = vst [vmem:[#allocation218_spill] sm:$0xff] %v10115_v41 }
 0x2fd   : > { %1760 = vbcast.lane.b32.xlu1 %v1754_v35, 264  ;;  %1756 = vbcast.lane.b32.xlu0 %v1754_v35, 256 }
 0x2ff   : > { %v10119_v11 = vpop.permute.xlu1 %1494  ;;  %v10121_v40 = vpop.permute.xlu0 %1490 }
 0x300   : > { %16145 = vst [vmem:[#allocation219_spill] sm:$0xff] %v10119_v11  ;;  %16146 = vst [vmem:[#allocation220_spill] sm:$0xff] %v10121_v40 }
 0x301   : > { %1768 = vbcast.lane.b32.xlu1 %v1754_v35, 280  ;;  %1764 = vbcast.lane.b32.xlu0 %v1754_v35, 272  ;;  %v1792_v35 = vrot.slane %v10111_v22, %v9435_v6 }
 0x303   : > { %v10123_v24 = vpop.permute.xlu1 %1502  ;;  %v10125_v29 = vpop.permute.xlu0 %1498 }
 0x304   : > { %16147 = vst [vmem:[#allocation221_spill] sm:$0xff] %v10123_v24  ;;  %16148 = vst [vmem:[#allocation222_spill] sm:$0xff] %v10125_v29 }
 0x305   : > { %1779 = vbcast.lane.b32.xlu1 %v1773_v46, 264  ;;  %1775 = vbcast.lane.b32.xlu0 %v1773_v46, 256 }
 0x307   : > { %v10129_v33 = vpop.permute.xlu1 %1513  ;;  %v10131_v63 = vpop.permute.xlu0 %1509 }
 0x308   : > { %16149 = vst [vmem:[#allocation223_spill] sm:$0xff] %v10129_v33  ;;  %16150 = vst [vmem:[#allocation224_spill] sm:$0xff] %v10131_v63 }
 0x309   : > { %1787 = vbcast.lane.b32.xlu1 %v1773_v46, 280  ;;  %1783 = vbcast.lane.b32.xlu0 %v1773_v46, 272  ;;  %v1811_v46 = vrot.slane %v10111_v22, %v9439_v8 }
 0x30b   : > { %v10133_v41 = vpop.permute.xlu1 %1521  ;;  %v10135_v40 = vpop.permute.xlu0 %1517 }
 0x30c   : > { %16151 = vst [vmem:[#allocation225_spill] sm:$0xff] %v10133_v41  ;;  %16152 = vst [vmem:[#allocation226_spill] sm:$0xff] %v10135_v40 }
 0x30d   : > { %1798 = vbcast.lane.b32.xlu1 %v1792_v35, 264  ;;  %1794 = vbcast.lane.b32.xlu0 %v1792_v35, 256 }
 0x30f   : > { %v10139_v39 = vpop.permute.xlu1 %1532  ;;  %v10141_v29 = vpop.permute.xlu0 %1528 }
 0x310   : > { %16153 = vst [vmem:[#allocation227_spill] sm:$0xff] %v10139_v39  ;;  %16154 = vst [vmem:[#allocation228_spill] sm:$0xff] %v10141_v29 }
 0x311   : > { %1806 = vbcast.lane.b32.xlu1 %v1792_v35, 280  ;;  %1802 = vbcast.lane.b32.xlu0 %v1792_v35, 272  ;;  %v1830_v35 = vrot.slane %v10111_v22, %v9443_v12 }
 0x313   : > { %v10143_v33 = vpop.permute.xlu1 %1540  ;;  %v10145_v63 = vpop.permute.xlu0 %1536 }
 0x314   : > { %16155 = vst [vmem:[#allocation229_spill] sm:$0xff] %v10143_v33  ;;  %16156 = vst [vmem:[#allocation230_spill] sm:$0xff] %v10145_v63 }
 0x315   : > { %1817 = vbcast.lane.b32.xlu1 %v1811_v46, 264  ;;  %1813 = vbcast.lane.b32.xlu0 %v1811_v46, 256 }
 0x317   : > { %v10149_v40 = vpop.permute.xlu1 %1551  ;;  %v10151_v41 = vpop.permute.xlu0 %1547 }
 0x318   : > { %16157 = vst [vmem:[#allocation231_spill] sm:$0xff] %v10149_v40  ;;  %16158 = vst [vmem:[#allocation232_spill] sm:$0xff] %v10151_v41 }
 0x319   : > { %1825 = vbcast.lane.b32.xlu1 %v1811_v46, 280  ;;  %1821 = vbcast.lane.b32.xlu0 %v1811_v46, 272  ;;  %v1849_v46 = vrot.slane %v10111_v22, %v9447_v14 }
 0x31b   : > { %v10153_v39 = vpop.permute.xlu1 %1559  ;;  %v10155_v29 = vpop.permute.xlu0 %1555 }
 0x31c   : > { %16159 = vst [vmem:[#allocation233_spill] sm:$0xff] %v10153_v39  ;;  %16160 = vst [vmem:[#allocation234_spill] sm:$0xff] %v10155_v29 }
 0x31d   : > { %1836 = vbcast.lane.b32.xlu1 %v1830_v35, 264  ;;  %1832 = vbcast.lane.b32.xlu0 %v1830_v35, 256 }
 0x31f   : > { %v10159_v63 = vpop.permute.xlu1 %1570  ;;  %v10161_v33 = vpop.permute.xlu0 %1566 }
 0x320   : > { %16161 = vst [vmem:[#allocation235_spill] sm:$0xff] %v10159_v63  ;;  %16162 = vst [vmem:[#allocation236_spill] sm:$0xff] %v10161_v33 }
 0x321   : > { %1844 = vbcast.lane.b32.xlu1 %v1830_v35, 280  ;;  %1840 = vbcast.lane.b32.xlu0 %v1830_v35, 272  ;;  %v1868_v35 = vrot.slane %v10111_v22, %v9451_v20 }
 0x323   : > { %v10163_v40 = vpop.permute.xlu1 %1578  ;;  %v10165_v41 = vpop.permute.xlu0 %1574 }
 0x324   : > { %16163 = vst [vmem:[#allocation237_spill] sm:$0xff] %v10163_v40  ;;  %16164 = vst [vmem:[#allocation238_spill] sm:$0xff] %v10165_v41 }
 0x325   : > { %1855 = vbcast.lane.b32.xlu1 %v1849_v46, 264  ;;  %1851 = vbcast.lane.b32.xlu0 %v1849_v46, 256 }
 0x327   : > { %v10169_v29 = vpop.permute.xlu1 %1589  ;;  %v10171_v39 = vpop.permute.xlu0 %1585 }
 0x328   : > { %16165 = vst [vmem:[#allocation239_spill] sm:$0xff] %v10169_v29  ;;  %16166 = vst [vmem:[#allocation240_spill] sm:$0xff] %v10171_v39  ;;  %v1887_v39 = vrot.slane %v10111_v22, %v9455_v25  ;;  %v9073_v22 = vmov 1983009808  }
 0x329   : > { %1863 = vbcast.lane.b32.xlu1 %v1849_v46, 280  ;;  %1859 = vbcast.lane.b32.xlu0 %v1849_v46, 272  ;;  %v3075_v51 = vunpack.c.l.s4 %v9073_v22 }
 0x32b   : > { %v10173_v63 = vpop.permute.xlu1 %1597  ;;  %v10175_v33 = vpop.permute.xlu0 %1593 }
 0x32c   : > { %16167 = vst [vmem:[#allocation241_spill] sm:$0xff] %v10173_v63  ;;  %16168 = vst [vmem:[#allocation242_spill] sm:$0xff] %v10175_v33  ;;  %v16169_v33 = vsub.f32 %v9301_v49, %v9295_v44 }
 0x32d   : > { %1874 = vbcast.lane.b32.xlu1 %v1868_v35, 264  ;;  %1870 = vbcast.lane.b32.xlu0 %v1868_v35, 256 }
 0x32e   : > { %v10186_v29 = vsel %vm15920_vm0, %v16169_v33, %v9481_v15 }
 0x32f   : > { %v1609_v41 = vpop.permute.xlu1 %1608  ;;  %v1605_v40 = vpop.permute.xlu0 %1604  ;;  %v1906_v10 = vrot.slane %v10186_v29, %v9426_v0 }
 0x330   : > { %v10192_v44 = vsel %vm2815_vm1, %v9493_v3, %v1609_v41  ;;  %v10196_v49 = vsel %vm2815_vm1, %v9495_v5, %v1605_v40  ;;  %v3076_v3 = vunpack.c.0.s8 %v3075_v51  ;;  %v1925_v40 = vrot.slane %v10186_v29, %v9431_v4 }
 0x331   : > { %1882 = vbcast.lane.b32.xlu1 %v1868_v35, 280  ;;  %1878 = vbcast.lane.b32.xlu0 %v1868_v35, 272  ;;  %16170 = vst [vmem:[#allocation243_spill] sm:$0xff] %v10192_v44 }
 0x333   : > { %v1617_v24 = vpop.permute.xlu1 %1616  ;;  %v1613_v47 = vpop.permute.xlu0 %1612 }
 0x335   : > { %1893 = vbcast.lane.b32.xlu1 %v1887_v39, 264  ;;  %1889 = vbcast.lane.b32.xlu0 %v1887_v39, 256 }
 0x337   : > { %v1628_v46 = vpop.permute.xlu1 %1627  ;;  %v1624_v63 = vpop.permute.xlu0 %1623 }
 0x339   : > { %1901 = vbcast.lane.b32.xlu1 %v1887_v39, 280  ;;  %1897 = vbcast.lane.b32.xlu0 %v1887_v39, 272 }
 0x33b   : > { %v1636_v11 = vpop.permute.xlu1 %1635  ;;  %v1632_v35 = vpop.permute.xlu0 %1631 }
 0x33d   : > { %1912 = vbcast.lane.b32.xlu1 %v1906_v10, 264  ;;  %1908 = vbcast.lane.b32.xlu0 %v1906_v10, 256 }
 0x33f   : > { %v1647_v16 = vpop.permute.xlu1 %1646  ;;  %v1643_v42 = vpop.permute.xlu0 %1642 }
 0x340   : > { %v10200_v15 = vsel %vm2815_vm1, %v9516_v28, %v1647_v16  ;;  %v10204_v39 = vsel %vm2815_vm1, %v9518_v34, %v1643_v42  ;;  %v10214_v28 = vsel %vm2815_vm1, %v9497_v7, %v1617_v24  ;;  %v10218_v34 = vsel %vm2815_vm1, %v9499_v9, %v1613_v47 }
 0x341   : > { %16171 = vst [vmem:[#allocation244_spill] sm:$0xff] %v10200_v15  ;;  %v3345_v33 = vcombine.high %v10192_v44, %v10200_v15  ;;  %v3073_v22 = vcombine.high %v10196_v49, %v10204_v39  ;;  %1920 = vbcast.lane.b32.xlu1 %v1906_v10, 280  ;;  %1916 = vbcast.lane.b32.xlu0 %v1906_v10, 272  ;;  %16172 = vst [vmem:[#allocation245_spill] sm:$0xff] %v10214_v28  ;;  %v9074_v44 = vmov 1934713408  }
 0x342   : > { %16173 = vst [vmem:[#allocation246_spill] sm:$0xff] %v10218_v34  ;;  %v10233_v7 = vsub.s32 %v3076_v3, %v9421_v62  ;;  %v3139_v15 = vunpack.c.l.s4 %v9074_v44 }
 0x343   : > { %v1655_v41 = vpop.permute.xlu1 %1654  ;;  %v1651_v5 = vpop.permute.xlu0 %1650 }
 0x344   : > { %v10222_v42 = vsel %vm2815_vm1, %v9520_v45, %v1655_v41  ;;  %v10226_v10 = vsel %vm2815_vm1, %v9522_v31, %v1651_v5  ;;  %v10237_v45 = vsel %vm2815_vm1, %v9506_v21, %v1628_v46  ;;  %v10241_v31 = vsel %vm2815_vm1, %v9508_v26, %v1624_v63 }
 0x345   : > { %16174 = vst [vmem:[#allocation247_spill] sm:$0xff] %v10222_v42  ;;  %16175 = vst [vmem:[#allocation248_spill] sm:$0xff] %v10226_v10  ;;  %v3889_v51 = vcombine.high %v10214_v28, %v10222_v42  ;;  %v3617_v16 = vcombine.high %v10218_v34, %v10226_v10  ;;  %1931 = vbcast.lane.b32.xlu1 %v1925_v40, 264  ;;  %1927 = vbcast.lane.b32.xlu0 %v1925_v40, 256 }
 0x346   : > { %16176 = vst [vmem:[#allocation249_spill] sm:$0xff] %v10237_v45  ;;  %v10256_v21 = vrot.slane %v3345_v33, %v10233_v7  ;;  %v1944_v46 = vrot.slane %v10186_v29, %v9435_v6  ;;  %v10287_v33 = vsel %vm2815_vm1, %v9512_v30, %v1636_v11 }
 0x347   : > { %v1666_v9 = vpop.permute.xlu1 %1665  ;;  %v1662_v47 = vpop.permute.xlu0 %1661  ;;  %16180 = vst [vmem:[#allocation253_spill] sm:$0xff] %v10287_v33 }
 0x348   : > { %v10245_v24 = vsel %vm2815_vm1, %v9526_v48, %v1666_v9  ;;  %v10249_v41 = vsel %vm2815_vm1, %v9528_v23, %v1662_v47  ;;  %v10267_v9 = vrot.slane %v3073_v22, %v10233_v7  ;;  %v10291_v47 = vsel %vm2815_vm1, %v9514_v32, %v1632_v35 }
 0x349   : > { %16177 = vst [vmem:[#allocation250_spill] sm:$0xff] %v10245_v24  ;;  %v3361_v3 = vcombine.high %v10237_v45, %v10245_v24  ;;  %v3089_v5 = vcombine.high %v10241_v31, %v10249_v41  ;;  %1939 = vbcast.lane.b32.xlu1 %v1925_v40, 280  ;;  %1935 = vbcast.lane.b32.xlu0 %v1925_v40, 272  ;;  %16181 = vst [vmem:[#allocation254_spill] sm:$0xff] %v10291_v47 }
 0x34a   : > { %v1963_v35 = vrot.slane %v10186_v29, %v9439_v8 }
 0x34b   : > { %v10259_v26 = vrot.slane %v3361_v3, %v10233_v7  ;;  %v10262_v48 = vrot.slane %v3089_v5, %v10233_v7  ;;  %v1674_v63 = vpop.permute.xlu1 %1673  ;;  %v1670_v23 = vpop.permute.xlu0 %1669 }
 0x34c   : > { %v10279_v5 = vsel %vm2815_vm1, %v9530_v2, %v1674_v63  ;;  %v10283_v22 = vsel %vm2815_vm1, %v9532_v13, %v1670_v23  ;;  %v10298_v13 = vrot.slane %v3889_v51, %v10233_v7  ;;  %v10309_v23 = vrot.slane %v3617_v16, %v10233_v7 }
 0x34d   : > { %1950 = vbcast.lane.b32.xlu1 %v1944_v46, 264  ;;  %16178 = vst [vmem:[#allocation251_spill] sm:$0xff] %v10279_v5  ;;  %16179 = vst [vmem:[#allocation252_spill] sm:$0xff] %v10283_v22  ;;  %1946 = vbcast.lane.b32.xlu0 %v1944_v46, 256  ;;  %v3905_v3 = vcombine.high %v10287_v33, %v10279_v5  ;;  %v3633_v2 = vcombine.high %v10291_v47, %v10283_v22 }
 0x34f   : > { %v1685_v40 = vpop.permute.xlu1 %1684  ;;  %v1681_v28 = vpop.permute.xlu0 %1680  ;;  %v10301_v63 = vrot.slane %v3905_v3, %v10233_v7  ;;  %v10304_v30 = vrot.slane %v3633_v2, %v10233_v7 }
 0x350   : > { %v10327_v3 = vsel %vm2815_vm1, %v9536_v58, %v1685_v40  ;;  %v2832_v2 = vsel %vm2815_vm1, %v9538_v60, %v1681_v28  ;;  %v2001_v60 = vrot.slane %v10186_v29, %v9447_v14  ;;  %v16186_v28 = vld [vmem:[#allocation18_spill] sm:$0xff] }
 0x351   : > { %1958 = vbcast.lane.b32.xlu1 %v1944_v46, 280  ;;  %1954 = vbcast.lane.b32.xlu0 %v1944_v46, 272  ;;  %v1982_v46 = vrot.slane %v10186_v29, %v9443_v12  ;;  %16182 = vst [vmem:[#allocation255_spill] sm:$0xff] %v10327_v3 }
 0x353   : > { %v1693_v11 = vpop.permute.xlu1 %1692  ;;  %v1689_v32 = vpop.permute.xlu0 %1688 }
 0x355   : > { %1969 = vbcast.lane.b32.xlu1 %v1963_v35, 264  ;;  %1965 = vbcast.lane.b32.xlu0 %v1963_v35, 256 }
 0x357   : > { %v1704_v42 = vpop.permute.xlu1 %1703  ;;  %v1700_v33 = vpop.permute.xlu0 %1699 }
 0x359   : > { %1977 = vbcast.lane.b32.xlu1 %v1963_v35, 280  ;;  %1973 = vbcast.lane.b32.xlu0 %v1963_v35, 272 }
 0x35b   : > { %v10319_v16 = vpop.permute.xlu1 %1711  ;;  %v10321_v5 = vpop.permute.xlu0 %1707 }
 0x35d   : > { %1988 = vbcast.lane.b32.xlu1 %v1982_v46, 264  ;;  %1984 = vbcast.lane.b32.xlu0 %v1982_v46, 256 }
 0x35f   : > { %v1723_v51 = vpop.permute.xlu1 %1722  ;;  %v1719_v34 = vpop.permute.xlu0 %1718 }
 0x360   : > { %v10333_v35 = vsel %vm2815_vm1, %v9556_v1, %v1723_v51  ;;  %v2840_v10 = vsel %vm2815_vm1, %v9558_v43, %v1719_v34  ;;  %v10343_v1 = vsel %vm2815_vm1, %v9540_v38, %v1693_v11  ;;  %v10347_v43 = vsel %vm2815_vm1, %v9542_v50, %v1689_v32  ;;  %v16190_v32 = vld [vmem:[#allocation14_spill] sm:$0xff] }
 0x361   : > { %16183 = vst [vmem:[#allocation256_spill] sm:$0xff] %v10333_v35  ;;  %v3377_v47 = vcombine.high %v10327_v3, %v10333_v35  ;;  %v3105_v22 = vcombine.high %v2832_v2, %v2840_v10  ;;  %1996 = vbcast.lane.b32.xlu1 %v1982_v46, 280  ;;  %1992 = vbcast.lane.b32.xlu0 %v1982_v46, 272  ;;  %16184 = vst [vmem:[#allocation257_spill] sm:$0xff] %v10343_v1  ;;  %v16188_v46 = vld [vmem:[#allocation19_spill] sm:$0xff]  ;;  %v3140_v38 = vunpack.c.0.s8 %v3139_v15 }
 0x362   : > { %16185 = vst [vmem:[#allocation258_spill] sm:$0xff] %v10347_v43  ;;  %v10363_v35 = vsel %vm2815_vm1, %v16190_v32, %v1704_v42  ;;  %v3088_v42 = vcombine.low %v10241_v31, %v10249_v41  ;;  %v3072_v31 = vcombine.low %v10196_v49, %v10204_v39 }
 0x363   : > { %v1731_v58 = vpop.permute.xlu1 %1730  ;;  %v1727_v40 = vpop.permute.xlu0 %1726  ;;  %16191 = vst [vmem:[#allocation14_spill] sm:$0xff] %v10363_v35  ;;  %v3391_v32 = vrot.slane %v3377_v47, %v10233_v7  ;;  %v10383_v45 = vsub.s32 %v3140_v38, %v9421_v62 }
 0x364   : > { %v10351_v34 = vsel %vm2815_vm1, %v16186_v28, %v1731_v58  ;;  %v10355_v44 = vsel %vm2815_vm1, %v16188_v46, %v1727_v40  ;;  %v16192_v58 = vld [vmem:[#allocation15_spill] sm:$0xff]  ;;  %v16193_v40 = vld [vmem:[#allocation20_spill] sm:$0xff] }
 0x365   : > { %16187 = vst [vmem:[#allocation18_spill] sm:$0xff] %v10351_v34  ;;  %16189 = vst [vmem:[#allocation19_spill] sm:$0xff] %v10355_v44  ;;  %v3921_v51 = vcombine.high %v10343_v1, %v10351_v34  ;;  %v3649_v3 = vcombine.high %v10347_v43, %v10355_v44  ;;  %2007 = vbcast.lane.b32.xlu1 %v2001_v60, 264  ;;  %2003 = vbcast.lane.b32.xlu0 %v2001_v60, 256  ;;  %v16195_v1 = vld [vmem:[#allocation21_spill] sm:$0xff] }
 0x366   : > { %v2836_v28 = vsel %vm2815_vm1, %v16192_v58, %v1700_v33  ;;  %v2020_v33 = vrot.slane %v10186_v29, %v9451_v20 }
 0x367   : > { %v1742_v11 = vpop.permute.xlu1 %1741  ;;  %v1738_v50 = vpop.permute.xlu0 %1737 }
 0x368   : > { %v10369_v46 = vsel %vm2815_vm1, %v16193_v40, %v1742_v11  ;;  %v2844_v34 = vsel %vm2815_vm1, %v16195_v1, %v1738_v50  ;;  %v3104_v11 = vcombine.low %v2832_v2, %v2840_v10  ;;  %v16196_v2 = vld [vmem:[#allocation22_spill] sm:$0xff] }
 0x369   : > { %16194 = vst [vmem:[#allocation15_spill] sm:$0xff] %v10369_v46  ;;  %v3393_v43 = vcombine.high %v10363_v35, %v10369_v46  ;;  %v3120_v15 = vcombine.low %v2836_v28, %v2844_v34  ;;  %v3121_v44 = vcombine.high %v2836_v28, %v2844_v34  ;;  %2015 = vbcast.lane.b32.xlu1 %v2001_v60, 280  ;;  %v16212_v35 = vld [vmem:[#allocation9_spill] sm:$0xff] }
 0x36a   : > { %2011 = vbcast.lane.b32.xlu0 %v2001_v60, 272  ;;  %v3119_v34 = vrot.slane %v3105_v22, %v10233_v7  ;;  %v10400_v22 = vrot.slane %v3088_v42, %v10233_v7  ;;  %v10403_v49 = vrot.slane %v3104_v11, %v10233_v7  ;;  %v10423_v11 = vrot.slane %v3072_v31, %v10233_v7 }
 0x36b   : > { %v3407_v58 = vrot.slane %v3393_v43, %v10233_v7  ;;  %v3135_v1 = vrot.slane %v3121_v44, %v10233_v7  ;;  %v1750_v50 = vpop.permute.xlu1 %1749  ;;  %v1746_v40 = vpop.permute.xlu0 %1745  ;;  %v10389_v28 = vrot.slane %v3120_v15, %v10233_v7  ;;  %v16198_v44 = vld [vmem:[#allocation23_spill] sm:$0xff]  ;;  %v16200_v15 = vld [vmem:[#allocation16_spill] sm:$0xff]  ;;  %v2039_v31 = vrot.slane %v10186_v29, %v9455_v25 }
 0x36c   : > { %v10393_v43 = vsel %vm2815_vm1, %v16196_v2, %v1750_v50  ;;  %v10397_v62 = vsel %vm2815_vm1, %v16198_v44, %v1746_v40  ;;  %v3935_v2 = vrot.slane %v3921_v51, %v10233_v7 }
 0x36d   : > { %v3456_v41 = vcombine.low %v3391_v32, %v3407_v58  ;;  %v3457_v60 = vcombine.high %v3391_v32, %v3407_v58  ;;  %2026 = vbcast.lane.b32.xlu1 %v2020_v33, 264  ;;  %v3184_v10 = vcombine.low %v3119_v34, %v3135_v1  ;;  %v3185_v47 = vcombine.high %v3119_v34, %v3135_v1  ;;  %v16202_v58 = vld [vmem:[#allocation17_spill] sm:$0xff] }
 0x36e   : > { %16197 = vst [vmem:[#allocation20_spill] sm:$0xff] %v10393_v43  ;;  %16199 = vst [vmem:[#allocation21_spill] sm:$0xff] %v10397_v62  ;;  %2022 = vbcast.lane.b32.xlu0 %v2020_v33, 256  ;;  %v10412_v32 = vsel %vm2815_vm1, %v16200_v15, %v10319_v16  ;;  %v10417_v1 = vsel %vm2815_vm1, %v16202_v58, %v10321_v5  ;;  %v3168_v50 = vcombine.low %v10403_v49, %v10389_v28 }
 0x36f   : > { %v10405_v39 = vpop.permute.xlu1 %1760  ;;  %v10407_v38 = vpop.permute.xlu0 %1756  ;;  %16201 = vst [vmem:[#allocation22_spill] sm:$0xff] %v10412_v32  ;;  %16203 = vst [vmem:[#allocation23_spill] sm:$0xff] %v10417_v1  ;;  %v10420_v42 = vrot.slane %v3184_v10, %v10383_v45  ;;  %v3937_v40 = vcombine.high %v10412_v32, %v10393_v43  ;;  %v3665_v16 = vcombine.high %v10417_v1, %v10397_v62 }
 0x370   : > { %16205 = vst [vmem:[#allocation17_spill] sm:$0xff] %v10423_v11  ;;  %v16206_v5 = vcombine.low %v10267_v9, %v10262_v48  ;;  %v3136_v10 = vcombine.low %v10423_v11, %v10400_v22  ;;  %v10452_v29 = vrot.slane %v3168_v50, %v10383_v45  ;;  %v10455_v51 = vrot.slane %v3185_v47, %v10383_v45  ;;  %v16213_v50 = vld [vmem:[#allocation8_spill] sm:$0xff] }
 0x371   : > { %16204 = vst [vmem:[#allocation16_spill] sm:$0xff] %v10420_v42  ;;  %2034 = vbcast.lane.b32.xlu1 %v2020_v33, 280  ;;  %v3951_v44 = vrot.slane %v3937_v40, %v10233_v7  ;;  %v3679_v15 = vrot.slane %v3665_v16, %v10233_v7  ;;  %v16214_v46 = vsub.f32 %v9380_v54, %v16213_v50 }
 0x372   : > { %v10435_v34 = vrot.slane %v16206_v5, %v10383_v45  ;;  %2030 = vbcast.lane.b32.xlu0 %v2020_v33, 272  ;;  %v3663_v5 = vrot.slane %v3649_v3, %v10233_v7  ;;  %16208 = vst [vmem:[#allocation260_spill] sm:$0xff] %v10452_v29  ;;  %16209 = vst [vmem:[#allocation261_spill] sm:$0xff] %v10455_v51  ;;  %v10458_v62 = vrot.slane %v3136_v10, %v10383_v45 }
 0x373   : > { %v10444_v58 = vpop.permute.xlu1 %1768  ;;  %v10446_v32 = vpop.permute.xlu0 %1764  ;;  %v4000_v43 = vcombine.low %v3935_v2, %v3951_v44  ;;  %v4001_v1 = vcombine.high %v3935_v2, %v3951_v44  ;;  %v10461_v3 = vrot.slane %v3456_v41, %v10383_v45  ;;  %v10468_v2 = vsel %vm15920_vm0, %v16214_v46, %v16212_v35 }
 0x374   : > { %16207 = vst [vmem:[#allocation259_spill] sm:$0xff] %v10435_v34  ;;  %v3728_v40 = vcombine.low %v3663_v5, %v3679_v15  ;;  %v3729_v16 = vcombine.high %v3663_v5, %v3679_v15  ;;  %16210 = vst [vmem:[#allocation262_spill] sm:$0xff] %v10458_v62  ;;  %v16215_v47 = vcombine.high %v10267_v9, %v10262_v48  ;;  %v16234_v5 = vld [vmem:[#allocation24_spill] sm:$0xff] }
 0x375   : > { %2045 = vbcast.lane.b32.xlu1 %v2039_v31, 264  ;;  %16211 = vst [vmem:[#allocation263_spill] sm:$0xff] %v10461_v3  ;;  %v10477_v10 = vrot.slane %v3457_v60, %v10383_v45  ;;  %v16218_v41 = vcombine.low %v10256_v21, %v10259_v26  ;;  %v16220_v54 = vcombine.high %v10256_v21, %v10259_v26  ;;  %v16263_v3 = vld [vmem:[#allocation40_spill] sm:$0xff] }
 0x376   : > { %2041 = vbcast.lane.b32.xlu0 %v2039_v31, 256  ;;  %v10474_v44 = vrot.slane %v16215_v47, %v10383_v45  ;;  %v10496_v46 = vrot.slane %v3728_v40, %v10383_v45  ;;  %v10499_v60 = vrot.slane %v3729_v16, %v10383_v45  ;;  %v16224_v26 = vcombine.low %v10309_v23, %v10304_v30 }
 0x377   : > { %v1780_v24 = vpop.permute.xlu1 %1779  ;;  %v1776_v33 = vpop.permute.xlu0 %1775  ;;  %16217 = vst [vmem:[#allocation8_spill] sm:$0xff] %v10477_v10  ;;  %v10483_v15 = vrot.slane %v16218_v41, %v10383_v45  ;;  %v10489_v35 = vrot.slane %v16220_v54, %v10383_v45  ;;  %v2058_v16 = vrot.slane %v10468_v2, %v9426_v0  ;;  %v16226_v54 = vcombine.high %v10309_v23, %v10304_v30  ;;  %v16236_v30 = vld [vmem:[#allocation25_spill] sm:$0xff] }
 0x378   : > { %16216 = vst [vmem:[#allocation9_spill] sm:$0xff] %v10474_v44  ;;  %16222 = vst [vmem:[#allocation266_spill] sm:$0xff] %v10496_v46  ;;  %v10509_v50 = vrot.slane %v16224_v26, %v10383_v45  ;;  %v10528_v26 = vrot.slane %v4000_v43, %v10383_v45  ;;  %v10541_v48 = vrot.slane %v4001_v1, %v10383_v45 }
 0x379   : > { %16219 = vst [vmem:[#allocation264_spill] sm:$0xff] %v10483_v15  ;;  %16221 = vst [vmem:[#allocation265_spill] sm:$0xff] %v10489_v35  ;;  %2053 = vbcast.lane.b32.xlu1 %v2039_v31, 280  ;;  %v10525_v9 = vrot.slane %v16226_v54, %v10383_v45  ;;  %v10560_v21 = vsel %vm2815_vm1, %v16234_v5, %v10405_v39  ;;  %v2848_v23 = vsel %vm2815_vm1, %v16236_v30, %v10407_v38  ;;  %v16261_v35 = vld [vmem:[#allocation39_spill] sm:$0xff] }
 0x37a   : > { %16223 = vst [vmem:[#allocation267_spill] sm:$0xff] %v10499_v60  ;;  %2049 = vbcast.lane.b32.xlu0 %v2039_v31, 272  ;;  %16225 = vst [vmem:[#allocation268_spill] sm:$0xff] %v10509_v50  ;;  %v16229_v31 = vcombine.low %v10298_v13, %v10301_v63  ;;  %v16238_v60 = vld [vmem:[#allocation32_spill] sm:$0xff]  ;;  %v2077_v30 = vrot.slane %v10468_v2, %v9431_v4  ;;  %v16264_v15 = vld [vmem:[#allocation47_spill] sm:$0xff] }
 0x37b   : > { %v10511_v47 = vpop.permute.xlu1 %1787  ;;  %v10513_v40 = vpop.permute.xlu0 %1783  ;;  %16227 = vst [vmem:[#allocation269_spill] sm:$0xff] %v10525_v9  ;;  %16228 = vst [vmem:[#allocation270_spill] sm:$0xff] %v10528_v26  ;;  %v16243_v26 = vld [vmem:[#allocation33_spill] sm:$0xff] }
 0x37c   : > { %v10538_v41 = vrot.slane %v16229_v31, %v10383_v45  ;;  %16231 = vst [vmem:[#allocation272_spill] sm:$0xff] %v10541_v48  ;;  %v16232_v31 = vcombine.high %v10298_v13, %v10301_v63  ;;  %16235 = vst [vmem:[#allocation24_spill] sm:$0xff] %v10560_v21  ;;  %v16241_v63 = vld [vmem:[#allocation27_spill] sm:$0xff] }
 0x37d   : > { %2064 = vbcast.lane.b32.xlu1 %v2058_v16, 264 }
 0x37e   : > { %16230 = vst [vmem:[#allocation271_spill] sm:$0xff] %v10538_v41  ;;  %2060 = vbcast.lane.b32.xlu0 %v2058_v16, 256  ;;  %v10555_v1 = vrot.slane %v16232_v31, %v10383_v45 }
 0x37f   : > { %v1799_v46 = vpop.permute.xlu1 %1798  ;;  %v1795_v43 = vpop.permute.xlu0 %1794 }
 0x380   : > { %16233 = vst [vmem:[#allocation273_spill] sm:$0xff] %v10555_v1  ;;  %v10567_v54 = vsel %vm2815_vm1, %v9602_v19, %v1799_v46  ;;  %v2856_v13 = vsel %vm2815_vm1, %v16238_v60, %v1795_v43  ;;  %v16239_v43 = vld [vmem:[#allocation26_spill] sm:$0xff] }
 0x381   : > { %16237 = vst [vmem:[#allocation25_spill] sm:$0xff] %v10567_v54  ;;  %v3481_v5 = vcombine.high %v10560_v21, %v10567_v54  ;;  %v3209_v31 = vcombine.high %v2848_v23, %v2856_v13  ;;  %2072 = vbcast.lane.b32.xlu1 %v2058_v16, 280  ;;  %v10586_v39 = vsel %vm2815_vm1, %v16239_v43, %v10444_v58  ;;  %v16245_v19 = vld [vmem:[#allocation34_spill] sm:$0xff]  ;;  %v16247_v43 = vld [vmem:[#allocation28_spill] sm:$0xff] }
 0x382   : > { %2068 = vbcast.lane.b32.xlu0 %v2058_v16, 272  ;;  %16240 = vst [vmem:[#allocation32_spill] sm:$0xff] %v10586_v39  ;;  %v10591_v16 = vsel %vm2815_vm1, %v16241_v63, %v10446_v32  ;;  %v10607_v32 = vsel %vm2815_vm1, %v16247_v43, %v1780_v24  ;;  %v3208_v9 = vcombine.low %v2848_v23, %v2856_v13 }
 0x383   : > { %v1807_v46 = vpop.permute.xlu1 %1806  ;;  %v1803_v60 = vpop.permute.xlu0 %1802  ;;  %16242 = vst [vmem:[#allocation26_spill] sm:$0xff] %v10591_v16  ;;  %16248 = vst [vmem:[#allocation34_spill] sm:$0xff] %v10607_v32  ;;  %v2096_v24 = vrot.slane %v10468_v2, %v9435_v6 }
 0x384   : > { %v10595_v38 = vsel %vm2815_vm1, %v16243_v26, %v1807_v46  ;;  %v10599_v48 = vsel %vm2815_vm1, %v16245_v19, %v1803_v60  ;;  %v16249_v26 = vld [vmem:[#allocation29_spill] sm:$0xff]  ;;  %v16250_v19 = vld [vmem:[#allocation35_spill] sm:$0xff] }
 0x385   : > { %16244 = vst [vmem:[#allocation27_spill] sm:$0xff] %v10595_v38  ;;  %16246 = vst [vmem:[#allocation33_spill] sm:$0xff] %v10599_v48  ;;  %v4025_v1 = vcombine.high %v10586_v39, %v10595_v38  ;;  %v3753_v58 = vcombine.high %v10591_v16, %v10599_v48  ;;  %2083 = vbcast.lane.b32.xlu1 %v2077_v30, 264  ;;  %v2852_v46 = vsel %vm2815_vm1, %v16249_v26, %v1776_v33  ;;  %v16252_v39 = vld [vmem:[#allocation36_spill] sm:$0xff]  ;;  %v16255_v26 = vld [vmem:[#allocation38_spill] sm:$0xff] }
 0x386   : > { %2079 = vbcast.lane.b32.xlu0 %v2077_v30, 256  ;;  %v10622_v33 = vrot.slane %v3481_v5, %v10233_v7  ;;  %v16259_v5 = vld [vmem:[#allocation31_spill] sm:$0xff] }
 0x387   : > { %v1818_v63 = vpop.permute.xlu1 %1817  ;;  %v1814_v41 = vpop.permute.xlu0 %1813 }
 0x388   : > { %v10613_v60 = vsel %vm2815_vm1, %v16250_v19, %v1818_v63  ;;  %v2860_v38 = vsel %vm2815_vm1, %v16252_v39, %v1814_v41  ;;  %v16253_v63 = vld [vmem:[#allocation37_spill] sm:$0xff] }
 0x389   : > { %16251 = vst [vmem:[#allocation28_spill] sm:$0xff] %v10613_v60  ;;  %v3497_v50 = vcombine.high %v10607_v32, %v10613_v60  ;;  %v3224_v16 = vcombine.low %v2852_v46, %v2860_v38  ;;  %v3225_v48 = vcombine.high %v2852_v46, %v2860_v38  ;;  %2091 = vbcast.lane.b32.xlu1 %v2077_v30, 280 }
 0x38a   : > { %2087 = vbcast.lane.b32.xlu0 %v2077_v30, 272  ;;  %v10634_v38 = vrot.slane %v3208_v9, %v10233_v7  ;;  %v10637_v30 = vrot.slane %v3209_v31, %v10233_v7 }
 0x38b   : > { %v10625_v23 = vrot.slane %v3497_v50, %v10233_v7  ;;  %v10628_v13 = vrot.slane %v3224_v16, %v10233_v7  ;;  %v10631_v41 = vrot.slane %v3225_v48, %v10233_v7  ;;  %v1826_v39 = vpop.permute.xlu1 %1825  ;;  %v1822_v43 = vpop.permute.xlu0 %1821  ;;  %v10665_v48 = vsel %vm2815_vm1, %v16259_v5, %v10513_v40 }
 0x38c   : > { %v10645_v16 = vsel %vm2815_vm1, %v16253_v63, %v1826_v39  ;;  %v10655_v46 = vsel %vm2815_vm1, %v16255_v26, %v1822_v43  ;;  %v16257_v39 = vld [vmem:[#allocation30_spill] sm:$0xff]  ;;  %16260 = vst [vmem:[#allocation37_spill] sm:$0xff] %v10665_v48  ;;  %v10672_v26 = vrot.slane %v4025_v1, %v10233_v7  ;;  %v2115_v5 = vrot.slane %v10468_v2, %v9439_v8 }
 0x38d   : > { %16254 = vst [vmem:[#allocation29_spill] sm:$0xff] %v10645_v16  ;;  %2102 = vbcast.lane.b32.xlu1 %v2096_v24, 264  ;;  %16256 = vst [vmem:[#allocation35_spill] sm:$0xff] %v10655_v46  ;;  %v10660_v63 = vsel %vm2815_vm1, %v16257_v39, %v10511_v47  ;;  %v3769_v43 = vcombine.high %v10665_v48, %v10655_v46 }
 0x38e   : > { %2098 = vbcast.lane.b32.xlu0 %v2096_v24, 256  ;;  %16258 = vst [vmem:[#allocation36_spill] sm:$0xff] %v10660_v63  ;;  %v4041_v31 = vcombine.high %v10660_v63, %v10645_v16  ;;  %v10683_v63 = vrot.slane %v3753_v58, %v10233_v7 }
 0x38f   : > { %v1837_v19 = vpop.permute.xlu1 %1836  ;;  %v1833_v50 = vpop.permute.xlu0 %1832  ;;  %v10678_v47 = vrot.slane %v3769_v43, %v10233_v7 }
 0x390   : > { %v10675_v9 = vrot.slane %v4041_v31, %v10233_v7  ;;  %v10697_v31 = vsel %vm2815_vm1, %v16261_v35, %v1837_v19  ;;  %v2864_v43 = vsel %vm2815_vm1, %v16263_v3, %v1833_v50  ;;  %v2153_v35 = vrot.slane %v10468_v2, %v9447_v14  ;;  %v16267_v19 = vld [vmem:[#allocation41_spill] sm:$0xff] }
 0x391   : > { %2110 = vbcast.lane.b32.xlu1 %v2096_v24, 280  ;;  %16262 = vst [vmem:[#allocation38_spill] sm:$0xff] %v10697_v31 }
 0x392   : > { %2106 = vbcast.lane.b32.xlu0 %v2096_v24, 272  ;;  %v2134_v24 = vrot.slane %v10468_v2, %v9443_v12 }
 0x393   : > { %v1845_v39 = vpop.permute.xlu1 %1844  ;;  %v1841_v40 = vpop.permute.xlu0 %1840 }
 0x394   : > { %v10713_v3 = vsel %vm2815_vm1, %v16267_v19, %v1845_v39  ;;  %v16275_v39 = vld [vmem:[#allocation43_spill] sm:$0xff] }
 0x395   : > { %2121 = vbcast.lane.b32.xlu1 %v2115_v5, 264  ;;  %16268 = vst [vmem:[#allocation31_spill] sm:$0xff] %v10713_v3 }
 0x396   : > { %2117 = vbcast.lane.b32.xlu0 %v2115_v5, 256 }
 0x397   : > { %v1856_v16 = vpop.permute.xlu1 %1855  ;;  %v1852_v48 = vpop.permute.xlu0 %1851 }
 0x399   : > { %2129 = vbcast.lane.b32.xlu1 %v2115_v5, 280 }
 0x39a   : > { %2125 = vbcast.lane.b32.xlu0 %v2115_v5, 272  ;;  %v16266_v5 = vld [vmem:[#allocation48_spill] sm:$0xff] }
 0x39b   : > { %v1864_v58 = vpop.permute.xlu1 %1863  ;;  %v1860_v46 = vpop.permute.xlu0 %1859 }
 0x39d   : > { %2140 = vbcast.lane.b32.xlu1 %v2134_v24, 264 }
 0x39e   : > { %2136 = vbcast.lane.b32.xlu0 %v2134_v24, 256 }
 0x39f   : > { %v1875_v1 = vpop.permute.xlu1 %1874  ;;  %v1871_v10 = vpop.permute.xlu0 %1870 }
 0x3a0   : > { %v10703_v21 = vsel %vm2815_vm1, %v16264_v15, %v1875_v1  ;;  %v2872_v54 = vsel %vm2815_vm1, %v16266_v5, %v1871_v10  ;;  %v16269_v15 = vld [vmem:[#allocation42_spill] sm:$0xff]  ;;  %v16271_v10 = vld [vmem:[#allocation49_spill] sm:$0xff] }
 0x3a1   : > { %16265 = vst [vmem:[#allocation30_spill] sm:$0xff] %v10703_v21  ;;  %v3513_v32 = vcombine.high %v10697_v31, %v10703_v21  ;;  %v3241_v60 = vcombine.high %v2864_v43, %v2872_v54  ;;  %2148 = vbcast.lane.b32.xlu1 %v2134_v24, 280  ;;  %v10717_v50 = vsel %vm2815_vm1, %v16269_v15, %v1841_v40  ;;  %v16273_v5 = vld [vmem:[#allocation50_spill] sm:$0xff] }
 0x3a2   : > { %2144 = vbcast.lane.b32.xlu0 %v2134_v24, 272  ;;  %16270 = vst [vmem:[#allocation39_spill] sm:$0xff] %v10717_v50  ;;  %v10733_v40 = vsel %vm2815_vm1, %v16275_v39, %v1856_v16  ;;  %v3240_v42 = vcombine.low %v2864_v43, %v2872_v54  ;;  %v3272_v16 = vcombine.low %v10634_v38, %v10628_v13 }
 0x3a3   : > { %v1883_v51 = vpop.permute.xlu1 %1882  ;;  %v1879_v44 = vpop.permute.xlu0 %1878  ;;  %16276 = vst [vmem:[#allocation48_spill] sm:$0xff] %v10733_v40  ;;  %v2172_v54 = vrot.slane %v10468_v2, %v9451_v20 }
 0x3a4   : > { %v10721_v1 = vsel %vm2815_vm1, %v16271_v10, %v1883_v51  ;;  %v10725_v24 = vsel %vm2815_vm1, %v16273_v5, %v1879_v44  ;;  %v16277_v51 = vld [vmem:[#allocation44_spill] sm:$0xff]  ;;  %v16278_v44 = vld [vmem:[#allocation51_spill] sm:$0xff] }
 0x3a5   : > { %16272 = vst [vmem:[#allocation40_spill] sm:$0xff] %v10721_v1  ;;  %16274 = vst [vmem:[#allocation47_spill] sm:$0xff] %v10725_v24  ;;  %v4057_v31 = vcombine.high %v10713_v3, %v10721_v1  ;;  %v3785_v21 = vcombine.high %v10717_v50, %v10725_v24  ;;  %2159 = vbcast.lane.b32.xlu1 %v2153_v35, 264  ;;  %v2868_v10 = vsel %vm2815_vm1, %v16277_v51, %v1852_v48  ;;  %v16280_v3 = vld [vmem:[#allocation52_spill] sm:$0xff] }
 0x3a6   : > { %2155 = vbcast.lane.b32.xlu0 %v2153_v35, 256  ;;  %v3527_v48 = vrot.slane %v3513_v32, %v10233_v7  ;;  %v3255_v51 = vrot.slane %v3241_v60, %v10233_v7  ;;  %v16286_v60 = vld [vmem:[#allocation45_spill] sm:$0xff] }
 0x3a7   : > { %v1894_v19 = vpop.permute.xlu1 %1893  ;;  %v1890_v15 = vpop.permute.xlu0 %1889 }
 0x3a8   : > { %v10739_v5 = vsel %vm2815_vm1, %v16278_v44, %v1894_v19  ;;  %v2876_v1 = vsel %vm2815_vm1, %v16280_v3, %v1890_v15 }
 0x3a9   : > { %16279 = vst [vmem:[#allocation41_spill] sm:$0xff] %v10739_v5  ;;  %v3529_v50 = vcombine.high %v10733_v40, %v10739_v5  ;;  %v3256_v24 = vcombine.low %v2868_v10, %v2876_v1  ;;  %v3257_v34 = vcombine.high %v2868_v10, %v2876_v1  ;;  %2167 = vbcast.lane.b32.xlu1 %v2153_v35, 280  ;;  %v16283_v5 = vld [vmem:[#allocation54_spill] sm:$0xff] }
 0x3aa   : > { %2163 = vbcast.lane.b32.xlu0 %v2153_v35, 272  ;;  %v3248_v1 = vrot.slane %v3240_v42, %v10233_v7  ;;  %v16281_v35 = vld [vmem:[#allocation53_spill] sm:$0xff]  ;;  %v10764_v42 = vrot.slane %v3272_v16, %v10383_v45 }
 0x3ab   : > { %v3543_v43 = vrot.slane %v3529_v50, %v10233_v7  ;;  %v3264_v39 = vrot.slane %v3256_v24, %v10233_v7  ;;  %v3271_v3 = vrot.slane %v3257_v34, %v10233_v7  ;;  %v1902_v19 = vpop.permute.xlu1 %1901  ;;  %v1898_v15 = vpop.permute.xlu0 %1897 }
 0x3ac   : > { %v10757_v40 = vsel %vm2815_vm1, %v16281_v35, %v1902_v19  ;;  %v10761_v32 = vsel %vm2815_vm1, %v16283_v5, %v1898_v15  ;;  %16285 = vst [vmem:[#allocation50_spill] sm:$0xff] %v10764_v42  ;;  %v16288_v35 = vld [vmem:[#allocation46_spill] sm:$0xff] }
 0x3ad   : > { %v3592_v10 = vcombine.low %v3527_v48, %v3543_v43  ;;  %v3593_v44 = vcombine.high %v3527_v48, %v3543_v43  ;;  %16282 = vst [vmem:[#allocation42_spill] sm:$0xff] %v10757_v40  ;;  %16284 = vst [vmem:[#allocation49_spill] sm:$0xff] %v10761_v32  ;;  %2178 = vbcast.lane.b32.xlu1 %v2172_v54, 264  ;;  %v3304_v50 = vcombine.low %v3248_v1, %v3264_v39 }
 0x3ae   : > { %v3305_v24 = vcombine.high %v3248_v1, %v3264_v39  ;;  %v3320_v34 = vcombine.low %v3255_v51, %v3271_v3  ;;  %v3321_v11 = vcombine.high %v3255_v51, %v3271_v3  ;;  %2174 = vbcast.lane.b32.xlu0 %v2172_v54, 256  ;;  %v10768_v48 = vsel %vm2815_vm1, %v16286_v60, %v1864_v58 }
 0x3af   : > { %16287 = vst [vmem:[#allocation43_spill] sm:$0xff] %v10768_v48  ;;  %v10770_v43 = vpop.permute.xlu1 %1912  ;;  %v10772_v19 = vpop.permute.xlu0 %1908  ;;  %v10776_v5 = vsel %vm2815_vm1, %v16288_v35, %v1860_v46  ;;  %v10779_v39 = vrot.slane %v3304_v50, %v10383_v45  ;;  %v4073_v58 = vcombine.high %v10768_v48, %v10757_v40  ;;  %v16293_v46 = vcombine.high %v10634_v38, %v10628_v13 }
 0x3b0   : > { %16289 = vst [vmem:[#allocation44_spill] sm:$0xff] %v10776_v5  ;;  %v10782_v3 = vrot.slane %v3305_v24, %v10383_v45  ;;  %v10785_v16 = vrot.slane %v3320_v34, %v10383_v45  ;;  %v3801_v15 = vcombine.high %v10776_v5, %v10761_v32  ;;  %v16295_v51 = vcombine.low %v10637_v30, %v10631_v41  ;;  %v16297_v24 = vld [vmem:[#allocation11_spill] sm:$0xff] }
 0x3b1   : > { %16290 = vst [vmem:[#allocation51_spill] sm:$0xff] %v10779_v39  ;;  %2186 = vbcast.lane.b32.xlu1 %v2172_v54, 280  ;;  %v10795_v1 = vrot.slane %v16293_v46, %v10383_v45  ;;  %v4071_v34 = vrot.slane %v4057_v31, %v10233_v7  ;;  %v4087_v60 = vrot.slane %v4073_v58, %v10233_v7 }
 0x3b2   : > { %16291 = vst [vmem:[#allocation52_spill] sm:$0xff] %v10782_v3  ;;  %16292 = vst [vmem:[#allocation53_spill] sm:$0xff] %v10785_v16  ;;  %v10801_v50 = vrot.slane %v16295_v51, %v10383_v45  ;;  %2182 = vbcast.lane.b32.xlu0 %v2172_v54, 272  ;;  %v3815_v35 = vrot.slane %v3801_v15, %v10233_v7  ;;  %v2191_v13 = vrot.slane %v10468_v2, %v9455_v25 }
 0x3b3   : > { %16294 = vst [vmem:[#allocation54_spill] sm:$0xff] %v10795_v1  ;;  %v10808_v48 = vpop.permute.xlu1 %1920  ;;  %v3799_v38 = vrot.slane %v3785_v21, %v10233_v7  ;;  %v10813_v46 = vpop.permute.xlu0 %1916  ;;  %v4136_v58 = vcombine.low %v4071_v34, %v4087_v60  ;;  %v4137_v15 = vcombine.high %v4071_v34, %v4087_v60  ;;  %v16298_v2 = vsub.f32 %v9400_v36, %v9403_v37  ;;  %v16367_v1 = vld [vmem:[#allocation84_spill] sm:$0xff] }
 0x3b4   : > { %16296 = vst [vmem:[#allocation45_spill] sm:$0xff] %v10801_v50  ;;  %v10829_v40 = vrot.slane %v3321_v11, %v10383_v45  ;;  %v10832_v51 = vrot.slane %v3592_v10, %v10383_v45  ;;  %v16301_v34 = vcombine.high %v10637_v30, %v10631_v41  ;;  %v10841_v36 = vrot.slane %v3593_v44, %v10383_v45  ;;  %v16352_v50 = vld [vmem:[#allocation79_spill] sm:$0xff] }
 0x3b5   : > { %2197 = vbcast.lane.b32.xlu1 %v2191_v13, 264  ;;  %v10826_v21 = vsel %vm15920_vm0, %v16298_v2, %v16297_v24  ;;  %v3864_v54 = vcombine.low %v3799_v38, %v3815_v35  ;;  %v3865_v5 = vcombine.high %v3799_v38, %v3815_v35  ;;  %v16304_v11 = vcombine.low %v10622_v33, %v10625_v23 }
 0x3b6   : > { %16299 = vst [vmem:[#allocation46_spill] sm:$0xff] %v10829_v40  ;;  %2193 = vbcast.lane.b32.xlu0 %v2191_v13, 256  ;;  %16300 = vst [vmem:[#allocation11_spill] sm:$0xff] %v10832_v51  ;;  %v10838_v60 = vrot.slane %v16301_v34, %v10383_v45  ;;  %v16306_v10 = vcombine.high %v10622_v33, %v10625_v23  ;;  %v2210_v41 = vrot.slane %v10826_v21, %v9426_v0 }
 0x3b7   : > { %v1932_v31 = vpop.permute.xlu1 %1931  ;;  %16303 = vst [vmem:[#allocation275_spill] sm:$0xff] %v10841_v36  ;;  %v1928_v37 = vpop.permute.xlu0 %1927  ;;  %v10847_v24 = vrot.slane %v16304_v11, %v10383_v45  ;;  %v10860_v44 = vrot.slane %v3864_v54, %v10383_v45  ;;  %v10863_v38 = vrot.slane %v3865_v5, %v10383_v45  ;;  %v16310_v23 = vcombine.low %v10683_v63, %v10678_v47  ;;  %v16339_v36 = vld [vmem:[#allocation68_spill] sm:$0xff] }
 0x3b8   : > { %16302 = vst [vmem:[#allocation274_spill] sm:$0xff] %v10838_v60  ;;  %v10853_v35 = vrot.slane %v16306_v10, %v10383_v45  ;;  %v16312_v54 = vcombine.high %v10683_v63, %v10678_v47  ;;  %v10888_v33 = vrot.slane %v4136_v58, %v10383_v45  ;;  %v16318_v58 = vcombine.high %v10672_v26, %v10675_v9  ;;  %v16329_v47 = vld [vmem:[#allocation57_spill] sm:$0xff]  ;;  %v16351_v60 = vld [vmem:[#allocation71_spill] sm:$0xff] }
 0x3b9   : > { %16305 = vst [vmem:[#allocation276_spill] sm:$0xff] %v10847_v24  ;;  %2205 = vbcast.lane.b32.xlu1 %v2191_v13, 280  ;;  %16308 = vst [vmem:[#allocation278_spill] sm:$0xff] %v10860_v44  ;;  %v10873_v34 = vrot.slane %v16310_v23, %v10383_v45  ;;  %v10891_v23 = vrot.slane %v4137_v15, %v10383_v45  ;;  %v16335_v44 = vld [vmem:[#allocation66_spill] sm:$0xff] }
 0x3ba   : > { %16307 = vst [vmem:[#allocation277_spill] sm:$0xff] %v10853_v35  ;;  %16309 = vst [vmem:[#allocation279_spill] sm:$0xff] %v10863_v38  ;;  %2201 = vbcast.lane.b32.xlu0 %v2191_v13, 272  ;;  %v10879_v11 = vrot.slane %v16312_v54, %v10383_v45  ;;  %v16316_v54 = vcombine.low %v10672_v26, %v10675_v9  ;;  %v10909_v15 = vrot.slane %v16318_v58, %v10383_v45  ;;  %v16321_v58 = vld [vmem:[#allocation62_spill] sm:$0xff]  ;;  %v16323_v38 = vld [vmem:[#allocation55_spill] sm:$0xff] }
 0x3bb   : > { %16311 = vst [vmem:[#allocation280_spill] sm:$0xff] %v10873_v34  ;;  %v10881_v5 = vpop.permute.xlu1 %1939  ;;  %16314 = vst [vmem:[#allocation282_spill] sm:$0xff] %v10888_v33  ;;  %v10893_v2 = vpop.permute.xlu0 %1935  ;;  %v10922_v9 = vsel %vm2815_vm1, %v9662_v61, %v10770_v43  ;;  %v10937_v61 = vsel %vm2815_vm1, %v16323_v38, %v10772_v19  ;;  %v2229_v19 = vrot.slane %v10826_v21, %v9431_v4  ;;  %v16325_v38 = vld [vmem:[#allocation56_spill] sm:$0xff]  ;;  %v16337_v34 = vld [vmem:[#allocation59_spill] sm:$0xff] }
 0x3bc   : > { %16313 = vst [vmem:[#allocation281_spill] sm:$0xff] %v10879_v11  ;;  %16315 = vst [vmem:[#allocation283_spill] sm:$0xff] %v10891_v23  ;;  %v10903_v13 = vrot.slane %v16316_v54, %v10383_v45  ;;  %v10954_v33 = vsel %vm2815_vm1, %v16325_v38, %v10808_v48  ;;  %v10963_v23 = vsel %vm2815_vm1, %v16329_v47, %v10813_v46  ;;  %v16341_v35 = vld [vmem:[#allocation60_spill] sm:$0xff] }
 0x3bd   : > { %16319 = vst [vmem:[#allocation285_spill] sm:$0xff] %v10909_v15  ;;  %2216 = vbcast.lane.b32.xlu1 %v2210_v41, 264  ;;  %16320 = vst [vmem:[#allocation286_spill] sm:$0xff] %v10922_v9  ;;  %v16331_v15 = vld [vmem:[#allocation65_spill] sm:$0xff] }
 0x3be   : > { %16317 = vst [vmem:[#allocation284_spill] sm:$0xff] %v10903_v13  ;;  %2212 = vbcast.lane.b32.xlu0 %v2210_v41, 256  ;;  %16326 = vst [vmem:[#allocation55_spill] sm:$0xff] %v10954_v33  ;;  %v16327_v13 = vld [vmem:[#allocation64_spill] sm:$0xff] }
 0x3bf   : > { %v1951_v26 = vpop.permute.xlu1 %1950  ;;  %v1947_v63 = vpop.permute.xlu0 %1946  ;;  %16330 = vst [vmem:[#allocation56_spill] sm:$0xff] %v10963_v23 }
 0x3c0   : > { %v10926_v30 = vsel %vm2815_vm1, %v16321_v58, %v1951_v26  ;;  %v16324_v26 = vld [vmem:[#allocation63_spill] sm:$0xff] }
 0x3c1   : > { %16322 = vst [vmem:[#allocation62_spill] sm:$0xff] %v10926_v30  ;;  %v4433_v43 = vcombine.high %v10922_v9, %v10926_v30  ;;  %v10943_v58 = vsel %vm2815_vm1, %v16324_v26, %v1947_v63  ;;  %2224 = vbcast.lane.b32.xlu1 %v2210_v41, 280 }
 0x3c2   : > { %v4161_v10 = vcombine.high %v10937_v61, %v10943_v58  ;;  %2220 = vbcast.lane.b32.xlu0 %v2210_v41, 272 }
 0x3c3   : > { %v1959_v54 = vpop.permute.xlu1 %1958  ;;  %v1955_v26 = vpop.permute.xlu0 %1954 }
 0x3c4   : > { %v10958_v63 = vsel %vm2815_vm1, %v16327_v13, %v1959_v54  ;;  %v10969_v11 = vsel %vm2815_vm1, %v16331_v15, %v1955_v26  ;;  %v16333_v54 = vld [vmem:[#allocation58_spill] sm:$0xff]  ;;  %v16338_v26 = vld [vmem:[#allocation67_spill] sm:$0xff] }
 0x3c5   : > { %16328 = vst [vmem:[#allocation63_spill] sm:$0xff] %v10958_v63  ;;  %v4977_v41 = vcombine.high %v10954_v33, %v10958_v63  ;;  %16332 = vst [vmem:[#allocation64_spill] sm:$0xff] %v10969_v11  ;;  %2235 = vbcast.lane.b32.xlu1 %v2229_v19, 264  ;;  %v4705_v48 = vcombine.high %v10963_v23, %v10969_v11  ;;  %v10975_v38 = vsel %vm2815_vm1, %v16333_v54, %v1932_v31 }
 0x3c6   : > { %2231 = vbcast.lane.b32.xlu0 %v2229_v19, 256  ;;  %16334 = vst [vmem:[#allocation57_spill] sm:$0xff] %v10975_v38  ;;  %v10983_v33 = vsel %vm2815_vm1, %v16337_v34, %v1928_v37  ;;  %v2248_v34 = vrot.slane %v10826_v21, %v9435_v6  ;;  %v11002_v54 = vrot.slane %v4161_v10, %v10233_v7 }
 0x3c7   : > { %v1970_v13 = vpop.permute.xlu1 %1969  ;;  %v1966_v47 = vpop.permute.xlu0 %1965  ;;  %v2286_v11 = vrot.slane %v10826_v21, %v9443_v12 }
 0x3c8   : > { %v10979_v46 = vsel %vm2815_vm1, %v16335_v44, %v1970_v13  ;;  %v10989_v63 = vsel %vm2815_vm1, %v16338_v26, %v1966_v47  ;;  %v10994_v44 = vrot.slane %v4433_v43, %v10233_v7  ;;  %v16343_v43 = vld [vmem:[#allocation61_spill] sm:$0xff] }
 0x3c9   : > { %16336 = vst [vmem:[#allocation65_spill] sm:$0xff] %v10979_v46  ;;  %v4449_v15 = vcombine.high %v10975_v38, %v10979_v46  ;;  %2243 = vbcast.lane.b32.xlu1 %v2229_v19, 280  ;;  %v4177_v31 = vcombine.high %v10983_v33, %v10989_v63  ;;  %v11027_v24 = vsel %vm2815_vm1, %v16343_v43, %v10893_v2  ;;  %v16363_v46 = vld [vmem:[#allocation82_spill] sm:$0xff] }
 0x3ca   : > { %2239 = vbcast.lane.b32.xlu0 %v2229_v19, 272  ;;  %v11022_v19 = vsel %vm2815_vm1, %v16341_v35, %v10881_v5  ;;  %16344 = vst [vmem:[#allocation59_spill] sm:$0xff] %v11027_v24  ;;  %v11038_v35 = vrot.slane %v4977_v41, %v10233_v7  ;;  %v2267_v43 = vrot.slane %v10826_v21, %v9439_v8 }
 0x3cb   : > { %v10997_v13 = vrot.slane %v4449_v15, %v10233_v7  ;;  %v1978_v37 = vpop.permute.xlu1 %1977  ;;  %v11005_v47 = vrot.slane %v4177_v31, %v10233_v7  ;;  %v1974_v26 = vpop.permute.xlu0 %1973  ;;  %16342 = vst [vmem:[#allocation66_spill] sm:$0xff] %v11022_v19  ;;  %v16345_v15 = vld [vmem:[#allocation69_spill] sm:$0xff] }
 0x3cc   : > { %v11017_v10 = vsel %vm2815_vm1, %v16339_v36, %v1978_v37  ;;  %v11033_v36 = vsel %vm2815_vm1, %v16345_v15, %v1974_v26 }
 0x3cd   : > { %2254 = vbcast.lane.b32.xlu1 %v2248_v34, 264  ;;  %16340 = vst [vmem:[#allocation58_spill] sm:$0xff] %v11017_v10  ;;  %v4993_v32 = vcombine.high %v11022_v19, %v11017_v10  ;;  %16346 = vst [vmem:[#allocation67_spill] sm:$0xff] %v11033_v36  ;;  %v4721_v37 = vcombine.high %v11027_v24, %v11033_v36  ;;  %v11046_v19 = vrot.slane %v4705_v48, %v10233_v7  ;;  %v16347_v24 = vld [vmem:[#allocation70_spill] sm:$0xff] }
 0x3ce   : > { %2250 = vbcast.lane.b32.xlu0 %v2248_v34, 256 }
 0x3cf   : > { %v1989_v31 = vpop.permute.xlu1 %1988  ;;  %v1985_v51 = vpop.permute.xlu0 %1984  ;;  %v11041_v5 = vrot.slane %v4993_v32, %v10233_v7  ;;  %v11049_v26 = vrot.slane %v4721_v37, %v10233_v7  ;;  %v16349_v32 = vld [vmem:[#allocation78_spill] sm:$0xff] }
 0x3d0   : > { %v11063_v36 = vsel %vm2815_vm1, %v16347_v24, %v1989_v31  ;;  %v2305_v24 = vrot.slane %v10826_v21, %v9447_v14  ;;  %v16353_v31 = vld [vmem:[#allocation72_spill] sm:$0xff] }
 0x3d1   : > { %2262 = vbcast.lane.b32.xlu1 %v2248_v34, 280  ;;  %16348 = vst [vmem:[#allocation68_spill] sm:$0xff] %v11063_v36 }
 0x3d2   : > { %2258 = vbcast.lane.b32.xlu0 %v2248_v34, 272 }
 0x3d3   : > { %v1997_v2 = vpop.permute.xlu1 %1996  ;;  %v1993_v15 = vpop.permute.xlu0 %1992 }
 0x3d5   : > { %2273 = vbcast.lane.b32.xlu1 %v2267_v43, 264 }
 0x3d6   : > { %2269 = vbcast.lane.b32.xlu0 %v2267_v43, 256 }
 0x3d7   : > { %v2008_v48 = vpop.permute.xlu1 %2007  ;;  %v2004_v23 = vpop.permute.xlu0 %2003 }
 0x3d9   : > { %2281 = vbcast.lane.b32.xlu1 %v2267_v43, 280 }
 0x3da   : > { %2277 = vbcast.lane.b32.xlu0 %v2267_v43, 272  ;;  %v2896_v43 = vsel %vm2815_vm1, %v16351_v60, %v1985_v51 }
 0x3db   : > { %v2016_v37 = vpop.permute.xlu1 %2015 }
 0x3dc   : > { %v2012_v34 = vpop.permute.xlu0 %2011 }
 0x3dd   : > { %2292 = vbcast.lane.b32.xlu1 %v2286_v11, 264 }
 0x3de   : > { %2288 = vbcast.lane.b32.xlu0 %v2286_v11, 256 }
 0x3df   : > { %v2027_v41 = vpop.permute.xlu1 %2026 }
 0x3e0   : > { %v11067_v10 = vsel %vm2815_vm1, %v16349_v32, %v2027_v41  ;;  %v2023_v40 = vpop.permute.xlu0 %2022  ;;  %v11079_v41 = vsel %vm2815_vm1, %v16353_v31, %v1997_v2  ;;  %v16355_v32 = vld [vmem:[#allocation80_spill] sm:$0xff] }
 0x3e1   : > { %16350 = vst [vmem:[#allocation60_spill] sm:$0xff] %v11067_v10  ;;  %v4465_v16 = vcombine.high %v11063_v36, %v11067_v10  ;;  %v2904_v9 = vsel %vm2815_vm1, %v16352_v50, %v2023_v40  ;;  %2300 = vbcast.lane.b32.xlu1 %v2286_v11, 280  ;;  %16354 = vst [vmem:[#allocation61_spill] sm:$0xff] %v11079_v41  ;;  %v16357_v36 = vld [vmem:[#allocation73_spill] sm:$0xff] }
 0x3e2   : > { %v4193_v30 = vcombine.high %v2896_v43, %v2904_v9  ;;  %2296 = vbcast.lane.b32.xlu0 %v2286_v11, 272  ;;  %v11087_v10 = vsel %vm2815_vm1, %v16357_v36, %v1993_v15  ;;  %v16359_v50 = vld [vmem:[#allocation81_spill] sm:$0xff] }
 0x3e3   : > { %v2035_v38 = vpop.permute.xlu1 %2034  ;;  %16358 = vst [vmem:[#allocation70_spill] sm:$0xff] %v11087_v10 }
 0x3e4   : > { %v11083_v51 = vsel %vm2815_vm1, %v16355_v32, %v2035_v38  ;;  %v2031_v60 = vpop.permute.xlu0 %2030  ;;  %v16361_v38 = vld [vmem:[#allocation74_spill] sm:$0xff] }
 0x3e5   : > { %16356 = vst [vmem:[#allocation69_spill] sm:$0xff] %v11083_v51  ;;  %v5009_v40 = vcombine.high %v11079_v41, %v11083_v51  ;;  %v11093_v11 = vsel %vm2815_vm1, %v16359_v50, %v2031_v60  ;;  %2311 = vbcast.lane.b32.xlu1 %v2305_v24, 264  ;;  %v11099_v32 = vsel %vm2815_vm1, %v16361_v38, %v2008_v48  ;;  %v16365_v41 = vld [vmem:[#allocation75_spill] sm:$0xff] }
 0x3e6   : > { %16360 = vst [vmem:[#allocation78_spill] sm:$0xff] %v11093_v11  ;;  %v4737_v2 = vcombine.high %v11087_v10, %v11093_v11  ;;  %2307 = vbcast.lane.b32.xlu0 %v2305_v24, 256  ;;  %16362 = vst [vmem:[#allocation71_spill] sm:$0xff] %v11099_v32  ;;  %v2900_v51 = vsel %vm2815_vm1, %v16365_v41, %v2004_v23  ;;  %v16366_v50 = vld [vmem:[#allocation83_spill] sm:$0xff]  ;;  %v4479_v48 = vrot.slane %v4465_v16, %v10233_v7 }
 0x3e7   : > { %v2046_v31 = vpop.permute.xlu1 %2045  ;;  %v4176_v23 = vcombine.low %v10983_v33, %v10989_v63  ;;  %v4192_v41 = vcombine.low %v2896_v43, %v2904_v9  ;;  %v16370_v9 = vld [vmem:[#allocation76_spill] sm:$0xff] }
 0x3e8   : > { %v11103_v36 = vsel %vm2815_vm1, %v16363_v46, %v2046_v31  ;;  %v2042_v15 = vpop.permute.xlu0 %2041  ;;  %v2324_v31 = vrot.slane %v10826_v21, %v9451_v20 }
 0x3e9   : > { %16364 = vst [vmem:[#allocation79_spill] sm:$0xff] %v11103_v36  ;;  %v4481_v60 = vcombine.high %v11099_v32, %v11103_v36  ;;  %v2908_v10 = vsel %vm2815_vm1, %v16366_v50, %v2042_v15  ;;  %2319 = vbcast.lane.b32.xlu1 %v2305_v24, 280  ;;  %v4207_v32 = vrot.slane %v4193_v30, %v10233_v7 }
 0x3ea   : > { %v4208_v11 = vcombine.low %v2900_v51, %v2908_v10  ;;  %v4209_v3 = vcombine.high %v2900_v51, %v2908_v10  ;;  %2315 = vbcast.lane.b32.xlu0 %v2305_v24, 272  ;;  %v4160_v10 = vcombine.low %v10937_v61, %v10943_v58  ;;  %v11135_v61 = vsel %vm2815_vm1, %v16370_v9, %v2016_v37 }
 0x3eb   : > { %v4495_v38 = vrot.slane %v4481_v60, %v10233_v7  ;;  %v2054_v46 = vpop.permute.xlu1 %2053  ;;  %16371 = vst [vmem:[#allocation73_spill] sm:$0xff] %v11135_v61  ;;  %v11138_v58 = vrot.slane %v4192_v41, %v10233_v7 }
 0x3ec   : > { %v4223_v15 = vrot.slane %v4209_v3, %v10233_v7  ;;  %v2050_v50 = vpop.permute.xlu0 %2049  ;;  %v11122_v51 = vrot.slane %v4208_v11, %v10233_v7  ;;  %v11126_v33 = vsel %vm2815_vm1, %v16367_v1, %v2054_v46  ;;  %v11131_v3 = vrot.slane %v4176_v23, %v10233_v7  ;;  %v16373_v1 = vld [vmem:[#allocation77_spill] sm:$0xff] }
 0x3ed   : > { %v4544_v24 = vcombine.low %v4479_v48, %v4495_v38  ;;  %v4545_v16 = vcombine.high %v4479_v48, %v4495_v38  ;;  %2330 = vbcast.lane.b32.xlu1 %v2324_v31, 264  ;;  %16368 = vst [vmem:[#allocation72_spill] sm:$0xff] %v11126_v33  ;;  %v11147_v11 = vsel %vm2815_vm1, %v16373_v1, %v2012_v34  ;;  %v16375_v48 = vld [vmem:[#allocation85_spill] sm:$0xff] }
 0x3ee   : > { %v4272_v60 = vcombine.low %v4207_v32, %v4223_v15  ;;  %v4273_v36 = vcombine.high %v4207_v32, %v4223_v15  ;;  %2326 = vbcast.lane.b32.xlu0 %v2324_v31, 256  ;;  %16369 = vst [vmem:[#allocation80_spill] sm:$0xff] %v11131_v3  ;;  %16374 = vst [vmem:[#allocation74_spill] sm:$0xff] %v11147_v11  ;;  %v5025_v32 = vcombine.high %v11135_v61, %v11126_v33 }
 0x3ef   : > { %v11128_v30 = vpop.permute.xlu1 %2064  ;;  %v11153_v38 = vsel %vm2815_vm1, %v16375_v48, %v2050_v50  ;;  %v11156_v37 = vrot.slane %v4160_v10, %v10233_v7  ;;  %v16378_v46 = vcombine.low %v11002_v54, %v11005_v47  ;;  %v4256_v34 = vcombine.low %v11138_v58, %v11122_v51 }
 0x3f0   : > { %v11141_v63 = vrot.slane %v4272_v60, %v10383_v45  ;;  %v11143_v43 = vpop.permute.xlu0 %2060  ;;  %16376 = vst [vmem:[#allocation82_spill] sm:$0xff] %v11153_v38  ;;  %v4753_v41 = vcombine.high %v11147_v11, %v11153_v38  ;;  %v5023_v15 = vrot.slane %v5009_v40, %v10233_v7  ;;  %v5039_v50 = vrot.slane %v5025_v32, %v10233_v7  ;;  %v16383_v38 = vld [vmem:[#allocation10_spill] sm:$0xff] }
 0x3f1   : > { %2338 = vbcast.lane.b32.xlu1 %v2324_v31, 280  ;;  %16377 = vst [vmem:[#allocation75_spill] sm:$0xff] %v11156_v37  ;;  %v11162_v23 = vrot.slane %v16378_v46, %v10383_v45  ;;  %v2343_v10 = vrot.slane %v10826_v21, %v9455_v25  ;;  %v4224_v9 = vcombine.low %v11156_v37, %v11131_v3 }
 0x3f2   : > { %16372 = vst [vmem:[#allocation81_spill] sm:$0xff] %v11141_v63  ;;  %2334 = vbcast.lane.b32.xlu0 %v2324_v31, 272  ;;  %v4751_v1 = vrot.slane %v4737_v2, %v10233_v7  ;;  %v4767_v48 = vrot.slane %v4753_v41, %v10233_v7  ;;  %v5088_v40 = vcombine.low %v5023_v15, %v5039_v50 }
 0x3f3   : > { %16379 = vst [vmem:[#allocation83_spill] sm:$0xff] %v11162_v23  ;;  %v11170_v60 = vpop.permute.xlu1 %2072  ;;  %v5089_v61 = vcombine.high %v5023_v15, %v5039_v50  ;;  %v11183_v32 = vrot.slane %v4256_v34, %v10383_v45  ;;  %v11186_v21 = vrot.slane %v4273_v36, %v10383_v45  ;;  %v11189_v2 = vrot.slane %v4544_v24, %v10383_v45  ;;  %v16451_v23 = vld [vmem:[#allocation114_spill] sm:$0xff] }
 0x3f4   : > { %v11178_v46 = vpop.permute.xlu0 %2068  ;;  %v4816_v33 = vcombine.low %v4751_v1, %v4767_v48  ;;  %v4817_v11 = vcombine.high %v4751_v1, %v4767_v48  ;;  %v16384_v31 = vsub.f32 %v9392_v18, %v9396_v55  ;;  %v11199_v34 = vrot.slane %v4224_v9, %v10383_v45 }
 0x3f5   : > { %2349 = vbcast.lane.b32.xlu1 %v2343_v10, 264  ;;  %16380 = vst [vmem:[#allocation84_spill] sm:$0xff] %v11183_v32  ;;  %16381 = vst [vmem:[#allocation76_spill] sm:$0xff] %v11186_v21  ;;  %v16386_v36 = vcombine.high %v11002_v54, %v11005_v47  ;;  %v11208_v24 = vrot.slane %v4545_v16, %v10383_v45  ;;  %v16389_v18 = vcombine.low %v10994_v44, %v10997_v13 }
 0x3f6   : > { %2345 = vbcast.lane.b32.xlu0 %v2343_v10, 256  ;;  %16382 = vst [vmem:[#allocation77_spill] sm:$0xff] %v11189_v2  ;;  %v11196_v15 = vsel %vm15920_vm0, %v16384_v31, %v16383_v38  ;;  %16385 = vst [vmem:[#allocation85_spill] sm:$0xff] %v11199_v34  ;;  %v16391_v38 = vcombine.high %v10994_v44, %v10997_v13  ;;  %v11223_v54 = vrot.slane %v4816_v33, %v10383_v45  ;;  %v16434_v2 = vld [vmem:[#allocation109_spill] sm:$0xff] }
 0x3f7   : > { %v2084_v41 = vpop.permute.xlu1 %2083  ;;  %v11205_v50 = vrot.slane %v16386_v36, %v10383_v45  ;;  %16388 = vst [vmem:[#allocation287_spill] sm:$0xff] %v11208_v24  ;;  %v11214_v55 = vrot.slane %v16389_v18, %v10383_v45  ;;  %v11228_v16 = vrot.slane %v4817_v11, %v10383_v45  ;;  %v16395_v13 = vcombine.low %v11046_v19, %v11049_v26  ;;  %v16406_v24 = vld [vmem:[#allocation93_spill] sm:$0xff] }
 0x3f8   : > { %v2080_v1 = vpop.permute.xlu0 %2079  ;;  %v11220_v9 = vrot.slane %v16391_v38, %v10383_v45  ;;  %16393 = vst [vmem:[#allocation290_spill] sm:$0xff] %v11223_v54  ;;  %v16397_v11 = vcombine.high %v11046_v19, %v11049_v26  ;;  %v2362_v18 = vrot.slane %v11196_v15, %v9426_v0  ;;  %v11255_v48 = vrot.slane %v5088_v40, %v10383_v45 }
 0x3f9   : > { %16387 = vst [vmem:[#allocation10_spill] sm:$0xff] %v11205_v50  ;;  %16390 = vst [vmem:[#allocation288_spill] sm:$0xff] %v11214_v55  ;;  %2357 = vbcast.lane.b32.xlu1 %v2343_v10, 280  ;;  %v11240_v33 = vrot.slane %v16395_v13, %v10383_v45  ;;  %v16401_v40 = vcombine.low %v11038_v35, %v11041_v5  ;;  %v11291_v13 = vsel %vm2815_vm1, %v9748_v27, %v11128_v30  ;;  %v16409_v27 = vld [vmem:[#allocation94_spill] sm:$0xff] }
 0x3fa   : > { %16392 = vst [vmem:[#allocation289_spill] sm:$0xff] %v11220_v9  ;;  %16394 = vst [vmem:[#allocation291_spill] sm:$0xff] %v11228_v16  ;;  %2353 = vbcast.lane.b32.xlu0 %v2343_v10, 272  ;;  %v11246_v10 = vrot.slane %v16397_v11, %v10383_v45  ;;  %v11266_v11 = vrot.slane %v5089_v61, %v10383_v45  ;;  %v16403_v61 = vcombine.high %v11038_v35, %v11041_v5  ;;  %v16408_v5 = vld [vmem:[#allocation86_spill] sm:$0xff]  ;;  %v16432_v9 = vld [vmem:[#allocation101_spill] sm:$0xff] }
 0x3fb   : > { %16396 = vst [vmem:[#allocation292_spill] sm:$0xff] %v11240_v33  ;;  %v11248_v36 = vpop.permute.xlu1 %2091  ;;  %16399 = vst [vmem:[#allocation294_spill] sm:$0xff] %v11255_v48  ;;  %v11272_v38 = vrot.slane %v16401_v40, %v10383_v45  ;;  %v2381_v48 = vrot.slane %v11196_v15, %v9431_v4 }
 0x3fc   : > { %16398 = vst [vmem:[#allocation293_spill] sm:$0xff] %v11246_v10  ;;  %v11257_v44 = vpop.permute.xlu0 %2087  ;;  %16400 = vst [vmem:[#allocation295_spill] sm:$0xff] %v11266_v11  ;;  %v11284_v31 = vrot.slane %v16403_v61, %v10383_v45  ;;  %v2912_v61 = vsel %vm2815_vm1, %v16408_v5, %v11143_v43  ;;  %v16410_v43 = vld [vmem:[#allocation87_spill] sm:$0xff]  ;;  %v16416_v11 = vld [vmem:[#allocation96_spill] sm:$0xff] }
 0x3fd   : > { %2368 = vbcast.lane.b32.xlu1 %v2362_v18, 264  ;;  %16402 = vst [vmem:[#allocation296_spill] sm:$0xff] %v11272_v38  ;;  %16405 = vst [vmem:[#allocation298_spill] sm:$0xff] %v11291_v13  ;;  %v11317_v5 = vsel %vm2815_vm1, %v16410_v43, %v11170_v60  ;;  %v16412_v38 = vld [vmem:[#allocation95_spill] sm:$0xff]  ;;  %v16423_v10 = vld [vmem:[#allocation98_spill] sm:$0xff] }
 0x3fe   : > { %2364 = vbcast.lane.b32.xlu0 %v2362_v18, 256  ;;  %16404 = vst [vmem:[#allocation297_spill] sm:$0xff] %v11284_v31  ;;  %16411 = vst [vmem:[#allocation86_spill] sm:$0xff] %v11317_v5 }
 0x3ff   : > { %v2103_v47 = vpop.permute.xlu1 %2102 }
 0x400   : > { %v11295_v19 = vsel %vm2815_vm1, %v16406_v24, %v2103_v47  ;;  %v2099_v26 = vpop.permute.xlu0 %2098  ;;  %v16414_v24 = vld [vmem:[#allocation88_spill] sm:$0xff] }
 0x401   : > { %16407 = vst [vmem:[#allocation93_spill] sm:$0xff] %v11295_v19  ;;  %v4569_v40 = vcombine.high %v11291_v13, %v11295_v19  ;;  %v2920_v30 = vsel %vm2815_vm1, %v16409_v27, %v2099_v26  ;;  %2376 = vbcast.lane.b32.xlu1 %v2362_v18, 280  ;;  %v16436_v13 = vld [vmem:[#allocation102_spill] sm:$0xff] }
 0x402   : > { %v4297_v47 = vcombine.high %v2912_v61, %v2920_v30  ;;  %2372 = vbcast.lane.b32.xlu0 %v2362_v18, 272  ;;  %v11326_v18 = vsel %vm2815_vm1, %v16414_v24, %v11178_v46  ;;  %v4296_v16 = vcombine.low %v2912_v61, %v2920_v30  ;;  %v16420_v46 = vld [vmem:[#allocation97_spill] sm:$0xff] }
 0x403   : > { %v2111_v35 = vpop.permute.xlu1 %2110  ;;  %16415 = vst [vmem:[#allocation87_spill] sm:$0xff] %v11326_v18 }
 0x404   : > { %v11321_v26 = vsel %vm2815_vm1, %v16412_v38, %v2111_v35  ;;  %v2107_v27 = vpop.permute.xlu0 %2106  ;;  %v16418_v35 = vld [vmem:[#allocation89_spill] sm:$0xff] }
 0x405   : > { %16413 = vst [vmem:[#allocation94_spill] sm:$0xff] %v11321_v26  ;;  %v5113_v54 = vcombine.high %v11317_v5, %v11321_v26  ;;  %v11332_v31 = vsel %vm2815_vm1, %v16416_v11, %v2107_v27  ;;  %2387 = vbcast.lane.b32.xlu1 %v2381_v48, 264  ;;  %v11338_v43 = vsel %vm2815_vm1, %v16418_v35, %v2084_v41  ;;  %v16422_v26 = vld [vmem:[#allocation90_spill] sm:$0xff]  ;;  %v16424_v35 = vld [vmem:[#allocation99_spill] sm:$0xff] }
 0x406   : > { %16417 = vst [vmem:[#allocation95_spill] sm:$0xff] %v11332_v31  ;;  %v4841_v60 = vcombine.high %v11326_v18, %v11332_v31  ;;  %2383 = vbcast.lane.b32.xlu0 %v2381_v48, 256  ;;  %16419 = vst [vmem:[#allocation88_spill] sm:$0xff] %v11338_v43  ;;  %v2916_v11 = vsel %vm2815_vm1, %v16422_v26, %v2080_v1  ;;  %v11351_v41 = vrot.slane %v4569_v40, %v10233_v7  ;;  %v16428_v40 = vld [vmem:[#allocation92_spill] sm:$0xff] }
 0x407   : > { %v2122_v38 = vpop.permute.xlu1 %2121  ;;  %v2400_v1 = vrot.slane %v11196_v15, %v9435_v6  ;;  %v11359_v26 = vrot.slane %v4296_v16, %v10233_v7  ;;  %v11392_v16 = vsel %vm2815_vm1, %v16428_v40, %v11257_v44  ;;  %v2419_v40 = vrot.slane %v11196_v15, %v9439_v8 }
 0x408   : > { %v11342_v24 = vsel %vm2815_vm1, %v16420_v46, %v2122_v38  ;;  %v2118_v5 = vpop.permute.xlu0 %2117  ;;  %v11362_v38 = vrot.slane %v4297_v47, %v10233_v7  ;;  %16429 = vst [vmem:[#allocation90_spill] sm:$0xff] %v11392_v16  ;;  %v16430_v47 = vld [vmem:[#allocation100_spill] sm:$0xff] }
 0x409   : > { %16421 = vst [vmem:[#allocation96_spill] sm:$0xff] %v11342_v24  ;;  %v4585_v27 = vcombine.high %v11338_v43, %v11342_v24  ;;  %v2924_v33 = vsel %vm2815_vm1, %v16423_v10, %v2118_v5  ;;  %2395 = vbcast.lane.b32.xlu1 %v2381_v48, 280  ;;  %v16437_v43 = vld [vmem:[#allocation110_spill] sm:$0xff] }
 0x40a   : > { %v4312_v18 = vcombine.low %v2916_v11, %v2924_v33  ;;  %v4313_v31 = vcombine.high %v2916_v11, %v2924_v33  ;;  %2391 = vbcast.lane.b32.xlu0 %v2381_v48, 272  ;;  %v16426_v11 = vld [vmem:[#allocation91_spill] sm:$0xff] }
 0x40b   : > { %v11354_v61 = vrot.slane %v4585_v27, %v10233_v7  ;;  %v2130_v30 = vpop.permute.xlu1 %2129  ;;  %v11387_v27 = vsel %vm2815_vm1, %v16426_v11, %v11248_v36  ;;  %v11403_v36 = vrot.slane %v5113_v54, %v10233_v7 }
 0x40c   : > { %v11365_v10 = vrot.slane %v4312_v18, %v10233_v7  ;;  %v11368_v48 = vrot.slane %v4313_v31, %v10233_v7  ;;  %v2126_v33 = vpop.permute.xlu0 %2125  ;;  %v11382_v31 = vsel %vm2815_vm1, %v16424_v35, %v2130_v30  ;;  %16427 = vst [vmem:[#allocation97_spill] sm:$0xff] %v11387_v27 }
 0x40d   : > { %2406 = vbcast.lane.b32.xlu1 %v2400_v1, 264  ;;  %16425 = vst [vmem:[#allocation89_spill] sm:$0xff] %v11382_v31  ;;  %v5129_v18 = vcombine.high %v11387_v27, %v11382_v31  ;;  %v11398_v30 = vsel %vm2815_vm1, %v16430_v47, %v2126_v33  ;;  %v11411_v27 = vrot.slane %v4841_v60, %v10233_v7 }
 0x40e   : > { %2402 = vbcast.lane.b32.xlu0 %v2400_v1, 256  ;;  %16431 = vst [vmem:[#allocation98_spill] sm:$0xff] %v11398_v30  ;;  %v4857_v35 = vcombine.high %v11392_v16, %v11398_v30  ;;  %v2438_v30 = vrot.slane %v11196_v15, %v9443_v12 }
 0x40f   : > { %v2141_v46 = vpop.permute.xlu1 %2140  ;;  %v11406_v11 = vrot.slane %v5129_v18, %v10233_v7 }
 0x410   : > { %v2137_v5 = vpop.permute.xlu0 %2136  ;;  %v11414_v33 = vrot.slane %v4857_v35, %v10233_v7  ;;  %v11430_v18 = vsel %vm2815_vm1, %v16432_v9, %v2141_v46  ;;  %v2457_v9 = vrot.slane %v11196_v15, %v9447_v14  ;;  %v16438_v46 = vld [vmem:[#allocation103_spill] sm:$0xff] }
 0x411   : > { %2414 = vbcast.lane.b32.xlu1 %v2400_v1, 280  ;;  %16433 = vst [vmem:[#allocation99_spill] sm:$0xff] %v11430_v18 }
 0x412   : > { %2410 = vbcast.lane.b32.xlu0 %v2400_v1, 272 }
 0x413   : > { %v2149_v44 = vpop.permute.xlu1 %2148 }
 0x414   : > { %v2145_v47 = vpop.permute.xlu0 %2144 }
 0x415   : > { %2425 = vbcast.lane.b32.xlu1 %v2419_v40, 264 }
 0x416   : > { %2421 = vbcast.lane.b32.xlu0 %v2419_v40, 256 }
 0x417   : > { %v2160_v60 = vpop.permute.xlu1 %2159 }
 0x418   : > { %v2156_v16 = vpop.permute.xlu0 %2155 }
 0x419   : > { %2433 = vbcast.lane.b32.xlu1 %v2419_v40, 280 }
 0x41a   : > { %2429 = vbcast.lane.b32.xlu0 %v2419_v40, 272  ;;  %v2928_v40 = vsel %vm2815_vm1, %v16436_v13, %v2137_v5 }
 0x41b   : > { %v2168_v35 = vpop.permute.xlu1 %2167 }
 0x41c   : > { %v11426_v1 = vpop.permute.xlu0 %2163 }
 0x41d   : > { %2444 = vbcast.lane.b32.xlu1 %v2438_v30, 264 }
 0x41e   : > { %2440 = vbcast.lane.b32.xlu0 %v2438_v30, 256 }
 0x41f   : > { %v2179_v54 = vpop.permute.xlu1 %2178 }
 0x420   : > { %v11434_v31 = vsel %vm2815_vm1, %v16434_v2, %v2179_v54  ;;  %v2175_v55 = vpop.permute.xlu0 %2174  ;;  %v11446_v2 = vsel %vm2815_vm1, %v16438_v46, %v2149_v44  ;;  %v16440_v54 = vld [vmem:[#allocation111_spill] sm:$0xff] }
 0x421   : > { %16435 = vst [vmem:[#allocation91_spill] sm:$0xff] %v11434_v31  ;;  %v4601_v19 = vcombine.high %v11430_v18, %v11434_v31  ;;  %v2936_v24 = vsel %vm2815_vm1, %v16437_v43, %v2175_v55  ;;  %2452 = vbcast.lane.b32.xlu1 %v2438_v30, 280  ;;  %16439 = vst [vmem:[#allocation92_spill] sm:$0xff] %v11446_v2  ;;  %v16442_v18 = vld [vmem:[#allocation104_spill] sm:$0xff] }
 0x422   : > { %v4329_v21 = vcombine.high %v2928_v40, %v2936_v24  ;;  %2448 = vbcast.lane.b32.xlu0 %v2438_v30, 272  ;;  %v11454_v31 = vsel %vm2815_vm1, %v16442_v18, %v2145_v47  ;;  %v16444_v43 = vld [vmem:[#allocation112_spill] sm:$0xff]  ;;  %v4328_v63 = vcombine.low %v2928_v40, %v2936_v24  ;;  %v16448_v47 = vld [vmem:[#allocation113_spill] sm:$0xff]  ;;  %v4360_v24 = vcombine.low %v11359_v26, %v11365_v10 }
 0x423   : > { %v2187_v50 = vpop.permute.xlu1 %2186  ;;  %16443 = vst [vmem:[#allocation101_spill] sm:$0xff] %v11454_v31 }
 0x424   : > { %v11450_v13 = vsel %vm2815_vm1, %v16440_v54, %v2187_v50  ;;  %v2183_v5 = vpop.permute.xlu0 %2182  ;;  %v16446_v50 = vld [vmem:[#allocation105_spill] sm:$0xff] }
 0x425   : > { %16441 = vst [vmem:[#allocation100_spill] sm:$0xff] %v11450_v13  ;;  %v5145_v55 = vcombine.high %v11446_v2, %v11450_v13  ;;  %v11460_v30 = vsel %vm2815_vm1, %v16444_v43, %v2183_v5  ;;  %2463 = vbcast.lane.b32.xlu1 %v2457_v9, 264  ;;  %v11466_v54 = vsel %vm2815_vm1, %v16446_v50, %v2160_v60  ;;  %v16450_v13 = vld [vmem:[#allocation106_spill] sm:$0xff] }
 0x426   : > { %16445 = vst [vmem:[#allocation109_spill] sm:$0xff] %v11460_v30  ;;  %v4873_v44 = vcombine.high %v11454_v31, %v11460_v30  ;;  %2459 = vbcast.lane.b32.xlu0 %v2457_v9, 256  ;;  %16447 = vst [vmem:[#allocation102_spill] sm:$0xff] %v11466_v54  ;;  %v2932_v5 = vsel %vm2815_vm1, %v16450_v13, %v2156_v16  ;;  %v4615_v60 = vrot.slane %v4601_v19, %v10233_v7 }
 0x427   : > { %v2198_v46 = vpop.permute.xlu1 %2197  ;;  %v2476_v16 = vrot.slane %v11196_v15, %v9451_v20  ;;  %v4336_v13 = vrot.slane %v4328_v63, %v10233_v7  ;;  %v4343_v50 = vrot.slane %v4329_v21, %v10233_v7  ;;  %v11495_v21 = vrot.slane %v4360_v24, %v10383_v45  ;;  %v16461_v24 = vld [vmem:[#allocation108_spill] sm:$0xff] }
 0x428   : > { %v11470_v18 = vsel %vm2815_vm1, %v16448_v47, %v2198_v46  ;;  %v2194_v2 = vpop.permute.xlu0 %2193 }
 0x429   : > { %16449 = vst [vmem:[#allocation110_spill] sm:$0xff] %v11470_v18  ;;  %v4617_v43 = vcombine.high %v11466_v54, %v11470_v18  ;;  %v2940_v31 = vsel %vm2815_vm1, %v16451_v23, %v2194_v2  ;;  %2471 = vbcast.lane.b32.xlu1 %v2457_v9, 280  ;;  %16454 = vst [vmem:[#allocation111_spill] sm:$0xff] %v11495_v21 }
 0x42a   : > { %v4344_v30 = vcombine.low %v2932_v5, %v2940_v31  ;;  %v4345_v37 = vcombine.high %v2932_v5, %v2940_v31  ;;  %2467 = vbcast.lane.b32.xlu0 %v2457_v9, 272  ;;  %v16452_v5 = vld [vmem:[#allocation115_spill] sm:$0xff] }
 0x42b   : > { %v4631_v40 = vrot.slane %v4617_v43, %v10233_v7  ;;  %v2206_v46 = vpop.permute.xlu1 %2205 }
 0x42c   : > { %v4352_v23 = vrot.slane %v4344_v30, %v10233_v7  ;;  %v4359_v31 = vrot.slane %v4345_v37, %v10233_v7  ;;  %v2202_v9 = vpop.permute.xlu0 %2201  ;;  %v11490_v19 = vsel %vm2815_vm1, %v16452_v5, %v2206_v46  ;;  %v16455_v30 = vld [vmem:[#allocation107_spill] sm:$0xff] }
 0x42d   : > { %v4680_v2 = vcombine.low %v4615_v60, %v4631_v40  ;;  %v4681_v47 = vcombine.high %v4615_v60, %v4631_v40  ;;  %16453 = vst [vmem:[#allocation103_spill] sm:$0xff] %v11490_v19  ;;  %2482 = vbcast.lane.b32.xlu1 %v2476_v16, 264  ;;  %v11499_v37 = vsel %vm2815_vm1, %v16455_v30, %v2168_v35 }
 0x42e   : > { %v4392_v43 = vcombine.low %v4336_v13, %v4352_v23  ;;  %v4393_v54 = vcombine.high %v4336_v13, %v4352_v23  ;;  %v4408_v18 = vcombine.low %v4343_v50, %v4359_v31  ;;  %v4409_v3 = vcombine.high %v4343_v50, %v4359_v31  ;;  %2478 = vbcast.lane.b32.xlu0 %v2476_v16, 256  ;;  %v16463_v31 = vld [vmem:[#allocation116_spill] sm:$0xff] }
 0x42f   : > { %v11492_v63 = vpop.permute.xlu1 %2216  ;;  %16456 = vst [vmem:[#allocation104_spill] sm:$0xff] %v11499_v37  ;;  %v16459_v13 = vcombine.high %v11359_v26, %v11365_v10  ;;  %v11518_v23 = vsel %vm2815_vm1, %v16461_v24, %v11426_v1  ;;  %v5161_v35 = vcombine.high %v11499_v37, %v11490_v19  ;;  %v2495_v26 = vrot.slane %v11196_v15, %v9455_v25  ;;  %v16470_v19 = vld [vmem:[#allocation13_spill] sm:$0xff] }
 0x430   : > { %v11502_v60 = vrot.slane %v4392_v43, %v10383_v45  ;;  %v11505_v40 = vrot.slane %v4393_v54, %v10383_v45  ;;  %v11507_v46 = vpop.permute.xlu0 %2212  ;;  %16462 = vst [vmem:[#allocation106_spill] sm:$0xff] %v11518_v23  ;;  %v11524_v54 = vsel %vm2815_vm1, %v16463_v31, %v2202_v9  ;;  %v5159_v10 = vrot.slane %v5145_v55, %v10233_v7 }
 0x431   : > { %v11513_v50 = vrot.slane %v16459_v13, %v10383_v45  ;;  %16464 = vst [vmem:[#allocation114_spill] sm:$0xff] %v11524_v54  ;;  %2490 = vbcast.lane.b32.xlu1 %v2476_v16, 280  ;;  %v4889_v5 = vcombine.high %v11518_v23, %v11524_v54  ;;  %v5175_v1 = vrot.slane %v5161_v35, %v10233_v7  ;;  %v16492_v54 = vld [vmem:[#allocation124_spill] sm:$0xff] }
 0x432   : > { %16457 = vst [vmem:[#allocation112_spill] sm:$0xff] %v11502_v60  ;;  %16458 = vst [vmem:[#allocation105_spill] sm:$0xff] %v11505_v40  ;;  %2486 = vbcast.lane.b32.xlu0 %v2476_v16, 272  ;;  %v4887_v13 = vrot.slane %v4873_v44, %v10233_v7  ;;  %v11545_v55 = vrot.slane %v4408_v18, %v10383_v45  ;;  %v11548_v30 = vrot.slane %v4409_v3, %v10383_v45 }
 0x433   : > { %16460 = vst [vmem:[#allocation113_spill] sm:$0xff] %v11513_v50  ;;  %v11532_v43 = vpop.permute.xlu1 %2224  ;;  %v4903_v24 = vrot.slane %v4889_v5, %v10233_v7  ;;  %v5224_v35 = vcombine.low %v5159_v10, %v5175_v1  ;;  %v5225_v31 = vcombine.high %v5159_v10, %v5175_v1  ;;  %v16467_v44 = vcombine.low %v11362_v38, %v11368_v48  ;;  %v16538_v50 = vld [vmem:[#allocation146_spill] sm:$0xff] }
 0x434   : > { %v11540_v16 = vpop.permute.xlu0 %2220  ;;  %16465 = vst [vmem:[#allocation115_spill] sm:$0xff] %v11545_v55  ;;  %16466 = vst [vmem:[#allocation107_spill] sm:$0xff] %v11548_v30  ;;  %v11557_v15 = vrot.slane %v4680_v2, %v10383_v45  ;;  %v16471_v10 = vsub.f32 %v9413_v56, %v9415_v57  ;;  %v16472_v1 = vcombine.high %v11362_v38, %v11368_v48 }
 0x435   : > { %2501 = vbcast.lane.b32.xlu1 %v2495_v26, 264  ;;  %v4952_v37 = vcombine.low %v4887_v13, %v4903_v24  ;;  %v4953_v9 = vcombine.high %v4887_v13, %v4903_v24  ;;  %v11554_v5 = vrot.slane %v16467_v44, %v10383_v45  ;;  %v11573_v24 = vrot.slane %v4681_v47, %v10383_v45 }
 0x436   : > { %2497 = vbcast.lane.b32.xlu0 %v2495_v26, 256  ;;  %16469 = vst [vmem:[#allocation116_spill] sm:$0xff] %v11557_v15  ;;  %v11564_v3 = vsel %vm15920_vm0, %v16471_v10, %v16470_v19  ;;  %v11570_v13 = vrot.slane %v16472_v1, %v10383_v45  ;;  %v16475_v2 = vcombine.low %v11351_v41, %v11354_v61 }
 0x437   : > { %16468 = vst [vmem:[#allocation108_spill] sm:$0xff] %v11554_v5  ;;  %v2236_v18 = vpop.permute.xlu1 %2235  ;;  %16474 = vst [vmem:[#allocation299_spill] sm:$0xff] %v11573_v24  ;;  %v16477_v56 = vcombine.high %v11351_v41, %v11354_v61  ;;  %v11588_v38 = vrot.slane %v4952_v37, %v10383_v45  ;;  %v11593_v47 = vrot.slane %v4953_v9, %v10383_v45  ;;  %v16510_v24 = vld [vmem:[#allocation130_spill] sm:$0xff]  ;;  %v16523_v5 = vld [vmem:[#allocation141_spill] sm:$0xff] }
 0x438   : > { %16473 = vst [vmem:[#allocation13_spill] sm:$0xff] %v11570_v13  ;;  %v2232_v44 = vpop.permute.xlu0 %2231  ;;  %v11579_v23 = vrot.slane %v16475_v2, %v10383_v45  ;;  %v16481_v61 = vcombine.low %v11411_v27, %v11414_v33  ;;  %v16483_v9 = vcombine.high %v11411_v27, %v11414_v33  ;;  %v2514_v2 = vrot.slane %v11564_v3, %v9426_v0  ;;  %v16522_v13 = vld [vmem:[#allocation133_spill] sm:$0xff] }
 0x439   : > { %v11585_v57 = vrot.slane %v16477_v56, %v10383_v45  ;;  %16479 = vst [vmem:[#allocation302_spill] sm:$0xff] %v11588_v38  ;;  %2509 = vbcast.lane.b32.xlu1 %v2495_v26, 280  ;;  %16480 = vst [vmem:[#allocation303_spill] sm:$0xff] %v11593_v47  ;;  %v11620_v41 = vrot.slane %v5224_v35, %v10383_v45  ;;  %v16487_v35 = vcombine.low %v11403_v36, %v11406_v11  ;;  %v16496_v38 = vld [vmem:[#allocation118_spill] sm:$0xff]  ;;  %v16506_v47 = vld [vmem:[#allocation128_spill] sm:$0xff] }
 0x43a   : > { %16476 = vst [vmem:[#allocation300_spill] sm:$0xff] %v11579_v23  ;;  %2505 = vbcast.lane.b32.xlu0 %v2495_v26, 272  ;;  %v11605_v37 = vrot.slane %v16481_v61, %v10383_v45  ;;  %v11611_v26 = vrot.slane %v16483_v9, %v10383_v45  ;;  %v11631_v9 = vrot.slane %v5225_v31, %v10383_v45 }
 0x43b   : > { %16478 = vst [vmem:[#allocation301_spill] sm:$0xff] %v11585_v57  ;;  %v11613_v1 = vpop.permute.xlu1 %2243  ;;  %16485 = vst [vmem:[#allocation306_spill] sm:$0xff] %v11620_v41  ;;  %v11637_v56 = vrot.slane %v16487_v35, %v10383_v45  ;;  %v16489_v31 = vcombine.high %v11403_v36, %v11406_v11  ;;  %v11656_v61 = vsel %vm2815_vm1, %v9834_v17, %v11492_v63  ;;  %v16494_v11 = vld [vmem:[#allocation117_spill] sm:$0xff]  ;;  %v16512_v57 = vld [vmem:[#allocation122_spill] sm:$0xff] }
 0x43c   : > { %16482 = vst [vmem:[#allocation304_spill] sm:$0xff] %v11605_v37  ;;  %16484 = vst [vmem:[#allocation305_spill] sm:$0xff] %v11611_v26  ;;  %v11622_v10 = vpop.permute.xlu0 %2239  ;;  %v16495_v63 = vld [vmem:[#allocation125_spill] sm:$0xff] }
 0x43d   : > { %16486 = vst [vmem:[#allocation307_spill] sm:$0xff] %v11631_v9  ;;  %2520 = vbcast.lane.b32.xlu1 %v2514_v2, 264  ;;  %16488 = vst [vmem:[#allocation308_spill] sm:$0xff] %v11637_v56  ;;  %v11649_v19 = vrot.slane %v16489_v31, %v10383_v45  ;;  %v11669_v31 = vsel %vm2815_vm1, %v16494_v11, %v11507_v46  ;;  %v2533_v11 = vrot.slane %v11564_v3, %v9431_v4  ;;  %v16500_v56 = vld [vmem:[#allocation119_spill] sm:$0xff]  ;;  %v16508_v26 = vld [vmem:[#allocation121_spill] sm:$0xff] }
 0x43e   : > { %2516 = vbcast.lane.b32.xlu0 %v2514_v2, 256  ;;  %16491 = vst [vmem:[#allocation310_spill] sm:$0xff] %v11656_v61  ;;  %v16502_v9 = vld [vmem:[#allocation127_spill] sm:$0xff]  ;;  %v11717_v37 = vsel %vm2815_vm1, %v16508_v26, %v2232_v44  ;;  %v2552_v26 = vrot.slane %v11564_v3, %v9435_v6 }
 0x43f   : > { %16490 = vst [vmem:[#allocation309_spill] sm:$0xff] %v11649_v19  ;;  %v2255_v48 = vpop.permute.xlu1 %2254 }
 0x440   : > { %v11660_v27 = vsel %vm2815_vm1, %v16492_v54, %v2255_v48  ;;  %v2251_v33 = vpop.permute.xlu0 %2250 }
 0x441   : > { %16493 = vst [vmem:[#allocation124_spill] sm:$0xff] %v11660_v27  ;;  %v5521_v17 = vcombine.high %v11656_v61, %v11660_v27  ;;  %v11675_v35 = vsel %vm2815_vm1, %v16495_v63, %v2251_v33  ;;  %2528 = vbcast.lane.b32.xlu1 %v2514_v2, 280  ;;  %v11688_v33 = vsel %vm2815_vm1, %v16496_v38, %v11532_v43  ;;  %v16498_v63 = vld [vmem:[#allocation126_spill] sm:$0xff] }
 0x442   : > { %v5249_v48 = vcombine.high %v11669_v31, %v11675_v35  ;;  %2524 = vbcast.lane.b32.xlu0 %v2514_v2, 272  ;;  %16497 = vst [vmem:[#allocation117_spill] sm:$0xff] %v11688_v33  ;;  %v11697_v2 = vsel %vm2815_vm1, %v16500_v56, %v11540_v16 }
 0x443   : > { %v2263_v46 = vpop.permute.xlu1 %2262  ;;  %16501 = vst [vmem:[#allocation118_spill] sm:$0xff] %v11697_v2 }
 0x444   : > { %v11692_v41 = vsel %vm2815_vm1, %v16498_v63, %v2263_v46  ;;  %v2259_v54 = vpop.permute.xlu0 %2258  ;;  %v16504_v46 = vld [vmem:[#allocation120_spill] sm:$0xff] }
 0x445   : > { %16499 = vst [vmem:[#allocation125_spill] sm:$0xff] %v11692_v41  ;;  %v6065_v36 = vcombine.high %v11688_v33, %v11692_v41  ;;  %v11703_v19 = vsel %vm2815_vm1, %v16502_v9, %v2259_v54  ;;  %2539 = vbcast.lane.b32.xlu1 %v2533_v11, 264  ;;  %v11709_v63 = vsel %vm2815_vm1, %v16504_v46, %v2236_v18  ;;  %v16509_v54 = vld [vmem:[#allocation129_spill] sm:$0xff] }
 0x446   : > { %16503 = vst [vmem:[#allocation126_spill] sm:$0xff] %v11703_v19  ;;  %v5793_v43 = vcombine.high %v11697_v2, %v11703_v19  ;;  %2535 = vbcast.lane.b32.xlu0 %v2533_v11, 256  ;;  %16505 = vst [vmem:[#allocation119_spill] sm:$0xff] %v11709_v63  ;;  %v11736_v46 = vrot.slane %v5249_v48, %v10233_v7  ;;  %v2590_v19 = vrot.slane %v11564_v3, %v9443_v12 }
 0x447   : > { %v2274_v38 = vpop.permute.xlu1 %2273 }
 0x448   : > { %v11713_v16 = vsel %vm2815_vm1, %v16506_v47, %v2274_v38  ;;  %v2270_v56 = vpop.permute.xlu0 %2269  ;;  %v11728_v47 = vrot.slane %v5521_v17, %v10233_v7  ;;  %v16514_v17 = vld [vmem:[#allocation123_spill] sm:$0xff] }
 0x449   : > { %16507 = vst [vmem:[#allocation127_spill] sm:$0xff] %v11713_v16  ;;  %v5537_v9 = vcombine.high %v11709_v63, %v11713_v16  ;;  %v11723_v33 = vsel %vm2815_vm1, %v16509_v54, %v2270_v56  ;;  %2547 = vbcast.lane.b32.xlu1 %v2533_v11, 280  ;;  %v11761_v23 = vsel %vm2815_vm1, %v16514_v17, %v11622_v10  ;;  %v16534_v16 = vld [vmem:[#allocation144_spill] sm:$0xff] }
 0x44a   : > { %v5265_v18 = vcombine.high %v11717_v37, %v11723_v33  ;;  %2543 = vbcast.lane.b32.xlu0 %v2533_v11, 272  ;;  %v11756_v11 = vsel %vm2815_vm1, %v16512_v57, %v11613_v1  ;;  %16515 = vst [vmem:[#allocation121_spill] sm:$0xff] %v11761_v23  ;;  %v11772_v57 = vrot.slane %v6065_v36, %v10233_v7 }
 0x44b   : > { %v11731_v38 = vrot.slane %v5537_v9, %v10233_v7  ;;  %v2282_v44 = vpop.permute.xlu1 %2281  ;;  %16513 = vst [vmem:[#allocation128_spill] sm:$0xff] %v11756_v11  ;;  %v16516_v9 = vld [vmem:[#allocation131_spill] sm:$0xff]  ;;  %v2571_v17 = vrot.slane %v11564_v3, %v9439_v8 }
 0x44c   : > { %v11739_v56 = vrot.slane %v5265_v18, %v10233_v7  ;;  %v2278_v54 = vpop.permute.xlu0 %2277  ;;  %v11751_v48 = vsel %vm2815_vm1, %v16510_v24, %v2282_v44 }
 0x44d   : > { %2558 = vbcast.lane.b32.xlu1 %v2552_v26, 264  ;;  %16511 = vst [vmem:[#allocation120_spill] sm:$0xff] %v11751_v48  ;;  %v6081_v41 = vcombine.high %v11756_v11, %v11751_v48  ;;  %v11767_v24 = vsel %vm2815_vm1, %v16516_v9, %v2278_v54  ;;  %v11780_v11 = vrot.slane %v5793_v43, %v10233_v7 }
 0x44e   : > { %2554 = vbcast.lane.b32.xlu0 %v2552_v26, 256  ;;  %16517 = vst [vmem:[#allocation129_spill] sm:$0xff] %v11767_v24  ;;  %v5809_v44 = vcombine.high %v11761_v23, %v11767_v24  ;;  %v16518_v23 = vld [vmem:[#allocation132_spill] sm:$0xff] }
 0x44f   : > { %v2293_v18 = vpop.permute.xlu1 %2292  ;;  %v11775_v1 = vrot.slane %v6081_v41, %v10233_v7  ;;  %v16520_v41 = vld [vmem:[#allocation140_spill] sm:$0xff] }
 0x450   : > { %v2289_v15 = vpop.permute.xlu0 %2288  ;;  %v11783_v54 = vrot.slane %v5809_v44, %v10233_v7  ;;  %v11797_v24 = vsel %vm2815_vm1, %v16518_v23, %v2293_v18  ;;  %v2609_v23 = vrot.slane %v11564_v3, %v9447_v14  ;;  %v16524_v18 = vld [vmem:[#allocation134_spill] sm:$0xff] }
 0x451   : > { %2566 = vbcast.lane.b32.xlu1 %v2552_v26, 280  ;;  %16519 = vst [vmem:[#allocation130_spill] sm:$0xff] %v11797_v24 }
 0x452   : > { %2562 = vbcast.lane.b32.xlu0 %v2552_v26, 272 }
 0x453   : > { %v2301_v10 = vpop.permute.xlu1 %2300 }
 0x454   : > { %v2297_v9 = vpop.permute.xlu0 %2296 }
 0x455   : > { %2577 = vbcast.lane.b32.xlu1 %v2571_v17, 264 }
 0x456   : > { %2573 = vbcast.lane.b32.xlu0 %v2571_v17, 256 }
 0x457   : > { %v2312_v43 = vpop.permute.xlu1 %2311 }
 0x458   : > { %v2308_v2 = vpop.permute.xlu0 %2307 }
 0x459   : > { %2585 = vbcast.lane.b32.xlu1 %v2571_v17, 280 }
 0x45a   : > { %2581 = vbcast.lane.b32.xlu0 %v2571_v17, 272  ;;  %v2960_v17 = vsel %vm2815_vm1, %v16522_v13, %v2289_v15 }
 0x45b   : > { %v2320_v44 = vpop.permute.xlu1 %2319 }
 0x45c   : > { %v2316_v26 = vpop.permute.xlu0 %2315 }
 0x45d   : > { %2596 = vbcast.lane.b32.xlu1 %v2590_v19, 264 }
 0x45e   : > { %2592 = vbcast.lane.b32.xlu0 %v2590_v19, 256 }
 0x45f   : > { %v2331_v36 = vpop.permute.xlu1 %2330 }
 0x460   : > { %v11801_v48 = vsel %vm2815_vm1, %v16520_v41, %v2331_v36  ;;  %v2327_v30 = vpop.permute.xlu0 %2326  ;;  %v11813_v36 = vsel %vm2815_vm1, %v16524_v18, %v2301_v10  ;;  %v16526_v41 = vld [vmem:[#allocation142_spill] sm:$0xff] }
 0x461   : > { %16521 = vst [vmem:[#allocation122_spill] sm:$0xff] %v11801_v48  ;;  %v5553_v55 = vcombine.high %v11797_v24, %v11801_v48  ;;  %v2968_v61 = vsel %vm2815_vm1, %v16523_v5, %v2327_v30  ;;  %2604 = vbcast.lane.b32.xlu1 %v2590_v19, 280  ;;  %16525 = vst [vmem:[#allocation123_spill] sm:$0xff] %v11813_v36  ;;  %v16528_v24 = vld [vmem:[#allocation135_spill] sm:$0xff] }
 0x462   : > { %v5281_v27 = vcombine.high %v2960_v17, %v2968_v61  ;;  %2600 = vbcast.lane.b32.xlu0 %v2590_v19, 272  ;;  %v11821_v48 = vsel %vm2815_vm1, %v16528_v24, %v2297_v9  ;;  %v16530_v5 = vld [vmem:[#allocation143_spill] sm:$0xff] }
 0x463   : > { %v2339_v63 = vpop.permute.xlu1 %2338  ;;  %16529 = vst [vmem:[#allocation132_spill] sm:$0xff] %v11821_v48 }
 0x464   : > { %v11817_v15 = vsel %vm2815_vm1, %v16526_v41, %v2339_v63  ;;  %v2335_v13 = vpop.permute.xlu0 %2334  ;;  %v16532_v63 = vld [vmem:[#allocation136_spill] sm:$0xff] }
 0x465   : > { %16527 = vst [vmem:[#allocation131_spill] sm:$0xff] %v11817_v15  ;;  %v6097_v30 = vcombine.high %v11813_v36, %v11817_v15  ;;  %v11827_v19 = vsel %vm2815_vm1, %v16530_v5, %v2335_v13  ;;  %2615 = vbcast.lane.b32.xlu1 %v2609_v23, 264  ;;  %v11833_v41 = vsel %vm2815_vm1, %v16532_v63, %v2312_v43  ;;  %v16536_v36 = vld [vmem:[#allocation137_spill] sm:$0xff] }
 0x466   : > { %16531 = vst [vmem:[#allocation140_spill] sm:$0xff] %v11827_v19  ;;  %v5825_v10 = vcombine.high %v11821_v48, %v11827_v19  ;;  %2611 = vbcast.lane.b32.xlu0 %v2609_v23, 256  ;;  %16533 = vst [vmem:[#allocation133_spill] sm:$0xff] %v11833_v41  ;;  %v2964_v15 = vsel %vm2815_vm1, %v16536_v36, %v2308_v2  ;;  %v16537_v5 = vld [vmem:[#allocation145_spill] sm:$0xff]  ;;  %v5567_v43 = vrot.slane %v5553_v55, %v10233_v7 }
 0x467   : > { %v2350_v18 = vpop.permute.xlu1 %2349  ;;  %v5264_v2 = vcombine.low %v11717_v37, %v11723_v33  ;;  %v5280_v36 = vcombine.low %v2960_v17, %v2968_v61 }
 0x468   : > { %v11837_v24 = vsel %vm2815_vm1, %v16534_v16, %v2350_v18  ;;  %v2346_v9 = vpop.permute.xlu0 %2345  ;;  %v2628_v18 = vrot.slane %v11564_v3, %v9451_v20 }
 0x469   : > { %16535 = vst [vmem:[#allocation141_spill] sm:$0xff] %v11837_v24  ;;  %v5569_v13 = vcombine.high %v11833_v41, %v11837_v24  ;;  %v2972_v48 = vsel %vm2815_vm1, %v16537_v5, %v2346_v9  ;;  %2623 = vbcast.lane.b32.xlu1 %v2609_v23, 280  ;;  %v5295_v41 = vrot.slane %v5281_v27, %v10233_v7  ;;  %v16540_v27 = vld [vmem:[#allocation138_spill] sm:$0xff] }
 0x46a   : > { %v5296_v19 = vcombine.low %v2964_v15, %v2972_v48  ;;  %v5297_v40 = vcombine.high %v2964_v15, %v2972_v48  ;;  %2619 = vbcast.lane.b32.xlu0 %v2609_v23, 272  ;;  %v5248_v48 = vcombine.low %v11669_v31, %v11675_v35  ;;  %v11869_v35 = vsel %vm2815_vm1, %v16540_v27, %v2320_v44 }
 0x46b   : > { %v5583_v63 = vrot.slane %v5569_v13, %v10233_v7  ;;  %v2358_v16 = vpop.permute.xlu1 %2357  ;;  %16541 = vst [vmem:[#allocation142_spill] sm:$0xff] %v11869_v35  ;;  %v11872_v31 = vrot.slane %v5280_v36, %v10233_v7 }
 0x46c   : > { %v5311_v9 = vrot.slane %v5297_v40, %v10233_v7  ;;  %v2354_v5 = vpop.permute.xlu0 %2353  ;;  %v11856_v15 = vrot.slane %v5296_v19, %v10233_v7  ;;  %v11860_v37 = vsel %vm2815_vm1, %v16538_v50, %v2358_v16  ;;  %v11865_v40 = vrot.slane %v5264_v2, %v10233_v7  ;;  %v16542_v50 = vld [vmem:[#allocation139_spill] sm:$0xff] }
 0x46d   : > { %v5632_v23 = vcombine.low %v5567_v43, %v5583_v63  ;;  %v5633_v55 = vcombine.high %v5567_v43, %v5583_v63  ;;  %2634 = vbcast.lane.b32.xlu1 %v2628_v18, 264  ;;  %16539 = vst [vmem:[#allocation134_spill] sm:$0xff] %v11860_v37  ;;  %v11881_v19 = vsel %vm2815_vm1, %v16542_v50, %v2316_v26  ;;  %v16544_v43 = vld [vmem:[#allocation147_spill] sm:$0xff] }
 0x46e   : > { %v5360_v13 = vcombine.low %v5295_v41, %v5311_v9  ;;  %v5361_v24 = vcombine.high %v5295_v41, %v5311_v9  ;;  %2630 = vbcast.lane.b32.xlu0 %v2628_v18, 256  ;;  %16543 = vst [vmem:[#allocation135_spill] sm:$0xff] %v11881_v19  ;;  %v6113_v41 = vcombine.high %v11869_v35, %v11860_v37 }
 0x46f   : > { %v11862_v61 = vpop.permute.xlu1 %2368  ;;  %v11887_v63 = vsel %vm2815_vm1, %v16544_v43, %v2354_v5  ;;  %v11890_v44 = vrot.slane %v5248_v48, %v10233_v7  ;;  %v16546_v16 = vcombine.low %v11736_v46, %v11739_v56  ;;  %v5344_v26 = vcombine.low %v11872_v31, %v11856_v15 }
 0x470   : > { %v11875_v33 = vrot.slane %v5360_v13, %v10383_v45  ;;  %v11877_v17 = vpop.permute.xlu0 %2364  ;;  %16545 = vst [vmem:[#allocation143_spill] sm:$0xff] %v11887_v63  ;;  %v5841_v36 = vcombine.high %v11881_v19, %v11887_v63  ;;  %v6111_v9 = vrot.slane %v6097_v30, %v10233_v7  ;;  %v6127_v5 = vrot.slane %v6113_v41, %v10233_v7  ;;  %v16549_v63 = vld [vmem:[#allocation12_spill] sm:$0xff] }
 0x471   : > { %2642 = vbcast.lane.b32.xlu1 %v2628_v18, 280  ;;  %v11896_v2 = vrot.slane %v16546_v16, %v10383_v45  ;;  %v2647_v48 = vrot.slane %v11564_v3, %v9455_v25  ;;  %v5312_v27 = vcombine.low %v11890_v44, %v11865_v40  ;;  %v5839_v50 = vrot.slane %v5825_v10, %v10233_v7 }
 0x472   : > { %2638 = vbcast.lane.b32.xlu0 %v2628_v18, 272  ;;  %v5855_v43 = vrot.slane %v5841_v36, %v10233_v7  ;;  %v6176_v30 = vcombine.low %v6111_v9, %v6127_v5  ;;  %v6177_v35 = vcombine.high %v6111_v9, %v6127_v5  ;;  %v11917_v41 = vrot.slane %v5344_v26, %v10383_v45 }
 0x473   : > { %v11904_v13 = vpop.permute.xlu1 %2376  ;;  %v11920_v3 = vrot.slane %v5361_v24, %v10383_v45  ;;  %v11923_v10 = vrot.slane %v5632_v23, %v10383_v45  ;;  %v16550_v18 = vsub.f32 %v9409_v59, %v9411_v52  ;;  %v11933_v26 = vrot.slane %v5312_v27, %v10383_v45 }
 0x474   : > { %v11912_v16 = vpop.permute.xlu0 %2372  ;;  %16547 = vst [vmem:[#allocation136_spill] sm:$0xff] %v11917_v41  ;;  %v5904_v37 = vcombine.low %v5839_v50, %v5855_v43  ;;  %v5905_v19 = vcombine.high %v5839_v50, %v5855_v43  ;;  %v16552_v24 = vcombine.high %v11736_v46, %v11739_v56  ;;  %v11942_v23 = vrot.slane %v5633_v55, %v10383_v45  ;;  %v16571_v56 = vld [vmem:[#allocation155_spill] sm:$0xff] }
 0x475   : > { %2653 = vbcast.lane.b32.xlu1 %v2647_v48, 264  ;;  %16548 = vst [vmem:[#allocation144_spill] sm:$0xff] %v11923_v10  ;;  %v11930_v9 = vsel %vm15920_vm0, %v16550_v18, %v16549_v63  ;;  %16551 = vst [vmem:[#allocation137_spill] sm:$0xff] %v11933_v26  ;;  %v16554_v59 = vcombine.low %v11728_v47, %v11731_v38  ;;  %v16556_v63 = vcombine.high %v11728_v47, %v11731_v38 }
 0x476   : > { %2649 = vbcast.lane.b32.xlu0 %v2647_v48, 256  ;;  %v11939_v5 = vrot.slane %v16552_v24, %v10383_v45  ;;  %16553 = vst [vmem:[#allocation145_spill] sm:$0xff] %v11942_v23  ;;  %v11957_v46 = vrot.slane %v5904_v37, %v10383_v45  ;;  %v11962_v55 = vrot.slane %v5905_v19, %v10383_v45  ;;  %v16601_v23 = vld [vmem:[#allocation164_spill] sm:$0xff] }
 0x477   : > { %v2388_v36 = vpop.permute.xlu1 %2387  ;;  %v11948_v52 = vrot.slane %v16554_v59, %v10383_v45  ;;  %v11954_v27 = vrot.slane %v16556_v63, %v10383_v45  ;;  %v16560_v38 = vcombine.low %v11780_v11, %v11783_v54  ;;  %v16562_v19 = vcombine.high %v11780_v11, %v11783_v54 }
 0x478   : > { %v2384_v50 = vpop.permute.xlu0 %2383  ;;  %16558 = vst [vmem:[#allocation139_spill] sm:$0xff] %v11957_v46  ;;  %16559 = vst [vmem:[#allocation147_spill] sm:$0xff] %v11962_v55  ;;  %v2666_v59 = vrot.slane %v11930_v9, %v9426_v0  ;;  %v11989_v43 = vrot.slane %v6176_v30, %v10383_v45  ;;  %v16566_v0 = vcombine.low %v11772_v57, %v11775_v1  ;;  %v16588_v55 = vld [vmem:[#allocation160_spill] sm:$0xff] }
 0x479   : > { %16555 = vst [vmem:[#allocation146_spill] sm:$0xff] %v11948_v52  ;;  %16557 = vst [vmem:[#allocation138_spill] sm:$0xff] %v11954_v27  ;;  %2661 = vbcast.lane.b32.xlu1 %v2647_v48, 280  ;;  %v11974_v37 = vrot.slane %v16560_v38, %v10383_v45  ;;  %v12025_v38 = vsel %vm2815_vm1, %v9920_v53, %v11862_v61  ;;  %v16574_v53 = vld [vmem:[#allocation156_spill] sm:$0xff] }
 0x47a   : > { %2657 = vbcast.lane.b32.xlu0 %v2647_v48, 272  ;;  %v11980_v48 = vrot.slane %v16562_v19, %v10383_v45  ;;  %16564 = vst [vmem:[#allocation312_spill] sm:$0xff] %v11989_v43  ;;  %v12000_v19 = vrot.slane %v6177_v35, %v10383_v45  ;;  %v12006_v30 = vrot.slane %v16566_v0, %v10383_v45  ;;  %16570 = vst [vmem:[#allocation316_spill] sm:$0xff] %v12025_v38  ;;  %v16602_v27 = vld [vmem:[#allocation172_spill] sm:$0xff] }
 0x47b   : > { %16561 = vst [vmem:[#allocation12_spill] sm:$0xff] %v11974_v37  ;;  %v11982_v24 = vpop.permute.xlu1 %2395  ;;  %v16568_v35 = vcombine.high %v11772_v57, %v11775_v1  ;;  %v16573_v1 = vld [vmem:[#allocation148_spill] sm:$0xff]  ;;  %v2685_v43 = vrot.slane %v11930_v9, %v9431_v4 }
 0x47c   : > { %16563 = vst [vmem:[#allocation311_spill] sm:$0xff] %v11980_v48  ;;  %v11991_v47 = vpop.permute.xlu0 %2391  ;;  %16565 = vst [vmem:[#allocation313_spill] sm:$0xff] %v12000_v19  ;;  %v16581_v19 = vld [vmem:[#allocation158_spill] sm:$0xff] }
 0x47d   : > { %2672 = vbcast.lane.b32.xlu1 %v2666_v59, 264  ;;  %16567 = vst [vmem:[#allocation314_spill] sm:$0xff] %v12006_v30  ;;  %v12018_v63 = vrot.slane %v16568_v35, %v10383_v45  ;;  %v2976_v35 = vsel %vm2815_vm1, %v16573_v1, %v11877_v17  ;;  %v16575_v17 = vld [vmem:[#allocation149_spill] sm:$0xff] }
 0x47e   : > { %2668 = vbcast.lane.b32.xlu0 %v2666_v59, 256  ;;  %v12051_v1 = vsel %vm2815_vm1, %v16575_v17, %v11904_v13  ;;  %v16577_v30 = vld [vmem:[#allocation157_spill] sm:$0xff] }
 0x47f   : > { %16569 = vst [vmem:[#allocation315_spill] sm:$0xff] %v12018_v63  ;;  %v2407_v18 = vpop.permute.xlu1 %2406  ;;  %16576 = vst [vmem:[#allocation148_spill] sm:$0xff] %v12051_v1 }
 0x480   : > { %v12029_v11 = vsel %vm2815_vm1, %v16571_v56, %v2407_v18  ;;  %v2403_v54 = vpop.permute.xlu0 %2402  ;;  %v16579_v56 = vld [vmem:[#allocation150_spill] sm:$0xff] }
 0x481   : > { %16572 = vst [vmem:[#allocation155_spill] sm:$0xff] %v12029_v11  ;;  %v5657_v0 = vcombine.high %v12025_v38, %v12029_v11  ;;  %v2984_v61 = vsel %vm2815_vm1, %v16574_v53, %v2403_v54  ;;  %2680 = vbcast.lane.b32.xlu1 %v2666_v59, 280  ;;  %v16607_v11 = vld [vmem:[#allocation166_spill] sm:$0xff] }
 0x482   : > { %v5385_v18 = vcombine.high %v2976_v35, %v2984_v61  ;;  %2676 = vbcast.lane.b32.xlu0 %v2666_v59, 272  ;;  %v12060_v59 = vsel %vm2815_vm1, %v16579_v56, %v11912_v16  ;;  %v5384_v63 = vcombine.low %v2976_v35, %v2984_v61  ;;  %v16585_v16 = vld [vmem:[#allocation159_spill] sm:$0xff] }
 0x483   : > { %v2415_v57 = vpop.permute.xlu1 %2414  ;;  %16580 = vst [vmem:[#allocation149_spill] sm:$0xff] %v12060_v59 }
 0x484   : > { %v12055_v54 = vsel %vm2815_vm1, %v16577_v30, %v2415_v57  ;;  %v2411_v53 = vpop.permute.xlu0 %2410  ;;  %v16583_v57 = vld [vmem:[#allocation151_spill] sm:$0xff] }
 0x485   : > { %16578 = vst [vmem:[#allocation156_spill] sm:$0xff] %v12055_v54  ;;  %v6201_v46 = vcombine.high %v12051_v1, %v12055_v54  ;;  %v12066_v4 = vsel %vm2815_vm1, %v16581_v19, %v2411_v53  ;;  %2691 = vbcast.lane.b32.xlu1 %v2685_v43, 264  ;;  %v12072_v17 = vsel %vm2815_vm1, %v16583_v57, %v2388_v36  ;;  %v16587_v54 = vld [vmem:[#allocation152_spill] sm:$0xff] }
 0x486   : > { %16582 = vst [vmem:[#allocation157_spill] sm:$0xff] %v12066_v4  ;;  %v5929_v13 = vcombine.high %v12060_v59, %v12066_v4  ;;  %2687 = vbcast.lane.b32.xlu0 %v2685_v43, 256  ;;  %16584 = vst [vmem:[#allocation150_spill] sm:$0xff] %v12072_v17  ;;  %v2980_v19 = vsel %vm2815_vm1, %v16587_v54, %v2384_v50  ;;  %v12085_v36 = vrot.slane %v5657_v0, %v10233_v7  ;;  %v16597_v4 = vld [vmem:[#allocation163_spill] sm:$0xff] }
 0x487   : > { %v2426_v30 = vpop.permute.xlu1 %2425  ;;  %v2704_v50 = vrot.slane %v11930_v9, %v9435_v6  ;;  %v12093_v54 = vrot.slane %v5384_v63, %v10233_v7  ;;  %v16595_v63 = vld [vmem:[#allocation162_spill] sm:$0xff] }
 0x488   : > { %v12076_v56 = vsel %vm2815_vm1, %v16585_v16, %v2426_v30  ;;  %v2422_v1 = vpop.permute.xlu0 %2421  ;;  %v12096_v30 = vrot.slane %v5385_v18, %v10233_v7  ;;  %v16589_v18 = vld [vmem:[#allocation161_spill] sm:$0xff]  ;;  %v12145_v6 = vrot.slane %v5929_v13, %v10233_v7 }
 0x489   : > { %16586 = vst [vmem:[#allocation158_spill] sm:$0xff] %v12076_v56  ;;  %v5673_v53 = vcombine.high %v12072_v17, %v12076_v56  ;;  %v2988_v48 = vsel %vm2815_vm1, %v16588_v55, %v2422_v1  ;;  %2699 = vbcast.lane.b32.xlu1 %v2685_v43, 280  ;;  %v16591_v16 = vld [vmem:[#allocation153_spill] sm:$0xff]  ;;  %v16593_v1 = vld [vmem:[#allocation154_spill] sm:$0xff] }
 0x48a   : > { %v5400_v37 = vcombine.low %v2980_v19, %v2988_v48  ;;  %v5401_v59 = vcombine.high %v2980_v19, %v2988_v48  ;;  %2695 = vbcast.lane.b32.xlu0 %v2685_v43, 272  ;;  %v12121_v19 = vsel %vm2815_vm1, %v16591_v16, %v11982_v24  ;;  %v12126_v0 = vsel %vm2815_vm1, %v16593_v1, %v11991_v47 }
 0x48b   : > { %v12088_v35 = vrot.slane %v5673_v53, %v10233_v7  ;;  %v2434_v61 = vpop.permute.xlu1 %2433  ;;  %16592 = vst [vmem:[#allocation159_spill] sm:$0xff] %v12121_v19  ;;  %16594 = vst [vmem:[#allocation152_spill] sm:$0xff] %v12126_v0  ;;  %v12137_v24 = vrot.slane %v6201_v46, %v10233_v7  ;;  %v2723_v1 = vrot.slane %v11930_v9, %v9439_v8 }
 0x48c   : > { %v12099_v55 = vrot.slane %v5400_v37, %v10233_v7  ;;  %v12102_v43 = vrot.slane %v5401_v59, %v10233_v7  ;;  %v2430_v48 = vpop.permute.xlu0 %2429  ;;  %v12116_v59 = vsel %vm2815_vm1, %v16589_v18, %v2434_v61 }
 0x48d   : > { %2710 = vbcast.lane.b32.xlu1 %v2704_v50, 264  ;;  %16590 = vst [vmem:[#allocation151_spill] sm:$0xff] %v12116_v59  ;;  %v6217_v37 = vcombine.high %v12121_v19, %v12116_v59  ;;  %v12132_v61 = vsel %vm2815_vm1, %v16595_v63, %v2430_v48  ;;  %v2742_v59 = vrot.slane %v11930_v9, %v9443_v12 }
 0x48e   : > { %2706 = vbcast.lane.b32.xlu0 %v2704_v50, 256  ;;  %16596 = vst [vmem:[#allocation160_spill] sm:$0xff] %v12132_v61  ;;  %v5945_v18 = vcombine.high %v12126_v0, %v12132_v61  ;;  %v16599_v0 = vld [vmem:[#allocation171_spill] sm:$0xff] }
 0x48f   : > { %v2445_v57 = vpop.permute.xlu1 %2444  ;;  %v12140_v16 = vrot.slane %v6217_v37, %v10233_v7 }
 0x490   : > { %v2441_v53 = vpop.permute.xlu0 %2440  ;;  %v12148_v48 = vrot.slane %v5945_v18, %v10233_v7  ;;  %v12164_v37 = vsel %vm2815_vm1, %v16597_v4, %v2445_v57  ;;  %v2761_v4 = vrot.slane %v11930_v9, %v9447_v14  ;;  %v16603_v57 = vld [vmem:[#allocation165_spill] sm:$0xff] }
 0x491   : > { %2718 = vbcast.lane.b32.xlu1 %v2704_v50, 280  ;;  %16598 = vst [vmem:[#allocation161_spill] sm:$0xff] %v12164_v37 }
 0x492   : > { %2714 = vbcast.lane.b32.xlu0 %v2704_v50, 272 }
 0x493   : > { %v2453_v47 = vpop.permute.xlu1 %2452 }
 0x494   : > { %v2449_v63 = vpop.permute.xlu0 %2448 }
 0x495   : > { %2729 = vbcast.lane.b32.xlu1 %v2723_v1, 264 }
 0x496   : > { %2725 = vbcast.lane.b32.xlu0 %v2723_v1, 256 }
 0x497   : > { %v2464_v13 = vpop.permute.xlu1 %2463 }
 0x498   : > { %v2460_v19 = vpop.permute.xlu0 %2459 }
 0x499   : > { %2737 = vbcast.lane.b32.xlu1 %v2723_v1, 280 }
 0x49a   : > { %2733 = vbcast.lane.b32.xlu0 %v2723_v1, 272  ;;  %v2992_v1 = vsel %vm2815_vm1, %v16601_v23, %v2441_v53 }
 0x49b   : > { %v2472_v18 = vpop.permute.xlu1 %2471 }
 0x49c   : > { %v12160_v50 = vpop.permute.xlu0 %2467 }
 0x49d   : > { %2748 = vbcast.lane.b32.xlu1 %v2742_v59, 264 }
 0x49e   : > { %2744 = vbcast.lane.b32.xlu0 %v2742_v59, 256 }
 0x49f   : > { %v2483_v46 = vpop.permute.xlu1 %2482 }
 0x4a0   : > { %v12168_v8 = vsel %vm2815_vm1, %v16599_v0, %v2483_v46  ;;  %v2479_v61 = vpop.permute.xlu0 %2478  ;;  %v12180_v0 = vsel %vm2815_vm1, %v16603_v57, %v2453_v47  ;;  %v16605_v46 = vld [vmem:[#allocation173_spill] sm:$0xff] }
 0x4a1   : > { %16600 = vst [vmem:[#allocation153_spill] sm:$0xff] %v12168_v8  ;;  %v5689_v12 = vcombine.high %v12164_v37, %v12168_v8  ;;  %v3000_v10 = vsel %vm2815_vm1, %v16602_v27, %v2479_v61  ;;  %2756 = vbcast.lane.b32.xlu1 %v2742_v59, 280  ;;  %16604 = vst [vmem:[#allocation154_spill] sm:$0xff] %v12180_v0  ;;  %v12188_v37 = vsel %vm2815_vm1, %v16607_v11, %v2449_v63  ;;  %v16613_v11 = vld [vmem:[#allocation175_spill] sm:$0xff]  ;;  %v16616_v8 = vld [vmem:[#allocation176_spill] sm:$0xff] }
 0x4a2   : > { %v5417_v52 = vcombine.high %v2992_v1, %v3000_v10  ;;  %2752 = vbcast.lane.b32.xlu0 %v2742_v59, 272  ;;  %16608 = vst [vmem:[#allocation163_spill] sm:$0xff] %v12188_v37  ;;  %v16609_v59 = vld [vmem:[#allocation174_spill] sm:$0xff] }
 0x4a3   : > { %v2491_v38 = vpop.permute.xlu1 %2490 }
 0x4a4   : > { %v12184_v23 = vsel %vm2815_vm1, %v16605_v46, %v2491_v38  ;;  %v2487_v53 = vpop.permute.xlu0 %2486  ;;  %v16611_v38 = vld [vmem:[#allocation167_spill] sm:$0xff]  ;;  %v5416_v46 = vcombine.low %v2992_v1, %v3000_v10  ;;  %v5448_v10 = vcombine.low %v12093_v54, %v12099_v55 }
 0x4a5   : > { %16606 = vst [vmem:[#allocation162_spill] sm:$0xff] %v12184_v23  ;;  %v6233_v27 = vcombine.high %v12180_v0, %v12184_v23  ;;  %v12194_v61 = vsel %vm2815_vm1, %v16609_v59, %v2487_v53  ;;  %2767 = vbcast.lane.b32.xlu1 %v2761_v4, 264  ;;  %v12200_v57 = vsel %vm2815_vm1, %v16611_v38, %v2464_v13  ;;  %v16615_v23 = vld [vmem:[#allocation168_spill] sm:$0xff] }
 0x4a6   : > { %16610 = vst [vmem:[#allocation171_spill] sm:$0xff] %v12194_v61  ;;  %v5961_v14 = vcombine.high %v12188_v37, %v12194_v61  ;;  %2763 = vbcast.lane.b32.xlu0 %v2761_v4, 256  ;;  %16612 = vst [vmem:[#allocation164_spill] sm:$0xff] %v12200_v57  ;;  %v2996_v53 = vsel %vm2815_vm1, %v16615_v23, %v2460_v19  ;;  %v5703_v13 = vrot.slane %v5689_v12, %v10233_v7 }
 0x4a7   : > { %v2502_v47 = vpop.permute.xlu1 %2501  ;;  %v2780_v19 = vrot.slane %v11930_v9, %v9451_v20  ;;  %v5424_v23 = vrot.slane %v5416_v46, %v10233_v7  ;;  %v5431_v38 = vrot.slane %v5417_v52, %v10233_v7  ;;  %v12229_v52 = vrot.slane %v5448_v10, %v10383_v45  ;;  %v16624_v10 = vld [vmem:[#allocation170_spill] sm:$0xff] }
 0x4a8   : > { %v12204_v63 = vsel %vm2815_vm1, %v16613_v11, %v2502_v47  ;;  %v2498_v0 = vpop.permute.xlu0 %2497 }
 0x4a9   : > { %16614 = vst [vmem:[#allocation172_spill] sm:$0xff] %v12204_v63  ;;  %v5705_v59 = vcombine.high %v12200_v57, %v12204_v63  ;;  %v3004_v37 = vsel %vm2815_vm1, %v16616_v8, %v2498_v0  ;;  %2775 = vbcast.lane.b32.xlu1 %v2761_v4, 280  ;;  %16619 = vst [vmem:[#allocation173_spill] sm:$0xff] %v12229_v52 }
 0x4aa   : > { %v5432_v61 = vcombine.low %v2996_v53, %v3004_v37  ;;  %v5433_v17 = vcombine.high %v2996_v53, %v3004_v37  ;;  %2771 = vbcast.lane.b32.xlu0 %v2761_v4, 272  ;;  %v16617_v53 = vld [vmem:[#allocation177_spill] sm:$0xff] }
 0x4ab   : > { %v5719_v1 = vrot.slane %v5705_v59, %v10233_v7  ;;  %v2510_v47 = vpop.permute.xlu1 %2509 }
 0x4ac   : > { %v5440_v8 = vrot.slane %v5432_v61, %v10233_v7  ;;  %v5447_v37 = vrot.slane %v5433_v17, %v10233_v7  ;;  %v2506_v4 = vpop.permute.xlu0 %2505  ;;  %v12224_v12 = vsel %vm2815_vm1, %v16617_v53, %v2510_v47  ;;  %v16620_v61 = vld [vmem:[#allocation169_spill] sm:$0xff] }
 0x4ad   : > { %v5768_v0 = vcombine.low %v5703_v13, %v5719_v1  ;;  %v5769_v11 = vcombine.high %v5703_v13, %v5719_v1  ;;  %16618 = vst [vmem:[#allocation165_spill] sm:$0xff] %v12224_v12  ;;  %2786 = vbcast.lane.b32.xlu1 %v2780_v19, 264  ;;  %v12233_v17 = vsel %vm2815_vm1, %v16620_v61, %v2472_v18 }
 0x4ae   : > { %v5480_v59 = vcombine.low %v5424_v23, %v5440_v8  ;;  %v5481_v56 = vcombine.high %v5424_v23, %v5440_v8  ;;  %v5496_v57 = vcombine.low %v5431_v38, %v5447_v37  ;;  %v5497_v20 = vcombine.high %v5431_v38, %v5447_v37  ;;  %2782 = vbcast.lane.b32.xlu0 %v2780_v19, 256  ;;  %v16626_v37 = vld [vmem:[#allocation178_spill] sm:$0xff] }
 0x4af   : > { %v12226_v46 = vpop.permute.xlu1 %2520  ;;  %16621 = vst [vmem:[#allocation166_spill] sm:$0xff] %v12233_v17  ;;  %v16623_v23 = vcombine.high %v12093_v54, %v12099_v55  ;;  %v12252_v8 = vsel %vm2815_vm1, %v16624_v10, %v12160_v50  ;;  %v6249_v18 = vcombine.high %v12233_v17, %v12224_v12  ;;  %v2799_v54 = vrot.slane %v11930_v9, %v9455_v25 }
 0x4b0   : > { %v12236_v13 = vrot.slane %v5480_v59, %v10383_v45  ;;  %v12239_v1 = vrot.slane %v5481_v56, %v10383_v45  ;;  %v12241_v47 = vpop.permute.xlu0 %2516  ;;  %16625 = vst [vmem:[#allocation167_spill] sm:$0xff] %v12252_v8  ;;  %v12258_v56 = vsel %vm2815_vm1, %v16626_v37, %v2506_v4  ;;  %v6247_v55 = vrot.slane %v6233_v27, %v10233_v7 }
 0x4b1   : > { %v12247_v38 = vrot.slane %v16623_v23, %v10383_v45  ;;  %16627 = vst [vmem:[#allocation175_spill] sm:$0xff] %v12258_v56  ;;  %2794 = vbcast.lane.b32.xlu1 %v2780_v19, 280  ;;  %v5977_v53 = vcombine.high %v12252_v8, %v12258_v56  ;;  %v6263_v50 = vrot.slane %v6249_v18, %v10233_v7  ;;  %v16677_v56 = vld [vmem:[#allocation188_spill] sm:$0xff] }
 0x4b2   : > { %16622 = vst [vmem:[#allocation174_spill] sm:$0xff] %v12236_v13  ;;  %2790 = vbcast.lane.b32.xlu0 %v2780_v19, 272  ;;  %v5975_v23 = vrot.slane %v5961_v14, %v10233_v7  ;;  %v12279_v18 = vrot.slane %v5496_v57, %v10383_v45  ;;  %v12282_v37 = vrot.slane %v5497_v20, %v10383_v45 }
 0x4b3   : > { %v12266_v59 = vpop.permute.xlu1 %2528  ;;  %v5991_v10 = vrot.slane %v5977_v53, %v10233_v7  ;;  %v6312_v9 = vcombine.low %v6247_v55, %v6263_v50  ;;  %v6313_v27 = vcombine.high %v6247_v55, %v6263_v50  ;;  %v16630_v53 = vcombine.low %v12096_v30, %v12102_v43 }
 0x4b4   : > { %v12274_v19 = vpop.permute.xlu0 %2524  ;;  %16628 = vst [vmem:[#allocation168_spill] sm:$0xff] %v12279_v18  ;;  %16629 = vst [vmem:[#allocation176_spill] sm:$0xff] %v12282_v37  ;;  %v16632_v55 = vcombine.high %v12096_v30, %v12102_v43  ;;  %v12299_v20 = vrot.slane %v5768_v0, %v10383_v45  ;;  %v12302_v50 = vrot.slane %v5769_v11, %v10383_v45  ;;  %v16697_v18 = vld [vmem:[#allocation201_spill] sm:$0xff] }
 0x4b5   : > { %2805 = vbcast.lane.b32.xlu1 %v2799_v54, 264  ;;  %v6040_v61 = vcombine.low %v5975_v23, %v5991_v10  ;;  %v6041_v4 = vcombine.high %v5975_v23, %v5991_v10  ;;  %v12290_v17 = vrot.slane %v16630_v53, %v10383_v45  ;;  %v16636_v10 = vcombine.low %v12085_v36, %v12088_v35 }
 0x4b6   : > { %2801 = vbcast.lane.b32.xlu0 %v2799_v54, 256  ;;  %v12296_v57 = vrot.slane %v16632_v55, %v10383_v45  ;;  %16634 = vst [vmem:[#allocation170_spill] sm:$0xff] %v12299_v20  ;;  %16635 = vst [vmem:[#allocation178_spill] sm:$0xff] %v12302_v50  ;;  %v16638_v30 = vcombine.high %v12085_v36, %v12088_v35  ;;  %v16641_v36 = vcombine.low %v12145_v6, %v12148_v48  ;;  %v16685_v20 = vld [vmem:[#allocation204_spill] sm:$0xff] }
 0x4b7   : > { %v12284_v14 = vpop.permute.xlu1 %2539  ;;  %16631 = vst [vmem:[#allocation177_spill] sm:$0xff] %v12290_v17  ;;  %v12310_v53 = vrot.slane %v16636_v10, %v10383_v45  ;;  %v12319_v0 = vrot.slane %v6040_v61, %v10383_v45  ;;  %v3201_v55 = vcombine.high %v10458_v62, %v10452_v29  ;;  %v12343_v10 = vrot.slane %v6312_v9, %v10383_v45 }
 0x4b8   : > { %16633 = vst [vmem:[#allocation169_spill] sm:$0xff] %v12296_v57  ;;  %v12304_v23 = vpop.permute.xlu0 %2535  ;;  %v12316_v43 = vrot.slane %v16638_v30, %v10383_v45  ;;  %v12333_v35 = vrot.slane %v16641_v36, %v10383_v45  ;;  %v3337_v30 = vcombine.high %v10764_v42, %v10779_v39  ;;  %v16645_v39 = vcombine.high %v12145_v6, %v12148_v48  ;;  %v16652_v6 = vld [vmem:[#allocation179_spill] sm:$0xff] }
 0x4b9   : > { %16637 = vst [vmem:[#allocation317_spill] sm:$0xff] %v12310_v53  ;;  %16640 = vst [vmem:[#allocation319_spill] sm:$0xff] %v12319_v0  ;;  %2813 = vbcast.lane.b32.xlu1 %v2799_v54, 280  ;;  %v16647_v11 = vcombine.low %v12137_v24, %v12140_v16  ;;  %v4289_v9 = vcombine.high %v11199_v34, %v11183_v32  ;;  %v12391_v12 = vsel %vm2815_vm1, %v16652_v6, %v12226_v46  ;;  %v16686_v53 = vld [vmem:[#allocation206_spill] sm:$0xff] }
 0x4ba   : > { %16639 = vst [vmem:[#allocation318_spill] sm:$0xff] %v12316_v43  ;;  %2809 = vbcast.lane.b32.xlu0 %v2799_v54, 272  ;;  %16642 = vst [vmem:[#allocation320_spill] sm:$0xff] %v12333_v35  ;;  %v12336_v54 = vrot.slane %v6041_v4, %v10383_v45  ;;  %v12355_v42 = vrot.slane %v16645_v39, %v10383_v45  ;;  %v12367_v4 = vrot.slane %v6313_v27, %v10383_v45  ;;  %v16681_v43 = vld [vmem:[#allocation205_spill] sm:$0xff] }
 0x4bb   : > { %v2548_v61 = vpop.permute.xlu1 %2547  ;;  %16644 = vst [vmem:[#allocation322_spill] sm:$0xff] %v12343_v10  ;;  %v12364_v36 = vrot.slane %v16647_v11, %v10383_v45  ;;  %16653 = vst [vmem:[#allocation179_spill] sm:$0xff] %v12391_v12  ;;  %v5513_v6 = vcombine.high %v12229_v52, %v12236_v13  ;;  %v16659_v11 = vld [vmem:[#allocation182_spill] sm:$0xff] }
 0x4bc   : > { %16643 = vst [vmem:[#allocation321_spill] sm:$0xff] %v12336_v54  ;;  %v2544_v25 = vpop.permute.xlu0 %2543  ;;  %16646 = vst [vmem:[#allocation323_spill] sm:$0xff] %v12355_v42  ;;  %v16667_v54 = vld [vmem:[#allocation185_spill] sm:$0xff] }
 0x4bd   : > { %7434 = vrot.lane.b32.xlu1 %v3337_v30, %s9075_s27  ;;  %16648 = vst [vmem:[#allocation324_spill] sm:$0xff] %v12364_v36  ;;  %16649 = vst [vmem:[#allocation325_spill] sm:$0xff] %v12367_v4  ;;  %v4425_v30 = vcombine.high %v11495_v21, %v11502_v60  ;;  %v16654_v60 = vld [vmem:[#allocation187_spill] sm:$0xff] }
 0x4be   : > { %7432 = vrot.lane.b32.xlu0 %v3201_v55, %s9075_s27  ;;  %v16650_v55 = vcombine.high %v12137_v24, %v12140_v16  ;;  %v5377_v16 = vcombine.high %v11933_v26, %v11917_v41  ;;  %v16671_v26 = vld [vmem:[#allocation194_spill] sm:$0xff] }
 0x4bf   : > { %v2559_v48 = vpop.permute.xlu1 %2558 }
 0x4c0   : > { %v12386_v39 = vrot.slane %v16650_v55, %v10383_v45  ;;  %v12395_v21 = vsel %vm2815_vm1, %v16654_v60, %v2559_v48  ;;  %v2555_v32 = vpop.permute.xlu0 %2554  ;;  %v16655_v48 = vld [vmem:[#allocation181_spill] sm:$0xff]  ;;  %v12425_v60 = vsel %vm2815_vm1, %v16659_v11, %v12274_v19  ;;  %v16664_v11 = vld [vmem:[#allocation191_spill] sm:$0xff] }
 0x4c1   : > { %v6609_v27 = vcombine.high %v12391_v12, %v12395_v21  ;;  %7438 = vrot.lane.b32.xlu1 %v4425_v30, %s9075_s27  ;;  %v12414_v55 = vsel %vm2815_vm1, %v16655_v48, %v12266_v59  ;;  %v16657_v30 = vld [vmem:[#allocation189_spill] sm:$0xff] }
 0x4c2   : > { %16651 = vst [vmem:[#allocation326_spill] sm:$0xff] %v12386_v39  ;;  %7436 = vrot.lane.b32.xlu0 %v4289_v9, %s9075_s27  ;;  %16656 = vst [vmem:[#allocation187_spill] sm:$0xff] %v12414_v55  ;;  %v16661_v39 = vld [vmem:[#allocation190_spill] sm:$0xff] }
 0x4c3   : > { %v2567_v46 = vpop.permute.xlu1 %2566  ;;  %16660 = vst [vmem:[#allocation189_spill] sm:$0xff] %v12425_v60 }
 0x4c4   : > { %v12418_v24 = vsel %vm2815_vm1, %v16657_v30, %v2567_v46  ;;  %v2563_v9 = vpop.permute.xlu0 %2562  ;;  %v16663_v30 = vld [vmem:[#allocation183_spill] sm:$0xff] }
 0x4c5   : > { %16658 = vst [vmem:[#allocation181_spill] sm:$0xff] %v12418_v24  ;;  %v7153_v4 = vcombine.high %v12414_v55, %v12418_v24  ;;  %v12431_v59 = vsel %vm2815_vm1, %v16661_v39, %v2563_v9  ;;  %7442 = vrot.lane.b32.xlu1 %v5513_v6, %s9075_s27  ;;  %v12440_v19 = vsel %vm2815_vm1, %v16663_v30, %v12284_v14  ;;  %v16674_v24 = vld [vmem:[#allocation203_spill] sm:$0xff] }
 0x4c6   : > { %16662 = vst [vmem:[#allocation182_spill] sm:$0xff] %v12431_v59  ;;  %v6881_v46 = vcombine.high %v12425_v60, %v12431_v59  ;;  %7440 = vrot.lane.b32.xlu0 %v5377_v16, %s9075_s27  ;;  %v12449_v6 = vrot.slane %v6609_v27, %v10233_v7  ;;  %v12464_v27 = vsel %vm2815_vm1, %v16667_v54, %v2548_v61  ;;  %v16691_v59 = vld [vmem:[#allocation200_spill] sm:$0xff] }
 0x4c7   : > { %v2578_v48 = vpop.permute.xlu1 %2577  ;;  %16668 = vst [vmem:[#allocation183_spill] sm:$0xff] %v12464_v27 }
 0x4c8   : > { %v12444_v10 = vsel %vm2815_vm1, %v16664_v11, %v2578_v48  ;;  %v2574_v36 = vpop.permute.xlu0 %2573  ;;  %v16665_v48 = vld [vmem:[#allocation193_spill] sm:$0xff] }
 0x4c9   : > { %v6625_v39 = vcombine.high %v12440_v19, %v12444_v10 }
 0x4cb   : > { %v12452_v9 = vrot.slane %v6625_v39, %v10233_v7  ;;  %v2586_v16 = vpop.permute.xlu1 %2585  ;;  %v16669_v39 = vld [vmem:[#allocation186_spill] sm:$0xff] }
 0x4cc   : > { %v2582_v13 = vpop.permute.xlu0 %2581  ;;  %v12460_v11 = vsel %vm2815_vm1, %v16665_v48, %v2586_v16  ;;  %v12468_v41 = vsel %vm2815_vm1, %v16669_v39, %v2544_v25  ;;  %v12479_v48 = vrot.slane %v7153_v4, %v10233_v7  ;;  %v12485_v25 = vrot.slane %v6881_v46, %v10233_v7 }
 0x4cd   : > { %16666 = vst [vmem:[#allocation190_spill] sm:$0xff] %v12460_v11  ;;  %16670 = vst [vmem:[#allocation191_spill] sm:$0xff] %v12468_v41  ;;  %v7169_v14 = vcombine.high %v12464_v27, %v12460_v11  ;;  %v12474_v30 = vsel %vm2815_vm1, %v16671_v26, %v2582_v13  ;;  %v16675_v27 = vld [vmem:[#allocation192_spill] sm:$0xff] }
 0x4ce   : > { %16672 = vst [vmem:[#allocation193_spill] sm:$0xff] %v12474_v30  ;;  %v6897_v16 = vcombine.high %v12468_v41, %v12474_v30  ;;  %v12508_v4 = vsel %vm2815_vm1, %v16675_v27, %v2574_v36  ;;  %v16676_v11 = vld [vmem:[#allocation184_spill] sm:$0xff]  ;;  %v16679_v27 = vld [vmem:[#allocation197_spill] sm:$0xff]  ;;  %v3169_v30 = vcombine.high %v10403_v49, %v10389_v28 }
 0x4cf   : > { %v2597_v52 = vpop.permute.xlu1 %2596  ;;  %v12482_v54 = vrot.slane %v7169_v14, %v10233_v7  ;;  %v12515_v8 = vsel %vm2815_vm1, %v16676_v11, %v12304_v23 }
 0x4d0   : > { %v2593_v42 = vpop.permute.xlu0 %2592  ;;  %v12488_v39 = vrot.slane %v6897_v16, %v10233_v7  ;;  %v16673_v16 = vld [vmem:[#allocation195_spill] sm:$0xff]  ;;  %v6352_v36 = vcombine.low %v12515_v8, %v12508_v4 }
 0x4d1   : > { %v12500_v55 = vsel %vm2815_vm1, %v16673_v16, %v2597_v52  ;;  %v12519_v52 = vsel %vm2815_vm1, %v16677_v56, %v2555_v32  ;;  %v16683_v32 = vld [vmem:[#allocation198_spill] sm:$0xff] }
 0x4d3   : > { %v2605_v61 = vpop.permute.xlu1 %2604 }
 0x4d4   : > { %v2601_v34 = vpop.permute.xlu0 %2600  ;;  %v12530_v50 = vsel %vm2815_vm1, %v16679_v27, %v2605_v61  ;;  %v16688_v27 = vld [vmem:[#allocation196_spill] sm:$0xff] }
 0x4d5   : > { %16680 = vst [vmem:[#allocation185_spill] sm:$0xff] %v12530_v50  ;;  %v12538_v56 = vsel %vm2815_vm1, %v16683_v32, %v2601_v34  ;;  %v12556_v34 = vsel %vm2815_vm1, %v16688_v27, %v2593_v42  ;;  %v16692_v27 = vld [vmem:[#allocation208_spill] sm:$0xff] }
 0x4d6   : > { %16684 = vst [vmem:[#allocation194_spill] sm:$0xff] %v12538_v56 }
 0x4d7   : > { %v2616_v29 = vpop.permute.xlu1 %2615 }
 0x4d8   : > { %v2612_v62 = vpop.permute.xlu0 %2611 }
 0x4d9   : > { %v12573_v42 = vsel %vm2815_vm1, %v16691_v59, %v2612_v62 }
 0x4db   : > { %v2624_v46 = vpop.permute.xlu1 %2623 }
 0x4dc   : > { %v2620_v0 = vpop.permute.xlu0 %2619 }
 0x4df   : > { %v2635_v35 = vpop.permute.xlu1 %2634 }
 0x4e0   : > { %v12504_v26 = vsel %vm2815_vm1, %v16674_v24, %v2635_v35  ;;  %v2631_v13 = vpop.permute.xlu0 %2630  ;;  %v16678_v35 = vld [vmem:[#allocation180_spill] sm:$0xff] }
 0x4e1   : > { %v6641_v14 = vcombine.high %v12500_v55, %v12504_v26  ;;  %v12524_v24 = vsel %vm2815_vm1, %v16678_v35, %v12241_v47  ;;  %v12542_v47 = vsel %vm2815_vm1, %v16685_v20, %v2631_v13  ;;  %v12559_v20 = vrot.slane %v6352_v36, %v10233_v7  ;;  %v16689_v13 = vld [vmem:[#allocation199_spill] sm:$0xff] }
 0x4e3   : > { %v2643_v16 = vpop.permute.xlu1 %2642 }
 0x4e4   : > { %v12534_v23 = vsel %vm2815_vm1, %v16681_v43, %v2643_v16  ;;  %v2639_v11 = vpop.permute.xlu0 %2638  ;;  %v6336_v43 = vcombine.low %v12524_v24, %v12519_v52 }
 0x4e5   : > { %16682 = vst [vmem:[#allocation186_spill] sm:$0xff] %v12534_v23  ;;  %v7185_v35 = vcombine.high %v12530_v50, %v12534_v23  ;;  %v12548_v61 = vsel %vm2815_vm1, %v16686_v53, %v2639_v11  ;;  %v12563_v50 = vsel %vm2815_vm1, %v16689_v13, %v2616_v29  ;;  %v6368_v53 = vcombine.low %v12556_v34, %v12542_v47  ;;  %v16690_v11 = vld [vmem:[#allocation207_spill] sm:$0xff] }
 0x4e6   : > { %16687 = vst [vmem:[#allocation195_spill] sm:$0xff] %v12548_v61  ;;  %v6913_v16 = vcombine.high %v12538_v56, %v12548_v61  ;;  %v12582_v29 = vrot.slane %v6336_v43, %v10233_v7 }
 0x4e7   : > { %v2654_v32 = vpop.permute.xlu1 %2653  ;;  %v12591_v59 = vrot.slane %v6368_v53, %v10233_v7  ;;  %v16695_v53 = vld [vmem:[#allocation17_spill] sm:$0xff] }
 0x4e8   : > { %v12569_v23 = vsel %vm2815_vm1, %v16690_v11, %v2654_v32  ;;  %v2650_v60 = vpop.permute.xlu0 %2649  ;;  %v6655_v32 = vrot.slane %v6641_v14, %v10233_v7  ;;  %v6400_v62 = vcombine.low %v12582_v29, %v12559_v20  ;;  %v3137_v57 = vcombine.high %v16695_v53, %v10400_v22 }
 0x4e9   : > { %v6657_v36 = vcombine.high %v12563_v50, %v12569_v23  ;;  %v12579_v56 = vsel %vm2815_vm1, %v16692_v27, %v2650_v60 }
 0x4ea   : > { %v6384_v13 = vcombine.low %v12573_v42, %v12579_v56 }
 0x4eb   : > { %v6671_v11 = vrot.slane %v6657_v36, %v10233_v7  ;;  %v2662_v61 = vpop.permute.xlu1 %2661  ;;  %v16693_v36 = vld [vmem:[#allocation209_spill] sm:$0xff] }
 0x4ec   : > { %v12594_v60 = vrot.slane %v6384_v13, %v10233_v7  ;;  %v2658_v27 = vpop.permute.xlu0 %2657  ;;  %v12602_v63 = vsel %vm2815_vm1, %v16693_v36, %v2662_v61  ;;  %v12609_v13 = vrot.slane %v6400_v62, %v10383_v45  ;;  %v4257_v61 = vcombine.high %v11138_v58, %v11122_v51  ;;  %v16702_v62 = vld [vmem:[#allocation210_spill] sm:$0xff]  ;;  %v16704_v58 = vld [vmem:[#allocation80_spill] sm:$0xff] }
 0x4ed   : > { %v6720_v43 = vcombine.low %v6655_v32, %v6671_v11  ;;  %v6721_v41 = vcombine.high %v6655_v32, %v6671_v11  ;;  %16694 = vst [vmem:[#allocation203_spill] sm:$0xff] %v12602_v63  ;;  %v12613_v32 = vsel %vm2815_vm1, %v16697_v18, %v2624_v46  ;;  %v16700_v11 = vld [vmem:[#allocation202_spill] sm:$0xff]  ;;  %v12630_v53 = vsel %vm2815_vm1, %v16702_v62, %v2658_v27 }
 0x4ee   : > { %v6432_v14 = vcombine.low %v12591_v59, %v12594_v60  ;;  %16696 = vst [vmem:[#allocation192_spill] sm:$0xff] %v12609_v13  ;;  %16698 = vst [vmem:[#allocation184_spill] sm:$0xff] %v12613_v32  ;;  %v12624_v36 = vsel %vm2815_vm1, %v16700_v11, %v2620_v0  ;;  %v7201_v22 = vcombine.high %v12613_v32, %v12602_v63 }
 0x4ef   : > { %v12604_v37 = vpop.permute.xlu1 %2672  ;;  %16701 = vst [vmem:[#allocation180_spill] sm:$0xff] %v12624_v36  ;;  %16703 = vst [vmem:[#allocation197_spill] sm:$0xff] %v12630_v53  ;;  %v12633_v18 = vrot.slane %v3169_v30, %v10383_v45  ;;  %v6929_v46 = vcombine.high %v12624_v36, %v12630_v53  ;;  %v7199_v11 = vrot.slane %v7185_v35, %v10233_v7 }
 0x4f0   : > { %v12616_v28 = vrot.slane %v6432_v14, %v10383_v45  ;;  %v12618_v49 = vpop.permute.xlu0 %2668  ;;  %v16705_v14 = vld [vmem:[#allocation75_spill] sm:$0xff]  ;;  %v7215_v32 = vrot.slane %v7201_v22, %v10233_v7  ;;  %v12646_v27 = vrot.slane %v3137_v57, %v10383_v45  ;;  %v6927_v30 = vrot.slane %v6913_v16, %v10233_v7 }
 0x4f1   : > { %v4225_v0 = vcombine.high %v16705_v14, %v16704_v58  ;;  %v6943_v62 = vrot.slane %v6929_v46, %v10233_v7  ;;  %v12654_v53 = vrot.slane %v4257_v61, %v10383_v45  ;;  %v5345_v35 = vcombine.high %v11872_v31, %v11856_v15 }
 0x4f2   : > { %16699 = vst [vmem:[#allocation188_spill] sm:$0xff] %v12616_v28  ;;  %v6465_v51 = vcombine.high %v12609_v13, %v12616_v28  ;;  %v7264_v22 = vcombine.low %v7199_v11, %v7215_v32  ;;  %v7265_v58 = vcombine.high %v7199_v11, %v7215_v32  ;;  %v3202_v57 = vcombine.low %v12646_v27, %v12633_v18  ;;  %v16752_v13 = vld [vmem:[#allocation227_spill] sm:$0xff] }
 0x4f3   : > { %v12643_v63 = vpop.permute.xlu1 %2680  ;;  %v6992_v14 = vcombine.low %v6927_v30, %v6943_v62  ;;  %v6993_v17 = vcombine.high %v6927_v30, %v6943_v62  ;;  %v12661_v16 = vrot.slane %v4225_v0, %v10383_v45  ;;  %v5313_v46 = vcombine.high %v11890_v44, %v11865_v40 }
 0x4f4   : > { %7444 = vrot.lane.b32.xlu0 %v6465_v51, %s9075_s27  ;;  %v12651_v36 = vpop.permute.xlu0 %2676  ;;  %v12666_v61 = vrot.slane %v6720_v43, %v10383_v45  ;;  %v12669_v12 = vrot.slane %v6721_v41, %v10383_v45  ;;  %v12675_v31 = vrot.slane %v5345_v35, %v10383_v45  ;;  %v16708_v32 = vcombine.low %v12449_v6, %v12452_v9 }
 0x4f5   : > { %v4290_v44 = vcombine.low %v12661_v16, %v12654_v53  ;;  %v16710_v41 = vcombine.high %v12449_v6, %v12452_v9  ;;  %v6433_v0 = vcombine.high %v12591_v59, %v12594_v60  ;;  %v12694_v11 = vrot.slane %v6992_v14, %v10383_v45 }
 0x4f6   : > { %16706 = vst [vmem:[#allocation205_spill] sm:$0xff] %v12666_v61  ;;  %16707 = vst [vmem:[#allocation198_spill] sm:$0xff] %v12669_v12  ;;  %v12681_v40 = vrot.slane %v16708_v32, %v10383_v45  ;;  %v12699_v62 = vrot.slane %v5313_v46, %v10383_v45  ;;  %v6401_v35 = vcombine.high %v12582_v29, %v12559_v20 }
 0x4f7   : > { %v2692_v51 = vpop.permute.xlu1 %2691  ;;  %v12689_v43 = vrot.slane %v16710_v41, %v10383_v45  ;;  %16712 = vst [vmem:[#allocation196_spill] sm:$0xff] %v12694_v11  ;;  %v16713_v6 = vcombine.low %v12485_v25, %v12488_v39  ;;  %v12710_v59 = vrot.slane %v6993_v17, %v10383_v45  ;;  %v12713_v14 = vrot.slane %v7264_v22, %v10383_v45 }
 0x4f8   : > { %7464 = vrot.lane.b32.xlu0 %v3202_v57, %s9076_s29  ;;  %v12672_v15 = vpop.permute.xlu0 %2687  ;;  %16709 = vst [vmem:[#allocation204_spill] sm:$0xff] %v12681_v40  ;;  %v16717_v17 = vcombine.low %v12479_v48, %v12482_v54  ;;  %v16719_v22 = vcombine.high %v12485_v25, %v12488_v39  ;;  %v5378_v41 = vcombine.low %v12699_v62, %v12675_v31  ;;  %v16726_v25 = vld [vmem:[#allocation219_spill] sm:$0xff] }
 0x4f9   : > { %16711 = vst [vmem:[#allocation206_spill] sm:$0xff] %v12689_v43  ;;  %v12707_v9 = vrot.slane %v16713_v6, %v10383_v45  ;;  %16715 = vst [vmem:[#allocation207_spill] sm:$0xff] %v12710_v59  ;;  %v12739_v30 = vrot.slane %v6433_v0, %v10383_v45  ;;  %v12742_v29 = vrot.slane %v7265_v58, %v10383_v45  ;;  %v16730_v6 = vld [vmem:[#allocation221_spill] sm:$0xff] }
 0x4fa   : > { %16716 = vst [vmem:[#allocation200_spill] sm:$0xff] %v12713_v14  ;;  %v12726_v32 = vrot.slane %v16717_v17, %v10383_v45  ;;  %v6415_v39 = vrot.slane %v6401_v35, %v10383_v45  ;;  %v16722_v58 = vcombine.high %v12479_v48, %v12482_v54  ;;  %v16724_v17 = vld [vmem:[#allocation211_spill] sm:$0xff]  ;;  %v16732_v14 = vld [vmem:[#allocation214_spill] sm:$0xff] }
 0x4fb   : > { %16714 = vst [vmem:[#allocation199_spill] sm:$0xff] %v12707_v9  ;;  %v2700_v60 = vpop.permute.xlu1 %2699  ;;  %16721 = vst [vmem:[#allocation17_spill] sm:$0xff] %v12742_v29  ;;  %v12762_v46 = vsel %vm2815_vm1, %v16724_v17, %v12604_v37  ;;  %v12795_v17 = vsel %vm2815_vm1, %v16732_v14, %v12651_v36  ;;  %v16734_v29 = vld [vmem:[#allocation222_spill] sm:$0xff]  ;;  %v16737_v36 = vld [vmem:[#allocation223_spill] sm:$0xff] }
 0x4fc   : > { %7468 = vrot.lane.b32.xlu0 %v4290_v44, %s9076_s29  ;;  %v2696_v57 = vpop.permute.xlu0 %2695  ;;  %16718 = vst [vmem:[#allocation208_spill] sm:$0xff] %v12726_v32  ;;  %v12732_v44 = vrot.slane %v16719_v22, %v10383_v45  ;;  %v12757_v0 = vrot.slane %v16722_v58, %v10383_v45  ;;  %16725 = vst [vmem:[#allocation202_spill] sm:$0xff] %v12762_v46  ;;  %v6466_v37 = vcombine.low %v6415_v39, %v12739_v30 }
 0x4fd   : > { %16733 = vst [vmem:[#allocation211_spill] sm:$0xff] %v12795_v17  ;;  %v4291_v32 = vcombine.high %v12661_v16, %v12654_v53  ;;  %v5379_v53 = vcombine.high %v12699_v62, %v12675_v31  ;;  %v6385_v31 = vcombine.high %v12573_v42, %v12579_v56 }
 0x4fe   : > { %16720 = vst [vmem:[#allocation209_spill] sm:$0xff] %v12732_v44  ;;  %16723 = vst [vmem:[#allocation201_spill] sm:$0xff] %v12757_v0  ;;  %v16754_v44 = vld [vmem:[#allocation235_spill] sm:$0xff] }
 0x4ff   : > { %v2711_v22 = vpop.permute.xlu1 %2710 }
 0x500   : > { %v12766_v35 = vsel %vm2815_vm1, %v16726_v25, %v2711_v22  ;;  %7472 = vrot.lane.b32.xlu0 %v5378_v41, %s9076_s29  ;;  %v12769_v20 = vpop.permute.xlu0 %2706  ;;  %v16728_v22 = vld [vmem:[#allocation213_spill] sm:$0xff] }
 0x501   : > { %16727 = vst [vmem:[#allocation210_spill] sm:$0xff] %v12766_v35  ;;  %v6745_v48 = vcombine.high %v12762_v46, %v12766_v35  ;;  %v12785_v58 = vsel %vm2815_vm1, %v16728_v22, %v12643_v63  ;;  %v16777_v35 = vld [vmem:[#allocation241_spill] sm:$0xff] }
 0x502   : > { %16729 = vst [vmem:[#allocation80_spill] sm:$0xff] %v12785_v58 }
 0x503   : > { %v2719_v41 = vpop.permute.xlu1 %2718 }
 0x504   : > { %v12789_v28 = vsel %vm2815_vm1, %v16730_v6, %v2719_v41  ;;  %7476 = vrot.lane.b32.xlu0 %v6466_v37, %s9076_s29  ;;  %v2715_v54 = vpop.permute.xlu0 %2714  ;;  %v3203_v6 = vcombine.high %v12646_v27, %v12633_v18  ;;  %v16736_v41 = vld [vmem:[#allocation215_spill] sm:$0xff]  ;;  %v12821_v18 = vrot.slane %v6745_v48, %v10233_v7  ;;  %v16740_v48 = vld [vmem:[#allocation217_spill] sm:$0xff] }
 0x505   : > { %16731 = vst [vmem:[#allocation75_spill] sm:$0xff] %v12789_v28  ;;  %v7289_v25 = vcombine.high %v12785_v58, %v12789_v28  ;;  %v12801_v0 = vsel %vm2815_vm1, %v16734_v29, %v2715_v54  ;;  %v12809_v22 = vsel %vm2815_vm1, %v16736_v41, %v2692_v51  ;;  %v16742_v28 = vld [vmem:[#allocation218_spill] sm:$0xff] }
 0x506   : > { %16735 = vst [vmem:[#allocation219_spill] sm:$0xff] %v12801_v0  ;;  %v7017_v63 = vcombine.high %v12795_v17, %v12801_v0 }
 0x507   : > { %v2730_v37 = vpop.permute.xlu1 %2729 }
 0x508   : > { %v12813_v14 = vsel %vm2815_vm1, %v16737_v36, %v2730_v37  ;;  %7496 = vrot.lane.b32.xlu0 %v3203_v6, %s9077_s30  ;;  %v2726_v29 = vpop.permute.xlu0 %2725  ;;  %v16738_v36 = vld [vmem:[#allocation225_spill] sm:$0xff]  ;;  %v12844_v6 = vsel %vm2815_vm1, %v16742_v28, %v2696_v57  ;;  %v12868_v56 = vrot.slane %v7017_v63, %v10233_v7 }
 0x509   : > { %v6761_v54 = vcombine.high %v12809_v22, %v12813_v14  ;;  %16743 = vst [vmem:[#allocation214_spill] sm:$0xff] %v12844_v6 }
 0x50b   : > { %v12824_v27 = vrot.slane %v6761_v54, %v10233_v7  ;;  %v2738_v51 = vpop.permute.xlu1 %2737  ;;  %v12839_v54 = vsel %vm2815_vm1, %v16740_v48, %v2700_v60  ;;  %v6467_v60 = vcombine.high %v6415_v39, %v12739_v30  ;;  %v6353_v48 = vcombine.high %v12515_v8, %v12508_v4 }
 0x50c   : > { %7500 = vrot.lane.b32.xlu0 %v4291_v32, %s9077_s30  ;;  %v2734_v37 = vpop.permute.xlu0 %2733  ;;  %v12833_v58 = vsel %vm2815_vm1, %v16738_v36, %v2738_v51  ;;  %16741 = vst [vmem:[#allocation221_spill] sm:$0xff] %v12839_v54  ;;  %v16744_v51 = vld [vmem:[#allocation226_spill] sm:$0xff]  ;;  %v6337_v8 = vcombine.high %v12524_v24, %v12519_v52  ;;  %v12881_v4 = vrot.slane %v6385_v31, %v10233_v7  ;;  %v16747_v52 = vld [vmem:[#allocation16_spill] sm:$0xff] }
 0x50d   : > { %16739 = vst [vmem:[#allocation213_spill] sm:$0xff] %v12833_v58  ;;  %v7305_v41 = vcombine.high %v12839_v54, %v12833_v58  ;;  %v12850_v36 = vsel %vm2815_vm1, %v16744_v51, %v2734_v37  ;;  %v6369_v37 = vcombine.high %v12556_v34, %v12542_v47  ;;  %v16750_v34 = vld [vmem:[#allocation81_spill] sm:$0xff] }
 0x50e   : > { %16745 = vst [vmem:[#allocation222_spill] sm:$0xff] %v12850_v36  ;;  %v7033_v62 = vcombine.high %v12844_v6, %v12850_v36  ;;  %v16761_v36 = vld [vmem:[#allocation229_spill] sm:$0xff] }
 0x50f   : > { %v2749_v16 = vpop.permute.xlu1 %2748  ;;  %v12861_v28 = vrot.slane %v7305_v41, %v10233_v7  ;;  %v12888_v41 = vrot.slane %v6353_v48, %v10233_v7  ;;  %v12891_v51 = vrot.slane %v6369_v37, %v10233_v7  ;;  %v16749_v37 = vld [vmem:[#allocation83_spill] sm:$0xff] }
 0x510   : > { %7504 = vrot.lane.b32.xlu0 %v5379_v53, %s9077_s30  ;;  %v2745_v32 = vpop.permute.xlu0 %2744  ;;  %v12858_v53 = vrot.slane %v7289_v25, %v10233_v7  ;;  %v12871_v42 = vrot.slane %v7033_v62, %v10233_v7  ;;  %v16746_v62 = vld [vmem:[#allocation259_spill] sm:$0xff]  ;;  %v16751_v47 = vcombine.low %v16749_v37, %v16750_v34  ;;  %v12916_v59 = vsel %vm2815_vm1, %v16752_v13, %v2749_v16  ;;  %v16758_v16 = vld [vmem:[#allocation216_spill] sm:$0xff] }
 0x511   : > { %v16748_v24 = vcombine.low %v16746_v62, %v16747_v52  ;;  %v6448_v25 = vcombine.low %v12891_v51, %v12881_v4  ;;  %16753 = vst [vmem:[#allocation215_spill] sm:$0xff] %v12916_v59 }
 0x513   : > { %v2757_v57 = vpop.permute.xlu1 %2756  ;;  %v12909_v58 = vrot.slane %v6448_v25, %v10383_v45  ;;  %v16757_v25 = vld [vmem:[#allocation224_spill] sm:$0xff] }
 0x514   : > { %7508 = vrot.lane.b32.xlu0 %v6467_v60, %s9077_s30  ;;  %v2753_v30 = vpop.permute.xlu0 %2752  ;;  %v12898_v60 = vrot.slane %v6337_v8, %v10233_v7  ;;  %v12928_v17 = vsel %vm2815_vm1, %v16757_v25, %v2726_v29  ;;  %v16760_v29 = vld [vmem:[#allocation212_spill] sm:$0xff]  ;;  %v12953_v12 = vsel %vm2815_vm1, %v16761_v36, %v2757_v57  ;;  %v16768_v36 = vld [vmem:[#allocation238_spill] sm:$0xff] }
 0x515   : > { %v12947_v25 = vsel %vm2815_vm1, %v16760_v29, %v12618_v49  ;;  %16762 = vst [vmem:[#allocation225_spill] sm:$0xff] %v12953_v12  ;;  %v16767_v49 = vld [vmem:[#allocation236_spill] sm:$0xff] }
 0x516   : > { %v6416_v48 = vcombine.low %v12898_v60, %v12888_v41 }
 0x517   : > { %v2768_v63 = vpop.permute.xlu1 %2767 }
 0x518   : > { %7528 = vrot.lane.b32.xlu0 %v16748_v24, %s9078_s2  ;;  %v2764_v31 = vpop.permute.xlu0 %2763  ;;  %v12912_v8 = vrot.slane %v6416_v48, %v10383_v45 }
 0x51a   : > { %v6468_v13 = vcombine.low %v12912_v8, %v12909_v58 }
 0x51b   : > { %v2776_v39 = vpop.permute.xlu1 %2775 }
 0x51c   : > { %7532 = vrot.lane.b32.xlu0 %v16751_v47, %s9078_s2  ;;  %v2772_v54 = vpop.permute.xlu0 %2771  ;;  %v16756_v47 = vcombine.low %v11896_v2, %v11875_v33 }
 0x51f   : > { %v2787_v24 = vpop.permute.xlu1 %2786 }
 0x520   : > { %v12920_v11 = vsel %vm2815_vm1, %v16754_v44, %v2787_v24  ;;  %7536 = vrot.lane.b32.xlu0 %v16756_v47, %s9078_s2  ;;  %v2783_v9 = vpop.permute.xlu0 %2782  ;;  %v12937_v44 = vsel %vm2815_vm1, %v16758_v16, %v12672_v15  ;;  %v16759_v24 = vld [vmem:[#allocation220_spill] sm:$0xff]  ;;  %v16763_v15 = vld [vmem:[#allocation237_spill] sm:$0xff] }
 0x521   : > { %16755 = vst [vmem:[#allocation223_spill] sm:$0xff] %v12920_v11  ;;  %v6777_v48 = vcombine.high %v12916_v59, %v12920_v11  ;;  %v12942_v47 = vsel %vm2815_vm1, %v16759_v24, %v12769_v20  ;;  %v6488_v6 = vcombine.low %v12937_v44, %v12928_v17  ;;  %v16765_v24 = vld [vmem:[#allocation230_spill] sm:$0xff]  ;;  %v12966_v29 = vsel %vm2815_vm1, %v16767_v49, %v2783_v9  ;;  %v16771_v49 = vld [vmem:[#allocation231_spill] sm:$0xff]  ;;  %v16780_v11 = vld [vmem:[#allocation233_spill] sm:$0xff] }
 0x522   : > { %v12962_v43 = vsel %vm2815_vm1, %v16765_v24, %v2753_v30 }
 0x523   : > { %v2795_v0 = vpop.permute.xlu1 %2794  ;;  %16766 = vst [vmem:[#allocation218_spill] sm:$0xff] %v12962_v43  ;;  %v12983_v9 = vrot.slane %v6488_v6, %v10233_v7  ;;  %v16774_v6 = vld [vmem:[#allocation232_spill] sm:$0xff] }
 0x524   : > { %v12957_v16 = vsel %vm2815_vm1, %v16763_v15, %v2795_v0  ;;  %7540 = vrot.lane.b32.xlu0 %v6468_v13, %s9078_s2  ;;  %v2791_v20 = vpop.permute.xlu0 %2790  ;;  %v6472_v0 = vcombine.low %v12947_v25, %v12942_v47  ;;  %v16770_v15 = vld [vmem:[#allocation228_spill] sm:$0xff] }
 0x525   : > { %16764 = vst [vmem:[#allocation217_spill] sm:$0xff] %v12957_v16  ;;  %v7321_v61 = vcombine.high %v12953_v12, %v12957_v16  ;;  %v12972_v57 = vsel %vm2815_vm1, %v16768_v36, %v2791_v20  ;;  %v12980_v30 = vsel %vm2815_vm1, %v16770_v15, %v2745_v32  ;;  %v12987_v12 = vsel %vm2815_vm1, %v16771_v49, %v2768_v63  ;;  %v16772_v36 = vld [vmem:[#allocation239_spill] sm:$0xff]  ;;  %v16775_v49 = vld [vmem:[#allocation240_spill] sm:$0xff] }
 0x526   : > { %16769 = vst [vmem:[#allocation226_spill] sm:$0xff] %v12972_v57  ;;  %v7049_v13 = vcombine.high %v12962_v43, %v12972_v57  ;;  %v6504_v20 = vcombine.low %v12980_v30, %v12966_v29  ;;  %v16773_v32 = vcombine.high %v16746_v62, %v16747_v52  ;;  %v13001_v43 = vsel %vm2815_vm1, %v16774_v6, %v2764_v31 }
 0x527   : > { %v2806_v24 = vpop.permute.xlu1 %2805  ;;  %v6791_v62 = vrot.slane %v6777_v48, %v10233_v7 }
 0x528   : > { %v12993_v16 = vsel %vm2815_vm1, %v16772_v36, %v2806_v24  ;;  %7560 = vrot.lane.b32.xlu0 %v16773_v32, %s9079_s5  ;;  %v2802_v15 = vpop.permute.xlu0 %2801  ;;  %v13010_v24 = vrot.slane %v6472_v0, %v10233_v7  ;;  %v6512_v6 = vrot.slane %v6504_v20, %v10233_v7  ;;  %v16776_v0 = vcombine.high %v16749_v37, %v16750_v34  ;;  %v16784_v37 = vld [vmem:[#allocation234_spill] sm:$0xff] }
 0x529   : > { %v6793_v63 = vcombine.high %v12987_v12, %v12993_v16  ;;  %v13007_v57 = vsel %vm2815_vm1, %v16775_v49, %v2802_v15  ;;  %v13033_v20 = vsel %vm2815_vm1, %v16780_v11, %v2776_v39  ;;  %v16783_v34 = vcombine.high %v11896_v2, %v11875_v33 }
 0x52a   : > { %v6520_v36 = vcombine.low %v13001_v43, %v13007_v57  ;;  %v6536_v31 = vcombine.low %v13010_v24, %v12983_v9  ;;  %16781 = vst [vmem:[#allocation83_spill] sm:$0xff] %v13033_v20  ;;  %v7335_v2 = vrot.slane %v7321_v61, %v10233_v7  ;;  %v7063_v39 = vrot.slane %v7049_v13, %v10233_v7  ;;  %v16786_v61 = vld [vmem:[#allocation9_spill] sm:$0xff] }
 0x52b   : > { %v6807_v52 = vrot.slane %v6793_v63, %v10233_v7  ;;  %v2814_v32 = vpop.permute.xlu1 %2813  ;;  %v16787_v13 = vld [vmem:[#allocation261_spill] sm:$0xff] }
 0x52c   : > { %v6528_v40 = vrot.slane %v6520_v36, %v10233_v7  ;;  %7564 = vrot.lane.b32.xlu0 %v16776_v0, %s9079_s5  ;;  %v13026_v48 = vsel %vm2815_vm1, %v16777_v35, %v2814_v32  ;;  %v2810_v63 = vpop.permute.xlu0 %2809  ;;  %v13029_v59 = vrot.slane %v6536_v31, %v10383_v45  ;;  %v13044_v35 = vsel %vm2815_vm1, %v16784_v37, %v2772_v54 }
 0x52d   : > { %v6856_v15 = vcombine.low %v6791_v62, %v6807_v52  ;;  %v6857_v49 = vcombine.high %v6791_v62, %v6807_v52  ;;  %16778 = vst [vmem:[#allocation259_spill] sm:$0xff] %v13026_v48  ;;  %v7337_v62 = vcombine.high %v13033_v20, %v13026_v48  ;;  %v16785_v52 = vld [vmem:[#allocation242_spill] sm:$0xff] }
 0x52e   : > { %v6568_v46 = vcombine.low %v6512_v6, %v6528_v40  ;;  %16779 = vst [vmem:[#allocation16_spill] sm:$0xff] %v13029_v59  ;;  %v13050_v32 = vsel %vm2815_vm1, %v16785_v52, %v2810_v63  ;;  %v6417_v52 = vcombine.high %v12898_v60, %v12888_v41  ;;  %vm8550_vm1 = vcmask 261120  }
 0x52f   : > { %v7065_v11 = vcombine.high %v13044_v35, %v13050_v32  ;;  %v7351_v54 = vrot.slane %v7337_v62, %v10233_v7  ;;  %v16788_v62 = vcombine.low %v16786_v61, %v16787_v13 }
 0x530   : > { %v13036_v36 = vrot.slane %v6568_v46, %v10383_v45  ;;  %7568 = vrot.lane.b32.xlu0 %v16783_v34, %s9079_s5  ;;  %v6469_v46 = vcombine.high %v12912_v8, %v12909_v58  ;;  %v13065_v58 = vrot.slane %v6856_v15, %v10383_v45  ;;  %v13068_v8 = vrot.slane %v6857_v49, %v10383_v45  ;;  %v16790_v49 = vld [vmem:[#allocation54_spill] sm:$0xff] }
 0x531   : > { %v7079_v31 = vrot.slane %v7065_v11, %v10233_v7  ;;  %v7400_v0 = vcombine.low %v7335_v2, %v7351_v54  ;;  %v7401_v63 = vcombine.high %v7335_v2, %v7351_v54  ;;  %v6449_v11 = vcombine.high %v12891_v51, %v12881_v4 }
 0x532   : > { %16782 = vst [vmem:[#allocation81_spill] sm:$0xff] %v13036_v36  ;;  %v6601_v33 = vcombine.high %v13029_v59, %v13036_v36  ;;  %v16789_v15 = vcombine.low %v12821_v18, %v12824_v27  ;;  %v16793_v54 = vcombine.high %v12821_v18, %v12824_v27  ;;  %v16794_v4 = vcombine.low %v12868_v56, %v12871_v42  ;;  %v16817_v36 = vld [vmem:[#allocation255_spill] sm:$0xff] }
 0x533   : > { %v7128_v34 = vcombine.low %v7063_v39, %v7079_v31  ;;  %v7129_v37 = vcombine.high %v7063_v39, %v7079_v31  ;;  %v16796_v31 = vcombine.high %v12868_v56, %v12871_v42  ;;  %v6569_v18 = vcombine.high %v6512_v6, %v6528_v40  ;;  %v16819_v42 = vld [vmem:[#allocation244_spill] sm:$0xff] }
 0x534   : > { %7572 = vrot.lane.b32.xlu0 %v6469_v46, %s9079_s5  ;;  %7446 = vrot.lane.b32.xlu1 %v6601_v33, %s9075_s27  ;;  %v13082_v46 = vrot.slane %v16789_v15, %v10383_v45  ;;  %v16791_v33 = vld [vmem:[#allocation52_spill] sm:$0xff]  ;;  %v13092_v39 = vrot.slane %v16793_v54, %v10383_v45  ;;  %v13098_v41 = vrot.slane %v16794_v4, %v10383_v45  ;;  %s9093_s27 = smov 40  }
 0x535   : > { %v16792_v2 = vcombine.low %v16790_v49, %v16791_v33  ;;  %v13101_v51 = vrot.slane %v7128_v34, %v10383_v45  ;;  %v13104_v60 = vrot.slane %v7129_v37, %v10383_v45  ;;  %v13113_v27 = vrot.slane %v7400_v0, %v10383_v45  ;;  %v16800_v34 = vld [vmem:[#allocation10_spill] sm:$0xff]  ;;  %v16801_v37 = vld [vmem:[#allocation76_spill] sm:$0xff] }
 0x536   : > { %v16802_v54 = vcombine.low %v16800_v34, %v16801_v37  ;;  %v13131_v6 = vrot.slane %v6449_v11, %v10383_v45  ;;  %v6537_v0 = vcombine.high %v13010_v24, %v12983_v9  ;;  %v16808_v11 = vcombine.high %v12858_v53, %v12861_v28 }
 0x537   : > { %16795 = vst [vmem:[#allocation227_spill] sm:$0xff] %v13104_v60  ;;  %16798 = vst [vmem:[#allocation224_spill] sm:$0xff] %v13113_v27  ;;  %v6431_v56 = vrot.slane %v6417_v52, %v10383_v45  ;;  %v16811_v52 = vcombine.low %v12247_v38, %v12239_v1  ;;  %v16909_v60 = vld [vmem:[#allocation146_spill] sm:$0xff] }
 0x538   : > { %7592 = vrot.lane.b32.xlu0 %v16788_v62, %s9080_s12  ;;  %7466 = vrot.lane.b32.xlu1 %v16792_v2, %s9076_s29  ;;  %v13110_v62 = vrot.slane %v16796_v31, %v10383_v45  ;;  %v13118_v2 = vrot.slane %v7401_v63, %v10383_v45  ;;  %v16803_v63 = vcombine.low %v12858_v53, %v12861_v28  ;;  %v16805_v31 = vld [vmem:[#allocation113_spill] sm:$0xff]  ;;  %v16812_v28 = vld [vmem:[#allocation15_spill] sm:$0xff] }
 0x539   : > { %v13151_v40 = vrot.slane %v16808_v11, %v10383_v45  ;;  %v16810_v53 = vcombine.low %v11939_v5, %v11920_v3  ;;  %v16813_v11 = vld [vmem:[#allocation14_spill] sm:$0xff] }
 0x53a   : > { %16797 = vst [vmem:[#allocation235_spill] sm:$0xff] %v13110_v62  ;;  %16799 = vst [vmem:[#allocation216_spill] sm:$0xff] %v13118_v2  ;;  %v13139_v4 = vrot.slane %v16803_v63, %v10383_v45  ;;  %v3392_v9 = vcombine.low %v16813_v11, %v16812_v28  ;;  %v16814_v63 = vld [vmem:[#allocation250_spill] sm:$0xff]  ;;  %v16820_v2 = vld [vmem:[#allocation243_spill] sm:$0xff] }
 0x53b   : > { %16809 = vst [vmem:[#allocation212_spill] sm:$0xff] %v13151_v40  ;;  %v16821_v28 = vld [vmem:[#allocation79_spill] sm:$0xff] }
 0x53c   : > { %7596 = vrot.lane.b32.xlu0 %v16802_v54, %s9080_s12  ;;  %16804 = vst [vmem:[#allocation220_spill] sm:$0xff] %v13139_v4  ;;  %v16806_v54 = vld [vmem:[#allocation105_spill] sm:$0xff]  ;;  %v16816_v4 = vld [vmem:[#allocation256_spill] sm:$0xff]  ;;  %v13196_v40 = vrot.slane %v3392_v9, %v10233_v7 }
 0x53d   : > { %v16807_v15 = vcombine.low %v16805_v31, %v16806_v54  ;;  %v3376_v59 = vcombine.low %v16817_v36, %v16816_v4  ;;  %v16825_v4 = vld [vmem:[#allocation57_spill] sm:$0xff]  ;;  %v16827_v9 = vld [vmem:[#allocation68_spill] sm:$0xff] }
 0x53f   : > { %7470 = vrot.lane.b32.xlu1 %v16807_v15, %s9076_s29  ;;  %v6583_v15 = vrot.slane %v6569_v18, %v10383_v45  ;;  %v6551_v18 = vrot.slane %v6537_v0, %v10383_v45  ;;  %v16815_v0 = vld [vmem:[#allocation249_spill] sm:$0xff] }
 0x540   : > { %7600 = vrot.lane.b32.xlu0 %v16810_v53, %s9080_s12  ;;  %v6470_v53 = vcombine.low %v6431_v56, %v13131_v6  ;;  %v3360_v27 = vcombine.low %v16815_v0, %v16814_v63  ;;  %v16823_v63 = vcombine.high %v16790_v49, %v16791_v33 }
 0x541   : > { %v6602_v24 = vcombine.low %v6551_v18, %v6583_v15 }
 0x542   : > { %v13205_v36 = vrot.slane %v3360_v27, %v10233_v7  ;;  %v16829_v27 = vld [vmem:[#allocation62_spill] sm:$0xff] }
 0x543   : > { %7474 = vrot.lane.b32.xlu1 %v16811_v52, %s9076_s29  ;;  %v16818_v52 = vcombine.high %v16786_v61, %v16787_v13  ;;  %v13208_v61 = vrot.slane %v3376_v59, %v10233_v7  ;;  %v16824_v13 = vld [vmem:[#allocation65_spill] sm:$0xff]  ;;  %v16830_v59 = vld [vmem:[#allocation286_spill] sm:$0xff] }
 0x544   : > { %7604 = vrot.lane.b32.xlu0 %v6470_v53, %s9080_s12  ;;  %v3344_v53 = vcombine.low %v16820_v2, %v16819_v42  ;;  %v4448_v2 = vcombine.low %v16825_v4, %v16824_v13  ;;  %v16826_v42 = vld [vmem:[#allocation60_spill] sm:$0xff]  ;;  %v16832_v13 = vld [vmem:[#allocation141_spill] sm:$0xff] }
 0x545   : > { %v4464_v0 = vcombine.low %v16827_v9, %v16826_v42  ;;  %v3440_v33 = vcombine.low %v13208_v61, %v13196_v40  ;;  %v16834_v9 = vld [vmem:[#allocation127_spill] sm:$0xff] }
 0x546   : > { %v13219_v49 = vrot.slane %v3344_v53, %v10233_v7  ;;  %v13237_v4 = vrot.slane %v4448_v2, %v10233_v7 }
 0x547   : > { %7478 = vrot.lane.b32.xlu1 %v6602_v24, %s9076_s29  ;;  %v16822_v24 = vld [vmem:[#allocation71_spill] sm:$0xff]  ;;  %v13240_v42 = vrot.slane %v4464_v0, %v10233_v7  ;;  %s9094_s29 = smov 42  }
 0x548   : > { %7624 = vrot.lane.b32.xlu0 %v16818_v52, %s9081_s13  ;;  %v4480_v11 = vcombine.low %v16822_v24, %v16821_v28  ;;  %v16828_v52 = vcombine.high %v16800_v34, %v16801_v37  ;;  %v4432_v28 = vcombine.low %v16830_v59, %v16829_v27  ;;  %v16833_v34 = vld [vmem:[#allocation133_spill] sm:$0xff]  ;;  %v3408_v53 = vcombine.low %v13219_v49, %v13205_v36  ;;  %v16836_v27 = vld [vmem:[#allocation122_spill] sm:$0xff] }
 0x549   : > { %v5568_v37 = vcombine.low %v16833_v34, %v16832_v13  ;;  %v16837_v59 = vld [vmem:[#allocation130_spill] sm:$0xff]  ;;  %v16840_v13 = vld [vmem:[#allocation124_spill] sm:$0xff] }
 0x54a   : > { %v13226_v24 = vrot.slane %v4480_v11, %v10233_v7  ;;  %v16835_v11 = vld [vmem:[#allocation119_spill] sm:$0xff]  ;;  %v5552_v20 = vcombine.low %v16837_v59, %v16836_v27  ;;  %v13254_v2 = vrot.slane %v4432_v28, %v10233_v7  ;;  %v16841_v34 = vld [vmem:[#allocation310_spill] sm:$0xff]  ;;  %v3416_v28 = vrot.slane %v3408_v53, %v10383_v45 }
 0x54b   : > { %7498 = vrot.lane.b32.xlu1 %v16823_v63, %s9077_s30  ;;  %v16831_v63 = vcombine.high %v16805_v31, %v16806_v54  ;;  %v16838_v31 = vcombine.high %v11939_v5, %v11920_v3  ;;  %v13251_v54 = vrot.slane %v3440_v33, %v10383_v45  ;;  %v13265_v3 = vrot.slane %v5568_v37, %v10233_v7 }
 0x54c   : > { %7628 = vrot.lane.b32.xlu0 %v16828_v52, %s9081_s13  ;;  %v5536_v52 = vcombine.low %v16835_v11, %v16834_v9  ;;  %v4528_v0 = vcombine.low %v13240_v42, %v13226_v24  ;;  %v5520_v9 = vcombine.low %v16841_v34, %v16840_v13  ;;  %v6656_v5 = vcombine.low %v12563_v50, %v12569_v23 }
 0x54d   : > { %v6471_v33 = vcombine.high %v6431_v56, %v13131_v6  ;;  %v4496_v11 = vcombine.low %v13254_v2, %v13237_v4  ;;  %v13279_v37 = vrot.slane %v5552_v20, %v10233_v7  ;;  %v6624_v50 = vcombine.low %v12440_v19, %v12444_v10 }
 0x54e   : > { %v13276_v27 = vrot.slane %v5536_v52, %v10233_v7  ;;  %v6640_v23 = vcombine.low %v12500_v55, %v12504_v26  ;;  %v4536_v56 = vrot.slane %v4528_v0, %v10383_v45  ;;  %v3472_v20 = vcombine.low %v3416_v28, %v13251_v54  ;;  %v16842_v55 = vld [vmem:[#allocation179_spill] sm:$0xff]  ;;  %v16844_v52 = vld [vmem:[#allocation53_spill] sm:$0xff] }
 0x54f   : > { %7502 = vrot.lane.b32.xlu1 %v16831_v63, %s9077_s30  ;;  %v16839_v63 = vcombine.high %v12247_v38, %v12239_v1  ;;  %v6521_v1 = vcombine.high %v13001_v43, %v13007_v57  ;;  %v6603_v38 = vcombine.high %v6551_v18, %v6583_v15  ;;  %v6489_v43 = vcombine.high %v12937_v44, %v12928_v17  ;;  %v13303_v17 = vpop.permute.xlu0 %7432 }
 0x550   : > { %7632 = vrot.lane.b32.xlu0 %v16838_v31, %s9081_s13  ;;  %v6505_v57 = vcombine.high %v12980_v30, %v12966_v29  ;;  %v13294_v6 = vrot.slane %v5520_v9, %v10233_v7  ;;  %v5616_v10 = vcombine.low %v13279_v37, %v13265_v3  ;;  %v6608_v19 = vcombine.low %v16842_v55, %v12395_v21 }
 0x551   : > { %v13301_v26 = vrot.slane %v6656_v5, %v10233_v7  ;;  %v6473_v44 = vcombine.high %v12947_v25, %v12942_v47  ;;  %v13308_v29 = vrot.slane %v6521_v1, %v10233_v7  ;;  %v4504_v30 = vrot.slane %v4496_v11, %v10383_v45  ;;  %v16843_v25 = vld [vmem:[#allocation45_spill] sm:$0xff] }
 0x552   : > { %v5584_v15 = vcombine.low %v13294_v6, %v13276_v27  ;;  %v13314_v18 = vrot.slane %v6624_v50, %v10233_v7  ;;  %v13317_v21 = vrot.slane %v6640_v23, %v10233_v7  ;;  %v13321_v53 = vrot.slane %v6489_v43, %v10233_v7  ;;  %v16847_v50 = vld [vmem:[#allocation115_spill] sm:$0xff] }
 0x553   : > { %7506 = vrot.lane.b32.xlu1 %v16839_v63, %s9077_s30  ;;  %v13324_v47 = vrot.slane %v6505_v57, %v10233_v7  ;;  %v16845_v59 = vcombine.low %v16843_v25, %v16844_v52  ;;  %v5624_v31 = vrot.slane %v5616_v10, %v10383_v45  ;;  %v13332_v0 = vrot.slane %v6608_v19, %v10233_v7  ;;  %v13344_v11 = vpop.permute.xlu0 %7436  ;;  %v16849_v19 = vld [vmem:[#allocation177_spill] sm:$0xff] }
 0x554   : > { %7636 = vrot.lane.b32.xlu0 %v6471_v33, %s9081_s13  ;;  %v6704_v63 = vcombine.low %v13317_v21, %v13301_v26  ;;  %v4560_v13 = vcombine.low %v4504_v30, %v4536_v56  ;;  %v13337_v34 = vrot.slane %v6473_v44, %v10233_v7  ;;  %v5592_v5 = vrot.slane %v5584_v15, %v10383_v45  ;;  %v16850_v44 = vld [vmem:[#allocation168_spill] sm:$0xff] }
 0x555   : > { %v6584_v9 = vcombine.low %v13324_v47, %v13308_v29  ;;  %v6672_v33 = vcombine.low %v13332_v0, %v13314_v18  ;;  %v16851_v15 = vcombine.low %v16849_v19, %v16850_v44 }
 0x556   : > { %v6552_v1 = vcombine.low %v13337_v34, %v13321_v53  ;;  %v6712_v43 = vrot.slane %v6704_v63, %v10383_v45  ;;  %v5648_v57 = vcombine.low %v5592_v5, %v5624_v31 }
 0x557   : > { %7510 = vrot.lane.b32.xlu1 %v6603_v38, %s9077_s30  ;;  %v16846_v38 = vld [vmem:[#allocation108_spill] sm:$0xff]  ;;  %v6680_v10 = vrot.slane %v6672_v33, %v10383_v45  ;;  %v16852_v33 = vcombine.high %v16843_v25, %v16844_v52  ;;  %v3409_v25 = vcombine.high %v13219_v49, %v13205_v36  ;;  %v4529_v52 = vcombine.high %v13240_v42, %v13226_v24  ;;  %s9095_s30 = smov 44  }
 0x558   : > { %7656 = vrot.lane.b32.xlu0 %v3472_v20, %s9072_s18  ;;  %v16848_v23 = vcombine.low %v16846_v38, %v16847_v50  ;;  %v6592_v20 = vrot.slane %v6584_v9, %v10383_v45  ;;  %v6560_v55 = vrot.slane %v6552_v1, %v10383_v45  ;;  %v3473_v9 = vcombine.high %v3416_v28, %v13251_v54 }
 0x559   : > { %v3441_v54 = vcombine.high %v13208_v61, %v13196_v40  ;;  %v6737_v40 = vcombine.high %v6680_v10, %v6712_v43  ;;  %v4497_v36 = vcombine.high %v13254_v2, %v13237_v4  ;;  %v4543_v49 = vrot.slane %v4529_v52, %v10383_v45  ;;  %v16855_v4 = vld [vmem:[#allocation274_spill] sm:$0xff] }
 0x55a   : > { %v6605_v61 = vcombine.high %v6560_v55, %v6592_v20  ;;  %v16856_v2 = vld [vmem:[#allocation46_spill] sm:$0xff] }
 0x55b   : > { %7530 = vrot.lane.b32.xlu1 %v16845_v59, %s9078_s2  ;;  %v13362_v59 = vpop.permute.xlu0 %7440  ;;  %v4511_v42 = vrot.slane %v4497_v36, %v10383_v45  ;;  %v16868_v36 = vld [vmem:[#allocation28_spill] sm:$0xff] }
 0x55c   : > { %7660 = vrot.lane.b32.xlu0 %v4560_v13, %s9072_s18  ;;  %v6736_v13 = vcombine.low %v6680_v10, %v6712_v43  ;;  %v5585_v43 = vcombine.high %v13294_v6, %v13276_v27  ;;  %v6673_v6 = vcombine.high %v13332_v0, %v13314_v18  ;;  %v16863_v0 = vld [vmem:[#allocation176_spill] sm:$0xff] }
 0x55e   : > { %v5599_v27 = vrot.slane %v5585_v43, %v10383_v45  ;;  %v16870_v43 = vld [vmem:[#allocation30_spill] sm:$0xff] }
 0x55f   : > { %7534 = vrot.lane.b32.xlu1 %v16848_v23, %s9078_s2  ;;  %v6604_v23 = vcombine.low %v6560_v55, %v6592_v20  ;;  %v16857_v20 = vcombine.low %v16855_v4, %v16856_v2  ;;  %v4562_v55 = vcombine.low %v4511_v42, %v4543_v49 }
 0x560   : > { %7664 = vrot.lane.b32.xlu0 %v5648_v57, %s9072_s18  ;;  %v4561_v57 = vcombine.high %v4504_v30, %v4536_v56  ;;  %v16854_v56 = vcombine.high %v16849_v19, %v16850_v44  ;;  %v3455_v30 = vrot.slane %v3441_v54, %v10383_v45  ;;  %v6585_v19 = vcombine.high %v13324_v47, %v13308_v29 }
 0x561   : > { %v6553_v44 = vcombine.high %v13337_v34, %v13321_v53  ;;  %v16862_v53 = vld [vmem:[#allocation169_spill] sm:$0xff] }
 0x562   : > { %v6599_v47 = vrot.slane %v6585_v19, %v10383_v45  ;;  %v16864_v34 = vcombine.low %v16862_v53, %v16863_v0  ;;  %v16873_v19 = vld [vmem:[#allocation24_spill] sm:$0xff] }
 0x563   : > { %7538 = vrot.lane.b32.xlu1 %v16851_v15, %s9078_s2  ;;  %v16853_v15 = vcombine.high %v16846_v38, %v16847_v50  ;;  %v6567_v18 = vrot.slane %v6553_v44, %v10383_v45  ;;  %v16874_v44 = vcombine.high %v16855_v4, %v16856_v2  ;;  %v16879_v4 = vld [vmem:[#allocation91_spill] sm:$0xff] }
 0x564   : > { %7668 = vrot.lane.b32.xlu0 %v6736_v13, %s9072_s18  ;;  %v5649_v13 = vcombine.high %v5592_v5, %v5624_v31  ;;  %v3423_v31 = vrot.slane %v3409_v25, %v10383_v45  ;;  %v5617_v5 = vcombine.high %v13279_v37, %v13265_v3  ;;  %v6705_v3 = vcombine.high %v13317_v21, %v13301_v26  ;;  %v16866_v25 = vld [vmem:[#allocation41_spill] sm:$0xff]  ;;  %v16880_v2 = vld [vmem:[#allocation99_spill] sm:$0xff] }
 0x566   : > { %v13366_v63 = vpop.permute.xlu0 %7444  ;;  %v3474_v24 = vcombine.low %v3423_v31, %v3455_v30  ;;  %v5631_v10 = vrot.slane %v5617_v5, %v10383_v45  ;;  %v6719_v21 = vrot.slane %v6705_v3, %v10383_v45  ;;  %v16869_v5 = vld [vmem:[#allocation34_spill] sm:$0xff] }
 0x567   : > { %7542 = vrot.lane.b32.xlu1 %v6604_v23, %s9078_s2  ;;  %v16858_v23 = vld [vmem:[#allocation13_spill] sm:$0xff] }
 0x568   : > { %7688 = vrot.lane.b32.xlu0 %v3473_v9, %s9082_s15  ;;  %v16859_v9 = vld [vmem:[#allocation107_spill] sm:$0xff]  ;;  %v5650_v29 = vcombine.low %v5599_v27, %v5631_v10 }
 0x569   : > { %v16860_v26 = vcombine.low %v16858_v23, %v16859_v9 }
 0x56a   : > { %v13374_v1 = vpop.permute.xlu0 %7464 }
 0x56b   : > { %7562 = vrot.lane.b32.xlu1 %v16852_v33, %s9079_s5 }
 0x56c   : > { %7692 = vrot.lane.b32.xlu0 %v4561_v57, %s9082_s15  ;;  %v6687_v57 = vrot.slane %v6673_v6, %v10383_v45 }
 0x56e   : > { %v13383_v28 = vpop.permute.xlu0 %7468  ;;  %v6738_v54 = vcombine.low %v6687_v57, %v6719_v21 }
 0x56f   : > { %7566 = vrot.lane.b32.xlu1 %v16853_v15, %s9079_s5 }
 0x570   : > { %7696 = vrot.lane.b32.xlu0 %v5649_v13, %s9082_s15  ;;  %v6606_v13 = vcombine.low %v6567_v18, %v6599_v47 }
 0x572   : > { %v13395_v38 = vpop.permute.xlu0 %7472 }
 0x573   : > { %7570 = vrot.lane.b32.xlu1 %v16854_v56, %s9079_s5  ;;  %v16867_v56 = vld [vmem:[#allocation48_spill] sm:$0xff] }
 0x574   : > { %7700 = vrot.lane.b32.xlu0 %v6737_v40, %s9082_s15  ;;  %v3528_v52 = vcombine.low %v16867_v56, %v16866_v25  ;;  %v16877_v56 = vld [vmem:[#allocation96_spill] sm:$0xff] }
 0x576   : > { %v13405_v50 = vpop.permute.xlu0 %7476 }
 0x577   : > { %7574 = vrot.lane.b32.xlu1 %v6605_v61, %s9079_s5  ;;  %v3475_v61 = vcombine.high %v3423_v31, %v3455_v30  ;;  %v16875_v30 = vld [vmem:[#allocation110_spill] sm:$0xff]  ;;  %s9096_s5 = smov 46  }
 0x578   : > { %7720 = vrot.lane.b32.xlu0 %v3474_v24, %s9083_s16  ;;  %v3496_v24 = vcombine.low %v16869_v5, %v16868_v36  ;;  %v16876_v31 = vld [vmem:[#allocation102_spill] sm:$0xff]  ;;  %v4600_v5 = vcombine.low %v16880_v2, %v16879_v4  ;;  %v16890_v4 = vld [vmem:[#allocation161_spill] sm:$0xff] }
 0x57a   : > { %v13418_v37 = vpop.permute.xlu0 %7496 }
 0x57b   : > { %7594 = vrot.lane.b32.xlu1 %v16857_v20, %s9080_s12  ;;  %v16871_v20 = vld [vmem:[#allocation38_spill] sm:$0xff] }
 0x57c   : > { %7724 = vrot.lane.b32.xlu0 %v4562_v55, %s9083_s16  ;;  %v3512_v3 = vcombine.low %v16871_v20, %v16870_v43  ;;  %v16872_v55 = vld [vmem:[#allocation25_spill] sm:$0xff]  ;;  %v16883_v43 = vld [vmem:[#allocation298_spill] sm:$0xff] }
 0x57d   : > { %v3480_v6 = vcombine.low %v16873_v19, %v16872_v55  ;;  %v5651_v19 = vcombine.high %v5599_v27, %v5631_v10  ;;  %v16891_v27 = vcombine.high %v16862_v53, %v16863_v0  ;;  %v6792_v53 = vcombine.low %v12987_v12, %v12993_v16 }
 0x57e   : > { %v13433_v33 = vpop.permute.xlu0 %7500  ;;  %v13473_v25 = vrot.slane %v3512_v3, %v10233_v7  ;;  %v6607_v0 = vcombine.high %v6567_v18, %v6599_v47  ;;  %v13546_v47 = vpop.permute.xlu1 %7434 }
 0x57f   : > { %7598 = vrot.lane.b32.xlu1 %v16860_v26, %s9080_s12  ;;  %16861 = vst [vmem:[#allocation229_spill] sm:$0xff] %v13433_v33  ;;  %v13463_v26 = vrot.slane %v3528_v52, %v10233_v7  ;;  %v13481_v52 = vrot.slane %v3480_v6, %v10233_v7  ;;  %v16886_v6 = vld [vmem:[#allocation164_spill] sm:$0xff]  ;;  %16897 = vst [vmem:[#allocation238_spill] sm:$0xff] %v13546_v47 }
 0x580   : > { %7728 = vrot.lane.b32.xlu0 %v5650_v29, %s9083_s16  ;;  %v4616_v29 = vcombine.low %v16876_v31, %v16875_v30 }
 0x582   : > { %v13443_v15 = vpop.permute.xlu0 %7504  ;;  %v13492_v3 = vrot.slane %v4616_v29, %v10233_v7  ;;  %v16888_v29 = vld [vmem:[#allocation150_spill] sm:$0xff] }
 0x583   : > { %7602 = vrot.lane.b32.xlu1 %v16864_v34, %s9080_s12  ;;  %16865 = vst [vmem:[#allocation237_spill] sm:$0xff] %v13443_v15 }
 0x584   : > { %7732 = vrot.lane.b32.xlu0 %v6738_v54, %s9083_s16  ;;  %v4563_v54 = vcombine.high %v4511_v42, %v4543_v49  ;;  %v16881_v49 = vcombine.high %v16858_v23, %v16859_v9  ;;  %v3576_v42 = vcombine.low %v13473_v25, %v13463_v26  ;;  %v13504_v9 = vrot.slane %v4600_v5, %v10233_v7 }
 0x586   : > { %v13449_v40 = vpop.permute.xlu0 %7508  ;;  %v3584_v2 = vrot.slane %v3576_v42, %v10383_v45  ;;  %v4664_v5 = vcombine.low %v13504_v9, %v13492_v3 }
 0x587   : > { %7606 = vrot.lane.b32.xlu1 %v6606_v13, %s9080_s12  ;;  %v13470_v13 = vrot.slane %v3496_v24, %v10233_v7  ;;  %v16882_v24 = vld [vmem:[#allocation93_spill] sm:$0xff]  ;;  %s9097_s12 = smov 48  }
 0x588   : > { %7752 = vrot.lane.b32.xlu0 %v3475_v61, %s9084_s17  ;;  %v16878_v61 = vld [vmem:[#allocation88_spill] sm:$0xff]  ;;  %v4568_v20 = vcombine.low %v16883_v43, %v16882_v24  ;;  %v6739_v24 = vcombine.high %v6687_v57, %v6719_v21  ;;  %v16893_v43 = vld [vmem:[#allocation155_spill] sm:$0xff]  ;;  %v6760_v57 = vcombine.low %v12809_v22, %v12813_v14  ;;  %v4672_v16 = vrot.slane %v4664_v5, %v10383_v45  ;;  %v16899_v22 = vld [vmem:[#allocation202_spill] sm:$0xff] }
 0x589   : > { %v4584_v36 = vcombine.low %v16878_v61, %v16877_v56  ;;  %v3544_v31 = vcombine.low %v13481_v52, %v13470_v13  ;;  %v16889_v61 = vld [vmem:[#allocation153_spill] sm:$0xff]  ;;  %v16901_v5 = vld [vmem:[#allocation263_spill] sm:$0xff] }
 0x58a   : > { %v13467_v34 = vpop.permute.xlu0 %7528  ;;  %v5688_v10 = vcombine.low %v16890_v4, %v16889_v61  ;;  %v16898_v4 = vld [vmem:[#allocation210_spill] sm:$0xff] }
 0x58b   : > { %7626 = vrot.lane.b32.xlu1 %v16874_v44, %s9081_s13  ;;  %v16885_v44 = vld [vmem:[#allocation172_spill] sm:$0xff]  ;;  %v13501_v23 = vrot.slane %v4584_v36, %v10233_v7  ;;  %v13517_v36 = vrot.slane %v4568_v20, %v10233_v7  ;;  %v3552_v42 = vrot.slane %v3544_v31, %v10383_v45  ;;  %v6744_v14 = vcombine.low %v16899_v22, %v16898_v4  ;;  %v13582_v22 = vpop.permute.xlu1 %7438 }
 0x58c   : > { %7756 = vrot.lane.b32.xlu0 %v4563_v54, %s9084_s17  ;;  %v5704_v30 = vcombine.low %v16886_v6, %v16885_v44  ;;  %v16887_v54 = vld [vmem:[#allocation158_spill] sm:$0xff]  ;;  %v13538_v21 = vrot.slane %v5688_v10, %v10233_v7  ;;  %v13558_v10 = vrot.slane %v6792_v53, %v10233_v7  ;;  %16904 = vst [vmem:[#allocation231_spill] sm:$0xff] %v13582_v22  ;;  %v16910_v22 = vld [vmem:[#allocation144_spill] sm:$0xff] }
 0x58d   : > { %v5672_v56 = vcombine.low %v16888_v29, %v16887_v54  ;;  %v4632_v20 = vcombine.low %v13517_v36, %v13501_v23  ;;  %v16896_v29 = vld [vmem:[#allocation215_spill] sm:$0xff]  ;;  %v3608_v31 = vcombine.low %v3552_v42, %v3584_v2  ;;  %v16911_v62 = vcombine.low %v16909_v60, %v16910_v22 }
 0x58e   : > { %v13494_v55 = vpop.permute.xlu0 %7532  ;;  %v13526_v6 = vrot.slane %v5704_v30, %v10233_v7  ;;  %v16895_v30 = vld [vmem:[#allocation223_spill] sm:$0xff] }
 0x58f   : > { %7630 = vrot.lane.b32.xlu1 %v16881_v49, %s9081_s13  ;;  %16884 = vst [vmem:[#allocation230_spill] sm:$0xff] %v13494_v55  ;;  %v13535_v54 = vrot.slane %v5672_v56, %v10233_v7  ;;  %v6776_v12 = vcombine.low %v16896_v29, %v16895_v30  ;;  %v13578_v29 = vrot.slane %v6744_v14, %v10233_v7 }
 0x590   : > { %7760 = vrot.lane.b32.xlu0 %v5651_v19, %s9084_s17  ;;  %v16894_v19 = vld [vmem:[#allocation316_spill] sm:$0xff]  ;;  %v5752_v61 = vcombine.low %v13538_v21, %v13526_v6 }
 0x591   : > { %v5656_v44 = vcombine.low %v16894_v19, %v16893_v43  ;;  %v4640_v43 = vrot.slane %v4632_v20, %v10383_v45 }
 0x592   : > { %v13521_v49 = vpop.permute.xlu0 %7536  ;;  %v5760_v30 = vrot.slane %v5752_v61, %v10383_v45 }
 0x593   : > { %7634 = vrot.lane.b32.xlu1 %v16891_v27, %s9081_s13  ;;  %16892 = vst [vmem:[#allocation236_spill] sm:$0xff] %v13521_v49  ;;  %v13551_v56 = vrot.slane %v5656_v44, %v10233_v7  ;;  %v16900_v27 = vld [vmem:[#allocation264_spill] sm:$0xff]  ;;  %v13568_v44 = vrot.slane %v6760_v57, %v10233_v7  ;;  %v4696_v4 = vcombine.low %v4640_v43, %v4672_v16 }
 0x594   : > { %7764 = vrot.lane.b32.xlu0 %v6739_v24, %s9084_s17  ;;  %v16902_v24 = vcombine.low %v16900_v27, %v16901_v5  ;;  %v16905_v57 = vld [vmem:[#allocation288_spill] sm:$0xff] }
 0x595   : > { %v5720_v19 = vcombine.low %v13551_v56, %v13535_v54  ;;  %v6808_v47 = vcombine.low %v13578_v29, %v13568_v44 }
 0x596   : > { %v13548_v18 = vpop.permute.xlu0 %7540 }
 0x597   : > { %7638 = vrot.lane.b32.xlu1 %v6607_v0, %s9081_s13  ;;  %v13571_v0 = vrot.slane %v6776_v12, %v10233_v7  ;;  %v6816_v49 = vrot.slane %v6808_v47, %v10383_v45  ;;  %s9098_s13 = smov 50  }
 0x598   : > { %7784 = vrot.lane.b32.xlu0 %v16902_v24, %s9085_s22  ;;  %v16906_v24 = vld [vmem:[#allocation77_spill] sm:$0xff] }
 0x599   : > { %v6840_v20 = vcombine.low %v13571_v0, %v13558_v10  ;;  %v16907_v12 = vcombine.low %v16905_v57, %v16906_v24 }
 0x59a   : > { %v13574_v53 = vpop.permute.xlu0 %7560 }
 0x59b   : > { %7658 = vrot.lane.b32.xlu1 %v3608_v31, %s9072_s18  ;;  %16903 = vst [vmem:[#allocation228_spill] sm:$0xff] %v13574_v53  ;;  %v5728_v31 = vrot.slane %v5720_v19, %v10383_v45  ;;  %v6848_v14 = vrot.slane %v6840_v20, %v10383_v45  ;;  %v13601_v19 = vpop.permute.xlu1 %7442 }
 0x59c   : > { %7788 = vrot.lane.b32.xlu0 %v16907_v12, %s9085_s22  ;;  %16912 = vst [vmem:[#allocation232_spill] sm:$0xff] %v13601_v19 }
 0x59d   : > { %v5784_v48 = vcombine.low %v5728_v31, %v5760_v30  ;;  %v6872_v55 = vcombine.low %v6816_v49, %v6848_v14 }
 0x59e   : > { %v13592_v61 = vpop.permute.xlu0 %7564 }
 0x59f   : > { %7662 = vrot.lane.b32.xlu1 %v4696_v4, %s9072_s18  ;;  %16908 = vst [vmem:[#allocation239_spill] sm:$0xff] %v13592_v61  ;;  %v16914_v4 = vld [vmem:[#allocation204_spill] sm:$0xff]  ;;  %v16915_v61 = vld [vmem:[#allocation205_spill] sm:$0xff] }
 0x5a0   : > { %7792 = vrot.lane.b32.xlu0 %v16911_v62, %s9085_s22  ;;  %v16916_v53 = vcombine.low %v16914_v4, %v16915_v61  ;;  %v3609_v62 = vcombine.high %v3552_v42, %v3584_v2  ;;  %v3577_v42 = vcombine.high %v13473_v25, %v13463_v26  ;;  %v4665_v26 = vcombine.high %v13504_v9, %v13492_v3 }
 0x5a1   : > { %v5753_v3 = vcombine.high %v13538_v21, %v13526_v6  ;;  %v6841_v21 = vcombine.high %v13571_v0, %v13558_v10 }
 0x5a2   : > { %v13603_v12 = vpop.permute.xlu0 %7568 }
 0x5a3   : > { %7666 = vrot.lane.b32.xlu1 %v5784_v48, %s9072_s18  ;;  %16913 = vst [vmem:[#allocation240_spill] sm:$0xff] %v13603_v12  ;;  %v16918_v48 = vcombine.high %v16900_v27, %v16901_v5  ;;  %v5785_v5 = vcombine.high %v5728_v31, %v5760_v30  ;;  %v6873_v30 = vcombine.high %v6816_v49, %v6848_v14  ;;  %v16929_v31 = vld [vmem:[#allocation265_spill] sm:$0xff] }
 0x5a4   : > { %7796 = vrot.lane.b32.xlu0 %v16916_v53, %s9085_s22  ;;  %v4697_v53 = vcombine.high %v4640_v43, %v4672_v16  ;;  %v3545_v16 = vcombine.high %v13481_v52, %v13470_v13  ;;  %v4633_v13 = vcombine.high %v13517_v36, %v13501_v23  ;;  %v5721_v36 = vcombine.high %v13551_v56, %v13535_v54 }
 0x5a5   : > { %v5767_v6 = vrot.slane %v5753_v3, %v10383_v45  ;;  %v6809_v54 = vcombine.high %v13578_v29, %v13568_v44 }
 0x5a6   : > { %v13610_v20 = vpop.permute.xlu1 %7446  ;;  %v13612_v15 = vpop.permute.xlu0 %7572  ;;  %v4647_v23 = vrot.slane %v4633_v13, %v10383_v45 }
 0x5a7   : > { %7670 = vrot.lane.b32.xlu1 %v6872_v55, %s9072_s18  ;;  %16917 = vst [vmem:[#allocation241_spill] sm:$0xff] %v13610_v20  ;;  %v16921_v55 = vcombine.high %v16905_v57, %v16906_v24  ;;  %v3591_v57 = vrot.slane %v3577_v42, %v10383_v45  ;;  %v4679_v24 = vrot.slane %v4665_v26, %v10383_v45  ;;  %v16935_v42 = vld [vmem:[#allocation287_spill] sm:$0xff]  ;;  %v16939_v26 = vld [vmem:[#allocation138_spill] sm:$0xff]  ;;  %s9092_s18 = smov 38  }
 0x5a8   : > { %7816 = vrot.lane.b32.xlu0 %v16918_v48, %s9086_s23  ;;  %v6823_v13 = vrot.slane %v6809_v54, %v10383_v45  ;;  %v16950_v54 = vld [vmem:[#allocation254_spill] sm:$0xff] }
 0x5aa   : > { %v13619_v47 = vpop.permute.xlu0 %7592  ;;  %v13621_v19 = vpop.permute.xlu1 %7466 }
 0x5ab   : > { %7690 = vrot.lane.b32.xlu1 %v3609_v62, %s9082_s15  ;;  %16919 = vst [vmem:[#allocation233_spill] sm:$0xff] %v13619_v47  ;;  %16920 = vst [vmem:[#allocation234_spill] sm:$0xff] %v13621_v19  ;;  %v16924_v62 = vcombine.high %v16909_v60, %v16910_v22  ;;  %v16927_v60 = vcombine.high %v16914_v4, %v16915_v61  ;;  %v3559_v22 = vrot.slane %v3545_v16, %v10383_v45  ;;  %v16930_v61 = vld [vmem:[#allocation8_spill] sm:$0xff]  ;;  %v17003_v47 = vld [vmem:[#allocation170_spill] sm:$0xff] }
 0x5ac   : > { %7820 = vrot.lane.b32.xlu0 %v16921_v55, %s9086_s23  ;;  %v16931_v14 = vcombine.low %v16929_v31, %v16930_v61  ;;  %v16934_v55 = vld [vmem:[#allocation289_spill] sm:$0xff]  ;;  %v13689_v16 = vrot.slane %v6841_v21, %v10383_v45 }
 0x5ad   : > { %v3610_v49 = vcombine.low %v3559_v22, %v3591_v57  ;;  %v16947_v21 = vld [vmem:[#allocation21_spill] sm:$0xff]  ;;  %v3611_v19 = vcombine.high %v3559_v22, %v3591_v57  ;;  %v16960_v22 = vld [vmem:[#allocation67_spill] sm:$0xff] }
 0x5ae   : > { %v13628_v2 = vpop.permute.xlu0 %7596  ;;  %v6874_v3 = vcombine.low %v6823_v13, %v13689_v16 }
 0x5af   : > { %7694 = vrot.lane.b32.xlu1 %v4697_v53, %s9082_s15  ;;  %16922 = vst [vmem:[#allocation242_spill] sm:$0xff] %v13628_v2  ;;  %v4698_v53 = vcombine.low %v4647_v23, %v4679_v24 }
 0x5b0   : > { %7824 = vrot.lane.b32.xlu0 %v16924_v62, %s9086_s23  ;;  %v5735_v62 = vrot.slane %v5721_v36, %v10383_v45 }
 0x5b1   : > { %v13632_v27 = vpop.permute.xlu1 %7470 }
 0x5b2   : > { %16923 = vst [vmem:[#allocation9_spill] sm:$0xff] %v13632_v27  ;;  %v13641_v43 = vpop.permute.xlu0 %7600  ;;  %v5786_v0 = vcombine.low %v5735_v62, %v5767_v6  ;;  %v16952_v27 = vld [vmem:[#allocation258_spill] sm:$0xff] }
 0x5b3   : > { %7698 = vrot.lane.b32.xlu1 %v5785_v5, %s9082_s15  ;;  %16925 = vst [vmem:[#allocation261_spill] sm:$0xff] %v13641_v43  ;;  %v16936_v5 = vcombine.low %v16934_v55, %v16935_v42 }
 0x5b4   : > { %7828 = vrot.lane.b32.xlu0 %v16927_v60, %s9086_s23 }
 0x5b5   : > { %v13646_v25 = vpop.permute.xlu1 %7474 }
 0x5b6   : > { %16926 = vst [vmem:[#allocation54_spill] sm:$0xff] %v13646_v25  ;;  %v13656_v52 = vpop.permute.xlu0 %7604  ;;  %v16951_v25 = vld [vmem:[#allocation19_spill] sm:$0xff] }
 0x5b7   : > { %7702 = vrot.lane.b32.xlu1 %v6873_v30, %s9082_s15  ;;  %v16940_v30 = vld [vmem:[#allocation145_spill] sm:$0xff]  ;;  %s9099_s15 = smov 52  }
 0x5b8   : > { %7848 = vrot.lane.b32.xlu0 %v16931_v14, %s9087_s24  ;;  %v16941_v60 = vcombine.low %v16939_v26, %v16940_v30  ;;  %v16945_v14 = vld [vmem:[#allocation198_spill] sm:$0xff] }
 0x5b9   : > { %v13661_v9 = vpop.permute.xlu1 %7478 }
 0x5ba   : > { %16928 = vst [vmem:[#allocation52_spill] sm:$0xff] %v13661_v9  ;;  %v13671_v4 = vpop.permute.xlu0 %7624 }
 0x5bb   : > { %7722 = vrot.lane.b32.xlu1 %v3610_v49, %s9083_s16  ;;  %16932 = vst [vmem:[#allocation10_spill] sm:$0xff] %v13671_v4  ;;  %v16944_v49 = vld [vmem:[#allocation206_spill] sm:$0xff] }
 0x5bc   : > { %7852 = vrot.lane.b32.xlu0 %v16936_v5, %s9087_s24  ;;  %v16946_v36 = vcombine.low %v16944_v49, %v16945_v14 }
 0x5bd   : > { %v13676_v48 = vpop.permute.xlu1 %7498 }
 0x5be   : > { %16933 = vst [vmem:[#allocation76_spill] sm:$0xff] %v13676_v48  ;;  %v13686_v56 = vpop.permute.xlu0 %7628 }
 0x5bf   : > { %7726 = vrot.lane.b32.xlu1 %v4698_v53, %s9083_s16  ;;  %16937 = vst [vmem:[#allocation113_spill] sm:$0xff] %v13686_v56  ;;  %v16948_v53 = vld [vmem:[#allocation23_spill] sm:$0xff] }
 0x5c0   : > { %7856 = vrot.lane.b32.xlu0 %v16941_v60, %s9087_s24  ;;  %v3664_v5 = vcombine.low %v16948_v53, %v16947_v21  ;;  %v16949_v60 = vld [vmem:[#allocation252_spill] sm:$0xff]  ;;  %v16956_v53 = vld [vmem:[#allocation246_spill] sm:$0xff] }
 0x5c1   : > { %v13691_v10 = vpop.permute.xlu1 %7502  ;;  %v16955_v21 = vld [vmem:[#allocation248_spill] sm:$0xff] }
 0x5c2   : > { %16938 = vst [vmem:[#allocation105_spill] sm:$0xff] %v13691_v10  ;;  %v13699_v44 = vpop.permute.xlu0 %7632  ;;  %v3632_v10 = vcombine.low %v16950_v54, %v16949_v60  ;;  %v13726_v9 = vrot.slane %v3664_v5, %v10233_v7  ;;  %v16957_v60 = vld [vmem:[#allocation82_spill] sm:$0xff] }
 0x5c3   : > { %7730 = vrot.lane.b32.xlu1 %v5786_v0, %s9083_s16  ;;  %16942 = vst [vmem:[#allocation15_spill] sm:$0xff] %v13699_v44  ;;  %v16958_v54 = vld [vmem:[#allocation74_spill] sm:$0xff]  ;;  %v16975_v44 = vld [vmem:[#allocation132_spill] sm:$0xff] }
 0x5c4   : > { %7860 = vrot.lane.b32.xlu0 %v16946_v36, %s9087_s24  ;;  %v16954_v36 = vcombine.high %v16929_v31, %v16930_v61  ;;  %v4752_v20 = vcombine.low %v16958_v54, %v16957_v60  ;;  %v16961_v31 = vld [vmem:[#allocation59_spill] sm:$0xff]  ;;  %v16966_v60 = vld [vmem:[#allocation64_spill] sm:$0xff] }
 0x5c5   : > { %v13701_v29 = vpop.permute.xlu1 %7506  ;;  %v4720_v61 = vcombine.low %v16961_v31, %v16960_v22  ;;  %v16967_v54 = vld [vmem:[#allocation56_spill] sm:$0xff] }
 0x5c6   : > { %16943 = vst [vmem:[#allocation14_spill] sm:$0xff] %v13701_v29  ;;  %v13713_v0 = vpop.permute.xlu0 %7636  ;;  %v3648_v29 = vcombine.low %v16952_v27, %v16951_v25  ;;  %v13732_v27 = vrot.slane %v3632_v10, %v10233_v7  ;;  %v4704_v22 = vcombine.low %v16967_v54, %v16966_v60  ;;  %v13757_v31 = vrot.slane %v4752_v20, %v10233_v7  ;;  %v16972_v60 = vld [vmem:[#allocation129_spill] sm:$0xff] }
 0x5c7   : > { %7734 = vrot.lane.b32.xlu1 %v6874_v3, %s9083_s16  ;;  %v3616_v3 = vcombine.low %v16956_v53, %v16955_v21  ;;  %v16963_v21 = vld [vmem:[#allocation70_spill] sm:$0xff]  ;;  %v5787_v20 = vcombine.high %v5735_v62, %v5767_v6  ;;  %v16973_v54 = vld [vmem:[#allocation121_spill] sm:$0xff]  ;;  %s9100_s16 = smov 54  }
 0x5c8   : > { %7880 = vrot.lane.b32.xlu0 %v16954_v36, %s9088_s25  ;;  %v13737_v25 = vrot.slane %v3648_v29, %v10233_v7  ;;  %v16962_v36 = vld [vmem:[#allocation78_spill] sm:$0xff] }
 0x5c9   : > { %v13717_v48 = vpop.permute.xlu1 %7510  ;;  %v4736_v5 = vcombine.low %v16963_v21, %v16962_v36  ;;  %v13750_v10 = vrot.slane %v3616_v3, %v10233_v7  ;;  %v16977_v6 = vld [vmem:[#allocation126_spill] sm:$0xff] }
 0x5ca   : > { %16953 = vst [vmem:[#allocation250_spill] sm:$0xff] %v13717_v48  ;;  %v13734_v57 = vpop.permute.xlu0 %7656  ;;  %v4699_v48 = vcombine.high %v4647_v23, %v4679_v24  ;;  %v3712_v29 = vcombine.low %v13737_v25, %v13726_v9  ;;  %v16968_v24 = vld [vmem:[#allocation143_spill] sm:$0xff]  ;;  %v16978_v62 = vld [vmem:[#allocation118_spill] sm:$0xff] }
 0x5cb   : > { %7754 = vrot.lane.b32.xlu1 %v3611_v19, %s9084_s17  ;;  %16959 = vst [vmem:[#allocation249_spill] sm:$0xff] %v13734_v57  ;;  %v16965_v19 = vcombine.high %v16934_v55, %v16935_v42  ;;  %v16969_v23 = vld [vmem:[#allocation135_spill] sm:$0xff]  ;;  %v3680_v55 = vcombine.low %v13750_v10, %v13732_v27  ;;  %v13767_v42 = vrot.slane %v4720_v61, %v10233_v7 }
 0x5cc   : > { %v5840_v36 = vcombine.low %v16969_v23, %v16968_v24  ;;  %v13770_v3 = vrot.slane %v4736_v5, %v10233_v7  ;;  %v16976_v23 = vcombine.high %v16939_v26, %v16940_v30  ;;  %v3720_v61 = vrot.slane %v3712_v29, %v10383_v45 }
 0x5cd   : > { %v13743_v53 = vpop.permute.xlu1 %7530  ;;  %7884 = vrot.lane.b32.xlu0 %v16965_v19, %s9088_s25  ;;  %v3688_v29 = vrot.slane %v3680_v55, %v10383_v45  ;;  %v16987_v55 = vcombine.high %v16944_v49, %v16945_v14 }
 0x5ce   : > { %16964 = vst [vmem:[#allocation256_spill] sm:$0xff] %v13743_v53  ;;  %v13762_v21 = vpop.permute.xlu0 %7660  ;;  %v16974_v53 = vld [vmem:[#allocation140_spill] sm:$0xff]  ;;  %v4800_v5 = vcombine.low %v13770_v3, %v13757_v31 }
 0x5cf   : > { %7758 = vrot.lane.b32.xlu1 %v4699_v48, %s9084_s17  ;;  %16970 = vst [vmem:[#allocation255_spill] sm:$0xff] %v13762_v21  ;;  %v5808_v48 = vcombine.low %v16973_v54, %v16972_v60  ;;  %v5824_v24 = vcombine.low %v16975_v44, %v16974_v53  ;;  %v13784_v21 = vrot.slane %v4704_v22, %v10233_v7  ;;  %v16979_v53 = vld [vmem:[#allocation197_spill] sm:$0xff]  ;;  %v16980_v54 = vld [vmem:[#allocation180_spill] sm:$0xff] }
 0x5d0   : > { %v5792_v60 = vcombine.low %v16978_v62, %v16977_v6  ;;  %v13792_v44 = vrot.slane %v5840_v36, %v10233_v7  ;;  %v6928_v26 = vcombine.low %v16980_v54, %v16979_v53  ;;  %v16983_v6 = vld [vmem:[#allocation193_spill] sm:$0xff]  ;;  %v16984_v62 = vld [vmem:[#allocation191_spill] sm:$0xff] }
 0x5d1   : > { %v13772_v19 = vpop.permute.xlu1 %7534  ;;  %7888 = vrot.lane.b32.xlu0 %v16976_v23, %s9088_s25  ;;  %v4768_v22 = vcombine.low %v13784_v21, %v13767_v42  ;;  %v13808_v36 = vrot.slane %v5824_v24, %v10233_v7  ;;  %v6896_v53 = vcombine.low %v16984_v62, %v16983_v6  ;;  %v16985_v54 = vld [vmem:[#allocation195_spill] sm:$0xff]  ;;  %v16988_v24 = vld [vmem:[#allocation182_spill] sm:$0xff]  ;;  %v16989_v6 = vld [vmem:[#allocation189_spill] sm:$0xff] }
 0x5d2   : > { %16971 = vst [vmem:[#allocation244_spill] sm:$0xff] %v13772_v19  ;;  %v13796_v30 = vpop.permute.xlu0 %7664  ;;  %v13805_v19 = vrot.slane %v5808_v48, %v10233_v7  ;;  %v6880_v62 = vcombine.low %v16989_v6, %v16988_v24 }
 0x5d3   : > { %7762 = vrot.lane.b32.xlu1 %v5787_v20, %s9084_s17  ;;  %16981 = vst [vmem:[#allocation243_spill] sm:$0xff] %v13796_v30  ;;  %v6875_v20 = vcombine.high %v6823_v13, %v13689_v16  ;;  %v16986_v30 = vld [vmem:[#allocation194_spill] sm:$0xff]  ;;  %v3744_v16 = vcombine.low %v3688_v29, %v3720_v61  ;;  %v13821_v13 = vrot.slane %v5792_v60, %v10233_v7 }
 0x5d4   : > { %v6912_v56 = vcombine.low %v16986_v30, %v16985_v54  ;;  %v5888_v48 = vcombine.low %v13808_v36, %v13792_v44  ;;  %v13828_v30 = vrot.slane %v6928_v26, %v10233_v7  ;;  %v4776_v14 = vrot.slane %v4768_v22, %v10383_v45  ;;  %v16992_v26 = vld [vmem:[#allocation276_spill] sm:$0xff] }
 0x5d5   : > { %v13801_v23 = vpop.permute.xlu1 %7538  ;;  %7892 = vrot.lane.b32.xlu0 %v16987_v55, %s9088_s25  ;;  %v13838_v60 = vrot.slane %v6896_v53, %v10233_v7  ;;  %v16993_v55 = vld [vmem:[#allocation11_spill] sm:$0xff]  ;;  %v13850_v22 = vrot.slane %v6880_v62, %v10233_v7 }
 0x5d6   : > { %16982 = vst [vmem:[#allocation79_spill] sm:$0xff] %v13801_v23  ;;  %v4808_v23 = vrot.slane %v4800_v5, %v10383_v45  ;;  %v13830_v54 = vpop.permute.xlu0 %7668  ;;  %v5856_v5 = vcombine.low %v13821_v13, %v13805_v19  ;;  %v16994_v24 = vcombine.low %v16992_v26, %v16993_v55  ;;  %v5896_v6 = vrot.slane %v5888_v48, %v10383_v45  ;;  %v16997_v48 = vld [vmem:[#allocation300_spill] sm:$0xff] }
 0x5d7   : > { %7766 = vrot.lane.b32.xlu1 %v6875_v20, %s9084_s17  ;;  %16990 = vst [vmem:[#allocation71_spill] sm:$0xff] %v13830_v54  ;;  %v13841_v20 = vrot.slane %v6912_v56, %v10233_v7  ;;  %v6944_v2 = vcombine.low %v13850_v22, %v13838_v60  ;;  %s9101_s17 = smov 56  }
 0x5d8   : > { %v4832_v56 = vcombine.low %v4776_v14, %v4808_v23 }
 0x5d9   : > { %v13832_v49 = vpop.permute.xlu1 %7542  ;;  %7912 = vrot.lane.b32.xlu0 %v3744_v16, %s9089_s28  ;;  %v6976_v53 = vcombine.low %v13841_v20, %v13828_v30  ;;  %v5864_v16 = vrot.slane %v5856_v5, %v10383_v45  ;;  %v17002_v5 = vld [vmem:[#allocation317_spill] sm:$0xff] }
 0x5da   : > { %16991 = vst [vmem:[#allocation65_spill] sm:$0xff] %v13832_v49  ;;  %v13854_v49 = vpop.permute.xlu0 %7688 }
 0x5db   : > { %7786 = vrot.lane.b32.xlu1 %v16994_v24, %s9085_s22  ;;  %16995 = vst [vmem:[#allocation57_spill] sm:$0xff] %v13854_v49  ;;  %v16998_v24 = vld [vmem:[#allocation116_spill] sm:$0xff]  ;;  %v6984_v57 = vrot.slane %v6976_v53, %v10383_v45  ;;  %v5920_v49 = vcombine.low %v5864_v16, %v5896_v6  ;;  %v17007_v53 = vcombine.low %v13082_v46, %v13065_v58 }
 0x5dc   : > { %v16999_v62 = vcombine.low %v16997_v48, %v16998_v24 }
 0x5dd   : > { %v13856_v43 = vpop.permute.xlu1 %7562  ;;  %7916 = vrot.lane.b32.xlu0 %v4832_v56, %s9089_s28  ;;  %v17004_v56 = vcombine.low %v17002_v5, %v17003_v47 }
 0x5de   : > { %16996 = vst [vmem:[#allocation60_spill] sm:$0xff] %v13856_v43  ;;  %v13867_v12 = vpop.permute.xlu0 %7692  ;;  %v6952_v43 = vrot.slane %v6944_v2, %v10383_v45 }
 0x5df   : > { %7790 = vrot.lane.b32.xlu1 %v16999_v62, %s9085_s22  ;;  %17000 = vst [vmem:[#allocation68_spill] sm:$0xff] %v13867_v12 }
 0x5e0   : > { %v7008_v33 = vcombine.low %v6952_v43, %v6984_v57 }
 0x5e1   : > { %v13869_v4 = vpop.permute.xlu1 %7566  ;;  %7920 = vrot.lane.b32.xlu0 %v5920_v49, %s9089_s28  ;;  %v3745_v49 = vcombine.high %v3688_v29, %v3720_v61  ;;  %v17012_v61 = vcombine.high %v16997_v48, %v16998_v24  ;;  %v3713_v29 = vcombine.high %v13737_v25, %v13726_v9  ;;  %v4801_v9 = vcombine.high %v13770_v3, %v13757_v31 }
 0x5e2   : > { %17001 = vst [vmem:[#allocation62_spill] sm:$0xff] %v13869_v4  ;;  %v13877_v54 = vpop.permute.xlu0 %7696  ;;  %v5889_v31 = vcombine.high %v13808_v36, %v13792_v44  ;;  %v6977_v36 = vcombine.high %v13841_v20, %v13828_v30 }
 0x5e3   : > { %7794 = vrot.lane.b32.xlu1 %v17004_v56, %s9085_s22  ;;  %17005 = vst [vmem:[#allocation286_spill] sm:$0xff] %v13877_v54  ;;  %v17009_v56 = vcombine.high %v16992_v26, %v16993_v55  ;;  %v3727_v55 = vrot.slane %v3713_v29, %v10383_v45  ;;  %v17026_v29 = vld [vmem:[#allocation299_spill] sm:$0xff] }
 0x5e4   : > { %v5903_v44 = vrot.slane %v5889_v31, %v10383_v45 }
 0x5e5   : > { %v13879_v62 = vpop.permute.xlu1 %7570  ;;  %7924 = vrot.lane.b32.xlu0 %v7008_v33, %s9089_s28  ;;  %v4833_v33 = vcombine.high %v4776_v14, %v4808_v23  ;;  %v3681_v23 = vcombine.high %v13750_v10, %v13732_v27  ;;  %v17015_v14 = vcombine.high %v17002_v5, %v17003_v47  ;;  %v4769_v27 = vcombine.high %v13784_v21, %v13767_v42 }
 0x5e6   : > { %17006 = vst [vmem:[#allocation141_spill] sm:$0xff] %v13879_v62  ;;  %v13886_v2 = vpop.permute.xlu0 %7700  ;;  %v17018_v47 = vcombine.high %v13082_v46, %v13065_v58  ;;  %v4815_v10 = vrot.slane %v4801_v9, %v10383_v45  ;;  %v5857_v21 = vcombine.high %v13821_v13, %v13805_v19  ;;  %v17020_v58 = vld [vmem:[#allocation277_spill] sm:$0xff]  ;;  %v17021_v46 = vld [vmem:[#allocation275_spill] sm:$0xff]  ;;  %v6945_v13 = vcombine.high %v13850_v22, %v13838_v60  ;;  %v17030_v60 = vld [vmem:[#allocation318_spill] sm:$0xff] }
 0x5e7   : > { %7798 = vrot.lane.b32.xlu1 %v17007_v53, %s9085_s22  ;;  %v3695_v48 = vrot.slane %v3681_v23, %v10383_v45  ;;  %v4783_v24 = vrot.slane %v4769_v27, %v10383_v45  ;;  %v17022_v42 = vcombine.low %v17020_v58, %v17021_v46  ;;  %v6991_v23 = vrot.slane %v6977_v36, %v10383_v45  ;;  %v17031_v22 = vld [vmem:[#allocation178_spill] sm:$0xff]  ;;  %s9102_s22 = smov 58  }
 0x5e8   : > { %v5871_v19 = vrot.slane %v5857_v21, %v10383_v45  ;;  %v6959_v9 = vrot.slane %v6945_v13, %v10383_v45  ;;  %v17036_v21 = vld [vmem:[#allocation49_spill] sm:$0xff] }
 0x5e9   : > { %v13888_v4 = vpop.permute.xlu1 %7574  ;;  %7944 = vrot.lane.b32.xlu0 %v3745_v49, %s9090_s3  ;;  %v5921_v49 = vcombine.high %v5864_v16, %v5896_v6  ;;  %v7009_v6 = vcombine.high %v6952_v43, %v6984_v57  ;;  %v3746_v57 = vcombine.low %v3695_v48, %v3727_v55  ;;  %v3747_v13 = vcombine.high %v3695_v48, %v3727_v55  ;;  %v17046_v48 = vld [vmem:[#allocation114_spill] sm:$0xff] }
 0x5ea   : > { %17008 = vst [vmem:[#allocation133_spill] sm:$0xff] %v13888_v4  ;;  %v13895_v62 = vpop.permute.xlu0 %7720  ;;  %v5922_v20 = vcombine.low %v5871_v19, %v5903_v44 }
 0x5eb   : > { %7818 = vrot.lane.b32.xlu1 %v17009_v56, %s9086_s23  ;;  %17010 = vst [vmem:[#allocation127_spill] sm:$0xff] %v13895_v62  ;;  %v4834_v56 = vcombine.low %v4783_v24, %v4815_v10 }
 0x5ed   : > { %v13897_v54 = vpop.permute.xlu1 %7594  ;;  %7948 = vrot.lane.b32.xlu0 %v4833_v33, %s9090_s3 }
 0x5ee   : > { %17011 = vst [vmem:[#allocation119_spill] sm:$0xff] %v13897_v54  ;;  %v13906_v53 = vpop.permute.xlu0 %7724 }
 0x5ef   : > { %7822 = vrot.lane.b32.xlu1 %v17012_v61, %s9086_s23  ;;  %17013 = vst [vmem:[#allocation122_spill] sm:$0xff] %v13906_v53  ;;  %v17025_v61 = vld [vmem:[#allocation301_spill] sm:$0xff]  ;;  %v17088_v53 = vld [vmem:[#allocation12_spill] sm:$0xff] }
 0x5f1   : > { %v13908_v26 = vpop.permute.xlu1 %7598  ;;  %7952 = vrot.lane.b32.xlu0 %v5921_v49, %s9090_s3  ;;  %v17027_v49 = vcombine.low %v17025_v61, %v17026_v29 }
 0x5f2   : > { %17014 = vst [vmem:[#allocation130_spill] sm:$0xff] %v13908_v26  ;;  %v13920_v25 = vpop.permute.xlu0 %7728 }
 0x5f3   : > { %7826 = vrot.lane.b32.xlu1 %v17015_v14, %s9086_s23  ;;  %17016 = vst [vmem:[#allocation124_spill] sm:$0xff] %v13920_v25  ;;  %v17084_v25 = vld [vmem:[#allocation290_spill] sm:$0xff] }
 0x5f5   : > { %v13922_v16 = vpop.permute.xlu1 %7602  ;;  %7956 = vrot.lane.b32.xlu0 %v7009_v6, %s9090_s3  ;;  %v17032_v6 = vcombine.low %v17030_v60, %v17031_v22 }
 0x5f6   : > { %17017 = vst [vmem:[#allocation310_spill] sm:$0xff] %v13922_v16  ;;  %v13935_v43 = vpop.permute.xlu0 %7732 }
 0x5f7   : > { %7830 = vrot.lane.b32.xlu1 %v17018_v47, %s9086_s23  ;;  %v7010_v47 = vcombine.low %v6959_v9, %v6991_v23  ;;  %s9103_s23 = smov 60  }
 0x5f9   : > { %v13937_v3 = vpop.permute.xlu1 %7606  ;;  %7976 = vrot.lane.b32.xlu0 %v3746_v57, %s9091_s4  ;;  %v17035_v57 = vcombine.low %v13092_v39, %v13068_v8 }
 0x5fa   : > { %17019 = vst [vmem:[#allocation179_spill] sm:$0xff] %v13937_v3  ;;  %v13950_v5 = vpop.permute.xlu0 %7752 }
 0x5fb   : > { %7850 = vrot.lane.b32.xlu1 %v17022_v42, %s9087_s24  ;;  %17023 = vst [vmem:[#allocation45_spill] sm:$0xff] %v13950_v5  ;;  %v17037_v42 = vld [vmem:[#allocation44_spill] sm:$0xff] }
 0x5fc   : > { %v3800_v36 = vcombine.low %v17037_v42, %v17036_v21  ;;  %v17045_v21 = vcombine.high %v17020_v58, %v17021_v46  ;;  %v17047_v42 = vld [vmem:[#allocation106_spill] sm:$0xff] }
 0x5fd   : > { %v13952_v33 = vpop.permute.xlu1 %7626  ;;  %7980 = vrot.lane.b32.xlu0 %v4834_v56, %s9091_s4  ;;  %v17051_v58 = vld [vmem:[#allocation90_spill] sm:$0xff] }
 0x5fe   : > { %17024 = vst [vmem:[#allocation53_spill] sm:$0xff] %v13952_v33  ;;  %v13963_v30 = vpop.permute.xlu0 %7756  ;;  %v17044_v33 = vld [vmem:[#allocation26_spill] sm:$0xff]  ;;  %v14000_v55 = vrot.slane %v3800_v36, %v10233_v7  ;;  %v17053_v36 = vld [vmem:[#allocation101_spill] sm:$0xff] }
 0x5ff   : > { %7854 = vrot.lane.b32.xlu1 %v17027_v49, %s9087_s24  ;;  %17028 = vst [vmem:[#allocation108_spill] sm:$0xff] %v13963_v30 }
 0x601   : > { %v13965_v14 = vpop.permute.xlu1 %7630  ;;  %7984 = vrot.lane.b32.xlu0 %v5922_v20, %s9091_s4  ;;  %v17039_v20 = vld [vmem:[#allocation35_spill] sm:$0xff] }
 0x602   : > { %17029 = vst [vmem:[#allocation115_spill] sm:$0xff] %v13965_v14  ;;  %v13973_v27 = vpop.permute.xlu0 %7760  ;;  %v17041_v14 = vld [vmem:[#allocation47_spill] sm:$0xff] }
 0x603   : > { %7858 = vrot.lane.b32.xlu1 %v17032_v6, %s9087_s24  ;;  %17033 = vst [vmem:[#allocation177_spill] sm:$0xff] %v13973_v27  ;;  %v17040_v6 = vld [vmem:[#allocation37_spill] sm:$0xff] }
 0x604   : > { %v3768_v16 = vcombine.low %v17040_v6, %v17039_v20  ;;  %v4888_v20 = vcombine.low %v17047_v42, %v17046_v48 }
 0x605   : > { %v13975_v31 = vpop.permute.xlu1 %7634  ;;  %7988 = vrot.lane.b32.xlu0 %v7010_v47, %s9091_s4  ;;  %v17043_v47 = vld [vmem:[#allocation33_spill] sm:$0xff] }
 0x606   : > { %17034 = vst [vmem:[#allocation168_spill] sm:$0xff] %v13975_v31  ;;  %v13984_v56 = vpop.permute.xlu0 %7764  ;;  %v17042_v31 = vld [vmem:[#allocation39_spill] sm:$0xff] }
 0x607   : > { %7862 = vrot.lane.b32.xlu1 %v17035_v57, %s9087_s24  ;;  %v3784_v26 = vcombine.low %v17042_v31, %v17041_v14  ;;  %v3752_v57 = vcombine.low %v17044_v33, %v17043_v47  ;;  %v4835_v14 = vcombine.high %v4783_v24, %v4815_v10  ;;  %v17050_v47 = vld [vmem:[#allocation98_spill] sm:$0xff]  ;;  %v17054_v10 = vcombine.high %v17025_v61, %v17026_v29  ;;  %v17056_v24 = vld [vmem:[#allocation87_spill] sm:$0xff]  ;;  %s9104_s24 = smov 62  }
 0x608   : > { %v4856_v46 = vcombine.low %v17051_v58, %v17050_v47  ;;  %v14031_v47 = vrot.slane %v4888_v20, %v10233_v7  ;;  %v17061_v20 = vld [vmem:[#allocation160_spill] sm:$0xff] }
 0x609   : > { %v13986_v49 = vpop.permute.xlu1 %7638  ;;  %8008 = vrot.lane.b32.xlu0 %v3747_v13, %s9092_s18  ;;  %v14009_v13 = vrot.slane %v3768_v16, %v10233_v7  ;;  %v14012_v33 = vrot.slane %v3784_v26, %v10233_v7  ;;  %v14020_v48 = vrot.slane %v3752_v57, %v10233_v7  ;;  %v17055_v16 = vld [vmem:[#allocation95_spill] sm:$0xff] }
 0x60a   : > { %17038 = vst [vmem:[#allocation274_spill] sm:$0xff] %v13986_v49  ;;  %v14004_v6 = vpop.permute.xlu0 %7784  ;;  %v4840_v42 = vcombine.low %v17056_v24, %v17055_v16  ;;  %v17059_v57 = vld [vmem:[#allocation167_spill] sm:$0xff]  ;;  %v14042_v29 = vrot.slane %v4856_v46, %v10233_v7  ;;  %v17062_v16 = vld [vmem:[#allocation152_spill] sm:$0xff] }
 0x60b   : > { %7882 = vrot.lane.b32.xlu1 %v17045_v21, %s9088_s25  ;;  %17048 = vst [vmem:[#allocation46_spill] sm:$0xff] %v14004_v6  ;;  %v17052_v21 = vld [vmem:[#allocation109_spill] sm:$0xff]  ;;  %v3848_v26 = vcombine.low %v14012_v33, %v14000_v55  ;;  %v3816_v61 = vcombine.low %v14020_v48, %v14009_v13  ;;  %v5944_v24 = vcombine.low %v17062_v16, %v17061_v20 }
 0x60c   : > { %v4872_v54 = vcombine.low %v17053_v36, %v17052_v21  ;;  %v17058_v21 = vld [vmem:[#allocation175_spill] sm:$0xff]  ;;  %v14058_v46 = vrot.slane %v4840_v42, %v10233_v7  ;;  %v17067_v20 = vld [vmem:[#allocation157_spill] sm:$0xff] }
 0x60d   : > { %v14006_v31 = vpop.permute.xlu1 %7658  ;;  %8012 = vrot.lane.b32.xlu0 %v4835_v14, %s9092_s18  ;;  %v5923_v14 = vcombine.high %v5871_v19, %v5903_v44  ;;  %v5976_v36 = vcombine.low %v17059_v57, %v17058_v21  ;;  %v17063_v44 = vld [vmem:[#allocation171_spill] sm:$0xff]  ;;  %v17065_v21 = vcombine.high %v17030_v60, %v17031_v22  ;;  %v3856_v57 = vrot.slane %v3848_v26, %v10383_v45  ;;  %v17068_v16 = vld [vmem:[#allocation149_spill] sm:$0xff] }
 0x60e   : > { %17049 = vst [vmem:[#allocation13_spill] sm:$0xff] %v14006_v31  ;;  %v14033_v58 = vpop.permute.xlu0 %7788  ;;  %v17064_v19 = vld [vmem:[#allocation163_spill] sm:$0xff]  ;;  %v5928_v3 = vcombine.low %v17068_v16, %v17067_v20  ;;  %v7064_v60 = vcombine.low %v13044_v35, %v13050_v32  ;;  %v3824_v26 = vrot.slane %v3816_v61, %v10383_v45  ;;  %v4904_v42 = vcombine.low %v14058_v46, %v14042_v29  ;;  %v17072_v20 = vld [vmem:[#allocation226_spill] sm:$0xff] }
 0x60f   : > { %7886 = vrot.lane.b32.xlu1 %v17054_v10, %s9088_s25  ;;  %17057 = vst [vmem:[#allocation107_spill] sm:$0xff] %v14033_v58  ;;  %v14045_v10 = vrot.slane %v4872_v54, %v10233_v7  ;;  %v5960_v49 = vcombine.low %v17064_v19, %v17063_v44  ;;  %v14067_v44 = vrot.slane %v5976_v36, %v10233_v7  ;;  %v17070_v36 = vld [vmem:[#allocation222_spill] sm:$0xff] }
 0x610   : > { %v17071_v19 = vld [vmem:[#allocation214_spill] sm:$0xff]  ;;  %v17074_v61 = vcombine.high %v13092_v39, %v13068_v8  ;;  %v17078_v8 = vld [vmem:[#allocation268_spill] sm:$0xff] }
 0x611   : > { %v14037_v31 = vpop.permute.xlu1 %7662  ;;  %8016 = vrot.lane.b32.xlu0 %v5923_v14, %s9092_s18  ;;  %v4936_v54 = vcombine.low %v14045_v10, %v14031_v47  ;;  %v17073_v35 = vld [vmem:[#allocation218_spill] sm:$0xff] }
 0x612   : > { %17060 = vst [vmem:[#allocation169_spill] sm:$0xff] %v14037_v31  ;;  %v14062_v14 = vpop.permute.xlu0 %7792  ;;  %v7011_v31 = vcombine.high %v6959_v9, %v6991_v23  ;;  %v14078_v23 = vrot.slane %v5944_v24, %v10233_v7  ;;  %v14081_v9 = vrot.slane %v5960_v49, %v10233_v7  ;;  %v7048_v32 = vcombine.low %v17073_v35, %v17072_v20  ;;  %v17079_v39 = vld [vmem:[#allocation266_spill] sm:$0xff] }
 0x613   : > { %7890 = vrot.lane.b32.xlu1 %v17065_v21, %s9088_s25  ;;  %17066 = vst [vmem:[#allocation176_spill] sm:$0xff] %v14062_v14  ;;  %v7032_v21 = vcombine.low %v17071_v19, %v17070_v36  ;;  %v4944_v16 = vrot.slane %v4936_v54, %v10383_v45  ;;  %v3880_v24 = vcombine.low %v3824_v26, %v3856_v57  ;;  %v17075_v36 = vld [vmem:[#allocation219_spill] sm:$0xff] }
 0x614   : > { %v6024_v49 = vcombine.low %v14081_v9, %v14067_v44  ;;  %v17076_v19 = vld [vmem:[#allocation211_spill] sm:$0xff]  ;;  %v14102_v20 = vrot.slane %v7064_v60, %v10233_v7  ;;  %v17080_v54 = vcombine.low %v17078_v8, %v17079_v39 }
 0x615   : > { %v14071_v22 = vpop.permute.xlu1 %7666  ;;  %8020 = vrot.lane.b32.xlu0 %v7011_v31, %s9092_s18  ;;  %v7016_v4 = vcombine.low %v17076_v19, %v17075_v36  ;;  %v14114_v14 = vrot.slane %v7032_v21, %v10233_v7  ;;  %v14117_v36 = vrot.slane %v7048_v32, %v10233_v7  ;;  %v17083_v21 = vld [vmem:[#allocation292_spill] sm:$0xff] }
 0x616   : > { %17069 = vst [vmem:[#allocation41_spill] sm:$0xff] %v14071_v22  ;;  %v14092_v31 = vpop.permute.xlu0 %7796  ;;  %v14095_v22 = vrot.slane %v5928_v3, %v10233_v7  ;;  %v4912_v3 = vrot.slane %v4904_v42, %v10383_v45  ;;  %v6032_v19 = vrot.slane %v6024_v49, %v10383_v45  ;;  %v17085_v32 = vcombine.low %v17083_v21, %v17084_v25 }
 0x617   : > { %7894 = vrot.lane.b32.xlu1 %v17074_v61, %s9088_s25  ;;  %v7112_v42 = vcombine.low %v14117_v36, %v14102_v20  ;;  %s8825_s25 = sshll.u32 %s9229_s26, 6 }
 0x618   : > { %v5992_v61 = vcombine.low %v14095_v22, %v14078_v23  ;;  %v4968_v27 = vcombine.low %v4912_v3, %v4944_v16 }
 0x619   : > { %v14104_v35 = vpop.permute.xlu1 %7670  ;;  %8040 = vrot.lane.b32.xlu0 %v17080_v54, %s9093_s27  ;;  %v7120_v49 = vrot.slane %v7112_v42, %v10383_v45  ;;  %v17094_v42 = vld [vmem:[#allocation196_spill] sm:$0xff] }
 0x61a   : > { %17077 = vst [vmem:[#allocation48_spill] sm:$0xff] %v14104_v35  ;;  %v14120_v60 = vpop.permute.xlu0 %7816  ;;  %v14124_v35 = vrot.slane %v7016_v4, %v10233_v7 }
 0x61b   : > { %7914 = vrot.lane.b32.xlu1 %v3880_v24, %s9089_s28  ;;  %17081 = vst [vmem:[#allocation28_spill] sm:$0xff] %v14120_v60  ;;  %v6000_v24 = vrot.slane %v5992_v61, %v10383_v45  ;;  %v17089_v60 = vld [vmem:[#allocation139_spill] sm:$0xff] }
 0x61c   : > { %v7080_v58 = vcombine.low %v14124_v35, %v14114_v14  ;;  %v17090_v12 = vcombine.low %v17088_v53, %v17089_v60 }
 0x61d   : > { %v14128_v54 = vpop.permute.xlu1 %7690  ;;  %8044 = vrot.lane.b32.xlu0 %v17085_v32, %s9093_s27 }
 0x61e   : > { %17082 = vst [vmem:[#allocation34_spill] sm:$0xff] %v14128_v54  ;;  %v14138_v4 = vpop.permute.xlu0 %7820  ;;  %v6056_v54 = vcombine.low %v6000_v24, %v6032_v19  ;;  %v7088_v32 = vrot.slane %v7080_v58, %v10383_v45  ;;  %v17097_v58 = vcombine.high %v17078_v8, %v17079_v39  ;;  %v6057_v39 = vcombine.high %v6000_v24, %v6032_v19 }
 0x61f   : > { %7918 = vrot.lane.b32.xlu1 %v4968_v27, %s9089_s28  ;;  %17086 = vst [vmem:[#allocation30_spill] sm:$0xff] %v14138_v4  ;;  %v17093_v4 = vld [vmem:[#allocation199_spill] sm:$0xff] }
 0x620   : > { %v7144_v27 = vcombine.low %v7088_v32, %v7120_v49  ;;  %v17095_v5 = vcombine.low %v17093_v4, %v17094_v42  ;;  %v7145_v19 = vcombine.high %v7088_v32, %v7120_v49  ;;  %v17109_v49 = vld [vmem:[#allocation267_spill] sm:$0xff] }
 0x621   : > { %v14141_v30 = vpop.permute.xlu1 %7694  ;;  %8048 = vrot.lane.b32.xlu0 %v17090_v12, %s9093_s27  ;;  %v3881_v12 = vcombine.high %v3824_v26, %v3856_v57  ;;  %v3849_v26 = vcombine.high %v14012_v33, %v14000_v55  ;;  %v4937_v55 = vcombine.high %v14045_v10, %v14031_v47  ;;  %v6025_v47 = vcombine.high %v14081_v9, %v14067_v44 }
 0x622   : > { %17087 = vst [vmem:[#allocation38_spill] sm:$0xff] %v14141_v30  ;;  %v14149_v61 = vpop.permute.xlu0 %7824  ;;  %v7113_v9 = vcombine.high %v14117_v36, %v14102_v20 }
 0x623   : > { %7922 = vrot.lane.b32.xlu1 %v6056_v54, %s9089_s28  ;;  %17091 = vst [vmem:[#allocation25_spill] sm:$0xff] %v14149_v61  ;;  %v6039_v44 = vrot.slane %v6025_v47, %v10383_v45 }
 0x625   : > { %v14151_v6 = vpop.permute.xlu1 %7698  ;;  %8052 = vrot.lane.b32.xlu0 %v17095_v5, %s9093_s27  ;;  %v4969_v5 = vcombine.high %v4912_v3, %v4944_v16  ;;  %v3817_v16 = vcombine.high %v14020_v48, %v14009_v13  ;;  %v3863_v3 = vrot.slane %v3849_v26, %v10383_v45  ;;  %v4905_v13 = vcombine.high %v14058_v46, %v14042_v29  ;;  %v17114_v26 = vld [vmem:[#allocation291_spill] sm:$0xff] }
 0x626   : > { %17092 = vst [vmem:[#allocation24_spill] sm:$0xff] %v14151_v6  ;;  %v14158_v30 = vpop.permute.xlu0 %7828  ;;  %v5993_v46 = vcombine.high %v14095_v22, %v14078_v23  ;;  %v7081_v22 = vcombine.high %v14124_v35, %v14114_v14 }
 0x627   : > { %7926 = vrot.lane.b32.xlu1 %v7144_v27, %s9089_s28  ;;  %v17100_v27 = vcombine.high %v17083_v21, %v17084_v25  ;;  %v4951_v21 = vrot.slane %v4937_v55, %v10383_v45  ;;  %v4919_v29 = vrot.slane %v4905_v13, %v10383_v45  ;;  %v17118_v55 = vld [vmem:[#allocation311_spill] sm:$0xff]  ;;  %s15369_s28 = scalar_lea.vmem [#allocation5], %s8825_s25 }
 0x628   : > { %v7095_v13 = vrot.slane %v7081_v22, %v10383_v45  ;;  %v17129_v22 = vld [vmem:[#allocation253_spill] sm:$0xff] }
 0x629   : > { %v14160_v62 = vpop.permute.xlu1 %7702  ;;  %8072 = vrot.lane.b32.xlu0 %v17097_v58, %s9094_s29 }
 0x62a   : > { %17096 = vst [vmem:[#allocation110_spill] sm:$0xff] %v14160_v62  ;;  %v14167_v54 = vpop.permute.xlu0 %7848 }
 0x62b   : > { %7946 = vrot.lane.b32.xlu1 %v3881_v12, %s9090_s3  ;;  %17098 = vst [vmem:[#allocation102_spill] sm:$0xff] %v14167_v54  ;;  %v17103_v12 = vcombine.high %v17088_v53, %v17089_v60  ;;  %v17106_v53 = vcombine.high %v17093_v4, %v17094_v42  ;;  %v3831_v60 = vrot.slane %v3817_v16, %v10383_v45  ;;  %v17108_v4 = vld [vmem:[#allocation269_spill] sm:$0xff]  ;;  %v17182_v54 = vld [vmem:[#allocation319_spill] sm:$0xff] }
 0x62c   : > { %v17110_v32 = vcombine.low %v17108_v4, %v17109_v49  ;;  %v14237_v16 = vrot.slane %v7113_v9, %v10383_v45  ;;  %v17126_v9 = vld [vmem:[#allocation20_spill] sm:$0xff] }
 0x62d   : > { %v14169_v6 = vpop.permute.xlu1 %7722  ;;  %8076 = vrot.lane.b32.xlu0 %v17100_v27, %s9094_s29  ;;  %v3882_v24 = vcombine.low %v3831_v60, %v3863_v3  ;;  %v17113_v27 = vld [vmem:[#allocation293_spill] sm:$0xff] }
 0x62e   : > { %17099 = vst [vmem:[#allocation96_spill] sm:$0xff] %v14169_v6  ;;  %v14176_v57 = vpop.permute.xlu0 %7852  ;;  %v7146_v47 = vcombine.low %v7095_v13, %v14237_v16  ;;  %v3883_v6 = vcombine.high %v3831_v60, %v3863_v3 }
 0x62f   : > { %7950 = vrot.lane.b32.xlu1 %v4969_v5, %s9090_s3  ;;  %17101 = vst [vmem:[#allocation88_spill] sm:$0xff] %v14176_v57  ;;  %v4970_v5 = vcombine.low %v4919_v29, %v4951_v21 }
 0x631   : > { %v14180_v8 = vpop.permute.xlu1 %7726  ;;  %8080 = vrot.lane.b32.xlu0 %v17103_v12, %s9094_s29  ;;  %v6007_v12 = vrot.slane %v5993_v46, %v10383_v45 }
 0x632   : > { %17102 = vst [vmem:[#allocation91_spill] sm:$0xff] %v14180_v8  ;;  %v14189_v25 = vpop.permute.xlu0 %7856  ;;  %v17132_v8 = vld [vmem:[#allocation257_spill] sm:$0xff] }
 0x633   : > { %7954 = vrot.lane.b32.xlu1 %v6057_v39, %s9090_s3  ;;  %17104 = vst [vmem:[#allocation99_spill] sm:$0xff] %v14189_v25  ;;  %v17115_v39 = vcombine.low %v17113_v27, %v17114_v26  ;;  %v6058_v36 = vcombine.low %v6007_v12, %v6039_v44 }
 0x635   : > { %v14194_v33 = vpop.permute.xlu1 %7730  ;;  %8084 = vrot.lane.b32.xlu0 %v17106_v53, %s9094_s29 }
 0x636   : > { %17105 = vst [vmem:[#allocation93_spill] sm:$0xff] %v14194_v33  ;;  %v14204_v48 = vpop.permute.xlu0 %7860 }
 0x637   : > { %7958 = vrot.lane.b32.xlu1 %v7145_v19, %s9090_s3  ;;  %v17119_v19 = vld [vmem:[#allocation147_spill] sm:$0xff]  ;;  %s8722_s3 = sshll.u32 %s15369_s28, 4  ;;  %s15425_s3 = int_to_ptr.vmem [resolvable:$true] %s8722_s3 }
 0x638   : > { %v17120_v53 = vcombine.low %v17118_v55, %v17119_v19 }
 0x639   : > { %v14209_v10 = vpop.permute.xlu1 %7734  ;;  %8104 = vrot.lane.b32.xlu0 %v17110_v32, %s9095_s30  ;;  %v17124_v32 = vld [vmem:[#allocation207_spill] sm:$0xff] }
 0x63a   : > { %17107 = vst [vmem:[#allocation298_spill] sm:$0xff] %v14209_v10  ;;  %v14219_v42 = vpop.permute.xlu0 %7880 }
 0x63b   : > { %7978 = vrot.lane.b32.xlu1 %v3882_v24, %s9091_s4  ;;  %17111 = vst [vmem:[#allocation172_spill] sm:$0xff] %v14219_v42  ;;  %v17123_v24 = vld [vmem:[#allocation209_spill] sm:$0xff] }
 0x63c   : > { %v17125_v46 = vcombine.low %v17123_v24, %v17124_v32 }
 0x63d   : > { %v14224_v58 = vpop.permute.xlu1 %7754  ;;  %8108 = vrot.lane.b32.xlu0 %v17115_v39, %s9095_s30 }
 0x63e   : > { %17112 = vst [vmem:[#allocation164_spill] sm:$0xff] %v14224_v58 }
 0x63f   : > { %7982 = vrot.lane.b32.xlu1 %v4970_v5, %s9091_s4  ;;  %v14234_v23 = vpop.permute.xlu0 %7884  ;;  %v17127_v5 = vld [vmem:[#allocation22_spill] sm:$0xff] }
 0x640   : > { %17116 = vst [vmem:[#allocation158_spill] sm:$0xff] %v14234_v23  ;;  %v3936_v39 = vcombine.low %v17127_v5, %v17126_v9  ;;  %v17135_v9 = vld [vmem:[#allocation247_spill] sm:$0xff]  ;;  %v17136_v5 = vld [vmem:[#allocation245_spill] sm:$0xff] }
 0x641   : > { %v14239_v20 = vpop.permute.xlu1 %7758  ;;  %8112 = vrot.lane.b32.xlu0 %v17120_v53, %s9095_s30  ;;  %v17128_v53 = vld [vmem:[#allocation251_spill] sm:$0xff] }
 0x642   : > { %17117 = vst [vmem:[#allocation150_spill] sm:$0xff] %v14239_v20  ;;  %v3904_v33 = vcombine.low %v17129_v22, %v17128_v53  ;;  %v17131_v20 = vld [vmem:[#allocation18_spill] sm:$0xff]  ;;  %v14274_v10 = vrot.slane %v3936_v39, %v10233_v7  ;;  %v17137_v53 = vld [vmem:[#allocation72_spill] sm:$0xff]  ;;  %v17138_v22 = vld [vmem:[#allocation73_spill] sm:$0xff] }
 0x643   : > { %7986 = vrot.lane.b32.xlu1 %v6058_v36, %s9091_s4  ;;  %v14247_v14 = vpop.permute.xlu0 %7888  ;;  %v5024_v62 = vcombine.low %v17138_v22, %v17137_v53  ;;  %v17146_v53 = vld [vmem:[#allocation63_spill] sm:$0xff] }
 0x644   : > { %17121 = vst [vmem:[#allocation153_spill] sm:$0xff] %v14247_v14  ;;  %v17147_v22 = vld [vmem:[#allocation55_spill] sm:$0xff] }
 0x645   : > { %v14249_v35 = vpop.permute.xlu1 %7762  ;;  %8116 = vrot.lane.b32.xlu0 %v17125_v46, %s9095_s30  ;;  %v17134_v46 = vcombine.high %v17108_v4, %v17109_v49  ;;  %v17140_v4 = vld [vmem:[#allocation58_spill] sm:$0xff]  ;;  %v17155_v14 = vld [vmem:[#allocation123_spill] sm:$0xff] }
 0x646   : > { %17122 = vst [vmem:[#allocation161_spill] sm:$0xff] %v14249_v35  ;;  %v3920_v35 = vcombine.low %v17132_v8, %v17131_v20  ;;  %v14280_v8 = vrot.slane %v3904_v33, %v10233_v7  ;;  %v17141_v49 = vld [vmem:[#allocation66_spill] sm:$0xff] }
 0x647   : > { %7990 = vrot.lane.b32.xlu1 %v7146_v47, %s9091_s4  ;;  %v14261_v36 = vpop.permute.xlu0 %7892  ;;  %v3888_v47 = vcombine.low %v17136_v5, %v17135_v9  ;;  %v4992_v20 = vcombine.low %v17141_v49, %v17140_v4  ;;  %v17143_v9 = vld [vmem:[#allocation61_spill] sm:$0xff]  ;;  %v4976_v4 = vcombine.low %v17147_v22, %v17146_v53  ;;  %v14305_v49 = vrot.slane %v5024_v62, %v10233_v7  ;;  %v17152_v53 = vld [vmem:[#allocation120_spill] sm:$0xff]  ;;  %s8856_s4 = sshll.u32 %s9059_s9, 10  ;;  %s8704_s9 = scalar_lea.sflag [#allocation4], %s9229_s26 }
 0x648   : > { %17130 = vst [vmem:[#allocation155_spill] sm:$0xff] %v14261_v36  ;;  %v14285_v60 = vrot.slane %v3920_v35, %v10233_v7  ;;  %v6059_v62 = vcombine.high %v6007_v12, %v6039_v44  ;;  %v17153_v22 = vld [vmem:[#allocation128_spill] sm:$0xff]  ;;  %v17157_v44 = vld [vmem:[#allocation125_spill] sm:$0xff] }
 0x649   : > { %v14265_v58 = vpop.permute.xlu1 %7766  ;;  %8136 = vrot.lane.b32.xlu0 %v17134_v46, %s9096_s5  ;;  %v17142_v46 = vld [vmem:[#allocation69_spill] sm:$0xff]  ;;  %v14298_v33 = vrot.slane %v3888_v47, %v10233_v7  ;;  %v14332_v25 = vrot.slane %v4976_v4, %v10233_v7 }
 0x64a   : > { %17133 = vst [vmem:[#allocation316_spill] sm:$0xff] %v14265_v58  ;;  %v5008_v39 = vcombine.low %v17143_v9, %v17142_v46  ;;  %v4971_v58 = vcombine.high %v4919_v29, %v4951_v21  ;;  %v3984_v35 = vcombine.low %v14285_v60, %v14274_v10  ;;  %v17148_v21 = vld [vmem:[#allocation134_spill] sm:$0xff]  ;;  %v17158_v12 = vld [vmem:[#allocation117_spill] sm:$0xff] }
 0x64b   : > { %8010 = vrot.lane.b32.xlu1 %v3883_v6, %s9092_s18  ;;  %v14282_v3 = vpop.permute.xlu0 %7912  ;;  %v17145_v6 = vcombine.high %v17113_v27, %v17114_v26  ;;  %v17149_v29 = vld [vmem:[#allocation142_spill] sm:$0xff]  ;;  %v3952_v27 = vcombine.low %v14298_v33, %v14280_v8  ;;  %v14315_v26 = vrot.slane %v4992_v20, %v10233_v7 }
 0x64c   : > { %17139 = vst [vmem:[#allocation223_spill] sm:$0xff] %v14282_v3  ;;  %v6112_v46 = vcombine.low %v17149_v29, %v17148_v21  ;;  %v14318_v47 = vrot.slane %v5008_v39, %v10233_v7  ;;  %v17156_v29 = vcombine.high %v17118_v55, %v17119_v19  ;;  %v3992_v20 = vrot.slane %v3984_v35, %v10383_v45 }
 0x64d   : > { %v14291_v5 = vpop.permute.xlu1 %7786  ;;  %8140 = vrot.lane.b32.xlu0 %v17145_v6, %s9096_s5  ;;  %v3960_v35 = vrot.slane %v3952_v27, %v10383_v45  ;;  %v5040_v4 = vcombine.low %v14332_v25, %v14315_v26  ;;  %v17167_v27 = vcombine.high %v17123_v24, %v17124_v32 }
 0x64e   : > { %17144 = vst [vmem:[#allocation215_spill] sm:$0xff] %v14291_v5  ;;  %v17154_v5 = vld [vmem:[#allocation131_spill] sm:$0xff]  ;;  %v5072_v39 = vcombine.low %v14318_v47, %v14305_v49 }
 0x64f   : > { %8014 = vrot.lane.b32.xlu1 %v4971_v58, %s9092_s18  ;;  %v14310_v9 = vpop.permute.xlu0 %7916  ;;  %v6080_v58 = vcombine.low %v17153_v22, %v17152_v53  ;;  %v6096_v21 = vcombine.low %v17155_v14, %v17154_v5  ;;  %v6064_v53 = vcombine.low %v17158_v12, %v17157_v44  ;;  %v14340_v14 = vrot.slane %v6112_v46, %v10233_v7  ;;  %v17159_v5 = vld [vmem:[#allocation203_spill] sm:$0xff]  ;;  %v17160_v22 = vld [vmem:[#allocation184_spill] sm:$0xff]  ;;  %v17163_v44 = vld [vmem:[#allocation190_spill] sm:$0xff] }
 0x650   : > { %17150 = vst [vmem:[#allocation210_spill] sm:$0xff] %v14310_v9  ;;  %v7200_v55 = vcombine.low %v17160_v22, %v17159_v5  ;;  %v17164_v12 = vld [vmem:[#allocation183_spill] sm:$0xff]  ;;  %v17165_v22 = vld [vmem:[#allocation186_spill] sm:$0xff]  ;;  %v5048_v32 = vrot.slane %v5040_v4, %v10383_v45 }
 0x651   : > { %v14320_v6 = vpop.permute.xlu1 %7790  ;;  %8144 = vrot.lane.b32.xlu0 %v17156_v29, %s9096_s5  ;;  %v14356_v46 = vrot.slane %v6096_v21, %v10233_v7  ;;  %v7168_v5 = vcombine.low %v17164_v12, %v17163_v44  ;;  %v17168_v21 = vld [vmem:[#allocation181_spill] sm:$0xff]  ;;  %v17169_v44 = vld [vmem:[#allocation187_spill] sm:$0xff] }
 0x652   : > { %17151 = vst [vmem:[#allocation202_spill] sm:$0xff] %v14320_v6  ;;  %v14353_v6 = vrot.slane %v6080_v58, %v10233_v7  ;;  %v7152_v12 = vcombine.low %v17169_v44, %v17168_v21 }
 0x653   : > { %8018 = vrot.lane.b32.xlu1 %v6059_v62, %s9092_s18  ;;  %v14344_v19 = vpop.permute.xlu0 %7920  ;;  %v7147_v62 = vcombine.high %v7095_v13, %v14237_v16  ;;  %v4016_v16 = vcombine.low %v3960_v35, %v3992_v20  ;;  %v14369_v13 = vrot.slane %v6064_v53, %v10233_v7  ;;  %v6160_v58 = vcombine.low %v14356_v46, %v14340_v14 }
 0x654   : > { %17161 = vst [vmem:[#allocation264_spill] sm:$0xff] %v14344_v19  ;;  %v17166_v19 = vld [vmem:[#allocation185_spill] sm:$0xff]  ;;  %v14386_v53 = vrot.slane %v7168_v5, %v10233_v7  ;;  %v14396_v4 = vrot.slane %v7152_v12, %v10233_v7 }
 0x655   : > { %v14349_v29 = vpop.permute.xlu1 %7794  ;;  %v7184_v61 = vcombine.low %v17166_v19, %v17165_v22  ;;  %8148 = vrot.lane.b32.xlu0 %v17167_v27, %s9096_s5  ;;  %v14376_v19 = vrot.slane %v7200_v55, %v10233_v7  ;;  %v17172_v55 = vld [vmem:[#allocation280_spill] sm:$0xff]  ;;  %v17173_v27 = vld [vmem:[#allocation278_spill] sm:$0xff]  ;;  %v6168_v44 = vrot.slane %v6160_v58, %v10383_v45 }
 0x656   : > { %17162 = vst [vmem:[#allocation263_spill] sm:$0xff] %v14349_v29  ;;  %v5080_v29 = vrot.slane %v5072_v39, %v10383_v45  ;;  %v6128_v39 = vcombine.low %v14369_v13, %v14353_v6  ;;  %v17174_v21 = vcombine.low %v17172_v55, %v17173_v27  ;;  %v17178_v58 = vld [vmem:[#allocation302_spill] sm:$0xff] }
 0x657   : > { %8022 = vrot.lane.b32.xlu1 %v7147_v62, %s9092_s18  ;;  %v14378_v22 = vpop.permute.xlu0 %7924  ;;  %v7192_v62 = vrot.slane %v7184_v61, %v10233_v7 }
 0x658   : > { %17170 = vst [vmem:[#allocation288_spill] sm:$0xff] %v14378_v22  ;;  %v5104_v5 = vcombine.low %v5048_v32, %v5080_v29  ;;  %v6136_v61 = vrot.slane %v6128_v39, %v10383_v45  ;;  %v17181_v39 = vld [vmem:[#allocation320_spill] sm:$0xff] }
 0x659   : > { %v14380_v24 = vpop.permute.xlu1 %7798  ;;  %8168 = vrot.lane.b32.xlu0 %v4016_v16, %s9097_s12  ;;  %v7216_v16 = vcombine.low %v14396_v4, %v14386_v53 }
 0x65a   : > { %17171 = vst [vmem:[#allocation77_spill] sm:$0xff] %v14380_v24  ;;  %v7248_v24 = vcombine.low %v7192_v62, %v14376_v19 }
 0x65b   : > { %8042 = vrot.lane.b32.xlu1 %v17174_v21, %s9093_s27  ;;  %v14399_v9 = vpop.permute.xlu0 %7944  ;;  %v17177_v21 = vld [vmem:[#allocation304_spill] sm:$0xff] }
 0x65c   : > { %17175 = vst [vmem:[#allocation146_spill] sm:$0xff] %v14399_v9  ;;  %v17179_v57 = vcombine.low %v17177_v21, %v17178_v58  ;;  %v7256_v12 = vrot.slane %v7248_v24, %v10383_v45  ;;  %v6192_v9 = vcombine.low %v6136_v61, %v6168_v44  ;;  %v17186_v24 = vcombine.low %v13098_v41, %v13101_v51 }
 0x65d   : > { %v14401_v23 = vpop.permute.xlu1 %7818  ;;  %8172 = vrot.lane.b32.xlu0 %v5104_v5, %s9097_s12  ;;  %v17183_v5 = vcombine.low %v17181_v39, %v17182_v54 }
 0x65e   : > { %17176 = vst [vmem:[#allocation144_spill] sm:$0xff] %v14401_v23  ;;  %v7224_v23 = vrot.slane %v7216_v16, %v10383_v45 }
 0x65f   : > { %8046 = vrot.lane.b32.xlu1 %v17179_v57, %s9093_s27  ;;  %v14412_v3 = vpop.permute.xlu0 %7948 }
 0x660   : > { %v7280_v36 = vcombine.low %v7224_v23, %v7256_v12 }
 0x661   : > { %v14414_v42 = vpop.permute.xlu1 %7822  ;;  %8176 = vrot.lane.b32.xlu0 %v6192_v9, %s9097_s12  ;;  %v4017_v9 = vcombine.high %v3960_v35, %v3992_v20  ;;  %v3953_v20 = vcombine.high %v14298_v33, %v14280_v8  ;;  %v5073_v35 = vcombine.high %v14318_v47, %v14305_v49  ;;  %v6193_v8 = vcombine.high %v6136_v61, %v6168_v44  ;;  %v17189_v33 = vld [vmem:[#allocation29_spill] sm:$0xff] }
 0x662   : > { %17180 = vst [vmem:[#allocation204_spill] sm:$0xff] %v14414_v42  ;;  %v5041_v49 = vcombine.high %v14332_v25, %v14315_v26  ;;  %v17195_v26 = vcombine.high %v17181_v39, %v17182_v54 }
 0x663   : > { %8050 = vrot.lane.b32.xlu1 %v17183_v5, %s9093_s27  ;;  %v14422_v22 = vpop.permute.xlu0 %7952  ;;  %v17187_v5 = vcombine.high %v17172_v55, %v17173_v27  ;;  %v17188_v55 = vcombine.high %v17177_v21, %v17178_v58  ;;  %v14470_v21 = vrot.slane %v3953_v20, %v10383_v45  ;;  %v17191_v58 = vld [vmem:[#allocation40_spill] sm:$0xff]  ;;  %v14482_v25 = vrot.slane %v5073_v35, %v10383_v45 }
 0x664   : > { %17184 = vst [vmem:[#allocation205_spill] sm:$0xff] %v14422_v22  ;;  %v5105_v22 = vcombine.high %v5048_v32, %v5080_v29  ;;  %v7249_v29 = vcombine.high %v7192_v62, %v14376_v19  ;;  %v17193_v19 = vld [vmem:[#allocation42_spill] sm:$0xff]  ;;  %v17194_v62 = vld [vmem:[#allocation43_spill] sm:$0xff]  ;;  %v17197_v20 = vld [vmem:[#allocation32_spill] sm:$0xff]  ;;  %v14504_v54 = vrot.slane %v5041_v49, %v10383_v45 }
 0x665   : > { %v14424_v57 = vpop.permute.xlu1 %7826  ;;  %8180 = vrot.lane.b32.xlu0 %v7280_v36, %s9097_s12  ;;  %v3985_v36 = vcombine.high %v14285_v60, %v14274_v10  ;;  %v6161_v60 = vcombine.high %v14356_v46, %v14340_v14  ;;  %v6129_v14 = vcombine.high %v14369_v13, %v14353_v6  ;;  %v7217_v46 = vcombine.high %v14396_v4, %v14386_v53 }
 0x666   : > { %17185 = vst [vmem:[#allocation265_spill] sm:$0xff] %v14424_v57  ;;  %v4072_v44 = vcombine.low %v17194_v62, %v17193_v19  ;;  %v14492_v6 = vrot.slane %v7249_v29, %v10383_v45  ;;  %v7281_v53 = vcombine.high %v7224_v23, %v7256_v12 }
 0x667   : > { %8054 = vrot.lane.b32.xlu1 %v17186_v24, %s9093_s27  ;;  %v14431_v16 = vpop.permute.xlu0 %7956  ;;  %v14456_v10 = vrot.slane %v3985_v36, %v10383_v45  ;;  %v14489_v61 = vrot.slane %v6161_v60, %v10383_v45  ;;  %v17196_v36 = vld [vmem:[#allocation27_spill] sm:$0xff]  ;;  %v14514_v23 = vrot.slane %v6129_v14, %v10383_v45  ;;  %v14517_v12 = vrot.slane %v7217_v46, %v10383_v45 }
 0x668   : > { %v4024_v35 = vcombine.low %v17197_v20, %v17196_v36  ;;  %v17275_v36 = vld [vmem:[#allocation153_spill] sm:$0xff] }
 0x669   : > { %v14433_v42 = vpop.permute.xlu1 %7830  ;;  %8200 = vrot.lane.b32.xlu0 %v4017_v9, %s9098_s13  ;;  %v17192_v9 = vld [vmem:[#allocation31_spill] sm:$0xff]  ;;  %v4018_v4 = vcombine.low %v14470_v21, %v14456_v10  ;;  %v4019_v60 = vcombine.high %v14470_v21, %v14456_v10  ;;  %v6194_v46 = vcombine.low %v14514_v23, %v14489_v61  ;;  %v17261_v21 = vld [vmem:[#allocation104_spill] sm:$0xff] }
 0x66a   : > { %v17260_v10 = vld [vmem:[#allocation103_spill] sm:$0xff] }
 0x66b   : > { %8074 = vrot.lane.b32.xlu1 %v17187_v5, %s9094_s29  ;;  %v14442_v57 = vpop.permute.xlu0 %7976  ;;  %v4056_v5 = vcombine.low %v17192_v9, %v17191_v58  ;;  %v17201_v58 = vcombine.high %v13098_v41, %v13101_v51  ;;  %v5106_v9 = vcombine.low %v14504_v54, %v14482_v25  ;;  %v17202_v51 = vld [vmem:[#allocation262_spill] sm:$0xff] }
 0x66d   : > { %v14444_v24 = vpop.permute.xlu1 %7850  ;;  %8204 = vrot.lane.b32.xlu0 %v5105_v22, %s9098_s13  ;;  %v17190_v22 = vld [vmem:[#allocation36_spill] sm:$0xff]  ;;  %v14511_v29 = vrot.slane %v4056_v5, %v10233_v7 }
 0x66e   : > { %v4040_v27 = vcombine.low %v17190_v22, %v17189_v33  ;;  %v17198_v33 = vld [vmem:[#allocation192_spill] sm:$0xff] }
 0x66f   : > { %8078 = vrot.lane.b32.xlu1 %v17188_v55, %s9094_s29  ;;  %v14461_v32 = vpop.permute.xlu0 %7980  ;;  %v17199_v22 = vld [vmem:[#allocation188_spill] sm:$0xff] }
 0x670   : > { %v14501_v55 = vrot.slane %v4040_v27, %v10233_v7  ;;  %v17200_v27 = vcombine.low %v17198_v33, %v17199_v22 }
 0x671   : > { %v14467_v47 = vpop.permute.xlu1 %7854  ;;  %8208 = vrot.lane.b32.xlu0 %v6193_v8, %s9098_s13  ;;  %v14521_v8 = vrot.slane %v4072_v44, %v10233_v7 }
 0x672   : > { %v8423_v49 = vsel %vm8416_vm2, %v17200_v27, %v13366_v63  ;;  %v7282_v63 = vcombine.low %v14517_v12, %v14492_v6  ;;  %v17208_v27 = vld [vmem:[#allocation137_spill] sm:$0xff] }
 0x673   : > { %8082 = vrot.lane.b32.xlu1 %v17195_v26, %s9094_s29  ;;  %v14494_v13 = vpop.permute.xlu0 %7984  ;;  %v8432_v5 = vsel %vm8425_vm3, %v8423_v49, %v13405_v50  ;;  %v17203_v50 = vld [vmem:[#allocation260_spill] sm:$0xff]  ;;  %v17205_v26 = vld [vmem:[#allocation85_spill] sm:$0xff] }
 0x674   : > { %v8441_v19 = vsel %vm8434_vm4, %v8432_v5, %v13449_v40  ;;  %v17204_v62 = vcombine.low %v17202_v51, %v17203_v50  ;;  %v17209_v40 = vld [vmem:[#allocation136_spill] sm:$0xff]  ;;  %v17212_v50 = vld [vmem:[#allocation279_spill] sm:$0xff] }
 0x675   : > { %v14506_v39 = vpop.permute.xlu1 %7858  ;;  %8212 = vrot.lane.b32.xlu0 %v7281_v53, %s9098_s13  ;;  %v17206_v53 = vld [vmem:[#allocation84_spill] sm:$0xff]  ;;  %v17210_v49 = vcombine.low %v17208_v27, %v17209_v40  ;;  %v8450_v5 = vsel %vm8443_vm5, %v8441_v19, %v13548_v18  ;;  %v17217_v27 = vld [vmem:[#allocation71_spill] sm:$0xff]  ;;  %v17219_v40 = vld [vmem:[#allocation233_spill] sm:$0xff] }
 0x676   : > { %v8417_v44 = vsel %vm8416_vm2, %v17204_v62, %v13303_v17  ;;  %v17207_v33 = vcombine.low %v17205_v26, %v17206_v53  ;;  %v8459_v51 = vsel %vm15919_vm6, %v8450_v5, %v13612_v15  ;;  %v17214_v26 = vld [vmem:[#allocation229_spill] sm:$0xff] }
 0x677   : > { %8086 = vrot.lane.b32.xlu1 %v17201_v58, %s9094_s29  ;;  %v14536_v14 = vpop.permute.xlu0 %7988  ;;  %v8421_v58 = vsel %vm8416_vm2, %v17210_v49, %v13362_v59  ;;  %v8426_v17 = vsel %vm8425_vm3, %v8417_v44, %v13374_v1  ;;  %v17215_v53 = vld [vmem:[#allocation237_spill] sm:$0xff]  ;;  %s15432_s29 = scalar_lea.hbm %s15486_s1, %s8856_s4 }
 0x678   : > { %v8419_v22 = vsel %vm8416_vm2, %v17207_v33, %v13344_v11  ;;  %v17211_v11 = vld [vmem:[#allocation281_spill] sm:$0xff]  ;;  %v8435_v18 = vsel %vm8434_vm4, %v8426_v17, %v13418_v37  ;;  %v8430_v15 = vsel %vm8425_vm3, %v8421_v58, %v13395_v38  ;;  %v17216_v33 = vld [vmem:[#allocation228_spill] sm:$0xff]  ;;  %v17221_v17 = vld [vmem:[#allocation303_spill] sm:$0xff] }
 0x679   : > { %v14544_v41 = vpop.permute.xlu1 %7862  ;;  %8232 = vrot.lane.b32.xlu0 %v4018_v4, %s9099_s15  ;;  %v17213_v62 = vcombine.low %v17211_v11, %v17212_v50  ;;  %v8428_v59 = vsel %vm8425_vm3, %v8419_v22, %v13383_v28  ;;  %v8468_v4 = vsel %vm15918_vm7, %v8459_v51, %v13656_v52  ;;  %v8444_v19 = vsel %vm8443_vm5, %v8435_v18, %v13467_v34  ;;  %v17218_v34 = vld [vmem:[#allocation230_spill] sm:$0xff]  ;;  %v17220_v5 = vld [vmem:[#allocation305_spill] sm:$0xff] }
 0x67a   : > { %v8477_v44 = vsel %vm15917_vm8, %v8468_v4, %v13713_v0  ;;  %v8437_v37 = vsel %vm8434_vm4, %v8428_v59, %v17214_v26  ;;  %v8439_v52 = vsel %vm8434_vm4, %v8430_v15, %v17215_v53  ;;  %v8453_v22 = vsel %vm15919_vm6, %v8444_v19, %v17216_v33  ;;  %v17224_v18 = vld [vmem:[#allocation10_spill] sm:$0xff]  ;;  %v17225_v19 = vld [vmem:[#allocation239_spill] sm:$0xff] }
 0x67b   : > { %8106 = vrot.lane.b32.xlu1 %v17213_v62, %s9095_s30  ;;  %v14578_v1 = vpop.permute.xlu0 %8008  ;;  %v8485_v38 = vsel %vm15920_vm0, %v8477_v44, %v17217_v27  ;;  %v8446_v0 = vsel %vm8443_vm5, %v8437_v37, %v17218_v34  ;;  %v8462_v49 = vsel %vm15918_vm7, %v8453_v22, %v17219_v40  ;;  %v17222_v51 = vcombine.low %v17220_v5, %v17221_v17  ;;  %v17223_v62 = vld [vmem:[#allocation236_spill] sm:$0xff]  ;;  %v17227_v37 = vld [vmem:[#allocation249_spill] sm:$0xff]  ;;  %v17228_v22 = vld [vmem:[#allocation242_spill] sm:$0xff] }
 0x67c   : > { %v8494_v58 = vsel %vm8487_vm9, %v8485_v38, %v13886_v2  ;;  %v8448_v59 = vsel %vm8443_vm5, %v8439_v52, %v17223_v62  ;;  %v8455_v2 = vsel %vm15919_vm6, %v8446_v0, %v17225_v19  ;;  %v17226_v44 = vld [vmem:[#allocation240_spill] sm:$0xff]  ;;  %v17229_v27 = vld [vmem:[#allocation57_spill] sm:$0xff] }
 0x67d   : > { %v14586_v28 = vpop.permute.xlu1 %7882  ;;  %8236 = vrot.lane.b32.xlu0 %v5106_v9, %s9099_s15  ;;  %v8471_v9 = vsel %vm15917_vm8, %v8462_v49, %v17224_v18  ;;  %v8503_v4 = vsel %vm8496_vm10, %v8494_v58, %v13935_v43  ;;  %v8457_v26 = vsel %vm15919_vm6, %v8448_v59, %v17226_v44  ;;  %v8464_v43 = vsel %vm15918_vm7, %v8455_v2, %v17228_v22  ;;  %v17230_v0 = vld [vmem:[#allocation261_spill] sm:$0xff]  ;;  %v17231_v49 = vld [vmem:[#allocation127_spill] sm:$0xff] }
 0x67e   : > { %v8479_v53 = vsel %vm15920_vm0, %v8471_v9, %v17227_v37  ;;  %v8512_v52 = vsel %vm8505_vm11, %v8503_v4, %v13984_v56  ;;  %v8466_v40 = vsel %vm15918_vm7, %v8457_v26, %v17230_v0  ;;  %v17233_v62 = vld [vmem:[#allocation321_spill] sm:$0xff]  ;;  %v17236_v9 = vld [vmem:[#allocation15_spill] sm:$0xff]  ;;  %v17239_v37 = vld [vmem:[#allocation46_spill] sm:$0xff]  ;;  %vm15925_vm7 = vcmask 293888  }
 0x67f   : > { %8110 = vrot.lane.b32.xlu1 %v17222_v51, %s9095_s30  ;;  %v14613_v15 = vpop.permute.xlu0 %8012  ;;  %v8488_v38 = vsel %vm8487_vm9, %v8479_v53, %v17229_v27  ;;  %v8521_v34 = vsel %vm8514_vm12, %v8512_v52, %v14092_v31  ;;  %v17232_v51 = vld [vmem:[#allocation323_spill] sm:$0xff]  ;;  %v17235_v18 = vld [vmem:[#allocation113_spill] sm:$0xff]  ;;  %v17241_v27 = vld [vmem:[#allocation68_spill] sm:$0xff]  ;;  %vm15921_vm6 = vcmask 310272  }
 0x680   : > { %v8497_v56 = vsel %vm8496_vm10, %v8488_v38, %v17231_v49  ;;  %v8530_v58 = vsel %vm8523_vm13, %v8521_v34, %v14158_v30  ;;  %v17234_v59 = vcombine.low %v17232_v51, %v17233_v62  ;;  %v8473_v31 = vsel %vm15917_vm8, %v8464_v43, %v17235_v18  ;;  %v17237_v4 = vld [vmem:[#allocation45_spill] sm:$0xff]  ;;  %v17238_v30 = vld [vmem:[#allocation255_spill] sm:$0xff]  ;;  %v17242_v34 = vld [vmem:[#allocation28_spill] sm:$0xff] }
 0x681   : > { %v14623_v33 = vpop.permute.xlu1 %7886  ;;  %8240 = vrot.lane.b32.xlu0 %v6194_v46, %s9099_s15  ;;  %v8475_v46 = vsel %vm15917_vm8, %v8466_v40, %v17236_v9  ;;  %v8506_v19 = vsel %vm8505_vm11, %v8497_v56, %v17237_v4  ;;  %v8539_v2 = vsel %vm8532_vm14, %v8530_v58, %v14204_v48  ;;  %v8481_v26 = vsel %vm15920_vm0, %v8473_v31, %v17238_v30  ;;  %v17240_v52 = vld [vmem:[#allocation155_spill] sm:$0xff]  ;;  %v17243_v0 = vld [vmem:[#allocation288_spill] sm:$0xff]  ;;  %v17244_v49 = vld [vmem:[#allocation122_spill] sm:$0xff] }
 0x682   : > { %v8515_v53 = vsel %vm8514_vm12, %v8506_v19, %v17239_v37  ;;  %v8548_v22 = vsel %vm8541_vm15, %v8539_v2, %v17240_v52  ;;  %v8490_v38 = vsel %vm8487_vm9, %v8481_v26, %v17241_v27  ;;  %vm15926_vm8 = vcmask 277504   ;;  %v17245_v58 = vld [vmem:[#allocation102_spill] sm:$0xff]  ;;  %v17246_v31 = vld [vmem:[#allocation235_spill] sm:$0xff]  ;;  %v17249_v19 = vld [vmem:[#allocation108_spill] sm:$0xff] }
 0x683   : > { %8114 = vrot.lane.b32.xlu1 %v17234_v59, %s9095_s30  ;;  %v14650_v44 = vpop.permute.xlu0 %8016  ;;  %v8524_v48 = vsel %vm8523_vm13, %v8515_v53, %v17242_v34  ;;  %v8557_v40 = vsel %vm8550_vm1, %v8548_v22, %v17243_v0  ;;  %v8499_v56 = vsel %vm8496_vm10, %v8490_v38, %v17244_v49  ;;  %v17247_v9 = vld [vmem:[#allocation227_spill] sm:$0xff]  ;;  %v17250_v30 = vld [vmem:[#allocation172_spill] sm:$0xff]  ;;  %v17254_v0 = vld [vmem:[#allocation286_spill] sm:$0xff] }
 0x684   : > { %v8533_v59 = vsel %vm8532_vm14, %v8524_v48, %v17245_v58  ;;  %v8566_v18 = vsel %vm15926_vm8, %v8557_v40, %v14431_v16  ;;  %v17248_v4 = vcombine.low %v17246_v31, %v17247_v9  ;;  %v8508_v2 = vsel %vm8505_vm11, %v8499_v56, %v17249_v19  ;;  %v17251_v53 = vld [vmem:[#allocation243_spill] sm:$0xff]  ;;  %v17256_v56 = vld [vmem:[#allocation146_spill] sm:$0xff]  ;;  %v17257_v58 = vld [vmem:[#allocation124_spill] sm:$0xff] }
 0x685   : > { %v14658_v43 = vpop.permute.xlu1 %7890  ;;  %8244 = vrot.lane.b32.xlu0 %v7282_v63, %s9099_s15  ;;  %v8542_v63 = vsel %vm8541_vm15, %v8533_v59, %v17250_v30  ;;  %v8575_v26 = vsel %vm15925_vm7, %v8566_v18, %v14536_v14  ;;  %v8483_v16 = vsel %vm15920_vm0, %v8475_v46, %v17251_v53  ;;  %v17252_v52 = vld [vmem:[#allocation107_spill] sm:$0xff]  ;;  %v17255_v14 = vld [vmem:[#allocation30_spill] sm:$0xff]  ;;  %vm15922_vm0 = vcmask 326656   ;;  %v17258_v18 = vld [vmem:[#allocation88_spill] sm:$0xff] }
 0x686   : > { %v8517_v22 = vsel %vm8514_vm12, %v8508_v2, %v17252_v52  ;;  %v17253_v27 = vld [vmem:[#allocation223_spill] sm:$0xff]  ;;  %v8492_v40 = vsel %vm8487_vm9, %v8483_v16, %v17254_v0  ;;  %v17259_v2 = vcombine.high %v17211_v11, %v17212_v50  ;;  %v5107_v30 = vcombine.high %v14504_v54, %v14482_v25  ;;  %v17264_v50 = vld [vmem:[#allocation176_spill] sm:$0xff]  ;;  %v17265_v25 = vld [vmem:[#allocation210_spill] sm:$0xff] }
 0x687   : > { %8118 = vrot.lane.b32.xlu1 %v17248_v4, %s9095_s30  ;;  %v8021_v37 = vpop.permute.xlu0 %8020  ;;  %v8551_v38 = vsel %vm8550_vm1, %v8542_v63, %v17253_v27  ;;  %v8526_v49 = vsel %vm8523_vm13, %v8517_v22, %v17255_v14  ;;  %v8501_v59 = vsel %vm8496_vm10, %v8492_v40, %v17257_v58  ;;  %v17262_v63 = vld [vmem:[#allocation177_spill] sm:$0xff]  ;;  %v4120_v11 = vcombine.low %v14511_v29, %v14521_v8  ;;  %v17268_v14 = vld [vmem:[#allocation100_spill] sm:$0xff]  ;;  %s8985_s30 = scalar_lea.vmem %s15425_s3, 1024 }
 0x688   : > { %v14695_v48 = vsel %vm15921_vm6, %v8575_v26, %v8021_v37  ;;  %v8560_v46 = vsel %vm15926_vm8, %v8551_v38, %v17256_v56  ;;  %v8535_v4 = vsel %vm8532_vm14, %v8526_v49, %v17258_v18  ;;  %v8510_v26 = vsel %vm8505_vm11, %v8501_v59, %v17262_v63  ;;  %v17263_v37 = vld [vmem:[#allocation158_spill] sm:$0xff]  ;;  %v17266_v38 = vld [vmem:[#allocation89_spill] sm:$0xff]  ;;  %p8986_p8 = scmp.ne.s32.totalorder %s15425_s3, %s8985_s30 }
 0x689   : > { %v14692_v34 = vpop.permute.xlu1 %7894  ;;  %8264 = vrot.lane.b32.xlu0 %v4019_v60, %s9100_s16  ;;  %v8569_v19 = vsel %vm15925_vm7, %v8560_v46, %v14442_v57  ;;  %v5160_v60 = vcombine.low %v17261_v21, %v17260_v10  ;;  %v8544_v53 = vsel %vm8541_vm15, %v8535_v4, %v17263_v37  ;;  %v8519_v52 = vsel %vm8514_vm12, %v8510_v26, %v17264_v50  ;;  %v17267_v0 = vld [vmem:[#allocation97_spill] sm:$0xff]  ;;  %v17271_v18 = vld [vmem:[#allocation94_spill] sm:$0xff] }
 0x68a   : > { %v8578_v57 = vsel %vm15921_vm6, %v8569_v19, %v14578_v1  ;;  %v8553_v54 = vsel %vm8550_vm1, %v8544_v53, %v17265_v25  ;;  %v5128_v40 = vcombine.low %v17267_v0, %v17266_v38  ;;  %v17269_v1 = vld [vmem:[#allocation92_spill] sm:$0xff]  ;;  %v17270_v56 = vld [vmem:[#allocation25_spill] sm:$0xff]  ;;  %v14751_v59 = vrot.slane %v4024_v35, %v10233_v7  ;;  %v17272_v4 = vld [vmem:[#allocation86_spill] sm:$0xff]  ;;  %p8987_p11 = pnand %p8986_p8, %p17462_p9 }
 0x68b   : > { %8138 = vrot.lane.b32.xlu1 %v17259_v2, %s9096_s5  ;;  %v8041_v16 = vpop.permute.xlu0 %8040  ;;  %v5144_v49 = vcombine.low %v17269_v1, %v17268_v14  ;;  %v8528_v46 = vsel %vm8523_vm13, %v8519_v52, %v17270_v56  ;;  %v8562_v58 = vsel %vm15926_vm8, %v8553_v54, %v14412_v3  ;;  %v5112_v19 = vcombine.low %v17272_v4, %v17271_v18  ;;  %v17273_v2 = vld [vmem:[#allocation99_spill] sm:$0xff]  ;;  %v17276_v37 = vld [vmem:[#allocation165_spill] sm:$0xff]  ;;  %v17277_v53 = vld [vmem:[#allocation166_spill] sm:$0xff] }
 0x68c   : > { %v14736_v27 = vsel %vm15922_vm0, %v8578_v57, %v8041_v16  ;;  %v8537_v10 = vsel %vm8532_vm14, %v8528_v46, %v17273_v2  ;;  %v8571_v21 = vsel %vm15925_vm7, %v8562_v58, %v14461_v32  ;;  %v17274_v3 = vcombine.high %v17220_v5, %v17221_v17  ;;  %v17278_v17 = vld [vmem:[#allocation264_spill] sm:$0xff]  ;;  %v17280_v54 = vld [vmem:[#allocation151_spill] sm:$0xff]  ;;  %v17282_v14 = vld [vmem:[#allocation162_spill] sm:$0xff]  ;;  %p8988_p0 = pneg %p8987_p11 }
 0x68d   : > { %v14733_v22 = vpop.permute.xlu1 %7914  ;;  %8268 = vrot.lane.b32.xlu0 %v5107_v30, %s9100_s16  ;;  %v14764_v30 = vrot.slane %v5160_v60, %v10233_v7  ;;  %v8546_v20 = vsel %vm8541_vm15, %v8537_v10, %v17275_v36  ;;  %v8580_v35 = vsel %vm15921_vm6, %v8571_v21, %v14613_v15  ;;  %v6195_v26 = vcombine.high %v14514_v23, %v14489_v61  ;;  %v17279_v23 = vld [vmem:[#allocation205_spill] sm:$0xff]  ;;  %v17281_v38 = vld [vmem:[#allocation159_spill] sm:$0xff]  ;;  %v17285_v46 = vld [vmem:[#allocation156_spill] sm:$0xff] }
 0x68e   : > { %v4088_v32 = vcombine.low %v14751_v59, %v14501_v55  ;;  %v6248_v5 = vcombine.low %v17277_v53, %v17276_v37  ;;  %v8555_v60 = vsel %vm8550_vm1, %v8546_v20, %v17278_v17  ;;  %v14782_v50 = vrot.slane %v4120_v11, %v10383_v45  ;;  %v17283_v11 = vld [vmem:[#allocation154_spill] sm:$0xff]  ;;  %v17286_v58 = vld [vmem:[#allocation148_spill] sm:$0xff]  ;;  %v17287_v10 = vld [vmem:[#allocation259_spill] sm:$0xff] }
 0x68f   : > { %8142 = vrot.lane.b32.xlu1 %v17274_v3, %s9096_s5  ;;  %v8045_v63 = vpop.permute.xlu0 %8044  ;;  %v14785_v15 = vrot.slane %v5128_v40, %v10233_v7  ;;  %v14788_v61 = vrot.slane %v5144_v49, %v10233_v7  ;;  %v8564_v52 = vsel %vm15926_vm8, %v8555_v60, %v17279_v23  ;;  %v14794_v25 = vrot.slane %v5112_v19, %v10233_v7  ;;  %v17288_v21 = vld [vmem:[#allocation83_spill] sm:$0xff]  ;;  %v17292_v37 = vld [vmem:[#allocation225_spill] sm:$0xff] }
 0x690   : > { %v8589_v16 = vsel %vm15922_vm0, %v8580_v35, %v8045_v63  ;;  %v6216_v0 = vcombine.low %v17281_v38, %v17280_v54  ;;  %v6232_v1 = vcombine.low %v17283_v11, %v17282_v14  ;;  %v8573_v40 = vsel %vm15925_vm7, %v8564_v52, %v14494_v13  ;;  %v17290_v35 = vld [vmem:[#allocation221_spill] sm:$0xff]  ;;  %v17294_v54 = vld [vmem:[#allocation75_spill] sm:$0xff]  ;;  %v17295_v38 = vld [vmem:[#allocation80_spill] sm:$0xff] }
 0x691   : > { %v14778_v57 = vpop.permute.xlu1 %7918  ;;  %8272 = vrot.lane.b32.xlu0 %v6195_v26, %s9100_s16  ;;  %v17284_v49 = vcombine.high %v17232_v51, %v17233_v62  ;;  %v5208_v56 = vcombine.low %v14788_v61, %v14764_v30  ;;  %v6200_v18 = vcombine.low %v17286_v58, %v17285_v46  ;;  %v8582_v4 = vsel %vm15921_vm6, %v8573_v40, %v14650_v44  ;;  %v17291_v26 = vld [vmem:[#allocation217_spill] sm:$0xff]  ;;  %v17297_v40 = vld [vmem:[#allocation270_spill] sm:$0xff] }
 0x692   : > { %v7283_v2 = vcombine.high %v14517_v12, %v14492_v6  ;;  %v14815_v13 = vrot.slane %v6248_v5, %v10233_v7  ;;  %v7336_v51 = vcombine.low %v17288_v21, %v17287_v10  ;;  %v4096_v36 = vrot.slane %v4088_v32, %v10383_v45  ;;  %v17289_v12 = vld [vmem:[#allocation213_spill] sm:$0xff] }
 0x693   : > { %8146 = vrot.lane.b32.xlu1 %v17284_v49, %s9096_s5  ;;  %v8049_v19 = vpop.permute.xlu0 %8048  ;;  %v5176_v20 = vcombine.low %v14794_v25, %v14785_v15  ;;  %v14827_v44 = vrot.slane %v6216_v0, %v10233_v7  ;;  %v14830_v6 = vrot.slane %v6232_v1, %v10233_v7  ;;  %v7304_v63 = vcombine.low %v17290_v35, %v17289_v12  ;;  %v17296_v1 = vld [vmem:[#allocation271_spill] sm:$0xff] }
 0x694   : > { %v8591_v3 = vsel %vm15922_vm0, %v8582_v4, %v8049_v19  ;;  %v7320_v53 = vcombine.low %v17292_v37, %v17291_v26  ;;  %v17293_v32 = vcombine.high %v17246_v31, %v17247_v9  ;;  %v5216_v5 = vrot.slane %v5208_v56, %v10383_v45 }
 0x695   : > { %v14819_v62 = vpop.permute.xlu1 %7922  ;;  %8276 = vrot.lane.b32.xlu0 %v7283_v2, %s9100_s16  ;;  %v14842_v17 = vrot.slane %v6200_v18, %v10233_v7  ;;  %v4152_v23 = vcombine.low %v4096_v36, %v14782_v50  ;;  %v6296_v52 = vcombine.low %v14830_v6, %v14815_v13  ;;  %v7288_v0 = vcombine.low %v17295_v38, %v17294_v54 }
 0x696   : > { %v14850_v14 = vrot.slane %v7336_v51, %v10233_v7  ;;  %v5184_v9 = vrot.slane %v5176_v20, %v10383_v45  ;;  %v17298_v49 = vcombine.low %v17296_v1, %v17297_v40  ;;  %vm15924_vm6 = vcmask 343040   ;;  %v17299_v51 = vld [vmem:[#allocation296_spill] sm:$0xff]  ;;  %v17300_v20 = vld [vmem:[#allocation294_spill] sm:$0xff] }
 0x697   : > { %8150 = vrot.lane.b32.xlu1 %v17293_v32, %s9096_s5  ;;  %v8053_v60 = vpop.permute.xlu0 %8052  ;;  %v6264_v56 = vcombine.low %v14842_v17, %v14827_v44  ;;  %v14864_v46 = vrot.slane %v7304_v63, %v10233_v7  ;;  %v14867_v58 = vrot.slane %v7320_v53, %v10233_v7  ;;  %v6304_v4 = vrot.slane %v6296_v52, %v10383_v45  ;;  %v17302_v32 = vld [vmem:[#allocation314_spill] sm:$0xff]  ;;  %s9105_s5 = smov [#allocation5]  }
 0x698   : > { %v8593_v31 = vsel %vm15922_vm0, %v14695_v48, %v8053_v60  ;;  %v5240_v18 = vcombine.low %v5184_v9, %v5216_v5  ;;  %v14872_v19 = vrot.slane %v7288_v0, %v10233_v7  ;;  %v17301_v12 = vcombine.low %v17299_v51, %v17300_v20  ;;  %v17303_v60 = vld [vmem:[#allocation312_spill] sm:$0xff] }
 0x699   : > { %v14852_v11 = vpop.permute.xlu1 %7926  ;;  %8296 = vrot.lane.b32.xlu0 %v17298_v49, %s9101_s17  ;;  %v7384_v2 = vcombine.low %v14867_v58, %v14850_v14  ;;  %v6272_v35 = vrot.slane %v6264_v56, %v10383_v45  ;;  %v17305_v56 = vld [vmem:[#allocation208_spill] sm:$0xff]  ;;  %vm15923_vm0 = vcmask 359424   ;;  %vm17331_vm7 = vcmask 97280  }
 0x69a   : > { %v7352_v63 = vcombine.low %v14872_v19, %v14864_v46  ;;  %vm17349_vm8 = vcmask 130048  }
 0x69b   : > { %8170 = vrot.lane.b32.xlu1 %v4152_v23, %s9097_s12  ;;  %v8073_v48 = vpop.permute.xlu0 %8072  ;;  %v7392_v26 = vrot.slane %v7384_v2, %v10383_v45  ;;  %v17304_v23 = vcombine.low %v17302_v32, %v17303_v60 }
 0x69c   : > { %v8596_v21 = vsel %vm15924_vm6, %v14736_v27, %v8073_v48  ;;  %v6328_v27 = vcombine.low %v6272_v35, %v6304_v4  ;;  %v7360_v52 = vrot.slane %v7352_v63, %v10383_v45  ;;  %v17306_v48 = vld [vmem:[#allocation200_spill] sm:$0xff]  ;;  %v4153_v63 = vcombine.high %v4096_v36, %v14782_v50 }
 0x69d   : > { %v14876_v10 = vpop.permute.xlu1 %7946  ;;  %8300 = vrot.lane.b32.xlu0 %v17301_v12, %s9101_s17  ;;  %v4121_v36 = vcombine.high %v14511_v29, %v14521_v8 }
 0x69e   : > { %v7416_v49 = vcombine.low %v7360_v52, %v7392_v26 }
 0x69f   : > { %8174 = vrot.lane.b32.xlu1 %v5240_v18, %s9097_s12  ;;  %v8077_v7 = vpop.permute.xlu0 %8076  ;;  %v14940_v8 = vrot.slane %v4121_v36, %v10383_v45  ;;  %v17325_v36 = vld [vmem:[#allocation65_spill] sm:$0xff] }
 0x6a0   : > { %v8598_v53 = vsel %vm15924_vm6, %v8589_v16, %v8077_v7  ;;  %v17307_v16 = vcombine.low %v17305_v56, %v17306_v48 }
 0x6a1   : > { %v14889_v37 = vpop.permute.xlu1 %7950  ;;  %8304 = vrot.lane.b32.xlu0 %v17304_v23, %s9101_s17 }
 0x6a3   : > { %8178 = vrot.lane.b32.xlu1 %v6328_v27, %s9097_s12  ;;  %v8081_v54 = vpop.permute.xlu0 %8080 }
 0x6a4   : > { %v8600_v0 = vsel %vm15924_vm6, %v8591_v3, %v8081_v54  ;;  %v17308_v3 = vcombine.high %v17296_v1, %v17297_v40  ;;  %v5241_v54 = vcombine.high %v5184_v9, %v5216_v5  ;;  %v17310_v5 = vcombine.high %v17302_v32, %v17303_v60 }
 0x6a5   : > { %v14898_v38 = vpop.permute.xlu1 %7954  ;;  %8308 = vrot.lane.b32.xlu0 %v17307_v16, %s9101_s17  ;;  %v4089_v9 = vcombine.high %v14751_v59, %v14501_v55  ;;  %v6297_v55 = vcombine.high %v14830_v6, %v14815_v13  ;;  %v17311_v59 = vcombine.high %v17305_v56, %v17306_v48  ;;  %v17313_v13 = vld [vmem:[#allocation16_spill] sm:$0xff]  ;;  %v17314_v6 = vld [vmem:[#allocation81_spill] sm:$0xff]  ;;  %v17317_v16 = vld [vmem:[#allocation250_spill] sm:$0xff] }
 0x6a7   : > { %8182 = vrot.lane.b32.xlu1 %v7416_v49, %s9097_s12  ;;  %v8085_v18 = vpop.permute.xlu0 %8084  ;;  %v6329_v49 = vcombine.high %v6272_v35, %v6304_v4  ;;  %v5177_v35 = vcombine.high %v14794_v25, %v14785_v15  ;;  %v6265_v15 = vcombine.high %v14842_v17, %v14827_v44  ;;  %v17312_v25 = vld [vmem:[#allocation241_spill] sm:$0xff]  ;;  %v14986_v48 = vrot.slane %v6297_v55, %v10383_v45  ;;  %s8989_s12 = sshll.u32 %s9105_s5, 4  ;;  %s8990_s12 = int_to_ptr.vmem [resolvable:$false] %s8989_s12 }
 0x6a8   : > { %v8602_v12 = vsel %vm15924_vm6, %v8593_v31, %v8085_v18  ;;  %v17309_v31 = vcombine.high %v17299_v51, %v17300_v20  ;;  %v7417_v20 = vcombine.high %v7360_v52, %v7392_v26  ;;  %v7353_v52 = vcombine.high %v14872_v19, %v14864_v46  ;;  %v17318_v19 = vld [vmem:[#allocation273_spill] sm:$0xff]  ;;  %v17319_v18 = vld [vmem:[#allocation272_spill] sm:$0xff]  ;;  %p8992_p6 = scmp.lt.s32.totalorder %s15425_s3, %s8990_s12 }
 0x6a9   : > { %v14906_v2 = vpop.permute.xlu1 %7958  ;;  %8328 = vrot.lane.b32.xlu0 %v17308_v3, %s9102_s22  ;;  %v14983_v17 = vrot.slane %v5177_v35, %v10383_v45  ;;  %v17321_v3 = vld [vmem:[#allocation238_spill] sm:$0xff]  ;;  %vm17328_vm6 = vcmask 80896  }
 0x6ab   : > { %8202 = vrot.lane.b32.xlu1 %v4153_v63, %s9098_s13  ;;  %v8105_v7 = vpop.permute.xlu0 %8104  ;;  %v17320_v63 = vcombine.low %v17318_v19, %v17319_v18 }
 0x6ac   : > { %v8605_v23 = vsel %vm15923_vm0, %v8596_v21, %v8105_v7  ;;  %v5209_v21 = vcombine.high %v14788_v61, %v14764_v30  ;;  %v14956_v30 = vrot.slane %v4089_v9, %v10383_v45  ;;  %v7385_v61 = vcombine.high %v14867_v58, %v14850_v14  ;;  %v17322_v7 = vld [vmem:[#allocation50_spill] sm:$0xff] }
 0x6ad   : > { %v14915_v27 = vpop.permute.xlu1 %7978  ;;  %8332 = vrot.lane.b32.xlu0 %v17309_v31, %s9102_s22  ;;  %v15008_v9 = vrot.slane %v6265_v15, %v10383_v45 }
 0x6ae   : > { %v14962_v26 = vrot.slane %v5209_v21, %v10383_v45  ;;  %v4154_v44 = vcombine.low %v14956_v30, %v14940_v8  ;;  %v17326_v21 = vld [vmem:[#allocation234_spill] sm:$0xff] }
 0x6af   : > { %8206 = vrot.lane.b32.xlu1 %v5241_v54, %s9098_s13  ;;  %v8109_v50 = vpop.permute.xlu0 %8108  ;;  %v17323_v54 = vld [vmem:[#allocation51_spill] sm:$0xff] }
 0x6b0   : > { %v14928_v40 = vsel %vm15923_vm0, %v8598_v53, %v8109_v50  ;;  %v17315_v53 = vcombine.low %v17313_v13, %v17314_v6  ;;  %v17324_v31 = vcombine.low %v17322_v7, %v17323_v54  ;;  %v17330_v6 = vld [vmem:[#allocation179_spill] sm:$0xff] }
 0x6b1   : > { %v14925_v1 = vpop.permute.xlu1 %7982  ;;  %8336 = vrot.lane.b32.xlu0 %v17310_v5, %s9102_s22  ;;  %v4155_v5 = vcombine.high %v14956_v30, %v14940_v8  ;;  %v17340_v7 = vld [vmem:[#allocation295_spill] sm:$0xff] }
 0x6b2   : > { %v8424_v32 = vsel %vm8416_vm2, %v17315_v53, %v17312_v25  ;;  %v8418_v50 = vsel %vm8416_vm2, %v17324_v31, %v17321_v3  ;;  %v17329_v25 = vld [vmem:[#allocation76_spill] sm:$0xff]  ;;  %v17339_v3 = vld [vmem:[#allocation297_spill] sm:$0xff] }
 0x6b3   : > { %8210 = vrot.lane.b32.xlu1 %v6329_v49, %s9098_s13  ;;  %v8113_v29 = vpop.permute.xlu0 %8112  ;;  %v17341_v54 = vcombine.low %v17339_v3, %v17340_v7  ;;  %v17342_v31 = vld [vmem:[#allocation232_spill] sm:$0xff] }
 0x6b4   : > { %v14945_v4 = vsel %vm15923_vm0, %v8600_v0, %v8113_v29  ;;  %v17316_v0 = vld [vmem:[#allocation52_spill] sm:$0xff]  ;;  %v8427_v29 = vsel %vm8425_vm3, %v8418_v50, %v17326_v21  ;;  %v17343_v50 = vld [vmem:[#allocation173_spill] sm:$0xff] }
 0x6b5   : > { %v14942_v51 = vpop.permute.xlu1 %7986  ;;  %8340 = vrot.lane.b32.xlu0 %v17311_v59, %s9102_s22  ;;  %v8433_v14 = vsel %vm8425_vm3, %v8424_v32, %v17316_v0  ;;  %v5242_v59 = vcombine.low %v14983_v17, %v14962_v26  ;;  %v8436_v13 = vsel %vm8434_vm4, %v8427_v29, %v17329_v25  ;;  %v17333_v0 = vld [vmem:[#allocation111_spill] sm:$0xff]  ;;  %v17346_v29 = vld [vmem:[#allocation60_spill] sm:$0xff] }
 0x6b6   : > { %v8442_v46 = vsel %vm8434_vm4, %v8433_v14, %v17317_v16  ;;  %v17334_v14 = vld [vmem:[#allocation112_spill] sm:$0xff] }
 0x6b7   : > { %8214 = vrot.lane.b32.xlu1 %v7417_v20, %s9098_s13  ;;  %v8117_v60 = vpop.permute.xlu0 %8116  ;;  %v8451_v49 = vsel %vm8443_vm5, %v8442_v46, %v17325_v36  ;;  %v17327_v20 = vld [vmem:[#allocation133_spill] sm:$0xff]  ;;  %v17336_v46 = vld [vmem:[#allocation256_spill] sm:$0xff]  ;;  %v17344_v36 = vld [vmem:[#allocation174_spill] sm:$0xff]  ;;  %s8991_s13 = scalar_lea.vmem %s8990_s12, 2048 }
 0x6b8   : > { %v14978_v56 = vsel %vm15923_vm0, %v8602_v12, %v8117_v60  ;;  %vm8613_vm0 = vcmask 375808   ;;  %v14995_v12 = vrot.slane %v7385_v61, %v10383_v45  ;;  %v8460_v35 = vsel %vm17328_vm6, %v8451_v49, %v17327_v20  ;;  %v17332_v60 = vld [vmem:[#allocation231_spill] sm:$0xff]  ;;  %p8993_p13 = scmp.lt.s32.totalorder %s8991_s13, %s8985_s30 }
 0x6b9   : > { %v14975_v58 = vpop.permute.xlu1 %7990  ;;  %8360 = vrot.lane.b32.xlu0 %v17320_v63, %s9103_s23  ;;  %v15017_v61 = vrot.slane %v7353_v52, %v10383_v45  ;;  %v8469_v15 = vsel %vm17331_vm7, %v8460_v35, %v17330_v6  ;;  %v8445_v45 = vsel %vm8443_vm5, %v8436_v13, %v17336_v46  ;;  %v17337_v52 = vld [vmem:[#allocation274_spill] sm:$0xff]  ;;  %vm17338_vm6 = vcmask 113664   ;;  %v17348_v35 = vld [vmem:[#allocation48_spill] sm:$0xff]  ;;  %v17350_v13 = vld [vmem:[#allocation9_spill] sm:$0xff] }
 0x6ba   : > { %v8478_v63 = vsel %vm17338_vm6, %v8469_v15, %v17337_v52  ;;  %v17345_v49 = vcombine.low %v17343_v50, %v17344_v36  ;;  %vm17347_vm7 = vcmask 80896   ;;  %v17351_v15 = vld [vmem:[#allocation54_spill] sm:$0xff]  ;;  %vm17353_vm6 = vcmask 97280   ;;  %v17355_v52 = vld [vmem:[#allocation105_spill] sm:$0xff]  ;;  %p8994_p2 = por %p8993_p13, %p8992_p6 }
 0x6bb   : > { %8234 = vrot.lane.b32.xlu1 %v4154_v44, %s9099_s15  ;;  %v8137_v55 = vpop.permute.xlu0 %8136  ;;  %v17335_v44 = vcombine.low %v17333_v0, %v17334_v14  ;;  %v8454_v20 = vsel %vm17347_vm7, %v8445_v45, %v17346_v29  ;;  %v7418_v25 = vcombine.low %v15017_v61, %v14995_v12  ;;  %v17352_v0 = vld [vmem:[#allocation119_spill] sm:$0xff]  ;;  %v17360_v29 = vld [vmem:[#allocation244_spill] sm:$0xff] }
 0x6bc   : > { %v15026_v32 = vsel %vm8613_vm0, %v8605_v23, %v8137_v55  ;;  %v6330_v23 = vcombine.low %v15008_v9, %v14986_v48  ;;  %v8422_v21 = vsel %vm8416_vm2, %v17345_v49, %v17342_v31  ;;  %v8486_v55 = vsel %vm17349_vm8, %v8478_v63, %v17348_v35  ;;  %v17358_v31 = vld [vmem:[#allocation298_spill] sm:$0xff]  ;;  %v17361_v35 = vld [vmem:[#allocation13_spill] sm:$0xff]  ;;  %p8995_p5 = pnand %p8994_p2, %p8988_p0 }
 0x6bd   : > { %v15023_v53 = vpop.permute.xlu1 %8010  ;;  %v8420_v16 = vsel %vm8416_vm2, %v17335_v44, %v17332_v60  ;;  %8364 = vrot.lane.b32.xlu0 %v17341_v54, %s9103_s23  ;;  %v8431_v60 = vsel %vm8425_vm3, %v8422_v21, %v17351_v15  ;;  %v8463_v14 = vsel %vm17353_vm6, %v8454_v20, %v17352_v0  ;;  %v17354_v44 = vld [vmem:[#allocation110_spill] sm:$0xff]  ;;  %vm17357_vm2 = vcmask 113664   ;;  %v17364_v15 = vld [vmem:[#allocation315_spill] sm:$0xff]  ;;  %v17365_v0 = vld [vmem:[#allocation313_spill] sm:$0xff] }
 0x6be   : > { %v8429_v6 = vsel %vm8425_vm3, %v8420_v16, %v17350_v13  ;;  %v8495_v46 = vsel %vm8487_vm9, %v8486_v55, %v17354_v44  ;;  %v17359_v49 = vld [vmem:[#allocation14_spill] sm:$0xff]  ;;  %vm17362_vm3 = vmmov %vm17349_vm8  ;;  %v17363_v13 = vld [vmem:[#allocation316_spill] sm:$0xff] }
 0x6bf   : > { %8238 = vrot.lane.b32.xlu1 %v5242_v59, %s9099_s15  ;;  %v8141_v45 = vpop.permute.xlu0 %8140  ;;  %v8438_v63 = vsel %vm8434_vm4, %v8429_v6, %v17355_v52  ;;  %v17356_v59 = vld [vmem:[#allocation53_spill] sm:$0xff]  ;;  %v8504_v50 = vsel %vm8496_vm10, %v8495_v46, %v17358_v31  ;;  %v8440_v21 = vsel %vm8434_vm4, %v8431_v60, %v17359_v49  ;;  %v17367_v44 = vld [vmem:[#allocation79_spill] sm:$0xff]  ;;  %v17368_v46 = vld [vmem:[#allocation62_spill] sm:$0xff] }
 0x6c0   : > { %v8472_v54 = vsel %vm17357_vm2, %v8463_v14, %v17356_v59  ;;  %v15073_v36 = vsel %vm8613_vm0, %v14928_v40, %v8141_v45  ;;  %v8447_v20 = vsel %vm8443_vm5, %v8438_v63, %v17360_v29  ;;  %v8513_v6 = vsel %vm8505_vm11, %v8504_v50, %v17363_v13  ;;  %vm17369_vm8 = vmmov %vm17347_vm7  ;;  %v17370_v45 = vld [vmem:[#allocation34_spill] sm:$0xff]  ;;  %v17371_v63 = vld [vmem:[#allocation77_spill] sm:$0xff] }
 0x6c1   : > { %v15069_v16 = vpop.permute.xlu1 %8014  ;;  %v8480_v55 = vsel %vm17362_vm3, %v8472_v54, %v17361_v35  ;;  %v17366_v14 = vcombine.low %v17364_v15, %v17365_v0  ;;  %v8449_v40 = vsel %vm8443_vm5, %v8440_v21, %v17367_v44  ;;  %v8456_v60 = vsel %vm17369_vm8, %v8447_v20, %v17368_v46  ;;  %v17372_v54 = vld [vmem:[#allocation141_spill] sm:$0xff]  ;;  %vm17373_vm4 = vmmov %vm17347_vm7  ;;  %v17374_v50 = vld [vmem:[#allocation130_spill] sm:$0xff] }
 0x6c2   : > { %v8489_v52 = vsel %vm8487_vm9, %v8480_v55, %v17370_v45  ;;  %v8522_v59 = vsel %vm8514_vm12, %v8513_v6, %v17371_v63  ;;  %v8458_v31 = vsel %vm17373_vm4, %v8449_v40, %v17372_v54  ;;  %vm17375_vm7 = vmmov %vm17353_vm6  ;;  %v17376_v29 = vld [vmem:[#allocation96_spill] sm:$0xff]  ;;  %v17377_v13 = vld [vmem:[#allocation115_spill] sm:$0xff]  ;;  %vm17394_vm4 = vcmask 277504  }
 0x6c3   : > { %8368 = vrot.lane.b32.xlu0 %v17366_v14, %s9103_s23  ;;  %8242 = vrot.lane.b32.xlu1 %v6330_v23, %s9099_s15  ;;  %v8465_v49 = vsel %vm17375_vm7, %v8456_v60, %v17374_v50  ;;  %v8498_v21 = vsel %vm8496_vm10, %v8489_v52, %v17376_v29  ;;  %v8531_v20 = vsel %vm8523_vm13, %v8522_v59, %v14433_v42  ;;  %v8145_v35 = vpop.permute.xlu0 %8144  ;;  %vm17378_vm5 = vmmov %vm17357_vm2  ;;  %v17379_v14 = vld [vmem:[#allocation164_spill] sm:$0xff]  ;;  %v17380_v46 = vld [vmem:[#allocation310_spill] sm:$0xff]  ;;  %vm17396_vm7 = vcmask 293888  }
 0x6c4   : > { %v8474_v55 = vsel %vm17378_vm5, %v8465_v49, %v17377_v13  ;;  %v8507_v6 = vsel %vm8505_vm11, %v8498_v21, %v17379_v14  ;;  %v8540_v23 = vsel %vm8532_vm14, %v8531_v20, %v14544_v41  ;;  %v15114_v40 = vsel %vm8613_vm0, %v14945_v4, %v8145_v35  ;;  %v17381_v42 = vld [vmem:[#allocation169_spill] sm:$0xff]  ;;  %vm17382_vm2 = vmmov %vm17362_vm3  ;;  %v17383_v52 = vld [vmem:[#allocation215_spill] sm:$0xff] }
 0x6c5   : > { %v15110_v44 = vpop.permute.xlu1 %8018  ;;  %v8467_v60 = vsel %vm17353_vm6, %v8458_v31, %v17380_v46  ;;  %v8482_v45 = vsel %vm17382_vm2, %v8474_v55, %v17381_v42  ;;  %v8516_v63 = vsel %vm8514_vm12, %v8507_v6, %v17383_v52  ;;  %v8549_v59 = vsel %vm8541_vm15, %v8540_v23, %v14692_v34  ;;  %v17384_v41 = vld [vmem:[#allocation201_spill] sm:$0xff]  ;;  %v17387_v49 = vld [vmem:[#allocation168_spill] sm:$0xff]  ;;  %vm17388_vm3 = vmmov %vm17378_vm5 }
 0x6c6   : > { %v17385_v54 = vld [vmem:[#allocation17_spill] sm:$0xff]  ;;  %v8476_v4 = vsel %vm17388_vm3, %v8467_v60, %v17387_v49  ;;  %v17389_v29 = vld [vmem:[#allocation38_spill] sm:$0xff]  ;;  %v17390_v21 = vld [vmem:[#allocation144_spill] sm:$0xff]  ;;  %v8558_v35 = vsel %vm8550_vm1, %v8549_v59, %v14852_v11  ;;  %vm17398_vm5 = vcmask 310272   ;;  %vm8622_vm6 = vcmask 392192  }
 0x6c7   : > { %v17386_v50 = vcombine.low %v17384_v41, %v17385_v54  ;;  %v8491_v31 = vsel %vm8487_vm9, %v8482_v45, %v17389_v29  ;;  %v8525_v20 = vsel %vm8523_vm13, %v8516_v63, %v17390_v21  ;;  %8246 = vrot.lane.b32.xlu1 %v7418_v25, %s9099_s15  ;;  %v17391_v34 = vld [vmem:[#allocation41_spill] sm:$0xff]  ;;  %vm17392_vm8 = vmmov %vm17382_vm2  ;;  %v17393_v55 = vld [vmem:[#allocation91_spill] sm:$0xff]  ;;  %v8567_v23 = vsel %vm17394_vm4, %v8558_v35, %v14906_v2  ;;  %v8149_v46 = vpop.permute.xlu0 %8148 }
 0x6c8   : > { %v8484_v13 = vsel %vm17392_vm8, %v8476_v4, %v17391_v34  ;;  %v8500_v14 = vsel %vm8496_vm10, %v8491_v31, %v17393_v55  ;;  %v8534_v6 = vsel %vm8532_vm14, %v8525_v20, %v14444_v24  ;;  %v17395_v60 = vld [vmem:[#allocation150_spill] sm:$0xff]  ;;  %v8576_v25 = vsel %vm17396_vm7, %v8567_v23, %v14975_v58  ;;  %v17400_v58 = vld [vmem:[#allocation24_spill] sm:$0xff]  ;;  %vm17402_vm2 = vmmov %vm17394_vm4 }
 0x6c9   : > { %8372 = vrot.lane.b32.xlu0 %v17386_v50, %s9103_s23  ;;  %v8509_v42 = vsel %vm8505_vm11, %v8500_v14, %v17395_v60  ;;  %v8543_v11 = vsel %vm8541_vm15, %v8534_v6, %v14586_v28  ;;  %v8023_v45 = vpop.permute.xlu1 %8022  ;;  %v8620_v52 = vsel %vm8613_vm0, %v14978_v56, %v8149_v46  ;;  %v17397_v63 = vld [vmem:[#allocation202_spill] sm:$0xff]  ;;  %v17399_v28 = vcombine.high %v17318_v19, %v17319_v18  ;;  %v17401_v49 = vld [vmem:[#allocation204_spill] sm:$0xff]  ;;  %vm17404_vm3 = vmmov %vm17396_vm7 }
 0x6ca   : > { %v8518_v24 = vsel %vm8514_vm12, %v8509_v42, %v17397_v63  ;;  %v8552_v2 = vsel %vm8550_vm1, %v8543_v11, %v14733_v22  ;;  %v8585_v59 = vsel %vm17398_vm5, %v8576_v25, %v8023_v45  ;;  %v8493_v50 = vsel %vm8487_vm9, %v8484_v13, %v17400_v58  ;;  %v17403_v22 = vld [vmem:[#allocation93_spill] sm:$0xff]  ;;  %vm17406_vm9 = vmmov %vm17398_vm5  ;;  %v17407_v35 = vld [vmem:[#allocation263_spill] sm:$0xff] }
 0x6cb   : > { %v8527_v56 = vsel %vm8523_vm13, %v8518_v24, %v17401_v49  ;;  %v8561_v4 = vsel %vm17402_vm2, %v8552_v2, %v14876_v10  ;;  %8266 = vrot.lane.b32.xlu1 %v4155_v5, %s9100_s16  ;;  %v8502_v29 = vsel %vm8496_vm10, %v8493_v50, %v17403_v22  ;;  %v8169_v31 = vpop.permute.xlu0 %8168  ;;  %v5243_v21 = vcombine.high %v14983_v17, %v14962_v26  ;;  %v17405_v20 = vld [vmem:[#allocation161_spill] sm:$0xff]  ;;  %vm17413_vm8 = vmmov %vm17398_vm5  ;;  %v17423_v42 = vld [vmem:[#allocation282_spill] sm:$0xff] }
 0x6cc   : > { %v8536_v19 = vsel %vm8532_vm14, %v8527_v56, %v14467_v47  ;;  %v8570_v18 = vsel %vm17404_vm3, %v8561_v4, %v14915_v27  ;;  %v8511_v10 = vsel %vm8505_vm11, %v8502_v29, %v17405_v20  ;;  %v8623_v47 = vsel %vm8622_vm6, %v15026_v32, %v8169_v31  ;;  %vm17411_vm11 = vmmov %vm17402_vm2  ;;  %v17427_v45 = vld [vmem:[#allocation306_spill] sm:$0xff]  ;;  %v17434_v29 = vld [vmem:[#allocation220_spill] sm:$0xff] }
 0x6cd   : > { %8392 = vrot.lane.b32.xlu0 %v17399_v28, %s9104_s24  ;;  %v8545_v8 = vsel %vm8541_vm15, %v8536_v19, %v14623_v33  ;;  %v8579_v30 = vsel %vm17406_vm9, %v8570_v18, %v15023_v53  ;;  %v8043_v5 = vpop.permute.xlu1 %8042  ;;  %v8520_v27 = vsel %vm8514_vm12, %v8511_v10, %v17407_v35  ;;  %vm17408_vm10 = vcmask 326656   ;;  %v17410_v33 = vld [vmem:[#allocation265_spill] sm:$0xff]  ;;  %vm17412_vm12 = vmmov %vm17404_vm3  ;;  %v17430_v28 = vld [vmem:[#allocation324_spill] sm:$0xff] }
 0x6ce   : > { %v8554_v34 = vsel %vm8550_vm1, %v8545_v8, %v14778_v57  ;;  %v8588_v26 = vsel %vm17408_vm10, %v8579_v30, %v8043_v5  ;;  %v17409_v17 = vcombine.high %v17339_v3, %v17340_v7  ;;  %v8529_v53 = vsel %vm8523_vm13, %v8520_v27, %v17410_v33  ;;  %vm17414_vm13 = vmmov %vm17408_vm10  ;;  %v17431_v58 = vld [vmem:[#allocation322_spill] sm:$0xff]  ;;  %v17435_v19 = vld [vmem:[#allocation224_spill] sm:$0xff] }
 0x6cf   : > { %v8563_v13 = vsel %vm17411_vm11, %v8554_v34, %v14889_v37  ;;  %8270 = vrot.lane.b32.xlu1 %v5243_v21, %s9100_s16  ;;  %v8538_v32 = vsel %vm8532_vm14, %v8529_v53, %v14506_v39  ;;  %v8173_v55 = vpop.permute.xlu0 %8172  ;;  %v6331_v37 = vcombine.high %v15008_v9, %v14986_v48  ;;  %vm17416_vm14 = vmmov %vm17402_vm2  ;;  %vm17425_vm2 = vcmask 343040  }
 0x6d0   : > { %v8572_v57 = vsel %vm17412_vm12, %v8563_v13, %v14925_v1  ;;  %v8547_v14 = vsel %vm8541_vm15, %v8538_v32, %v14658_v43  ;;  %v8625_v6 = vsel %vm8622_vm6, %v15073_v36, %v8173_v55  ;;  %v17415_v1 = vcombine.high %v17364_v15, %v17365_v0  ;;  %vm17417_vm15 = vmmov %vm17404_vm3 }
 0x6d1   : > { %8396 = vrot.lane.b32.xlu0 %v17409_v17, %s9104_s24  ;;  %v8581_v3 = vsel %vm17413_vm8, %v8572_v57, %v15069_v16  ;;  %v8047_v7 = vpop.permute.xlu1 %8046  ;;  %v8556_v39 = vsel %vm8550_vm1, %v8547_v14, %v14819_v62  ;;  %vm17418_vm4 = vmmov %vm17398_vm5  ;;  %v7419_v15 = vcombine.high %v15017_v61, %v14995_v12  ;;  %vm8631_vm5 = vcmask 408576  }
 0x6d2   : > { %v8590_v23 = vsel %vm17414_vm13, %v8581_v3, %v8047_v7  ;;  %v8565_v43 = vsel %vm17416_vm14, %v8556_v39, %v14898_v38  ;;  %vm17419_vm1 = vmmov %vm17408_vm10  ;;  %v17420_v38 = vcombine.high %v17384_v41, %v17385_v54  ;;  %v17426_v54 = vld [vmem:[#allocation308_spill] sm:$0xff]  ;;  %v17432_v50 = vcombine.low %v17430_v28, %v17431_v58  ;;  %v17446_v39 = vld [vmem:[#allocation285_spill] sm:$0xff] }
 0x6d3   : > { %8274 = vrot.lane.b32.xlu1 %v6331_v37, %s9100_s16  ;;  %v8574_v16 = vsel %vm17417_vm15, %v8565_v43, %v14942_v51  ;;  %v8177_v36 = vpop.permute.xlu0 %8176  ;;  %vm17421_vm7 = vmmov %vm17419_vm1  ;;  %v17428_v63 = vcombine.low %v17426_v54, %v17427_v45  ;;  %v17436_v18 = vcombine.low %v17434_v29, %v17435_v19  ;;  %vm8640_vm11 = vcmask 424960  }
 0x6d4   : > { %v8583_v48 = vsel %vm17418_vm4, %v8574_v16, %v15110_v44  ;;  %v8627_v9 = vsel %vm8622_vm6, %v15114_v40, %v8177_v36  ;;  %v17422_v40 = vld [vmem:[#allocation284_spill] sm:$0xff]  ;;  %vm17429_vm3 = vmmov %vm17425_vm2  ;;  %vm17439_vm12 = vcmask 359424   ;;  %v17440_v27 = vcombine.high %v17426_v54, %v17427_v45 }
 0x6d5   : > { %8400 = vrot.lane.b32.xlu0 %v17415_v1, %s9104_s24  ;;  %v8051_v62 = vpop.permute.xlu1 %8050  ;;  %v17424_v12 = vcombine.low %v17422_v40, %v17423_v42  ;;  %vm17433_vm9 = vmmov %vm17425_vm2  ;;  %v17438_v8 = vcombine.high %v17422_v40, %v17423_v42  ;;  %v17442_v53 = vcombine.high %v17430_v28, %v17431_v58  ;;  %v17444_v14 = vcombine.high %v17434_v29, %v17435_v19 }
 0x6d6   : > { %v8592_v0 = vsel %vm17419_vm1, %v8583_v48, %v8051_v62  ;;  %vm17437_vm10 = vmmov %vm17425_vm2  ;;  %v17449_v48 = vld [vmem:[#allocation309_spill] sm:$0xff]  ;;  %v17450_v62 = vld [vmem:[#allocation307_spill] sm:$0xff]  ;;  %vm8667_vm15 = vcmask 474112   ;;  %vm8676_vm4 = vcmask 490496   ;;  %vm8685_vm1 = vcmask 506880  }
 0x6d7   : > { %8278 = vrot.lane.b32.xlu1 %v7419_v15, %s9100_s16  ;;  %v8181_v51 = vpop.permute.xlu0 %8180  ;;  %vm17441_vm8 = vmmov %vm17439_vm12 }
 0x6d8   : > { %v8629_v44 = vsel %vm8622_vm6, %v8620_v52, %v8181_v51  ;;  %vm17443_vm13 = vmmov %vm17441_vm8  ;;  %v17452_v51 = vld [vmem:[#allocation326_spill] sm:$0xff] }
 0x6d9   : > { %8404 = vrot.lane.b32.xlu0 %v17420_v38, %s9104_s24  ;;  %v8055_v46 = vpop.permute.xlu1 %8054  ;;  %vm17445_vm14 = vmmov %vm17441_vm8 }
 0x6da   : > { %v8594_v60 = vsel %vm17421_vm7, %v8585_v59, %v8055_v46  ;;  %v17453_v46 = vld [vmem:[#allocation325_spill] sm:$0xff]  ;;  %vm8694_vm7 = vcmask 523264  }
 0x6db   : > { %8298 = vrot.lane.b32.xlu1 %v17424_v12, %s9101_s17  ;;  %v8201_v61 = vpop.permute.xlu0 %8200  ;;  %v17455_v12 = vld [vmem:[#allocation212_spill] sm:$0xff] }
 0x6dc   : > { %v8632_v25 = vsel %vm8631_vm5, %v8623_v47, %v8201_v61  ;;  %v17456_v61 = vld [vmem:[#allocation216_spill] sm:$0xff] }
 0x6dd   : > { %v8075_v11 = vpop.permute.xlu1 %8074 }
 0x6de   : > { %v8597_v41 = vsel %vm17425_vm2, %v8588_v26, %v8075_v11  ;;  %v17457_v11 = vcombine.low %v17455_v12, %v17456_v61 }
 0x6df   : > { %8302 = vrot.lane.b32.xlu1 %v17428_v63, %s9101_s17  ;;  %v8205_v52 = vpop.permute.xlu0 %8204 }
 0x6e0   : > { %v8634_v2 = vsel %vm8631_vm5, %v8625_v6, %v8205_v52 }
 0x6e1   : > { %v8079_v24 = vpop.permute.xlu1 %8078 }
 0x6e2   : > { %v8599_v59 = vsel %vm17429_vm3, %v8590_v23, %v8079_v24  ;;  %v17447_v23 = vld [vmem:[#allocation283_spill] sm:$0xff] }
 0x6e3   : > { %8306 = vrot.lane.b32.xlu1 %v17432_v50, %s9101_s17  ;;  %v8209_v49 = vpop.permute.xlu0 %8208  ;;  %v17448_v1 = vcombine.low %v17446_v39, %v17447_v23  ;;  %v17458_v45 = vcombine.high %v17446_v39, %v17447_v23  ;;  %v17460_v50 = vcombine.high %v17452_v51, %v17453_v46 }
 0x6e4   : > { %v8636_v4 = vsel %vm8631_vm5, %v8627_v9, %v8209_v49  ;;  %v17451_v9 = vcombine.low %v17449_v48, %v17450_v62 }
 0x6e5   : > { %v8083_v56 = vpop.permute.xlu1 %8082 }
 0x6e6   : > { %v8601_v22 = vsel %vm17433_vm9, %v8592_v0, %v8083_v56 }
 0x6e7   : > { %8310 = vrot.lane.b32.xlu1 %v17436_v18, %s9101_s17  ;;  %v8213_v31 = vpop.permute.xlu0 %8212 }
 0x6e8   : > { %v8638_v20 = vsel %vm8631_vm5, %v8629_v44, %v8213_v31  ;;  %v17454_v44 = vcombine.low %v17452_v51, %v17453_v46 }
 0x6e9   : > { %v8087_v21 = vpop.permute.xlu1 %8086 }
 0x6ea   : > { %v8603_v10 = vsel %vm17437_vm10, %v8594_v60, %v8087_v21 }
 0x6eb   : > { %8330 = vrot.lane.b32.xlu1 %v17438_v8, %s9102_s22  ;;  %v8233_v30 = vpop.permute.xlu0 %8232 }
 0x6ec   : > { %v15269_v47 = vsel %vm8640_vm11, %v8632_v25, %v8233_v30 }
 0x6ed   : > { %v8107_v5 = vpop.permute.xlu1 %8106 }
 0x6ee   : > { %v8606_v35 = vsel %vm17439_vm12, %v8597_v41, %v8107_v5 }
 0x6ef   : > { %8334 = vrot.lane.b32.xlu1 %v17440_v27, %s9102_s22  ;;  %v8237_v34 = vpop.permute.xlu0 %8236 }
 0x6f0   : > { %v15277_v17 = vsel %vm8640_vm11, %v8634_v2, %v8237_v34  ;;  %v17459_v2 = vcombine.high %v17449_v48, %v17450_v62 }
 0x6f1   : > { %v8111_v26 = vpop.permute.xlu1 %8110 }
 0x6f2   : > { %v8608_v33 = vsel %vm17441_vm8, %v8599_v59, %v8111_v26 }
 0x6f3   : > { %8338 = vrot.lane.b32.xlu1 %v17442_v53, %s9102_s22  ;;  %v8241_v13 = vpop.permute.xlu0 %8240 }
 0x6f4   : > { %v15285_v57 = vsel %vm8640_vm11, %v8636_v4, %v8241_v13 }
 0x6f5   : > { %v8115_v32 = vpop.permute.xlu1 %8114 }
 0x6f6   : > { %v8610_v55 = vsel %vm17443_vm13, %v8601_v22, %v8115_v32  ;;  %v17461_v22 = vcombine.high %v17455_v12, %v17456_v61 }
 0x6f7   : > { %8342 = vrot.lane.b32.xlu1 %v17444_v14, %s9102_s22  ;;  %v8245_v3 = vpop.permute.xlu0 %8244 }
 0x6f8   : > { %v15293_v6 = vsel %vm8640_vm11, %v8638_v20, %v8245_v3 }
 0x6f9   : > { %v8119_v7 = vpop.permute.xlu1 %8118 }
 0x6fa   : > { %v8612_v37 = vsel %vm17445_vm14, %v8603_v10, %v8119_v7 }
 0x6fb   : > { %8362 = vrot.lane.b32.xlu1 %v17448_v1, %s9103_s23  ;;  %v8265_v43 = vpop.permute.xlu0 %8264 }
 0x6fd   : > { %v8139_v16 = vpop.permute.xlu1 %8138 }
 0x6fe   : > { %v8615_v36 = vsel %vm8613_vm0, %v8606_v35, %v8139_v16 }
 0x6ff   : > { %8366 = vrot.lane.b32.xlu1 %v17451_v9, %s9103_s23  ;;  %v15305_v15 = vpop.permute.xlu0 %8268 }
 0x701   : > { %v8143_v0 = vpop.permute.xlu1 %8142 }
 0x702   : > { %v8617_v38 = vsel %vm8613_vm0, %v8608_v33, %v8143_v0 }
 0x703   : > { %8370 = vrot.lane.b32.xlu1 %v17454_v44, %s9103_s23  ;;  %v15312_v60 = vpop.permute.xlu0 %8272 }
 0x705   : > { %v8147_v40 = vpop.permute.xlu1 %8146 }
 0x706   : > { %v8619_v42 = vsel %vm8613_vm0, %v8610_v55, %v8147_v40 }
 0x707   : > { %8374 = vrot.lane.b32.xlu1 %v17457_v11, %s9103_s23  ;;  %v15319_v25 = vpop.permute.xlu0 %8276 }
 0x709   : > { %v8151_v41 = vpop.permute.xlu1 %8150 }
 0x70a   : > { %v8621_v54 = vsel %vm8613_vm0, %v8612_v37, %v8151_v41  ;;  %vm8649_vm0 = vcmask 441344  }
 0x70b   : > { %8394 = vrot.lane.b32.xlu1 %v17458_v45, %s9104_s24  ;;  %v8297_v63 = vpop.permute.xlu0 %8296  ;;  %v8650_v1 = vsel %vm8649_vm0, %v15269_v47, %v8265_v43 }
 0x70d   : > { %v8171_v52 = vpop.permute.xlu1 %8170 }
 0x70e   : > { %v8624_v24 = vsel %vm8622_vm6, %v8615_v36, %v8171_v52 }
 0x70f   : > { %8398 = vrot.lane.b32.xlu1 %v17459_v2, %s9104_s24  ;;  %v8301_v59 = vpop.permute.xlu0 %8300 }
 0x711   : > { %v8175_v28 = vpop.permute.xlu1 %8174 }
 0x712   : > { %v8626_v58 = vsel %vm8622_vm6, %v8617_v38, %v8175_v28  ;;  %v8652_v38 = vsel %vm8649_vm0, %v15277_v17, %v15305_v15  ;;  %v8654_v17 = vsel %vm8649_vm0, %v15285_v57, %v15312_v60 }
 0x713   : > { %8402 = vrot.lane.b32.xlu1 %v17460_v50, %s9104_s24  ;;  %v8305_v49 = vpop.permute.xlu0 %8304 }
 0x715   : > { %v8179_v56 = vpop.permute.xlu1 %8178 }
 0x716   : > { %v8628_v4 = vsel %vm8622_vm6, %v8619_v42, %v8179_v56 }
 0x717   : > { %8406 = vrot.lane.b32.xlu1 %v17461_v22, %s9104_s24  ;;  %v8309_v29 = vpop.permute.xlu0 %8308 }
 0x719   : > { %v8183_v19 = vpop.permute.xlu1 %8182 }
 0x71a   : > { %v8630_v18 = vsel %vm8622_vm6, %v8621_v54, %v8183_v19  ;;  %vm8658_vm6 = vcmask 457728   ;;  %v8656_v54 = vsel %vm8649_vm0, %v15293_v6, %v15319_v25 }
 0x71b   : > { %v8329_v31 = vpop.permute.xlu0 %8328  ;;  %v8659_v36 = vsel %vm8658_vm6, %v8650_v1, %v8297_v63  ;;  %v8661_v43 = vsel %vm8658_vm6, %v8652_v38, %v8301_v59  ;;  %v8663_v12 = vsel %vm8658_vm6, %v8654_v17, %v8305_v49  ;;  %v8665_v60 = vsel %vm8658_vm6, %v8656_v54, %v8309_v29 }
 0x71c   : > { %v8668_v62 = vsel %vm8667_vm15, %v8659_v36, %v8329_v31 }
 0x71d   : > { %v8203_v21 = vpop.permute.xlu1 %8202 }
 0x71e   : > { %v8633_v20 = vsel %vm8631_vm5, %v8624_v24, %v8203_v21 }
 0x71f   : > { %v8333_v10 = vpop.permute.xlu0 %8332 }
 0x720   : > { %v8670_v46 = vsel %vm8667_vm15, %v8661_v43, %v8333_v10 }
 0x721   : > { %v8207_v8 = vpop.permute.xlu1 %8206 }
 0x722   : > { %v8635_v30 = vsel %vm8631_vm5, %v8626_v58, %v8207_v8 }
 0x723   : > { %v8337_v5 = vpop.permute.xlu0 %8336 }
 0x724   : > { %v8672_v61 = vsel %vm8667_vm15, %v8663_v12, %v8337_v5 }
 0x725   : > { %v8211_v35 = vpop.permute.xlu1 %8210 }
 0x726   : > { %v8637_v27 = vsel %vm8631_vm5, %v8628_v4, %v8211_v35 }
 0x727   : > { %v8341_v34 = vpop.permute.xlu0 %8340 }
 0x728   : > { %v8674_v63 = vsel %vm8667_vm15, %v8665_v60, %v8341_v34 }
 0x729   : > { %v8215_v26 = vpop.permute.xlu1 %8214 }
 0x72a   : > { %v8639_v33 = vsel %vm8631_vm5, %v8630_v18, %v8215_v26 }
 0x72b   : > { %v8361_v53 = vpop.permute.xlu0 %8360 }
 0x72c   : > { %v8677_v9 = vsel %vm8676_vm4, %v8668_v62, %v8361_v53 }
 0x72d   : > { %v8235_v13 = vpop.permute.xlu1 %8234 }
 0x72e   : > { %v15347_v32 = vsel %vm8640_vm11, %v8633_v20, %v8235_v13 }
 0x72f   : > { %v8365_v55 = vpop.permute.xlu0 %8364 }
 0x730   : > { %v8679_v44 = vsel %vm8676_vm4, %v8670_v46, %v8365_v55 }
 0x731   : > { %v8239_v14 = vpop.permute.xlu1 %8238 }
 0x732   : > { %v15350_v3 = vsel %vm8640_vm11, %v8635_v30, %v8239_v14 }
 0x735   : > { %v8369_v7 = vpop.permute.xlu0 %8368  ;;  %v8243_v37 = vpop.permute.xlu1 %8242 }
 0x736   : > { %v15353_v39 = vsel %vm8640_vm11, %v8637_v27, %v8243_v37  ;;  %v8681_v11 = vsel %vm8676_vm4, %v8672_v61, %v8369_v7 }
 0x739   : > { %v8247_v16 = vpop.permute.xlu1 %8246 }
 0x73a   : > { %v15360_v48 = vsel %vm8640_vm11, %v8639_v33, %v8247_v16 }
 0x73b   : > { %v8373_v23 = vpop.permute.xlu0 %8372 }
 0x73c   : > { %v8683_v52 = vsel %vm8676_vm4, %v8674_v63, %v8373_v23 }
 0x73d   : > { %v8267_v51 = vpop.permute.xlu1 %8266 }
 0x73e   : > { %v8651_v31 = vsel %vm8649_vm0, %v15347_v32, %v8267_v51 }
 0x73f   : > { %v8393_v0 = vpop.permute.xlu0 %8392 }
 0x740   : > { %v8686_v47 = vsel %vm8685_vm1, %v8677_v9, %v8393_v0 }
 0x741   : > { %8695 = vst.msk [vmem:[%s15369_s28] sm:$0xff] %vm8694_vm7, %v8686_v47  ;;  %v8271_v15 = vpop.permute.xlu1 %8270 }
 0x742   : > { %v8653_v30 = vsel %vm8649_vm0, %v15350_v3, %v8271_v15 }
 0x743   : > { %v8397_v40 = vpop.permute.xlu0 %8396 }
 0x744   : > { %v8688_v42 = vsel %vm8685_vm1, %v8679_v44, %v8397_v40 }
 0x745   : > { %8697 = vst.msk [vmem:[%s15369_s28 + $0x10] sm:$0xff] %vm8694_vm7, %v8688_v42  ;;  %v8275_v45 = vpop.permute.xlu1 %8274 }
 0x746   : > { %v8655_v33 = vsel %vm8649_vm0, %v15353_v39, %v8275_v45 }
 0x747   : > { %v8401_v41 = vpop.permute.xlu0 %8400 }
 0x748   : > { %v8690_v57 = vsel %vm8685_vm1, %v8681_v11, %v8401_v41 }
 0x749   : > { %8699 = vst.msk [vmem:[%s15369_s28 + $0x20] sm:$0xff] %vm8694_vm7, %v8690_v57  ;;  %v8279_v2 = vpop.permute.xlu1 %8278 }
 0x74a   : > { %v8657_v3 = vsel %vm8649_vm0, %v15360_v48, %v8279_v2 }
 0x74b   : > { %v8405_v24 = vpop.permute.xlu0 %8404 }
 0x74c   : > { %v8692_v59 = vsel %vm8685_vm1, %v8683_v52, %v8405_v24 }
 0x74d   : > { %8701 = vst.msk [vmem:[%s15369_s28 + $0x30] sm:$0xff] %vm8694_vm7, %v8692_v59  ;;  %v8299_v28 = vpop.permute.xlu1 %8298 }
 0x74e   : > { %v8660_v21 = vsel %vm8658_vm6, %v8651_v31, %v8299_v28 }
 0x751   : > { %v8303_v58 = vpop.permute.xlu1 %8302 }
 0x752   : > { %v8662_v35 = vsel %vm8658_vm6, %v8653_v30, %v8303_v58 }
 0x755   : > { %v8307_v6 = vpop.permute.xlu1 %8306 }
 0x756   : > { %v8664_v13 = vsel %vm8658_vm6, %v8655_v33, %v8307_v6 }
 0x759   : > { %v8311_v25 = vpop.permute.xlu1 %8310 }
 0x75a   : > { %v8666_v37 = vsel %vm8658_vm6, %v8657_v3, %v8311_v25 }
 0x75d   : > { %v8331_v50 = vpop.permute.xlu1 %8330 }
 0x75e   : > { %v8669_v20 = vsel %vm8667_vm15, %v8660_v21, %v8331_v50 }
 0x761   : > { %v8335_v49 = vpop.permute.xlu1 %8334 }
 0x762   : > { %v8671_v27 = vsel %vm8667_vm15, %v8662_v35, %v8335_v49 }
 0x765   : > { %v8339_v56 = vpop.permute.xlu1 %8338 }
 0x766   : > { %v8673_v32 = vsel %vm8667_vm15, %v8664_v13, %v8339_v56 }
 0x769   : > { %v8343_v4 = vpop.permute.xlu1 %8342 }
 0x76a   : > { %v8675_v39 = vsel %vm8667_vm15, %v8666_v37, %v8343_v4 }
 0x76d   : > { %v8363_v22 = vpop.permute.xlu1 %8362 }
 0x76e   : > { %v8678_v10 = vsel %vm8676_vm4, %v8669_v20, %v8363_v22 }
 0x771   : > { %v8367_v29 = vpop.permute.xlu1 %8366 }
 0x772   : > { %v8680_v34 = vsel %vm8676_vm4, %v8671_v27, %v8367_v29 }
 0x775   : > { %v8371_v19 = vpop.permute.xlu1 %8370 }
 0x776   : > { %v8682_v55 = vsel %vm8676_vm4, %v8673_v32, %v8371_v19 }
 0x779   : > { %v8375_v18 = vpop.permute.xlu1 %8374 }
 0x77a   : > { %v8684_v23 = vsel %vm8676_vm4, %v8675_v39, %v8375_v18 }
 0x77d   : > { %v8395_v8 = vpop.permute.xlu1 %8394 }
 0x77e   : > { %v8687_v5 = vsel %vm8685_vm1, %v8678_v10, %v8395_v8 }
 0x77f   : > { %8696 = vst.msk [vmem:[%s15369_s28 + $0x8] sm:$0xff] %vm8694_vm7, %v8687_v5 }
 0x781   : > { %v8399_v26 = vpop.permute.xlu1 %8398 }
 0x782   : > { %v8689_v53 = vsel %vm8685_vm1, %v8680_v34, %v8399_v26 }
 0x783   : > { %8698 = vst.msk [vmem:[%s15369_s28 + $0x18] sm:$0xff] %vm8694_vm7, %v8689_v53 }
 0x785   : > { %v8403_v14 = vpop.permute.xlu1 %8402 }
 0x786   : > { %v8691_v7 = vsel %vm8685_vm1, %v8682_v55, %v8403_v14 }
 0x787   : > { %8700 = vst.msk [vmem:[%s15369_s28 + $0x28] sm:$0xff] %vm8694_vm7, %v8691_v7 }
 0x789   : > { %v8407_v1 = vpop.permute.xlu1 %8406 }
 0x78a   : > { %v8693_v16 = vsel %vm8685_vm1, %v8684_v23, %v8407_v1 }
 0x78b   : > { %8702 = vst.msk [vmem:[%s15369_s28 + $0x38] sm:$0xff] %vm8694_vm7, %v8693_v16 }
 0x78c   : > { %8998 = shalt.err (!%p8995_p5)
}
 0x78d   : > { %s8999_s15 = scalar_lea.hbm %s15432_s29, 1024  ;;  %s9003_s22 = scalar_lea.hbm %s15486_s1, 2048 }
 0x78e   : > { %p9000_p4 = scmp.ne.s32.totalorder %s15432_s29, %s8999_s15  ;;  %p9004_p12 = scmp.lt.u32.totalorder %s15432_s29, %s15486_s1 }
 0x78f   : > { %p9005_p1 = scmp.lt.u32.totalorder %s9003_s22, %s8999_s15  ;;  %p9007_p8 = scmp.lt.u32.totalorder %s8999_s15, %s15432_s29 }
 0x790   : > { %p9001_p7 = pnand %p9000_p4, %p17462_p9 }
 0x791   : > { %p9006_p3 = por %p9005_p1, %p9004_p12 }
 0x792   : > { %p9002_p10 = pneg %p9001_p7 }
 0x793   : > { %p9008_p11 = por %p9007_p8, %p9006_p3 }
 0x795   : > { %p9009_p0 = pnand %p9008_p11, %p9002_p10 }
 0x797   : > { %9012 = shalt.err (!%p9009_p0)
}
 0x798   : > { %s9106_s25 = smov 128  }
 0x799   : > { %8859 = dma.vmem_to_hbm [thread:$0]  (%p17462_p9), %s15425_s3, 1024, %s15432_s29, %s8704_s9, %s9106_s25, %s9106_s25, %s9078_s2  }
 0x79a PF: > { %s8737_s28 = sand.u32 1, %s9047_s6   ;;  %p17463_p6 = scmp.ne.s32.totalorder %s15930_s21, 0 }
 0x79b   : > { %p17464_p13 = scmp.ge.s32.totalorder %s9067_s11, 2  ;;  %s8738_s4 = scalar_lea.sflag [#allocation4], %s8737_s28 }
 0x79d   : > { %p8866_p2 = pnand %p17464_p13, %p17463_p6 }
 0x79f   : > { %9042 = dma.done.wait (!%p8866_p2), %s8738_s4, 1024  }
 0x7a0   : > { %9044 = vsyncadd (!%p8866_p2), %s8738_s4, 4294966272  ;;  %s17_s11 = sadd.s32 1, %s9067_s11   ;;  %s17465_s6 = smov %s9051_s7 }
 0x7a1   : > { %p14_p5 = scmp.ge.s32.totalorder %s17_s11, 4   ;;  %s17466_s7 = smov %s9055_s8 }
 0x7a2   : > { %s17467_s8 = smov %s9173_s20  ;;  %s17468_s9 = smov %s9063_s10 }
 0x7a3   : > { %s17469_s10 = smov %s17471_s14  ;;  %16 = sbr.rel (!%p14_p5) target bundleno = 6 (0x6), region = 72 }
 0x7aa   :  { %8743 = vsyncpa [#allocation3], 1 }
 0x7ab   :  { %8745 = vsyncpa [#allocation3 + $0x1], 1 }
 0x7ac   :  { %8746 = vsyncpa [#allocation4], 1 }
 0x7ad   :  { %8748 = vsyncpa [#allocation4 + $0x1], 1 }

</bundles_post_ra>
